<compile_context>
chip_gen: v5e
topology: v5e:2x2
jax: 0.10.0
libtpu: 0.0.40
codegen_flags: <defaults>
</compile_context>

<pallas_src>
import functools

import jax
import jax.numpy as jnp
from jax.experimental import pallas as pl
from jax.experimental.pallas import tpu as pltpu


# ----------------------------- kernel -----------------------------------------

def vae_kernel(
    x_ref, eps_ref,
    ew1_ref, eb1_ref, ew2_ref, eb2_ref,      # encoder
    mlw_ref, mlb_ref,                        # fused [fc_mu | fc_logvar]
    zcw_ref, zcb_ref,                        # fused [decoder layer1 | classifier]
    dw2_ref, db2_ref, dw3_ref, db3_ref,      # decoder hidden + output (padded 896)
    recon_ref, logpred_ref, mulogvar_ref,
):
    lat = eps_ref.shape[-1]
    dec1 = dw2_ref.shape[0]

    xb = x_ref[...].astype(jnp.bfloat16)

    # ---- encoder: Linear + ReLU stack (bf16 matmuls, f32 accumulate/elementwise) ----
    h = jnp.dot(xb, ew1_ref[...], preferred_element_type=jnp.float32) + eb1_ref[...]
    h = jnp.maximum(h, 0.0)
    h = jnp.dot(h.astype(jnp.bfloat16), ew2_ref[...],
                preferred_element_type=jnp.float32) + eb2_ref[...]
    h = jnp.maximum(h, 0.0)

    # ---- fused latent heads: [mu | logvar] in one matmul ----
    ml = jnp.dot(h.astype(jnp.bfloat16), mlw_ref[...],
                 preferred_element_type=jnp.float32) + mlb_ref[...]
    mu = ml[:, :lat]
    logvar = ml[:, lat:]

    # ---- reparameterize: z = mu + eps * exp(0.5 * logvar) ----
    std = jnp.exp(0.5 * logvar)
    z = mu + eps_ref[...] * std

    # ---- fused: decoder first layer + classifier logits in one matmul on z ----
    zc = jnp.dot(z.astype(jnp.bfloat16), zcw_ref[...],
                 preferred_element_type=jnp.float32) + zcb_ref[...]
    d = jnp.maximum(zc[:, :dec1], 0.0)
    cl = zc[:, dec1:]

    # ---- decoder: Linear + ReLU, Linear + Sigmoid (output padded to 896 lanes) ----
    d = jnp.dot(d.astype(jnp.bfloat16), dw2_ref[...],
                preferred_element_type=jnp.float32) + db2_ref[...]
    d = jnp.maximum(d, 0.0)
    logits_rec = jnp.dot(d.astype(jnp.bfloat16), dw3_ref[...],
                         preferred_element_type=jnp.float32) + db3_ref[...]
    recon_ref[...] = jax.nn.sigmoid(logits_rec)          # EUP logistic

    # ---- classifier head: LogSoftmax(dim=1) ----
    cmax = jnp.max(cl, axis=-1, keepdims=True)
    lse = jnp.log(jnp.sum(jnp.exp(cl - cmax), axis=-1, keepdims=True)) + cmax
    logpred_ref[...] = cl - lse

    # ---- packed (mu | logvar) output slab ----
    mulogvar_ref[...] = ml


# ----------------------------- parameter utilities -----------------------------

def _round_up(n, m):
    return (n + m - 1) // m * m


def _pad_axis(a, target, axis):
    pad = target - a.shape[axis]
    if pad == 0:
        return a
    widths = [(0, 0)] * a.ndim
    widths[axis] = (0, pad)
    return jnp.pad(a, widths)


def make_linear_params(key, fan_in, fan_out):
    """Deterministic PyTorch-style uniform(-1/sqrt(fan_in), 1/sqrt(fan_in)) init (f32)."""
    kw, kb = jax.random.split(key)
    bound = 1.0 / jnp.sqrt(jnp.float32(fan_in))
    w = jax.random.uniform(kw, (fan_in, fan_out), jnp.float32, -bound, bound)
    b = jax.random.uniform(kb, (1, fan_out), jnp.float32, -bound, bound)
    return w, b


def prepare_kernel_params(p, in_dim):
    """Pad 784->next multiple of 128, fuse heads, cast weights to bf16 (biases stay f32)."""
    in_pad = _round_up(in_dim, 128)
    kp = {}
    # encoder layer 1: pad input rows 784 -> 896 (zero rows are inert since x is zero-padded)
    kp["ew1"] = _pad_axis(p["ew1"], in_pad, 0).astype(jnp.bfloat16)
    kp["eb1"] = p["eb1"]
    kp["ew2"] = p["ew2"].astype(jnp.bfloat16)
    kp["eb2"] = p["eb2"]
    # fused [fc_mu | fc_logvar]
    kp["mlw"] = jnp.concatenate([p["mw"], p["lw"]], axis=1).astype(jnp.bfloat16)
    kp["mlb"] = jnp.concatenate([p["mb"], p["lb"]], axis=1)
    # fused [decoder layer1 | classifier]
    kp["zcw"] = jnp.concatenate([p["dw1"], p["cw"]], axis=1).astype(jnp.bfloat16)
    kp["zcb"] = jnp.concatenate([p["db1"], p["cb"]], axis=1)
    # decoder hidden + padded output layer
    kp["dw2"] = p["dw2"].astype(jnp.bfloat16)
    kp["db2"] = p["db2"]
    kp["dw3"] = _pad_axis(p["dw3"], in_pad, 1).astype(jnp.bfloat16)
    kp["db3"] = _pad_axis(p["db3"], in_pad, 1)
    return kp


_WEIGHT_ORDER = ("ew1", "eb1", "ew2", "eb2", "mlw", "mlb",
                 "zcw", "zcb", "dw2", "db2", "dw3", "db3")


# ----------------------------- wrapper -----------------------------------------

@functools.partial(jax.jit, static_argnames=("in_dim", "latent_dim", "dec1", "tb"))
def vae_forward(x, eps, kp, *, in_dim, latent_dim, dec1, tb=256):
    B = x.shape[0]
    in_pad = kp["ew1"].shape[0]
    n_classes = kp["zcw"].shape[1] - dec1

    # batch tile: up to `tb` rows (multiple of 8); pad batch to a multiple of the tile
    TB = min(tb, _round_up(B, 8))
    Bp = _round_up(B, TB)
    grid = (Bp // TB,)

    xp = _pad_axis(_pad_axis(x, Bp, 0), in_pad, 1)
    epsp = _pad_axis(eps, Bp, 0)

    def batch_spec(cols):
        return pl.BlockSpec((TB, cols), lambda i: (i, 0))

    def resident(name):
        return pl.BlockSpec(kp[name].shape, lambda i: (0, 0))   # stays in VMEM across grid

    in_specs = [batch_spec(in_pad), batch_spec(latent_dim)] + [resident(n) for n in _WEIGHT_ORDER]

    out_shapes = (
        jax.ShapeDtypeStruct((Bp, in_pad), jnp.float32),          # reconstruction (padded)
        jax.ShapeDtypeStruct((Bp, n_classes), jnp.float32),       # log-probs
        jax.ShapeDtypeStruct((Bp, 2 * latent_dim), jnp.float32),  # packed [mu | logvar]
    )
    out_specs = (batch_spec(in_pad), batch_spec(n_classes), batch_spec(2 * latent_dim))

    recon_p, logpred_p, ml_p = pl.pallas_call(
        vae_kernel,
        grid=grid,
        out_shape=out_shapes,
        in_specs=in_specs,
        out_specs=out_specs,
        compiler_params=pltpu.CompilerParams(
            dimension_semantics=("parallel",),      # megacore: split batch across TCs
        ),
    )(xp, epsp, *[kp[n] for n in _WEIGHT_ORDER])

    recon = recon_p[:B, :in_dim]
    logpred = logpred_p[:B]
    mu = ml_p[:B, :latent_dim]
    logvar = ml_p[:B, latent_dim:]
    return recon, logpred, mu, logvar


# ----------------------------- reference (pure JAX, f32) ------------------------

def vae_reference(x, eps, p):
    h = jnp.maximum(x @ p["ew1"] + p["eb1"], 0.0)
    h = jnp.maximum(h @ p["ew2"] + p["eb2"], 0.0)
    mu = h @ p["mw"] + p["mb"]
    logvar = h @ p["lw"] + p["lb"]
    z = mu + eps * jnp.exp(0.5 * logvar)
    d = jnp.maximum(z @ p["dw1"] + p["db1"], 0.0)
    d = jnp.maximum(d @ p["dw2"] + p["db2"], 0.0)
    recon = jax.nn.sigmoid(d @ p["dw3"] + p["db3"])
    cl = z @ p["cw"] + p["cb"]
    logpred = cl - jax.nn.logsumexp(cl, axis=-1, keepdims=True)
    return recon, logpred, mu, logvar


# ----------------------------- demo --------------------------------------------

if __name__ == "__main__":
    # Model hyperparameters (consistent with x.view(-1, 784) in the reference forward)
    encoder_dims = [784, 256, 64]
    latent_dim = 16
    decoder_dims = [16, 64, 256]
    n_classes = 10
    B = 200          # ragged on purpose: padded to 256 inside the wrapper, TB=128, grid=(2,)

    root = jax.random.PRNGKey(0)
    keys = jax.random.split(root, 12)

    params = {}
    params["ew1"], params["eb1"] = make_linear_params(keys[0], encoder_dims[0], encoder_dims[1])
    params["ew2"], params["eb2"] = make_linear_params(keys[1], encoder_dims[1], encoder_dims[2])
    params["mw"], params["mb"] = make_linear_params(keys[2], encoder_dims[-1], latent_dim)
    params["lw"], params["lb"] = make_linear_params(keys[3], encoder_dims[-1], latent_dim)
    params["dw1"], params["db1"] = make_linear_params(keys[4], decoder_dims[0], decoder_dims[1])
    params["dw2"], params["db2"] = make_linear_params(keys[5], decoder_dims[1], decoder_dims[2])
    params["dw3"], params["db3"] = make_linear_params(keys[6], decoder_dims[-1], encoder_dims[0])
    params["cw"], params["cb"] = make_linear_params(keys[7], latent_dim, n_classes)

    kparams = prepare_kernel_params(params, encoder_dims[0])

    # Inputs ("image-like" in [0,1], flattened as x.view(-1, 784)); eps drawn outside the
    # kernel so the reparameterization noise is deterministic (== torch.randn_like(std)).
    x = jax.random.uniform(keys[8], (B, encoder_dims[0]), jnp.float32, 0.0, 1.0)
    eps = jax.random.normal(keys[9], (B, latent_dim), jnp.float32)

    recon, logpred, mu, logvar = vae_forward(
        x, eps, kparams,
        in_dim=encoder_dims[0], latent_dim=latent_dim, dec1=decoder_dims[1], tb=128,
    )
    jax.block_until_ready((recon, logpred, mu, logvar))

    # sanity checks
    assert recon.shape == (B, 784) and logpred.shape == (B, n_classes)
    assert mu.shape == (B, latent_dim) and logvar.shape == (B, latent_dim)
    assert bool(jnp.all(recon >= 0.0)) and bool(jnp.all(recon <= 1.0))
    assert bool(jnp.allclose(jnp.sum(jnp.exp(logpred), axis=1), 1.0, atol=1e-4))

    # loose comparison vs f32 reference (kernel matmuls run bf16 inputs / f32 accumulate)
    r_ref, lp_ref, mu_ref, lv_ref = vae_reference(x, eps, params)
    assert bool(jnp.max(jnp.abs(recon - r_ref)) < 5e-2)
    assert bool(jnp.max(jnp.abs(mu - mu_ref)) < 5e-2)
    assert bool(jnp.max(jnp.abs(logvar - lv_ref)) < 5e-2)
    assert bool(jnp.max(jnp.abs(logpred - lp_ref)) < 5e-2)

    print("KERNEL_OK")
</pallas_src>

<mosaic_0001>
module attributes {stable_mosaic.version = 11 : i64} {
  func.func @vae_kernel(%arg0: i32, %arg1: memref<128x896xf32, #tpu.memory_space<vmem>>, %arg2: memref<128x16xf32, #tpu.memory_space<vmem>>, %arg3: memref<896x256xbf16, #tpu.memory_space<vmem>>, %arg4: memref<1x256xf32, #tpu.memory_space<vmem>>, %arg5: memref<256x64xbf16, #tpu.memory_space<vmem>>, %arg6: memref<1x64xf32, #tpu.memory_space<vmem>>, %arg7: memref<64x32xbf16, #tpu.memory_space<vmem>>, %arg8: memref<1x32xf32, #tpu.memory_space<vmem>>, %arg9: memref<16x74xbf16, #tpu.memory_space<vmem>>, %arg10: memref<1x74xf32, #tpu.memory_space<vmem>>, %arg11: memref<64x256xbf16, #tpu.memory_space<vmem>>, %arg12: memref<1x256xf32, #tpu.memory_space<vmem>>, %arg13: memref<256x896xbf16, #tpu.memory_space<vmem>>, %arg14: memref<1x896xf32, #tpu.memory_space<vmem>>, %arg15: memref<128x896xf32, #tpu.memory_space<vmem>>, %arg16: memref<128x10xf32, #tpu.memory_space<vmem>>, %arg17: memref<128x32xf32, #tpu.memory_space<vmem>>) attributes {dimension_semantics = [#tpu.dimension_semantics<parallel>], iteration_bounds = array<i64: 2>, scalar_prefetch = 0 : i64, scratch_operands = 0 : i64, tpu.core_type = #tpu.core_type<tc>, window_params = [{transform_indices = @transform_0, window_bounds = array<i64: 128, 896>}, {transform_indices = @transform_1, window_bounds = array<i64: 128, 16>}, {pipeline_mode = #tpu.pipeline_mode<synchronous>, transform_indices = @transform_2, window_bounds = array<i64: 896, 256>}, {pipeline_mode = #tpu.pipeline_mode<synchronous>, transform_indices = @transform_3, window_bounds = array<i64: 1, 256>}, {pipeline_mode = #tpu.pipeline_mode<synchronous>, transform_indices = @transform_4, window_bounds = array<i64: 256, 64>}, {pipeline_mode = #tpu.pipeline_mode<synchronous>, transform_indices = @transform_5, window_bounds = array<i64: 1, 64>}, {pipeline_mode = #tpu.pipeline_mode<synchronous>, transform_indices = @transform_6, window_bounds = array<i64: 64, 32>}, {pipeline_mode = #tpu.pipeline_mode<synchronous>, transform_indices = @transform_7, window_bounds = array<i64: 1, 32>}, {pipeline_mode = #tpu.pipeline_mode<synchronous>, transform_indices = @transform_8, window_bounds = array<i64: 16, 74>}, {pipeline_mode = #tpu.pipeline_mode<synchronous>, transform_indices = @transform_9, window_bounds = array<i64: 1, 74>}, {pipeline_mode = #tpu.pipeline_mode<synchronous>, transform_indices = @transform_10, window_bounds = array<i64: 64, 256>}, {pipeline_mode = #tpu.pipeline_mode<synchronous>, transform_indices = @transform_11, window_bounds = array<i64: 1, 256>}, {pipeline_mode = #tpu.pipeline_mode<synchronous>, transform_indices = @transform_12, window_bounds = array<i64: 256, 896>}, {pipeline_mode = #tpu.pipeline_mode<synchronous>, transform_indices = @transform_13, window_bounds = array<i64: 1, 896>}, {transform_indices = @transform_14, window_bounds = array<i64: 128, 896>}, {transform_indices = @transform_15, window_bounds = array<i64: 128, 10>}, {transform_indices = @transform_16, window_bounds = array<i64: 128, 32>}]} {
    %c0 = arith.constant 0 : index
    %c0_0 = arith.constant 0 : index
    %0 = vector.load %arg1[%c0, %c0_0] : memref<128x896xf32, #tpu.memory_space<vmem>>, vector<128x896xf32>
    %1 = arith.truncf %0 : vector<128x896xf32> to vector<128x896xbf16>
    %c0_1 = arith.constant 0 : index
    %c0_2 = arith.constant 0 : index
    %2 = vector.load %arg3[%c0_1, %c0_2] : memref<896x256xbf16, #tpu.memory_space<vmem>>, vector<896x256xbf16>
    %cst = arith.constant dense<0.000000e+00> : vector<128x256xf32>
    %3 = tpu.matmul %1, %2, %cst {dimension_numbers = #tpu.dot_dimension_numbers<[1], [0], [0], [1], [0, 0, 1, 1], [], []>} : vector<128x896xbf16>, vector<896x256xbf16>, vector<128x256xf32> -> vector<128x256xf32>
    %c0_3 = arith.constant 0 : index
    %c0_4 = arith.constant 0 : index
    %4 = vector.load %arg4[%c0_3, %c0_4] : memref<1x256xf32, #tpu.memory_space<vmem>>, vector<1x256xf32>
    %5 = vector.broadcast %4 : vector<1x256xf32> to vector<128x256xf32>
    %6 = arith.addf %3, %5 : vector<128x256xf32>
    %cst_5 = arith.constant 0.000000e+00 : f32
    %7 = vector.broadcast %cst_5 : f32 to vector<128x256xf32>
    %8 = arith.maximumf %6, %7 : vector<128x256xf32>
    %9 = arith.truncf %8 : vector<128x256xf32> to vector<128x256xbf16>
    %c0_6 = arith.constant 0 : index
    %c0_7 = arith.constant 0 : index
    %10 = vector.load %arg5[%c0_6, %c0_7] : memref<256x64xbf16, #tpu.memory_space<vmem>>, vector<256x64xbf16>
    %cst_8 = arith.constant dense<0.000000e+00> : vector<128x64xf32>
    %11 = tpu.matmul %9, %10, %cst_8 {dimension_numbers = #tpu.dot_dimension_numbers<[1], [0], [0], [1], [0, 0, 1, 1], [], []>} : vector<128x256xbf16>, vector<256x64xbf16>, vector<128x64xf32> -> vector<128x64xf32>
    %c0_9 = arith.constant 0 : index
    %c0_10 = arith.constant 0 : index
    %12 = vector.load %arg6[%c0_9, %c0_10] : memref<1x64xf32, #tpu.memory_space<vmem>>, vector<1x64xf32>
    %13 = vector.broadcast %12 : vector<1x64xf32> to vector<128x64xf32>
    %14 = arith.addf %11, %13 : vector<128x64xf32>
    %cst_11 = arith.constant 0.000000e+00 : f32
    %15 = vector.broadcast %cst_11 : f32 to vector<128x64xf32>
    %16 = arith.maximumf %14, %15 : vector<128x64xf32>
    %17 = arith.truncf %16 : vector<128x64xf32> to vector<128x64xbf16>
    %c0_12 = arith.constant 0 : index
    %c0_13 = arith.constant 0 : index
    %18 = vector.load %arg7[%c0_12, %c0_13] : memref<64x32xbf16, #tpu.memory_space<vmem>>, vector<64x32xbf16>
    %cst_14 = arith.constant dense<0.000000e+00> : vector<128x32xf32>
    %19 = tpu.matmul %17, %18, %cst_14 {dimension_numbers = #tpu.dot_dimension_numbers<[1], [0], [0], [1], [0, 0, 1, 1], [], []>} : vector<128x64xbf16>, vector<64x32xbf16>, vector<128x32xf32> -> vector<128x32xf32>
    %c0_15 = arith.constant 0 : index
    %c0_16 = arith.constant 0 : index
    %20 = vector.load %arg8[%c0_15, %c0_16] : memref<1x32xf32, #tpu.memory_space<vmem>>, vector<1x32xf32>
    %21 = vector.broadcast %20 : vector<1x32xf32> to vector<128x32xf32>
    %22 = arith.addf %19, %21 : vector<128x32xf32>
    %23 = vector.extract_strided_slice %22 {offsets = [0, 0], sizes = [128, 16], strides = [1, 1]} : vector<128x32xf32> to vector<128x16xf32>
    %24 = vector.extract_strided_slice %22 {offsets = [0, 16], sizes = [128, 16], strides = [1, 1]} : vector<128x32xf32> to vector<128x16xf32>
    %cst_17 = arith.constant 5.000000e-01 : f32
    %25 = vector.broadcast %cst_17 : f32 to vector<128x16xf32>
    %26 = arith.mulf %25, %24 : vector<128x16xf32>
    %27 = math.exp %26 : vector<128x16xf32>
    %c0_18 = arith.constant 0 : index
    %c0_19 = arith.constant 0 : index
    %28 = vector.load %arg2[%c0_18, %c0_19] : memref<128x16xf32, #tpu.memory_space<vmem>>, vector<128x16xf32>
    %29 = arith.mulf %28, %27 : vector<128x16xf32>
    %30 = arith.addf %23, %29 : vector<128x16xf32>
    %31 = arith.truncf %30 : vector<128x16xf32> to vector<128x16xbf16>
    %c0_20 = arith.constant 0 : index
    %c0_21 = arith.constant 0 : index
    %32 = vector.load %arg9[%c0_20, %c0_21] : memref<16x74xbf16, #tpu.memory_space<vmem>>, vector<16x74xbf16>
    %cst_22 = arith.constant dense<0.000000e+00> : vector<128x74xf32>
    %33 = tpu.matmul %31, %32, %cst_22 {dimension_numbers = #tpu.dot_dimension_numbers<[1], [0], [0], [1], [0, 0, 1, 1], [], []>} : vector<128x16xbf16>, vector<16x74xbf16>, vector<128x74xf32> -> vector<128x74xf32>
    %c0_23 = arith.constant 0 : index
    %c0_24 = arith.constant 0 : index
    %34 = vector.load %arg10[%c0_23, %c0_24] : memref<1x74xf32, #tpu.memory_space<vmem>>, vector<1x74xf32>
    %35 = vector.broadcast %34 : vector<1x74xf32> to vector<128x74xf32>
    %36 = arith.addf %33, %35 : vector<128x74xf32>
    %37 = vector.extract_strided_slice %36 {offsets = [0, 0], sizes = [128, 64], strides = [1, 1]} : vector<128x74xf32> to vector<128x64xf32>
    %cst_25 = arith.constant 0.000000e+00 : f32
    %38 = vector.broadcast %cst_25 : f32 to vector<128x64xf32>
    %39 = arith.maximumf %37, %38 : vector<128x64xf32>
    %40 = vector.extract_strided_slice %36 {offsets = [0, 64], sizes = [128, 10], strides = [1, 1]} : vector<128x74xf32> to vector<128x10xf32>
    %41 = arith.truncf %39 : vector<128x64xf32> to vector<128x64xbf16>
    %c0_26 = arith.constant 0 : index
    %c0_27 = arith.constant 0 : index
    %42 = vector.load %arg11[%c0_26, %c0_27] : memref<64x256xbf16, #tpu.memory_space<vmem>>, vector<64x256xbf16>
    %cst_28 = arith.constant dense<0.000000e+00> : vector<128x256xf32>
    %43 = tpu.matmul %41, %42, %cst_28 {dimension_numbers = #tpu.dot_dimension_numbers<[1], [0], [0], [1], [0, 0, 1, 1], [], []>} : vector<128x64xbf16>, vector<64x256xbf16>, vector<128x256xf32> -> vector<128x256xf32>
    %c0_29 = arith.constant 0 : index
    %c0_30 = arith.constant 0 : index
    %44 = vector.load %arg12[%c0_29, %c0_30] : memref<1x256xf32, #tpu.memory_space<vmem>>, vector<1x256xf32>
    %45 = vector.broadcast %44 : vector<1x256xf32> to vector<128x256xf32>
    %46 = arith.addf %43, %45 : vector<128x256xf32>
    %cst_31 = arith.constant 0.000000e+00 : f32
    %47 = vector.broadcast %cst_31 : f32 to vector<128x256xf32>
    %48 = arith.maximumf %46, %47 : vector<128x256xf32>
    %49 = arith.truncf %48 : vector<128x256xf32> to vector<128x256xbf16>
    %c0_32 = arith.constant 0 : index
    %c0_33 = arith.constant 0 : index
    %50 = vector.load %arg13[%c0_32, %c0_33] : memref<256x896xbf16, #tpu.memory_space<vmem>>, vector<256x896xbf16>
    %cst_34 = arith.constant dense<0.000000e+00> : vector<128x896xf32>
    %51 = tpu.matmul %49, %50, %cst_34 {dimension_numbers = #tpu.dot_dimension_numbers<[1], [0], [0], [1], [0, 0, 1, 1], [], []>} : vector<128x256xbf16>, vector<256x896xbf16>, vector<128x896xf32> -> vector<128x896xf32>
    %c0_35 = arith.constant 0 : index
    %c0_36 = arith.constant 0 : index
    %52 = vector.load %arg14[%c0_35, %c0_36] : memref<1x896xf32, #tpu.memory_space<vmem>>, vector<1x896xf32>
    %53 = vector.broadcast %52 : vector<1x896xf32> to vector<128x896xf32>
    %54 = arith.addf %51, %53 : vector<128x896xf32>
    %55 = arith.negf %54 : vector<128x896xf32>
    %56 = math.exp %55 : vector<128x896xf32>
    %cst_37 = arith.constant 1.000000e+00 : f32
    %57 = vector.broadcast %cst_37 : f32 to vector<128x896xf32>
    %58 = arith.addf %57, %56 : vector<128x896xf32>
    %59 = arith.divf %57, %58 : vector<128x896xf32>
    %c0_38 = arith.constant 0 : index
    %c0_39 = arith.constant 0 : index
    %60 = vector.load %arg15[%c0_38, %c0_39] : memref<128x896xf32, #tpu.memory_space<vmem>>, vector<128x896xf32>
    tpu.vector_store %arg15[%c0_38, %c0_39], %59 {strides = array<i32>} : memref<128x896xf32, #tpu.memory_space<vmem>>, vector<128x896xf32>,
    %cst_40 = arith.constant dense<0xFF800000> : vector<128xf32>
    %61 = vector.multi_reduction <maximumf>, %40, %cst_40 [1] : vector<128x10xf32> to vector<128xf32>
    %62 = vector.shape_cast %61 : vector<128xf32> to vector<128x1xf32>
    %63 = vector.broadcast %62 : vector<128x1xf32> to vector<128x10xf32>
    %64 = arith.subf %40, %63 : vector<128x10xf32>
    %65 = math.exp %64 : vector<128x10xf32>
    %cst_41 = arith.constant dense<0.000000e+00> : vector<128xf32>
    %66 = vector.multi_reduction <add>, %65, %cst_41 [1] : vector<128x10xf32> to vector<128xf32>
    %67 = vector.shape_cast %66 : vector<128xf32> to vector<128x1xf32>
    %68 = math.log %67 : vector<128x1xf32>
    %69 = arith.addf %68, %62 : vector<128x1xf32>
    %70 = vector.broadcast %69 : vector<128x1xf32> to vector<128x10xf32>
    %71 = arith.subf %40, %70 : vector<128x10xf32>
    %c0_42 = arith.constant 0 : index
    %c0_43 = arith.constant 0 : index
    %72 = vector.load %arg16[%c0_42, %c0_43] : memref<128x10xf32, #tpu.memory_space<vmem>>, vector<128x10xf32>
    tpu.vector_store %arg16[%c0_42, %c0_43], %71 {strides = array<i32>} : memref<128x10xf32, #tpu.memory_space<vmem>>, vector<128x10xf32>,
    %c0_44 = arith.constant 0 : index
    %c0_45 = arith.constant 0 : index
    %73 = vector.load %arg17[%c0_44, %c0_45] : memref<128x32xf32, #tpu.memory_space<vmem>>, vector<128x32xf32>
    tpu.vector_store %arg17[%c0_44, %c0_45], %22 {strides = array<i32>} : memref<128x32xf32, #tpu.memory_space<vmem>>, vector<128x32xf32>,
    return
  }
  func.func @transform_0(%arg0: i32) -> (i32, i32) {
    %c0_i32 = arith.constant 0 : i32
    %c0_i32_0 = arith.constant 0 : i32
    return %arg0, %c0_i32 : i32, i32
  }
  func.func @transform_1(%arg0: i32) -> (i32, i32) {
    %c0_i32 = arith.constant 0 : i32
    %c0_i32_0 = arith.constant 0 : i32
    return %arg0, %c0_i32 : i32, i32
  }
  func.func @transform_2(%arg0: i32) -> (i32, i32) {
    %c0_i32 = arith.constant 0 : i32
    %c0_i32_0 = arith.constant 0 : i32
    %c0_i32_1 = arith.constant 0 : i32
    return %c0_i32, %c0_i32_0 : i32, i32
  }
  func.func @transform_3(%arg0: i32) -> (i32, i32) {
    %c0_i32 = arith.constant 0 : i32
    %c0_i32_0 = arith.constant 0 : i32
    %c0_i32_1 = arith.constant 0 : i32
    return %c0_i32, %c0_i32_0 : i32, i32
  }
  func.func @transform_4(%arg0: i32) -> (i32, i32) {
    %c0_i32 = arith.constant 0 : i32
    %c0_i32_0 = arith.constant 0 : i32
    %c0_i32_1 = arith.constant 0 : i32
    return %c0_i32, %c0_i32_0 : i32, i32
  }
  func.func @transform_5(%arg0: i32) -> (i32, i32) {
    %c0_i32 = arith.constant 0 : i32
    %c0_i32_0 = arith.constant 0 : i32
    %c0_i32_1 = arith.constant 0 : i32
    return %c0_i32, %c0_i32_0 : i32, i32
  }
  func.func @transform_6(%arg0: i32) -> (i32, i32) {
    %c0_i32 = arith.constant 0 : i32
    %c0_i32_0 = arith.constant 0 : i32
    %c0_i32_1 = arith.constant 0 : i32
    return %c0_i32, %c0_i32_0 : i32, i32
  }
  func.func @transform_7(%arg0: i32) -> (i32, i32) {
    %c0_i32 = arith.constant 0 : i32
    %c0_i32_0 = arith.constant 0 : i32
    %c0_i32_1 = arith.constant 0 : i32
    return %c0_i32, %c0_i32_0 : i32, i32
  }
  func.func @transform_8(%arg0: i32) -> (i32, i32) {
    %c0_i32 = arith.constant 0 : i32
    %c0_i32_0 = arith.constant 0 : i32
    %c0_i32_1 = arith.constant 0 : i32
    return %c0_i32, %c0_i32_0 : i32, i32
  }
  func.func @transform_9(%arg0: i32) -> (i32, i32) {
    %c0_i32 = arith.constant 0 : i32
    %c0_i32_0 = arith.constant 0 : i32
    %c0_i32_1 = arith.constant 0 : i32
    return %c0_i32, %c0_i32_0 : i32, i32
  }
  func.func @transform_10(%arg0: i32) -> (i32, i32) {
    %c0_i32 = arith.constant 0 : i32
    %c0_i32_0 = arith.constant 0 : i32
    %c0_i32_1 = arith.constant 0 : i32
    return %c0_i32, %c0_i32_0 : i32, i32
  }
  func.func @transform_11(%arg0: i32) -> (i32, i32) {
    %c0_i32 = arith.constant 0 : i32
    %c0_i32_0 = arith.constant 0 : i32
    %c0_i32_1 = arith.constant 0 : i32
    return %c0_i32, %c0_i32_0 : i32, i32
  }
  func.func @transform_12(%arg0: i32) -> (i32, i32) {
    %c0_i32 = arith.constant 0 : i32
    %c0_i32_0 = arith.constant 0 : i32
    %c0_i32_1 = arith.constant 0 : i32
    return %c0_i32, %c0_i32_0 : i32, i32
  }
  func.func @transform_13(%arg0: i32) -> (i32, i32) {
    %c0_i32 = arith.constant 0 : i32
    %c0_i32_0 = arith.constant 0 : i32
    %c0_i32_1 = arith.constant 0 : i32
    return %c0_i32, %c0_i32_0 : i32, i32
  }
  func.func @transform_14(%arg0: i32) -> (i32, i32) {
    %c0_i32 = arith.constant 0 : i32
    %c0_i32_0 = arith.constant 0 : i32
    return %arg0, %c0_i32 : i32, i32
  }
  func.func @transform_15(%arg0: i32) -> (i32, i32) {
    %c0_i32 = arith.constant 0 : i32
    %c0_i32_0 = arith.constant 0 : i32
    return %arg0, %c0_i32 : i32, i32
  }
  func.func @transform_16(%arg0: i32) -> (i32, i32) {
    %c0_i32 = arith.constant 0 : i32
    %c0_i32_0 = arith.constant 0 : i32
    return %arg0, %c0_i32 : i32, i32
  }
}

</mosaic_0001>

<bundles_post_ra>
// kernel: vae_forward.1
= control target key start
LH: loop header
LB: loop body
LE: loop exit
PB: predicated region body
PF: predicated region fallthrough
CT: control target
= control target key end

     0   :  { %s9279_s21 = smov 0   ;;  %s14762_s0 = inlined_call_operand.vmem [shape: f32[256,896], index: 0, kind: input, shape index: {}]   ;;  %s14763_s1 = inlined_call_operand.vmem [shape: f32[256,16], index: 1, kind: input, shape index: {}]   ;;  %s14764_s2 = inlined_call_operand.vmem [shape: bf16[896,256], index: 2, kind: input, shape index: {}]   ;;  %s14765_s3 = inlined_call_operand.vmem [shape: f32[1,256], index: 3, kind: input, shape index: {}]   ;;  %s14766_s4 = inlined_call_operand.vmem [shape: bf16[256,64], index: 4, kind: input, shape index: {}]   ;;  %s14767_s5 = inlined_call_operand.vmem [shape: f32[1,64], index: 5, kind: input, shape index: {}]   ;;  %s14768_s6 = inlined_call_operand.vmem [shape: bf16[64,32], index: 6, kind: input, shape index: {}]   ;;  %s14769_s7 = inlined_call_operand.vmem [shape: f32[1,32], index: 7, kind: input, shape index: {}]   ;;  %s14770_s8 = inlined_call_operand.vmem [shape: bf16[16,74], index: 8, kind: input, shape index: {}]   ;;  %s14771_s9 = inlined_call_operand.vmem [shape: f32[1,74], index: 9, kind: input, shape index: {}]   ;;  %s14772_s10 = inlined_call_operand.vmem [shape: bf16[64,256], index: 10, kind: input, shape index: {}]   ;;  %s14773_s11 = inlined_call_operand.vmem [shape: f32[1,256], index: 11, kind: input, shape index: {}]   ;;  %s14774_s12 = inlined_call_operand.vmem [shape: bf16[256,896], index: 12, kind: input, shape index: {}]   ;;  %s14775_s13 = inlined_call_operand.vmem [shape: f32[1,896], index: 13, kind: input, shape index: {}]   ;;  %s14776_s14 = inlined_call_operand.vmem [shape: f32[256,896], index: 14, kind: output, shape index: {0}]   ;;  %s14777_s15 = inlined_call_operand.vmem [shape: f32[256,10], index: 15, kind: output, shape index: {1}]   ;;  %s14778_s16 = inlined_call_operand.vmem [shape: f32[256,32], index: 16, kind: output, shape index: {2}]  }
   0x1   :  { %14837 = sst [smem:[#allocation32_spill]] %s14762_s0 }
   0x2 LB: > { %s7181_s22 = sadd.s32 4294967295, %s9190_s21   ;;  %p7185_p0 = scmp.ge.s32.totalorder %s9190_s21, 1  ;;  %s9190_s21 = sphi %s9279_s21, %s27_s21  }
   0x3   : > { %p480_p1 = scmp.lt.s32.totalorder %s9190_s21, 3 }
   0x5   : > { %p481_p2 = pnand %p7185_p0, %p480_p1 }
   0x7   : > { %484 = sbr.rel (%p481_p2) target bundleno = 1932 (0x78c), region = 76 }
   0xc   : > { %v7254_v0 = vld [vmem:[%s14764_s2 + $0x70] sm:$0xf]  ;;  %v8369_v1 = vld [vmem:[%s14764_s2 + $0x74] sm:$0xf0]  ;;  %v7246_v5 = vld [vmem:[%s14764_s2 + $0x60] sm:$0xf] }
   0xd   : > { %v7318_v2 = vld [vmem:[%s14764_s2 + $0xf0] sm:$0xf]  ;;  %v7255_v3 = vor.u32 %v8369_v1, %v7254_v0  ;;  %v8385_v4 = vld [vmem:[%s14764_s2 + $0xf4] sm:$0xf0]  ;;  %v8367_v6 = vld [vmem:[%s14764_s2 + $0x64] sm:$0xf0] }
   0xe   : > { %v7319_v7 = vor.u32 %v8385_v4, %v7318_v2  ;;  %v7310_v8 = vld [vmem:[%s14764_s2 + $0xe0] sm:$0xf]  ;;  %v8383_v9 = vld [vmem:[%s14764_s2 + $0xe4] sm:$0xf0]  ;;  %v7247_v10 = vor.u32 %v8367_v6, %v7246_v5  ;;  %v7238_v12 = vld [vmem:[%s14764_s2 + $0x50] sm:$0xf] }
   0xf   : > { %8607 = vmatpush.bf16.msra.mxu2 %v7255_v3  ;;  %1426 = vmatpush.bf16.msra.mxu0 %v7255_v3  ;;  %v7311_v11 = vor.u32 %v8383_v9, %v7310_v8  ;;  %v8365_v13 = vld [vmem:[%s14764_s2 + $0x54] sm:$0xf0]  ;;  %v7302_v14 = vld [vmem:[%s14764_s2 + $0xd0] sm:$0xf]  ;;  %v7230_v18 = vld [vmem:[%s14764_s2 + $0x40] sm:$0xf] }
  0x10   : > { %8615 = vmatpush.bf16.msra.mxu3 %v7319_v7  ;;  %1475 = vmatpush.bf16.msra.mxu1 %v7319_v7  ;;  %v8381_v15 = vld [vmem:[%s14764_s2 + $0xd4] sm:$0xf0]  ;;  %v7239_v16 = vor.u32 %v8365_v13, %v7238_v12  ;;  %v8363_v19 = vld [vmem:[%s14764_s2 + $0x44] sm:$0xf0]  ;;  %v7294_v20 = vld [vmem:[%s14764_s2 + $0xc0] sm:$0xf] }
  0x11   : > { %v7303_v17 = vor.u32 %v8381_v15, %v7302_v14  ;;  %v8379_v21 = vld [vmem:[%s14764_s2 + $0xc4] sm:$0xf0]  ;;  %s7186_s29 = sshll.u32 %s7181_s22, 4  ;;  %v7231_v22 = vor.u32 %v8363_v19, %v7230_v18  ;;  %v7222_v24 = vld [vmem:[%s14764_s2 + $0x30] sm:$0xf]  ;;  %s14838_s19 = sld [smem:[#allocation32_spill]] }
  0x12   : > { %p548_p3 = scmp.lt.s32.totalorder %s7186_s29, 31  ;;  %v7295_v23 = vor.u32 %v8379_v21, %v7294_v20  ;;  %v8361_v25 = vld [vmem:[%s14764_s2 + $0x34] sm:$0xf0]  ;;  %v7286_v26 = vld [vmem:[%s14764_s2 + $0xb0] sm:$0xf]  ;;  %vm2450_vm0 = vcmask 523264  }
  0x13   : > { %8608 = vmatpush.bf16.msra.mxu2 %v7247_v10  ;;  %1427 = vmatpush.bf16.msra.mxu0 %v7247_v10  ;;  %v8377_v27 = vld [vmem:[%s14764_s2 + $0xb4] sm:$0xf0]  ;;  %v7223_v28 = vor.u32 %v8361_v25, %v7222_v24  ;;  %v7214_v29 = vld [vmem:[%s14764_s2 + $0x20] sm:$0xf]  ;;  %v8359_v30 = vld [vmem:[%s14764_s2 + $0x24] sm:$0xf0] }
  0x14   : > { %8616 = vmatpush.bf16.msra.mxu3 %v7311_v11  ;;  %1476 = vmatpush.bf16.msra.mxu1 %v7311_v11  ;;  %s15129_s29 = smov (!%p548_p3, %s7186_s29), 31  ;;  %v7287_v31 = vor.u32 %v8377_v27, %v7286_v26  ;;  %v7278_v32 = vld [vmem:[%s14764_s2 + $0xa0] sm:$0xf]  ;;  %v8375_v33 = vld [vmem:[%s14764_s2 + $0xa4] sm:$0xf0]  ;;  %v7215_v34 = vor.u32 %v8359_v30, %v7214_v29  ;;  %vm7026_vm1 = vcmask 261120  }
  0x15   : > { %s14779_s18 = smul.u32 56, %s15129_s29  ;;  %v7279_v35 = vor.u32 %v8375_v33, %v7278_v32  ;;  %v7206_v36 = vld [vmem:[%s14764_s2 + $0x10] sm:$0xf]  ;;  %v8357_v37 = vld [vmem:[%s14764_s2 + $0x14] sm:$0xf0]  ;;  %s10635_s22 = sshll.u32 %s15129_s29, 3 }
  0x16   : > { %v7270_v38 = vld [vmem:[%s14764_s2 + $0x90] sm:$0xf]  ;;  %v8373_v39 = vld [vmem:[%s14764_s2 + $0x94] sm:$0xf0]  ;;  %v7207_v40 = vor.u32 %v8357_v37, %v7206_v36  ;;  %v7198_v41 = vld [vmem:[%s14764_s2] sm:$0xf]  ;;  %s10646_s26 = scalar_lea.vmem %s14778_s16, %s10635_s22 }
  0x17   : > { %8609 = vmatpush.bf16.msra.mxu2 %v7239_v16  ;;  %1428 = vmatpush.bf16.msra.mxu0 %v7239_v16  ;;  %s9384_s20 = scalar_lea.vmem %s14838_s19, %s14779_s18  ;;  %v7271_v42 = vor.u32 %v8373_v39, %v7270_v38  ;;  %v8355_v43 = vld [vmem:[%s14764_s2 + $0x4] sm:$0xf0]  ;;  %v7262_v44 = vld [vmem:[%s14764_s2 + $0x80] sm:$0xf]  ;;  %v7382_v46 = vld [vmem:[%s14764_s2 + $0x170] sm:$0xf]  ;;  %s13206_s19 = scalar_lea.vmem %s14777_s15, %s10635_s22 }
  0x18   : > { %8617 = vmatpush.bf16.msra.mxu3 %v7303_v17  ;;  %1477 = vmatpush.bf16.msra.mxu1 %v7303_v17  ;;  %v8371_v45 = vld [vmem:[%s14764_s2 + $0x84] sm:$0xf0]  ;;  %v8401_v47 = vld [vmem:[%s14764_s2 + $0x174] sm:$0xf0]  ;;  %v7446_v48 = vld [vmem:[%s14764_s2 + $0x1f0] sm:$0xf]  ;;  %v7199_v52 = vor.u32 %v8355_v43, %v7198_v41 }
  0x19   : > { %v636_v49 = vld [vmem:[%s9384_s20 + $0x1c0] sm:$0xff]  ;;  %v8417_v50 = vld [vmem:[%s14764_s2 + $0x1f4] sm:$0xf0]  ;;  %v7510_v51 = vld [vmem:[%s14764_s2 + $0x270] sm:$0xf]  ;;  %v7263_v58 = vor.u32 %v8371_v45, %v7262_v44  ;;  %v7383_v61 = vor.u32 %v8401_v47, %v7382_v46  ;;  %s9192_s27 = smov 112  }
  0x1a   : > { %v643_v53 = vld [vmem:[%s9384_s20 + $0x1f8] sm:$0xff]  ;;  %v580_v54 = vld [vmem:[%s9384_s20] sm:$0xff]  ;;  %v8399_v57 = vld [vmem:[%s14764_s2 + $0x164] sm:$0xf0]  ;;  %v7447_v63 = vor.u32 %v8417_v50, %v7446_v48  ;;  %vm2704_vm2 = vcmask 130048   ;;  %vm6672_vm3 = vcmask 605696  }
  0x1b   : > { %8610 = vmatpush.bf16.msra.mxu2 %v7231_v22  ;;  %1429 = vmatpush.bf16.msra.mxu0 %v7231_v22  ;;  %v587_v55 = vld [vmem:[%s9384_s20 + $0x38] sm:$0xff]  ;;  %v7374_v56 = vld [vmem:[%s14764_s2 + $0x160] sm:$0xf]  ;;  %v637_v59 = vld [vmem:[%s9384_s20 + $0x1c8] sm:$0xff]  ;;  %v9430_v3 = vpack.c.bf16 %v643_v53, %v636_v49  ;;  %vm6833_vm4 = vcmask 80896   ;;  %s14903_s17 = smul.u32 56, %s15129_s29 }
  0x1c   : > { %8618 = vmatpush.bf16.msra.mxu3 %v7295_v23  ;;  %1478 = vmatpush.bf16.msra.mxu1 %v7295_v23  ;;  %v644_v60 = vld [vmem:[%s9384_s20 + $0x200] sm:$0xff]  ;;  %v8433_v62 = vld [vmem:[%s14764_s2 + $0x274] sm:$0xf0]  ;;  %v581_v0 = vld [vmem:[%s9384_s20 + $0x8] sm:$0xff]  ;;  %v9432_v4 = vpack.c.bf16 %v587_v55, %v580_v54  ;;  %v7375_v11 = vor.u32 %v8399_v57, %v7374_v56 }
  0x1d   : > { %v588_v1 = vld [vmem:[%s9384_s20 + $0x40] sm:$0xff]  ;;  %v8415_v5 = vld [vmem:[%s14764_s2 + $0x1e4] sm:$0xf0]  ;;  %v7574_v6 = vld [vmem:[%s14764_s2 + $0x2f0] sm:$0xf]  ;;  %v9443_v8 = vpack.c.bf16 %v644_v60, %v637_v59  ;;  %v7511_v9 = vor.u32 %v8433_v62, %v7510_v51  ;;  %s11634_s24 = scalar_lea.vmem %s14776_s14, %s14903_s17 }
  0x1e   : > { %v7438_v2 = vld [vmem:[%s14764_s2 + $0x1e0] sm:$0xf]  ;;  %v8449_v7 = vld [vmem:[%s14764_s2 + $0x2f4] sm:$0xf0]  ;;  %v9445_v10 = vpack.c.bf16 %v588_v1, %v581_v0  ;;  %v8431_v13 = vld [vmem:[%s14764_s2 + $0x264] sm:$0xf0] }
  0x1f   : > { %8611 = vmatpush.bf16.msra.mxu2 %v7223_v28  ;;  %1430 = vmatpush.bf16.msra.mxu0 %v7223_v28  ;;  %v7502_v12 = vld [vmem:[%s14764_s2 + $0x260] sm:$0xf]  ;;  %v7439_v14 = vor.u32 %v8415_v5, %v7438_v2  ;;  %v7575_v15 = vor.u32 %v8449_v7, %v7574_v6  ;;  %v7366_v16 = vld [vmem:[%s14764_s2 + $0x150] sm:$0xf]  ;;  %v8397_v17 = vld [vmem:[%s14764_s2 + $0x154] sm:$0xf0] }
  0x20   : > { %8619 = vmatpush.bf16.msra.mxu3 %v7287_v31  ;;  %1479 = vmatpush.bf16.msra.mxu1 %v7287_v31  ;;  %v7430_v18 = vld [vmem:[%s14764_s2 + $0x1d0] sm:$0xf]  ;;  %v8413_v19 = vld [vmem:[%s14764_s2 + $0x1d4] sm:$0xf0]  ;;  %v7566_v20 = vld [vmem:[%s14764_s2 + $0x2e0] sm:$0xf]  ;;  %v7503_v22 = vor.u32 %v8431_v13, %v7502_v12  ;;  %v7367_v23 = vor.u32 %v8397_v17, %v7366_v16 }
  0x21   : > { %v8447_v21 = vld [vmem:[%s14764_s2 + $0x2e4] sm:$0xf0]  ;;  %v7494_v24 = vld [vmem:[%s14764_s2 + $0x250] sm:$0xf]  ;;  %v8429_v25 = vld [vmem:[%s14764_s2 + $0x254] sm:$0xf0]  ;;  %v7431_v26 = vor.u32 %v8413_v19, %v7430_v18 }
  0x22   : > { %v7567_v27 = vor.u32 %v8447_v21, %v7566_v20  ;;  %v7358_v28 = vld [vmem:[%s14764_s2 + $0x140] sm:$0xf]  ;;  %v8395_v29 = vld [vmem:[%s14764_s2 + $0x144] sm:$0xf0]  ;;  %v7558_v32 = vld [vmem:[%s14764_s2 + $0x2d0] sm:$0xf] }
  0x23   : > { %8612 = vmatpush.bf16.msra.mxu2 %v7215_v34  ;;  %1431 = vmatpush.bf16.msra.mxu0 %v7215_v34  ;;  %v7422_v30 = vld [vmem:[%s14764_s2 + $0x1c0] sm:$0xf]  ;;  %v8411_v31 = vld [vmem:[%s14764_s2 + $0x1c4] sm:$0xf0]  ;;  %v8445_v33 = vld [vmem:[%s14764_s2 + $0x2d4] sm:$0xf0]  ;;  %v7495_v34 = vor.u32 %v8429_v25, %v7494_v24 }
  0x24   : > { %8620 = vmatpush.bf16.msra.mxu3 %v7279_v35  ;;  %1480 = vmatpush.bf16.msra.mxu1 %v7279_v35  ;;  %v7359_v35 = vor.u32 %v8395_v29, %v7358_v28  ;;  %v7486_v36 = vld [vmem:[%s14764_s2 + $0x240] sm:$0xf]  ;;  %v8427_v37 = vld [vmem:[%s14764_s2 + $0x244] sm:$0xf0]  ;;  %v650_v38 = vld [vmem:[%s9384_s20 + $0x230] sm:$0xff]  ;;  %v7559_v41 = vor.u32 %v8445_v33, %v7558_v32 }
  0x25   : > { %v657_v39 = vld [vmem:[%s9384_s20 + $0x268] sm:$0xff]  ;;  %v8393_v43 = vld [vmem:[%s14764_s2 + $0x134] sm:$0xf0]  ;;  %v7414_v44 = vld [vmem:[%s14764_s2 + $0x1b0] sm:$0xf]  ;;  %v7487_v53 = vor.u32 %v8427_v37, %v7486_v36 }
  0x26   : > { %v651_v45 = vld [vmem:[%s9384_s20 + $0x238] sm:$0xff]  ;;  %v658_v46 = vld [vmem:[%s9384_s20 + $0x270] sm:$0xff]  ;;  %v7550_v48 = vld [vmem:[%s14764_s2 + $0x2c0] sm:$0xf] }
  0x27   : > { %8613 = vmatpush.bf16.msra.mxu2 %v7207_v40  ;;  %1432 = vmatpush.bf16.msra.mxu0 %v7207_v40  ;;  %v7423_v40 = vor.u32 %v8411_v31, %v7422_v30  ;;  %v8409_v47 = vld [vmem:[%s14764_s2 + $0x1b4] sm:$0xf0]  ;;  %v8443_v49 = vld [vmem:[%s14764_s2 + $0x2c4] sm:$0xf0]  ;;  %v594_v50 = vld [vmem:[%s9384_s20 + $0x70] sm:$0xff]  ;;  %v9559_v6 = vpack.c.bf16 %v658_v46, %v651_v45 }
  0x28   : > { %8621 = vmatpush.bf16.msra.mxu3 %v7271_v42  ;;  %1481 = vmatpush.bf16.msra.mxu1 %v7271_v42  ;;  %v7350_v42 = vld [vmem:[%s14764_s2 + $0x130] sm:$0xf]  ;;  %v601_v51 = vld [vmem:[%s9384_s20 + $0xa8] sm:$0xff]  ;;  %v8425_v57 = vld [vmem:[%s14764_s2 + $0x234] sm:$0xf0]  ;;  %v7551_v59 = vor.u32 %v8443_v49, %v7550_v48 }
  0x29   : > { %v602_v54 = vld [vmem:[%s9384_s20 + $0xb0] sm:$0xff]  ;;  %v7351_v55 = vor.u32 %v8393_v43, %v7350_v42  ;;  %v7342_v60 = vld [vmem:[%s14764_s2 + $0x120] sm:$0xf]  ;;  %v9548_v0 = vpack.c.bf16 %v601_v51, %v594_v50  ;;  %v8407_v1 = vld [vmem:[%s14764_s2 + $0x1a4] sm:$0xf0] }
  0x2a   : > { %v7478_v56 = vld [vmem:[%s14764_s2 + $0x230] sm:$0xf]  ;;  %v7406_v62 = vld [vmem:[%s14764_s2 + $0x1a0] sm:$0xf]  ;;  %v8441_v5 = vld [vmem:[%s14764_s2 + $0x2b4] sm:$0xf0] }
  0x2b   : > { %8614 = vmatpush.bf16.msra.mxu2 %v7199_v52  ;;  %1433 = vmatpush.bf16.msra.mxu0 %v7199_v52  ;;  %v595_v52 = vld [vmem:[%s9384_s20 + $0x78] sm:$0xff]  ;;  %v7542_v2 = vld [vmem:[%s14764_s2 + $0x2b0] sm:$0xf]  ;;  %v7479_v7 = vor.u32 %v8425_v57, %v7478_v56  ;;  %v7407_v12 = vor.u32 %v8407_v1, %v7406_v62  ;;  %v7470_v19 = vld [vmem:[%s14764_s2 + $0x220] sm:$0xf] }
  0x2c   : > { %8622 = vmatpush.bf16.msra.mxu3 %v7263_v58  ;;  %1482 = vmatpush.bf16.msra.mxu1 %v7263_v58  ;;  %v7415_v58 = vor.u32 %v8409_v47, %v7414_v44  ;;  %v7543_v13 = vor.u32 %v8441_v5, %v7542_v2  ;;  %v7398_v16 = vld [vmem:[%s14764_s2 + $0x190] sm:$0xf]  ;;  %v8405_v18 = vld [vmem:[%s14764_s2 + $0x194] sm:$0xf0]  ;;  %v8423_v20 = vld [vmem:[%s14764_s2 + $0x224] sm:$0xf0] }
  0x2d   : > { %v7399_v21 = vor.u32 %v8405_v18, %v7398_v16  ;;  %v8439_v24 = vld [vmem:[%s14764_s2 + $0x2a4] sm:$0xf0]  ;;  %v7326_v25 = vld [vmem:[%s14764_s2 + $0x100] sm:$0xf]  ;;  %v7462_v30 = vld [vmem:[%s14764_s2 + $0x210] sm:$0xf] }
  0x2e   : > { %1454 = vmatmul.bf16.vlgmr.msra.gmra.mxu2 %v9430_v3  ;;  %1434 = vmatmul.bf16.vlgmr.msra.gmra.mxu0 %v9432_v4  ;;  %v7390_v28 = vld [vmem:[%s14764_s2 + $0x180] sm:$0xf]  ;;  %v8403_v29 = vld [vmem:[%s14764_s2 + $0x184] sm:$0xf0]  ;;  %v8421_v32 = vld [vmem:[%s14764_s2 + $0x214] sm:$0xf0] }
  0x2f   : > { %1524 = vmatpush.bf16.msrb.mxu2 %v7383_v61  ;;  %1503 = vmatmul.bf16.vlgmr.msra.gmra.mxu3 %v9443_v8  ;;  %v8391_v61 = vld [vmem:[%s14764_s2 + $0x124] sm:$0xf0]  ;;  %v7526_v33 = vld [vmem:[%s14764_s2 + $0x290] sm:$0xf]  ;;  %v7463_v36 = vor.u32 %v8421_v32, %v7462_v30  ;;  %v608_v42 = vld [vmem:[%s9384_s20 + $0xe0] sm:$0xff] }
  0x30   : > { %1573 = vmatpush.bf16.msrb.mxu3 %v7447_v63  ;;  %1622 = vmatpush.bf16.msrb.mxu0 %v7511_v9  ;;  %v9546_v63 = vpack.c.bf16 %v657_v39, %v650_v38  ;;  %v9561_v9 = vpack.c.bf16 %v602_v54, %v595_v52  ;;  %v7454_v38 = vld [vmem:[%s14764_s2 + $0x200] sm:$0xf]  ;;  %v8419_v39 = vld [vmem:[%s14764_s2 + $0x204] sm:$0xf0]  ;;  %v615_v43 = vld [vmem:[%s9384_s20 + $0x118] sm:$0xff] }
  0x31   : > { %1483 = vmatmul.bf16.vlgmr.msra.gmra.mxu1 %v9445_v10  ;;  %v7455_v44 = vor.u32 %v8419_v39, %v7454_v38  ;;  %v665_v45 = vld [vmem:[%s9384_s20 + $0x2a8] sm:$0xff]  ;;  %v672_v46 = vld [vmem:[%s9384_s20 + $0x2e0] sm:$0xff]  ;;  %v9631_v50 = vpack.c.bf16 %v615_v43, %v608_v42  ;;  %v7638_v56 = vld [vmem:[%s14764_s2 + $0x370] sm:$0xf] }
  0x32   : > { %1671 = vmatpush.bf16.msrb.mxu1 %v7575_v15  ;;  %v8389_v15 = vld [vmem:[%s14764_s2 + $0x114] sm:$0xf0]  ;;  %v609_v47 = vld [vmem:[%s9384_s20 + $0xe8] sm:$0xff]  ;;  %v616_v48 = vld [vmem:[%s9384_s20 + $0x120] sm:$0xff]  ;;  %v9633_v51 = vpack.c.bf16 %v672_v46, %v665_v45 }
  0x33   : > { %1525 = vmatpush.bf16.msrb.mxu2 %v7375_v11  ;;  %v7343_v11 = vor.u32 %v8391_v61, %v7342_v60  ;;  %v9635_v52 = vpack.c.bf16 %v616_v48, %v609_v47  ;;  %v8435_v54 = vld [vmem:[%s14764_s2 + $0x284] sm:$0xf0]  ;;  %v8465_v57 = vld [vmem:[%s14764_s2 + $0x374] sm:$0xf0]  ;;  %v7256_v60 = vld [vmem:[%s14764_s2 + $0x78] sm:$0xf0] }
  0x34   : > { %1574 = vmatpush.bf16.msrb.mxu3 %v7439_v14  ;;  %1623 = vmatpush.bf16.msrb.mxu0 %v7503_v22  ;;  %v7334_v14 = vld [vmem:[%s14764_s2 + $0x110] sm:$0xf]  ;;  %v7471_v22 = vor.u32 %v8423_v20, %v7470_v19  ;;  %v8384_v62 = vld [vmem:[%s14764_s2 + $0xf4] sm:$0xf]  ;;  %v7320_v1 = vld [vmem:[%s14764_s2 + $0xf8] sm:$0xf0] }
  0x35   : > { %v7335_v17 = vor.u32 %v8389_v15, %v7334_v14  ;;  %v8400_v2 = vld [vmem:[%s14764_s2 + $0x174] sm:$0xf]  ;;  %v7323_v5 = vor.u32 %v8384_v62, %v7320_v1  ;;  %v629_v15 = vld [vmem:[%s9384_s20 + $0x188] sm:$0xff]  ;;  %v679_v16 = vld [vmem:[%s9384_s20 + $0x318] sm:$0xff] }
  0x36   : > { %1672 = vmatpush.bf16.msrb.mxu1 %v7567_v27  ;;  %v622_v14 = vld [vmem:[%s9384_s20 + $0x150] sm:$0xff]  ;;  %v623_v18 = vld [vmem:[%s9384_s20 + $0x158] sm:$0xff]  ;;  %v8382_v30 = vld [vmem:[%s14764_s2 + $0xe4] sm:$0xf] }
  0x37   : > { %1526 = vmatpush.bf16.msrb.mxu2 %v7367_v23  ;;  %v7534_v23 = vld [vmem:[%s14764_s2 + $0x2a0] sm:$0xf]  ;;  %v630_v19 = vld [vmem:[%s9384_s20 + $0x190] sm:$0xff]  ;;  %v8398_v32 = vld [vmem:[%s14764_s2 + $0x164] sm:$0xf] }
  0x38   : > { %1575 = vmatpush.bf16.msrb.mxu3 %v7431_v26  ;;  %1624 = vmatpush.bf16.msrb.mxu0 %v7495_v34  ;;  %v8387_v26 = vld [vmem:[%s14764_s2 + $0x104] sm:$0xf0]  ;;  %v7535_v27 = vor.u32 %v8439_v24, %v7534_v23  ;;  %v8437_v34 = vld [vmem:[%s14764_s2 + $0x294] sm:$0xf0]  ;;  %v9685_v23 = vpack.c.bf16 %v630_v19, %v623_v18  ;;  %v7630_v24 = vld [vmem:[%s14764_s2 + $0x360] sm:$0xf] }
  0x39   : > { %v7327_v31 = vor.u32 %v8387_v26, %v7326_v25  ;;  %v7527_v37 = vor.u32 %v8437_v34, %v7526_v33  ;;  %v8463_v25 = vld [vmem:[%s14764_s2 + $0x364] sm:$0xf0]  ;;  %v8366_v26 = vld [vmem:[%s14764_s2 + $0x64] sm:$0xf]  ;;  %v7376_v34 = vld [vmem:[%s14764_s2 + $0x168] sm:$0xf0] }
  0x3a   : > { %1673 = vmatpush.bf16.msrb.mxu1 %v7559_v41  ;;  %v671_v41 = vld [vmem:[%s9384_s20 + $0x2d8] sm:$0xff]  ;;  %v584_v38 = vld [vmem:[%s9384_s20 + $0x20] sm:$0xff]  ;;  %v585_v42 = vld [vmem:[%s9384_s20 + $0x28] sm:$0xff] }
  0x3b   : > { %1527 = vmatpush.bf16.msrb.mxu2 %v7359_v35  ;;  %v7391_v35 = vor.u32 %v8403_v29, %v7390_v28  ;;  %v7248_v28 = vld [vmem:[%s14764_s2 + $0x68] sm:$0xf0]  ;;  %v591_v39 = vld [vmem:[%s9384_s20 + $0x58] sm:$0xff]  ;;  %v592_v43 = vld [vmem:[%s9384_s20 + $0x60] sm:$0xff] }
  0x3c   : > { %1576 = vmatpush.bf16.msrb.mxu3 %v7423_v40  ;;  %1625 = vmatpush.bf16.msrb.mxu0 %v7487_v53  ;;  %v664_v40 = vld [vmem:[%s9384_s20 + $0x2a0] sm:$0xff]  ;;  %v7251_v29 = vor.u32 %v8366_v26, %v7248_v28  ;;  %v9725_v45 = vpack.c.bf16 %v591_v39, %v584_v38  ;;  %v9729_v47 = vpack.c.bf16 %v592_v43, %v585_v42  ;;  %v7622_v48 = vld [vmem:[%s14764_s2 + $0x350] sm:$0xf]  ;;  %v7368_v62 = vld [vmem:[%s14764_s2 + $0x158] sm:$0xf0] }
  0x3d   : > { %v9629_v49 = vpack.c.bf16 %v671_v41, %v664_v40  ;;  %v7518_v53 = vld [vmem:[%s14764_s2 + $0x280] sm:$0xf]  ;;  %v583_v40 = vld [vmem:[%s9384_s20 + $0x18] sm:$0xff]  ;;  %v590_v41 = vld [vmem:[%s9384_s20 + $0x50] sm:$0xff] }
  0x3e   : > { %1674 = vmatpush.bf16.msrb.mxu1 %v7551_v59  ;;  %1459 = vmatmul.bf16.gmra.mxu2 %v9546_v63  ;;  %v7639_v59 = vor.u32 %v8465_v57, %v7638_v56  ;;  %v9727_v46 = vpack.c.bf16 %v590_v41, %v583_v40  ;;  %v7240_v56 = vld [vmem:[%s14764_s2 + $0x58] sm:$0xf0]  ;;  %v8362_v26 = vld [vmem:[%s14764_s2 + $0x44] sm:$0xf]  ;;  %v7232_v28 = vld [vmem:[%s14764_s2 + $0x48] sm:$0xf0] }
  0x3f   : > { %1528 = vmatpush.bf16.msrb.mxu2 %v7351_v55  ;;  %1439 = vmatmul.bf16.gmra.mxu0 %v9548_v0  ;;  %v7519_v55 = vor.u32 %v8435_v54, %v7518_v53  ;;  %v8461_v53 = vld [vmem:[%s14764_s2 + $0x354] sm:$0xf0]  ;;  %v8364_v54 = vld [vmem:[%s14764_s2 + $0x54] sm:$0xf]  ;;  %v612_v38 = vld [vmem:[%s9384_s20 + $0x100] sm:$0xff] }
  0x40   : > { %1577 = vmatpush.bf16.msrb.mxu3 %v7415_v58  ;;  %1626 = vmatpush.bf16.msrb.mxu0 %v7479_v7  ;;  %v8368_v58 = vld [vmem:[%s14764_s2 + $0x74] sm:$0xf]  ;;  %v7384_v7 = vld [vmem:[%s14764_s2 + $0x178] sm:$0xf0]  ;;  %v7243_v57 = vor.u32 %v8364_v54, %v7240_v56  ;;  %v613_v42 = vld [vmem:[%s9384_s20 + $0x108] sm:$0xff] }
  0x41   : > { %1508 = vmatmul.bf16.gmra.mxu3 %v9559_v6  ;;  %1488 = vmatmul.bf16.gmra.mxu1 %v9561_v9  ;;  %v7259_v61 = vor.u32 %v8368_v58, %v7256_v60  ;;  %v8380_v58 = vld [vmem:[%s14764_s2 + $0xd4] sm:$0xf]  ;;  %v619_v39 = vld [vmem:[%s9384_s20 + $0x138] sm:$0xff]  ;;  %v620_v43 = vld [vmem:[%s9384_s20 + $0x140] sm:$0xff] }
  0x42   : > { %1675 = vmatpush.bf16.msrb.mxu1 %v7543_v13  ;;  %v685_v13 = vld [vmem:[%s9384_s20 + $0x348] sm:$0xff]  ;;  %v8396_v60 = vld [vmem:[%s14764_s2 + $0x154] sm:$0xf]  ;;  %v611_v40 = vld [vmem:[%s9384_s20 + $0xf8] sm:$0xff] }
  0x43   : > { %1529 = vmatpush.bf16.msrb.mxu2 %v7343_v11  ;;  %v7387_v11 = vor.u32 %v8400_v2, %v7384_v7  ;;  %v7371_v1 = vor.u32 %v8396_v60, %v7368_v62  ;;  %v596_v2 = vld [vmem:[%s9384_s20 + $0x80] sm:$0xff]  ;;  %v598_v7 = vld [vmem:[%s9384_s20 + $0x90] sm:$0xff]  ;;  %v7224_v60 = vld [vmem:[%s14764_s2 + $0x38] sm:$0xf0] }
  0x44   : > { %1578 = vmatpush.bf16.msrb.mxu3 %v7407_v12  ;;  %1627 = vmatpush.bf16.msrb.mxu0 %v7471_v22  ;;  %v678_v12 = vld [vmem:[%s9384_s20 + $0x310] sm:$0xff]  ;;  %v624_v62 = vld [vmem:[%s9384_s20 + $0x160] sm:$0xff] }
  0x45   : > { %v9679_v20 = vpack.c.bf16 %v685_v13, %v678_v12  ;;  %v597_v12 = vld [vmem:[%s9384_s20 + $0x88] sm:$0xff]  ;;  %v604_v13 = vld [vmem:[%s9384_s20 + $0xc0] sm:$0xff]  ;;  %v618_v41 = vld [vmem:[%s9384_s20 + $0x130] sm:$0xff] }
  0x46   : > { %1676 = vmatpush.bf16.msrb.mxu1 %v7535_v27  ;;  %v7631_v27 = vor.u32 %v8463_v25, %v7630_v24  ;;  %v9771_v18 = vpack.c.bf16 %v604_v13, %v597_v12  ;;  %v7614_v24 = vld [vmem:[%s14764_s2 + $0x340] sm:$0xf]  ;;  %v8459_v25 = vld [vmem:[%s14764_s2 + $0x344] sm:$0xf0]  ;;  %v9815_v54 = vpack.c.bf16 %v618_v41, %v611_v40  ;;  %v7606_v56 = vld [vmem:[%s14764_s2 + $0x330] sm:$0xf] }
  0x47   : > { %1530 = vmatpush.bf16.msrb.mxu2 %v7335_v17  ;;  %v686_v17 = vld [vmem:[%s9384_s20 + $0x350] sm:$0xff]  ;;  %v625_v13 = vld [vmem:[%s9384_s20 + $0x168] sm:$0xff]  ;;  %v8374_v40 = vld [vmem:[%s14764_s2 + $0xa4] sm:$0xf] }
  0x48   : > { %1579 = vmatpush.bf16.msrb.mxu3 %v7399_v21  ;;  %1628 = vmatpush.bf16.msrb.mxu0 %v7463_v36  ;;  %v9681_v21 = vpack.c.bf16 %v629_v15, %v622_v14  ;;  %v9683_v22 = vpack.c.bf16 %v686_v17, %v679_v16  ;;  %v582_v36 = vld [vmem:[%s9384_s20 + $0x10] sm:$0xff]  ;;  %v599_v14 = vld [vmem:[%s9384_s20 + $0x98] sm:$0xff]  ;;  %v7280_v41 = vld [vmem:[%s14764_s2 + $0xa8] sm:$0xf0] }
  0x49   : > { %v606_v15 = vld [vmem:[%s9384_s20 + $0xd0] sm:$0xff] }
  0x4a   : > { %1677 = vmatpush.bf16.msrb.mxu1 %v7527_v37  ;;  %v589_v37 = vld [vmem:[%s9384_s20 + $0x48] sm:$0xff]  ;;  %v9773_v19 = vpack.c.bf16 %v606_v15, %v599_v14  ;;  %v632_v14 = vld [vmem:[%s9384_s20 + $0x1a0] sm:$0xff]  ;;  %v627_v15 = vld [vmem:[%s9384_s20 + $0x178] sm:$0xff] }
  0x4b   : > { %1531 = vmatpush.bf16.msrb.mxu2 %v7327_v31  ;;  %v7312_v31 = vld [vmem:[%s14764_s2 + $0xe8] sm:$0xf0] }
  0x4c   : > { %1580 = vmatpush.bf16.msrb.mxu3 %v7391_v35  ;;  %1629 = vmatpush.bf16.msrb.mxu0 %v7455_v44  ;;  %v7315_v33 = vor.u32 %v8382_v30, %v7312_v31  ;;  %v7379_v35 = vor.u32 %v8398_v32, %v7376_v34  ;;  %v9723_v44 = vpack.c.bf16 %v589_v37, %v582_v36  ;;  %v8378_v30 = vld [vmem:[%s14764_s2 + $0xc4] sm:$0xf]  ;;  %v7296_v31 = vld [vmem:[%s14764_s2 + $0xc8] sm:$0xf0]  ;;  %v610_v36 = vld [vmem:[%s9384_s20 + $0xf0] sm:$0xff] }
  0x4d   : > { %v8394_v32 = vld [vmem:[%s14764_s2 + $0x144] sm:$0xf]  ;;  %v7360_v34 = vld [vmem:[%s14764_s2 + $0x148] sm:$0xf0] }
  0x4e   : > { %1464 = vmatmul.bf16.gmra.mxu2 %v9629_v49  ;;  %1678 = vmatpush.bf16.msrb.mxu1 %v7519_v55  ;;  %v7623_v55 = vor.u32 %v8461_v53, %v7622_v48  ;;  %v617_v37 = vld [vmem:[%s9384_s20 + $0x128] sm:$0xff]  ;;  %v9813_v53 = vpack.c.bf16 %v619_v39, %v612_v38  ;;  %v9882_v38 = vld [vmem:[%s14765_s3] sm:$0x3]  ;;  %v638_v39 = vld [vmem:[%s9384_s20 + $0x1d0] sm:$0xff] }
  0x4f   : > { %1444 = vmatmul.bf16.gmra.mxu0 %v9631_v50  ;;  %1720 = vmatpush.bf16.msra.mxu2 %v7639_v59  ;;  %v7304_v59 = vld [vmem:[%s14764_s2 + $0xd8] sm:$0xf0]  ;;  %v9811_v48 = vpack.c.bf16 %v617_v37, %v610_v36  ;;  %v7216_v36 = vld [vmem:[%s14764_s2 + $0x28] sm:$0xf0] }
  0x50   : > { %1769 = vmatpush.bf16.msra.mxu3 %v7259_v61  ;;  %1818 = vmatpush.bf16.msra.mxu0 %v7323_v5  ;;  %v7307_v61 = vor.u32 %v8380_v58, %v7304_v59  ;;  %v603_v5 = vld [vmem:[%s9384_s20 + $0xb8] sm:$0xff]  ;;  %14839 = vst [vmem:[#allocation2_spill] sm:$0xff] %v9813_v53  ;;  %v8360_v58 = vld [vmem:[%s14764_s2 + $0x34] sm:$0xf] }
  0x51   : > { %1513 = vmatmul.bf16.gmra.mxu3 %v9633_v51  ;;  %1493 = vmatmul.bf16.gmra.mxu1 %v9635_v52  ;;  %v9767_v16 = vpack.c.bf16 %v603_v5, %v596_v2  ;;  %v7288_v2 = vld [vmem:[%s14764_s2 + $0xb8] sm:$0xf0] }
  0x52   : > { %1867 = vmatpush.bf16.msra.mxu1 %v7387_v11  ;;  %v605_v11 = vld [vmem:[%s9384_s20 + $0xc8] sm:$0xff]  ;;  %v631_v5 = vld [vmem:[%s9384_s20 + $0x198] sm:$0xff] }
  0x53   : > { %1721 = vmatpush.bf16.msra.mxu2 %v7631_v27  ;;  %v9769_v17 = vpack.c.bf16 %v605_v11, %v598_v7  ;;  %v7615_v27 = vor.u32 %v8459_v25, %v7614_v24  ;;  %v626_v7 = vld [vmem:[%s9384_s20 + $0x170] sm:$0xff]  ;;  %v633_v11 = vld [vmem:[%s9384_s20 + $0x1a8] sm:$0xff]  ;;  %v9849_v25 = vpack.c.bf16 %v631_v5, %v624_v62  ;;  %v9899_v62 = vperm.slane %v9882_v38, 0 }
  0x54   : > { %1770 = vmatpush.bf16.msra.mxu3 %v7251_v29  ;;  %1819 = vmatpush.bf16.msra.mxu0 %v7315_v33  ;;  %v7235_v29 = vor.u32 %v8362_v26, %v7232_v28  ;;  %v7299_v33 = vor.u32 %v8378_v30, %v7296_v31  ;;  %v634_v24 = vld [vmem:[%s9384_s20 + $0x1b0] sm:$0xff]  ;;  %v9851_v26 = vpack.c.bf16 %v633_v11, %v626_v7  ;;  %v7352_v30 = vld [vmem:[%s14764_s2 + $0x138] sm:$0xf0] }
  0x55   : > { %v9855_v28 = vpack.c.bf16 %v634_v24, %v627_v15 }
  0x56   : > { %1868 = vmatpush.bf16.msra.mxu1 %v7379_v35  ;;  %v7363_v35 = vor.u32 %v8394_v32, %v7360_v34  ;;  %14840 = vst [vmem:[#allocation3_spill] sm:$0xff] %v9851_v26  ;;  %v7598_v32 = vld [vmem:[%s14764_s2 + $0x320] sm:$0xf]  ;;  %v8358_v34 = vld [vmem:[%s14764_s2 + $0x24] sm:$0xf] }
  0x57   : > { %1722 = vmatpush.bf16.msra.mxu2 %v7623_v55  ;;  %v9817_v55 = vpack.c.bf16 %v620_v43, %v613_v42  ;;  %14842 = vst [vmem:[#allocation5_spill] sm:$0xff] %v9855_v28  ;;  %v7219_v37 = vor.u32 %v8358_v34, %v7216_v36  ;;  %v645_v42 = vld [vmem:[%s9384_s20 + $0x208] sm:$0xff]  ;;  %v640_v43 = vld [vmem:[%s9384_s20 + $0x1e0] sm:$0xff]  ;;  %v7208_v34 = vld [vmem:[%s14764_s2 + $0x18] sm:$0xf0] }
  0x58   : > { %1771 = vmatpush.bf16.msra.mxu3 %v7243_v57  ;;  %1820 = vmatpush.bf16.msra.mxu0 %v7307_v61  ;;  %v8457_v57 = vld [vmem:[%s14764_s2 + $0x334] sm:$0xf0]  ;;  %v7227_v61 = vor.u32 %v8360_v58, %v7224_v60  ;;  %v641_v60 = vld [vmem:[%s9384_s20 + $0x1e8] sm:$0xff] }
  0x59   : > { %v7607_v59 = vor.u32 %v8457_v57, %v7606_v56  ;;  %v647_v56 = vld [vmem:[%s9384_s20 + $0x218] sm:$0xff]  ;;  %v7283_v57 = vor.u32 %v8374_v40, %v7280_v41 }
  0x5a   : > { %1869 = vmatpush.bf16.msra.mxu1 %v7371_v1  ;;  %v8376_v1 = vld [vmem:[%s14764_s2 + $0xb4] sm:$0xf]  ;;  %v639_v58 = vld [vmem:[%s9384_s20 + $0x1d8] sm:$0xff] }
  0x5b   : > { %1723 = vmatpush.bf16.msra.mxu2 %v7615_v27  ;;  %v7291_v12 = vor.u32 %v8376_v1, %v7288_v2  ;;  %v9853_v27 = vpack.c.bf16 %v632_v14, %v625_v13  ;;  %v9901_v1 = vpack.c.bf16 %v645_v42, %v638_v39  ;;  %v9903_v2 = vpack.c.bf16 %v647_v56, %v640_v43  ;;  %v8390_v13 = vld [vmem:[%s14764_s2 + $0x124] sm:$0xf]  ;;  %v7344_v14 = vld [vmem:[%s14764_s2 + $0x128] sm:$0xf0] }
  0x5c   : > { %1772 = vmatpush.bf16.msra.mxu3 %v7235_v29  ;;  %1821 = vmatpush.bf16.msra.mxu0 %v7299_v33  ;;  %v8392_v29 = vld [vmem:[%s14764_s2 + $0x134] sm:$0xf]  ;;  %v8455_v33 = vld [vmem:[%s14764_s2 + $0x324] sm:$0xf0]  ;;  %v7347_v24 = vor.u32 %v8390_v13, %v7344_v14  ;;  %v660_v14 = vld [vmem:[%s9384_s20 + $0x280] sm:$0xff] }
  0x5d   : > { %14841 = vst [vmem:[#allocation4_spill] sm:$0xff] %v9853_v27  ;;  %v7355_v31 = vor.u32 %v8392_v29, %v7352_v30  ;;  %v7590_v30 = vld [vmem:[%s14764_s2 + $0x310] sm:$0xf]  ;;  %v653_v13 = vld [vmem:[%s9384_s20 + $0x248] sm:$0xff] }
  0x5e   : > { %1469 = vmatmul.bf16.gmra.mxu2 %v9679_v20  ;;  %1870 = vmatpush.bf16.msra.mxu1 %v7363_v35  ;;  %v7599_v35 = vor.u32 %v8455_v33, %v7598_v32  ;;  %14843 = vst [vmem:[#allocation6_spill] sm:$0xff] %v9903_v2  ;;  %v8356_v32 = vld [vmem:[%s14764_s2 + $0x14] sm:$0xf] }
  0x5f   : > { %1449 = vmatmul.bf16.gmra.mxu0 %v9681_v21  ;;  %1724 = vmatpush.bf16.msra.mxu2 %v7607_v59  ;;  %v646_v59 = vld [vmem:[%s9384_s20 + $0x210] sm:$0xff]  ;;  %v7211_v36 = vor.u32 %v8356_v32, %v7208_v34 }
  0x60   : > { %1773 = vmatpush.bf16.msra.mxu3 %v7227_v61  ;;  %1822 = vmatpush.bf16.msra.mxu0 %v7291_v12  ;;  %v648_v61 = vld [vmem:[%s9384_s20 + $0x220] sm:$0xff]  ;;  %v9905_v7 = vpack.c.bf16 %v646_v59, %v639_v58  ;;  %v8372_v58 = vld [vmem:[%s14764_s2 + $0x94] sm:$0xf]  ;;  %v7272_v59 = vld [vmem:[%s14764_s2 + $0x98] sm:$0xf0] }
  0x61   : > { %1518 = vmatmul.bf16.gmra.mxu3 %v9683_v22  ;;  %1498 = vmatmul.bf16.gmra.mxu1 %v9685_v23  ;;  %v9908_v12 = vpack.c.bf16 %v648_v61, %v641_v60  ;;  %v659_v60 = vld [vmem:[%s9384_s20 + $0x278] sm:$0xff]  ;;  %v654_v61 = vld [vmem:[%s9384_s20 + $0x250] sm:$0xff] }
  0x62   : > { %1871 = vmatpush.bf16.msra.mxu1 %v7355_v31  ;;  %14844 = vst [vmem:[#allocation7_spill] sm:$0xff] %v9905_v7  ;;  %v8453_v31 = vld [vmem:[%s14764_s2 + $0x314] sm:$0xf0] }
  0x63   : > { %1725 = vmatpush.bf16.msra.mxu2 %v7599_v35  ;;  %14845 = vst [vmem:[#allocation8_spill] sm:$0xff] %v9908_v12  ;;  %v7591_v33 = vor.u32 %v8453_v31, %v7590_v30  ;;  %v662_v30 = vld [vmem:[%s9384_s20 + $0x290] sm:$0xff] }
  0x64   : > { %1774 = vmatpush.bf16.msra.mxu3 %v7219_v37  ;;  %1823 = vmatpush.bf16.msra.mxu0 %v7283_v57  ;;  %v652_v57 = vld [vmem:[%s9384_s20 + $0x240] sm:$0xff] }
  0x66   : > { %1872 = vmatpush.bf16.msra.mxu1 %v7347_v24  ;;  %v655_v24 = vld [vmem:[%s9384_s20 + $0x258] sm:$0xff] }
  0x67   : > { %1726 = vmatpush.bf16.msra.mxu2 %v7591_v33  ;;  %v9955_v33 = vpack.c.bf16 %v659_v60, %v652_v57  ;;  %v7582_v60 = vld [vmem:[%s14764_s2 + $0x300] sm:$0xf] }
  0x68   : > { %1775 = vmatpush.bf16.msra.mxu3 %v7211_v36  ;;  %v9959_v36 = vpack.c.bf16 %v660_v14, %v653_v13  ;;  %v7200_v13 = vld [vmem:[%s14764_s2 + $0x8] sm:$0xf0] }
  0x6a   : > { %14847 = vst [vmem:[#allocation10_spill] sm:$0xff] %v9959_v36 }
  0x6e   : > { %1532 = vmatmul.bf16.vlgmr.msrb.gmra.mxu2 %v9723_v44 }
  0x6f   : > { %1630 = vmatmul.bf16.vlgmr.msrb.gmra.mxu0 %v9725_v45 }
  0x71   : > { %1581 = vmatmul.bf16.vlgmr.msrb.gmra.mxu3 %v9727_v46  ;;  %1679 = vmatmul.bf16.vlgmr.msrb.gmra.mxu1 %v9729_v47 }
  0x7e   : > { %1537 = vmatmul.bf16.gmra.mxu2 %v9767_v16 }
  0x7f   : > { %1635 = vmatmul.bf16.gmra.mxu0 %v9769_v17 }
  0x81   : > { %1586 = vmatmul.bf16.gmra.mxu3 %v9771_v18  ;;  %1684 = vmatmul.bf16.gmra.mxu1 %v9773_v19 }
  0x8e   : > { %1542 = vmatmul.bf16.gmra.mxu2 %v9811_v48 }
  0x8f   : > { %1640 = vmatmul.bf16.gmra.mxu0 %v9813_v53 }
  0x91   : > { %1591 = vmatmul.bf16.gmra.mxu3 %v9815_v54  ;;  %1689 = vmatmul.bf16.gmra.mxu1 %v9817_v55 }
  0x9e   : > { %1547 = vmatmul.bf16.gmra.mxu2 %v9849_v25 }
  0x9f   : > { %1645 = vmatmul.bf16.gmra.mxu0 %v9851_v26 }
  0xa1   : > { %1596 = vmatmul.bf16.gmra.mxu3 %v9853_v27  ;;  %1694 = vmatmul.bf16.gmra.mxu1 %v9855_v28 }
  0xab   : > { %v1435_v5 = vpop.f32.mrf.mxu0 }
  0xac   : > { %v1436_v11 = vadd.f32 %v1435_v5, %v9899_v62  ;;  %v661_v5 = vld [vmem:[%s9384_s20 + $0x288] sm:$0xff] }
  0xad   : > { %v9957_v34 = vpack.c.bf16 %v661_v5, %v654_v61  ;;  %v8451_v61 = vld [vmem:[%s14764_s2 + $0x304] sm:$0xf0]  ;;  %v8354_v5 = vld [vmem:[%s14764_s2 + $0x4] sm:$0xf] }
  0xae   : > { %v1484_v15 = vpop.f32.mrf.mxu1  ;;  %1552 = vmatmul.bf16.gmra.mxu2 %v9901_v1 }
  0xaf   : > { %v9917_v29 = vadd.f32 %v1484_v15, %v1436_v11  ;;  %1650 = vmatmul.bf16.gmra.mxu0 %v9903_v2  ;;  %v7275_v11 = vor.u32 %v8372_v58, %v7272_v59  ;;  %14846 = vst [vmem:[#allocation9_spill] sm:$0xff] %v9957_v34 }
  0xb1   : > { %1601 = vmatmul.bf16.gmra.mxu3 %v9905_v7  ;;  %1699 = vmatmul.bf16.gmra.mxu1 %v9908_v12  ;;  %v1455_v35 = vpop.f32.mrf.mxu2 }
  0xb2   : > { %v1456_v37 = vadd.f32 %v1455_v35, %v9899_v62  ;;  %v1504_v39 = vpop.f32.mrf.mxu3  ;;  %1824 = vmatpush.bf16.msra.mxu0 %v7275_v11  ;;  %v7583_v11 = vor.u32 %v8451_v61, %v7582_v60  ;;  %v673_v60 = vld [vmem:[%s9384_s20 + $0x2e8] sm:$0xff]  ;;  %v668_v61 = vld [vmem:[%s9384_s20 + $0x2c0] sm:$0xff] }
  0xb3   : > { %v1437_v40 = vpop.f32.mrf.mxu0 }
  0xb4   : > { %v9935_v41 = vadd.f32 %v1504_v39, %v1456_v37  ;;  %v1438_v42 = vadd.f32 %v1437_v40, %v9899_v62  ;;  %v9964_v40 = vpack.c.bf16 %v662_v30, %v655_v24  ;;  %1727 = vmatpush.bf16.msra.mxu2 %v7583_v11 }
  0xb6   : > { %v1486_v43 = vpop.f32.mrf.mxu1  ;;  %14848 = vst [vmem:[#allocation11_spill] sm:$0xff] %v9964_v40 }
  0xb7   : > { %v9938_v56 = vadd.f32 %v1486_v43, %v1438_v42  ;;  %v8388_v42 = vld [vmem:[%s14764_s2 + $0x114] sm:$0xf]  ;;  %v7336_v43 = vld [vmem:[%s14764_s2 + $0x118] sm:$0xf0] }
  0xb8   : > { %v7339_v58 = vor.u32 %v8388_v42, %v7336_v43  ;;  %v666_v43 = vld [vmem:[%s9384_s20 + $0x2b0] sm:$0xff] }
  0xb9   : > { %v1457_v15 = vpop.f32.mrf.mxu2 }
  0xba   : > { %v1458_v31 = vadd.f32 %v1457_v15, %v9899_v62  ;;  %v1506_v32 = vpop.f32.mrf.mxu3  ;;  %1873 = vmatpush.bf16.msra.mxu1 %v7339_v58  ;;  %v7203_v15 = vor.u32 %v8354_v5, %v7200_v13  ;;  %v7264_v58 = vld [vmem:[%s14764_s2 + $0x88] sm:$0xf0]  ;;  %v675_v5 = vld [vmem:[%s9384_s20 + $0x2f8] sm:$0xff] }
  0xbb   : > { %v667_v13 = vld [vmem:[%s9384_s20 + $0x2b8] sm:$0xff] }
  0xbc   : > { %v1440_v35 = vpop.f32.mrf.mxu0  ;;  %v9961_v37 = vadd.f32 %v1506_v32, %v1458_v31  ;;  %1776 = vmatpush.bf16.msra.mxu3 %v7203_v15 }
  0xbd   : > { %v1441_v39 = vadd.f32 %v1440_v35, %v9899_v62 }
  0xbe   : > { %v1489_v57 = vpop.f32.mrf.mxu1  ;;  %1557 = vmatmul.bf16.gmra.mxu2 %v9955_v33 }
  0xbf   : > { %v9973_v59 = vadd.f32 %v1489_v57, %v1441_v39  ;;  %1655 = vmatmul.bf16.gmra.mxu0 %v9957_v34  ;;  %v8370_v57 = vld [vmem:[%s14764_s2 + $0x84] sm:$0xf]  ;;  %v10013_v34 = vpack.c.bf16 %v675_v5, %v668_v61 }
  0xc0   : > { %v7267_v11 = vor.u32 %v8370_v57, %v7264_v58 }
  0xc1   : > { %1606 = vmatmul.bf16.gmra.mxu3 %v9959_v36  ;;  %1704 = vmatmul.bf16.gmra.mxu1 %v9964_v40  ;;  %v1460_v14 = vpop.f32.mrf.mxu2  ;;  %14849 = vst [vmem:[#allocation12_spill] sm:$0xff] %v10013_v34 }
  0xc2   : > { %v1461_v24 = vadd.f32 %v1460_v14, %v9899_v62  ;;  %v674_v14 = vld [vmem:[%s9384_s20 + $0x2f0] sm:$0xff]  ;;  %1825 = vmatpush.bf16.msra.mxu0 %v7267_v11  ;;  %v8386_v11 = vld [vmem:[%s14764_s2 + $0x104] sm:$0xf] }
  0xc3   : > { %v10015_v36 = vpack.c.bf16 %v674_v14, %v667_v13  ;;  %v7448_v13 = vld [vmem:[%s14764_s2 + $0x1f8] sm:$0xf0]  ;;  %v8432_v14 = vld [vmem:[%s14764_s2 + $0x274] sm:$0xf] }
  0xc4   : > { %v1509_v30 = vpop.f32.mrf.mxu3  ;;  %v1442_v31 = vpop.f32.mrf.mxu0 }
  0xc5   : > { %v9991_v32 = vadd.f32 %v1509_v30, %v1461_v24  ;;  %v1443_v35 = vadd.f32 %v1442_v31, %v9899_v62  ;;  %v669_v24 = vld [vmem:[%s9384_s20 + $0x2c8] sm:$0xff]  ;;  %v676_v30 = vld [vmem:[%s9384_s20 + $0x300] sm:$0xff]  ;;  %14850 = vst [vmem:[#allocation13_spill] sm:$0xff] %v10015_v36 }
  0xc6   : > { %v1491_v39 = vpop.f32.mrf.mxu1  ;;  %v10020_v58 = vpack.c.bf16 %v676_v30, %v669_v24  ;;  %v7512_v24 = vld [vmem:[%s14764_s2 + $0x278] sm:$0xf0] }
  0xc7   : > { %v9994_v42 = vadd.f32 %v1491_v39, %v1443_v35  ;;  %v10011_v39 = vpack.c.bf16 %v673_v60, %v666_v43  ;;  %v7328_v43 = vld [vmem:[%s14764_s2 + $0x108] sm:$0xf0] }
  0xc8   : > { %14851 = vst [vmem:[#allocation14_spill] sm:$0xff] %v10020_v58  ;;  %v7331_v61 = vor.u32 %v8386_v11, %v7328_v43 }
  0xc9   : > { %v1462_v15 = vpop.f32.mrf.mxu2 }
  0xca   : > { %v1463_v31 = vadd.f32 %v1462_v15, %v9899_v62  ;;  %1874 = vmatpush.bf16.msra.mxu1 %v7331_v61 }
  0xcc   : > { %v1511_v35 = vpop.f32.mrf.mxu3  ;;  %v1445_v40 = vpop.f32.mrf.mxu0 }
  0xcd   : > { %v10017_v2 = vadd.f32 %v1511_v35, %v1463_v31  ;;  %v1446_v57 = vadd.f32 %v1445_v40, %v9899_v62  ;;  %v8416_v40 = vld [vmem:[%s14764_s2 + $0x1f4] sm:$0xf]  ;;  %v7515_v31 = vor.u32 %v8432_v14, %v7512_v24  ;;  %v687_v24 = vld [vmem:[%s9384_s20 + $0x358] sm:$0xff] }
  0xce   : > { %v1494_v60 = vpop.f32.mrf.mxu1  ;;  %1562 = vmatmul.bf16.gmra.mxu2 %v10011_v39  ;;  %v7451_v15 = vor.u32 %v8416_v40, %v7448_v13  ;;  %v680_v13 = vld [vmem:[%s9384_s20 + $0x320] sm:$0xff]  ;;  %v8448_v14 = vld [vmem:[%s14764_s2 + $0x2f4] sm:$0xf] }
  0xcf   : > { %v10029_v5 = vadd.f32 %v1494_v60, %v1446_v57  ;;  %1660 = vmatmul.bf16.gmra.mxu0 %v10013_v34  ;;  %1965 = vmatpush.bf16.msrb.mxu3 %v7515_v31  ;;  %v689_v31 = vld [vmem:[%s9384_s20 + $0x368] sm:$0xff]  ;;  %v10067_v12 = vpack.c.bf16 %v687_v24, %v680_v13  ;;  %v7640_v13 = vld [vmem:[%s14764_s2 + $0x378] sm:$0xf0]  ;;  %v8430_v24 = vld [vmem:[%s14764_s2 + $0x264] sm:$0xf] }
  0xd0   : > { %1916 = vmatpush.bf16.msrb.mxu2 %v7451_v15  ;;  %v7576_v15 = vld [vmem:[%s14764_s2 + $0x2f8] sm:$0xf0] }
  0xd1   : > { %1611 = vmatmul.bf16.gmra.mxu3 %v10015_v36  ;;  %1709 = vmatmul.bf16.gmra.mxu1 %v10020_v58  ;;  %v1465_v30 = vpop.f32.mrf.mxu2  ;;  %v7579_v34 = vor.u32 %v8448_v14, %v7576_v15  ;;  %v690_v36 = vld [vmem:[%s9384_s20 + $0x370] sm:$0xff] }
  0xd2   : > { %v1466_v35 = vadd.f32 %v1465_v30, %v9899_v62  ;;  %v682_v30 = vld [vmem:[%s9384_s20 + $0x330] sm:$0xff] }
  0xd3   : > { %2014 = vmatpush.bf16.msrb.mxu0 %v7579_v34  ;;  %v10069_v7 = vpack.c.bf16 %v689_v31, %v682_v30  ;;  %v7504_v31 = vld [vmem:[%s14764_s2 + $0x268] sm:$0xf0] }
  0xd4   : > { %v1514_v57 = vpop.f32.mrf.mxu3  ;;  %v1447_v11 = vpop.f32.mrf.mxu0 }
  0xd5   : > { %v10047_v43 = vadd.f32 %v1514_v57, %v1466_v35  ;;  %v1448_v60 = vadd.f32 %v1447_v11, %v9899_v62  ;;  %v681_v35 = vld [vmem:[%s9384_s20 + $0x328] sm:$0xff]  ;;  %v688_v57 = vld [vmem:[%s9384_s20 + $0x360] sm:$0xff]  ;;  %v683_v11 = vld [vmem:[%s9384_s20 + $0x338] sm:$0xff]  ;;  %14852 = vst [vmem:[#allocation15_spill] sm:$0xff] %v10069_v7 }
  0xd6   : > { %v1496_v61 = vpop.f32.mrf.mxu1  ;;  %v10071_v28 = vpack.c.bf16 %v688_v57, %v681_v35  ;;  %v10076_v15 = vpack.c.bf16 %v690_v36, %v683_v11  ;;  %v8414_v36 = vld [vmem:[%s14764_s2 + $0x1e4] sm:$0xf]  ;;  %v7507_v57 = vor.u32 %v8430_v24, %v7504_v31  ;;  %v586_v24 = vld [vmem:[%s9384_s20 + $0x30] sm:$0xff]  ;;  %v593_v31 = vld [vmem:[%s9384_s20 + $0x68] sm:$0xff] }
  0xd7   : > { %v10050_v40 = vadd.f32 %v1496_v61, %v1448_v60 }
  0xd8   : > { %14853 = vst [vmem:[#allocation16_spill] sm:$0xff] %v10071_v28  ;;  %1966 = vmatpush.bf16.msrb.mxu3 %v7507_v57 }
  0xd9   : > { %v1467_v58 = vpop.f32.mrf.mxu2  ;;  %14854 = vst [vmem:[#allocation17_spill] sm:$0xff] %v10076_v15 }
  0xda   : > { %v1468_v60 = vadd.f32 %v1467_v58, %v9899_v62  ;;  %v8464_v58 = vld [vmem:[%s14764_s2 + $0x374] sm:$0xf] }
  0xdc   : > { %v1516_v61 = vpop.f32.mrf.mxu3  ;;  %v1450_v26 = vpop.f32.mrf.mxu0 }
  0xdd   : > { %v10073_v27 = vadd.f32 %v1516_v61, %v1468_v60  ;;  %v1451_v14 = vadd.f32 %v1450_v26, %v9899_v62  ;;  %v7643_v26 = vor.u32 %v8464_v58, %v7640_v13 }
  0xde   : > { %v1499_v53 = vpop.f32.mrf.mxu1  ;;  %1567 = vmatmul.bf16.gmra.mxu2 %v10067_v12 }
  0xdf   : > { %v10079_v34 = vadd.f32 %v1499_v53, %v1451_v14  ;;  %1665 = vmatmul.bf16.gmra.mxu0 %v10069_v7  ;;  %v7440_v53 = vld [vmem:[%s14764_s2 + $0x1e8] sm:$0xf0]  ;;  %2063 = vmatpush.bf16.msrb.mxu1 %v7643_v26  ;;  %v8462_v7 = vld [vmem:[%s14764_s2 + $0x364] sm:$0xf] }
  0xe0   : > { %v7443_v30 = vor.u32 %v8414_v36, %v7440_v53  ;;  %v8446_v53 = vld [vmem:[%s14764_s2 + $0x2e4] sm:$0xf]  ;;  %v7568_v26 = vld [vmem:[%s14764_s2 + $0x2e8] sm:$0xf0] }
  0xe1   : > { %1616 = vmatmul.bf16.gmra.mxu3 %v10071_v28  ;;  %1714 = vmatmul.bf16.gmra.mxu1 %v10076_v15  ;;  %v1470_v35 = vpop.f32.mrf.mxu2 }
  0xe2   : > { %v1471_v11 = vadd.f32 %v1470_v35, %v9899_v62  ;;  %1917 = vmatpush.bf16.msrb.mxu2 %v7443_v30  ;;  %v7571_v30 = vor.u32 %v8446_v53, %v7568_v26  ;;  %v7632_v53 = vld [vmem:[%s14764_s2 + $0x368] sm:$0xf0]  ;;  %v8412_v26 = vld [vmem:[%s14764_s2 + $0x1d4] sm:$0xf] }
  0xe4   : > { %v1519_v60 = vpop.f32.mrf.mxu3  ;;  %v1452_v61 = vpop.f32.mrf.mxu0  ;;  %2015 = vmatpush.bf16.msrb.mxu0 %v7571_v30 }
  0xe5   : > { %v10103_v14 = vadd.f32 %v1519_v60, %v1471_v11  ;;  %v1453_v58 = vadd.f32 %v1452_v61, %v9899_v62  ;;  %v10117_v60 = vpack.c.bf16 %v593_v31, %v586_v24  ;;  %v7432_v24 = vld [vmem:[%s14764_s2 + $0x1d8] sm:$0xf0] }
  0xe6   : > { %v1501_v13 = vpop.f32.mrf.mxu1  ;;  %v7435_v31 = vor.u32 %v8412_v26, %v7432_v24  ;;  %v7560_v26 = vld [vmem:[%s14764_s2 + $0x2d8] sm:$0xf0]  ;;  %v600_v24 = vld [vmem:[%s9384_s20 + $0xa0] sm:$0xff] }
  0xe7   : > { %v10106_v36 = vadd.f32 %v1501_v13, %v1453_v58 }
  0xe8   : > { %1918 = vmatpush.bf16.msrb.mxu2 %v7435_v31 }
  0xe9   : > { %v1472_v35 = vpop.f32.mrf.mxu2 }
  0xea   : > { %v1473_v57 = vadd.f32 %v1472_v35, %v9899_v62  ;;  %v7635_v62 = vor.u32 %v8462_v7, %v7632_v53 }
  0xec   : > { %v1521_v11 = vpop.f32.mrf.mxu3  ;;  %v1631_v61 = vpop.f32.mrf.mxu0  ;;  %2064 = vmatpush.bf16.msrb.mxu1 %v7635_v62  ;;  %v607_v62 = vld [vmem:[%s9384_s20 + $0xd8] sm:$0xff] }
  0xed   : > { %v10119_v58 = vadd.f32 %v1521_v11, %v1473_v57 }
  0xee   : > { %v1680_v13 = vpop.f32.mrf.mxu1  ;;  %1728 = vmatmul.bf16.vlgmr.msra.gmra.mxu2 %v10117_v60 }
  0xef   : > { %1826 = vmatmul.bf16.vlgmr.msra.gmra.mxu0 %v9445_v10  ;;  %v8428_v10 = vld [vmem:[%s14764_s2 + $0x254] sm:$0xf] }
  0xf1   : > { %1777 = vmatmul.bf16.vlgmr.msra.gmra.mxu3 %v9432_v4  ;;  %1875 = vmatmul.bf16.vlgmr.msra.gmra.mxu1 %v9723_v44  ;;  %v7496_v4 = vld [vmem:[%s14764_s2 + $0x258] sm:$0xf0]  ;;  %v1533_v7 = vpop.f32.mrf.mxu2  ;;  %v8444_v44 = vld [vmem:[%s14764_s2 + $0x2d4] sm:$0xf] }
  0xf2   : > { %v7499_v30 = vor.u32 %v8428_v10, %v7496_v4  ;;  %v1534_v35 = vadd.f32 %v1533_v7, %v9917_v29  ;;  %v7563_v10 = vor.u32 %v8444_v44, %v7560_v26  ;;  %v8410_v44 = vld [vmem:[%s14764_s2 + $0x1c4] sm:$0xf] }
  0xf4   : > { %v1582_v57 = vpop.f32.mrf.mxu3  ;;  %v1633_v11 = vpop.f32.mrf.mxu0  ;;  %1967 = vmatpush.bf16.msrb.mxu3 %v7499_v30  ;;  %2016 = vmatpush.bf16.msrb.mxu0 %v7563_v10  ;;  %v10155_v30 = vpack.c.bf16 %v607_v62, %v600_v24 }
  0xf5   : > { %v1583_v53 = vadd.f32 %v1582_v57, %v1534_v35 }
  0xf6   : > { %v1682_v15 = vpop.f32.mrf.mxu1 }
  0xf7   : > { %v1632_v28 = vadd.f32 %v1631_v61, %v1583_v53 }
  0xf9   : > { %v10152_v4 = vadd.f32 %v1680_v13, %v1632_v28  ;;  %v1535_v29 = vpop.f32.mrf.mxu2  ;;  %v8460_v28 = vld [vmem:[%s14764_s2 + $0x354] sm:$0xf]  ;;  %v7624_v13 = vld [vmem:[%s14764_s2 + $0x358] sm:$0xf0] }
  0xfa   : > { %v1536_v31 = vadd.f32 %v1535_v29, %v9938_v56  ;;  %v7627_v56 = vor.u32 %v8460_v28, %v7624_v13  ;;  %v8442_v13 = vld [vmem:[%s14764_s2 + $0x2c4] sm:$0xf] }
  0xfc   : > { %v1584_v7 = vpop.f32.mrf.mxu3  ;;  %v1636_v61 = vpop.f32.mrf.mxu0  ;;  %2065 = vmatpush.bf16.msrb.mxu1 %v7627_v56  ;;  %v621_v56 = vld [vmem:[%s9384_s20 + $0x148] sm:$0xff] }
  0xfd   : > { %v1585_v35 = vadd.f32 %v1584_v7, %v1536_v31 }
  0xfe   : > { %v1685_v57 = vpop.f32.mrf.mxu1  ;;  %1733 = vmatmul.bf16.gmra.mxu2 %v10155_v30 }
  0xff   : > { %v1634_v53 = vadd.f32 %v1633_v11, %v1585_v35  ;;  %1831 = vmatmul.bf16.gmra.mxu0 %v9561_v9  ;;  %v7424_v11 = vld [vmem:[%s14764_s2 + $0x1c8] sm:$0xf0]  ;;  %v8426_v9 = vld [vmem:[%s14764_s2 + $0x244] sm:$0xf] }
 0x100   : > { %v7427_v26 = vor.u32 %v8410_v44, %v7424_v11 }
 0x101   : > { %1782 = vmatmul.bf16.gmra.mxu3 %v9548_v0  ;;  %1880 = vmatmul.bf16.gmra.mxu1 %v9767_v16  ;;  %v7488_v0 = vld [vmem:[%s14764_s2 + $0x248] sm:$0xf0]  ;;  %v10179_v24 = vadd.f32 %v1682_v15, %v1634_v53  ;;  %v1538_v62 = vpop.f32.mrf.mxu2  ;;  %v614_v53 = vld [vmem:[%s9384_s20 + $0x110] sm:$0xff] }
 0x102   : > { %v7491_v10 = vor.u32 %v8426_v9, %v7488_v0  ;;  %v1539_v29 = vadd.f32 %v1538_v62, %v9973_v59  ;;  %1919 = vmatpush.bf16.msrb.mxu2 %v7427_v26  ;;  %v7552_v15 = vld [vmem:[%s14764_s2 + $0x2c8] sm:$0xf0]  ;;  %v10193_v0 = vpack.c.bf16 %v621_v56, %v614_v53 }
 0x103   : > { %v7555_v44 = vor.u32 %v8442_v13, %v7552_v15 }
 0x104   : > { %v1587_v31 = vpop.f32.mrf.mxu3  ;;  %v1638_v7 = vpop.f32.mrf.mxu0  ;;  %1968 = vmatpush.bf16.msrb.mxu3 %v7491_v10 }
 0x105   : > { %v1588_v35 = vadd.f32 %v1587_v31, %v1539_v29  ;;  %2017 = vmatpush.bf16.msrb.mxu0 %v7555_v44  ;;  %v7616_v31 = vld [vmem:[%s14764_s2 + $0x348] sm:$0xf0] }
 0x106   : > { %v1687_v16 = vpop.f32.mrf.mxu1 }
 0x107   : > { %v1637_v28 = vadd.f32 %v1636_v61, %v1588_v35  ;;  %v8408_v35 = vld [vmem:[%s14764_s2 + $0x1b4] sm:$0xf] }
 0x109   : > { %v10190_v11 = vadd.f32 %v1685_v57, %v1637_v28  ;;  %v1540_v59 = vpop.f32.mrf.mxu2  ;;  %v8458_v57 = vld [vmem:[%s14764_s2 + $0x344] sm:$0xf] }
 0x10a   : > { %v1541_v9 = vadd.f32 %v1540_v59, %v9994_v42  ;;  %v7619_v42 = vor.u32 %v8458_v57, %v7616_v31  ;;  %v635_v57 = vld [vmem:[%s9384_s20 + $0x1b8] sm:$0xff] }
 0x10c   : > { %v1589_v26 = vpop.f32.mrf.mxu3  ;;  %v1641_v61 = vpop.f32.mrf.mxu0  ;;  %2066 = vmatpush.bf16.msrb.mxu1 %v7619_v42 }
 0x10d   : > { %v1590_v62 = vadd.f32 %v1589_v26, %v1541_v9 }
 0x10e   : > { %v1690_v10 = vpop.f32.mrf.mxu1  ;;  %1738 = vmatmul.bf16.gmra.mxu2 %v10193_v0 }
 0x10f   : > { %v1639_v29 = vadd.f32 %v1638_v7, %v1590_v62  ;;  %1836 = vmatmul.bf16.gmra.mxu0 %v9635_v52  ;;  %v7416_v7 = vld [vmem:[%s14764_s2 + $0x1b8] sm:$0xf0]  ;;  %v8424_v52 = vld [vmem:[%s14764_s2 + $0x234] sm:$0xf] }
 0x110   : > { %v7419_v28 = vor.u32 %v8408_v35, %v7416_v7  ;;  %v8440_v62 = vld [vmem:[%s14764_s2 + $0x2b4] sm:$0xf] }
 0x111   : > { %1787 = vmatmul.bf16.gmra.mxu3 %v9631_v50  ;;  %1885 = vmatmul.bf16.gmra.mxu1 %v9811_v48  ;;  %v7480_v50 = vld [vmem:[%s14764_s2 + $0x238] sm:$0xf0]  ;;  %v10217_v13 = vadd.f32 %v1687_v16, %v1639_v29  ;;  %v1543_v15 = vpop.f32.mrf.mxu2  ;;  %v628_v29 = vld [vmem:[%s9384_s20 + $0x180] sm:$0xff] }
 0x112   : > { %v7483_v53 = vor.u32 %v8424_v52, %v7480_v50  ;;  %v1544_v56 = vadd.f32 %v1543_v15, %v10029_v5  ;;  %1920 = vmatpush.bf16.msrb.mxu2 %v7419_v28  ;;  %v7544_v16 = vld [vmem:[%s14764_s2 + $0x2b8] sm:$0xf0]  ;;  %v10231_v52 = vpack.c.bf16 %v635_v57, %v628_v29 }
 0x113   : > { %v7547_v31 = vor.u32 %v8440_v62, %v7544_v16 }
 0x114   : > { %v1592_v44 = vpop.f32.mrf.mxu3  ;;  %v1643_v59 = vpop.f32.mrf.mxu0  ;;  %1969 = vmatpush.bf16.msrb.mxu3 %v7483_v53  ;;  %v7608_v53 = vld [vmem:[%s14764_s2 + $0x338] sm:$0xf0] }
 0x115   : > { %v1593_v9 = vadd.f32 %v1592_v44, %v1544_v56  ;;  %2018 = vmatpush.bf16.msrb.mxu0 %v7547_v31  ;;  %v8406_v56 = vld [vmem:[%s14764_s2 + $0x1a4] sm:$0xf]  ;;  %v7408_v44 = vld [vmem:[%s14764_s2 + $0x1a8] sm:$0xf0] }
 0x116   : > { %v1692_v48 = vpop.f32.mrf.mxu1 }
 0x117   : > { %v1642_v26 = vadd.f32 %v1641_v61, %v1593_v9 }
 0x119   : > { %v10228_v42 = vadd.f32 %v1690_v10, %v1642_v26  ;;  %v1545_v5 = vpop.f32.mrf.mxu2  ;;  %v8456_v10 = vld [vmem:[%s14764_s2 + $0x334] sm:$0xf] }
 0x11a   : > { %v1546_v35 = vadd.f32 %v1545_v5, %v10050_v40  ;;  %v7611_v40 = vor.u32 %v8456_v10, %v7608_v53 }
 0x11c   : > { %v1594_v7 = vpop.f32.mrf.mxu3  ;;  %v1646_v61 = vpop.f32.mrf.mxu0  ;;  %2067 = vmatpush.bf16.msrb.mxu1 %v7611_v40 }
 0x11d   : > { %v1595_v28 = vadd.f32 %v1594_v7, %v1546_v35  ;;  %v8438_v35 = vld [vmem:[%s14764_s2 + $0x2a4] sm:$0xf]  ;;  %v642_v7 = vld [vmem:[%s9384_s20 + $0x1f0] sm:$0xff] }
 0x11e   : > { %v1695_v50 = vpop.f32.mrf.mxu1  ;;  %1743 = vmatmul.bf16.gmra.mxu2 %v10231_v52 }
 0x11f   : > { %v1644_v15 = vadd.f32 %v1643_v59, %v1595_v28  ;;  %1841 = vmatmul.bf16.gmra.mxu0 %v9685_v23  ;;  %v8422_v23 = vld [vmem:[%s14764_s2 + $0x224] sm:$0xf]  ;;  %v7411_v59 = vor.u32 %v8406_v56, %v7408_v44  ;;  %v649_v28 = vld [vmem:[%s9384_s20 + $0x228] sm:$0xff] }
 0x120   : > { %v10269_v56 = vpack.c.bf16 %v649_v28, %v642_v7 }
 0x121   : > { %1792 = vmatmul.bf16.gmra.mxu3 %v9681_v21  ;;  %1890 = vmatmul.bf16.gmra.mxu1 %v9849_v25  ;;  %v7472_v21 = vld [vmem:[%s14764_s2 + $0x228] sm:$0xf0]  ;;  %v10255_v9 = vadd.f32 %v1692_v48, %v1644_v15  ;;  %v1548_v26 = vpop.f32.mrf.mxu2 }
 0x122   : > { %v7475_v62 = vor.u32 %v8422_v23, %v7472_v21  ;;  %v1549_v16 = vadd.f32 %v1548_v26, %v10079_v34  ;;  %1921 = vmatpush.bf16.msrb.mxu2 %v7411_v59  ;;  %v7536_v48 = vld [vmem:[%s14764_s2 + $0x2a8] sm:$0xf0]  ;;  %v8404_v26 = vld [vmem:[%s14764_s2 + $0x194] sm:$0xf] }
 0x123   : > { %v7539_v15 = vor.u32 %v8438_v35, %v7536_v48  ;;  %v7600_v21 = vld [vmem:[%s14764_s2 + $0x328] sm:$0xf0] }
 0x124   : > { %v1597_v29 = vpop.f32.mrf.mxu3  ;;  %v1648_v57 = vpop.f32.mrf.mxu0  ;;  %1970 = vmatpush.bf16.msrb.mxu3 %v7475_v62  ;;  %v7400_v62 = vld [vmem:[%s14764_s2 + $0x198] sm:$0xf0] }
 0x125   : > { %v1598_v31 = vadd.f32 %v1597_v29, %v1549_v16  ;;  %2019 = vmatpush.bf16.msrb.mxu0 %v7539_v15  ;;  %v7403_v16 = vor.u32 %v8404_v26, %v7400_v62  ;;  %v8436_v15 = vld [vmem:[%s14764_s2 + $0x294] sm:$0xf] }
 0x126   : > { %v1697_v25 = vpop.f32.mrf.mxu1 }
 0x127   : > { %v1647_v5 = vadd.f32 %v1646_v61, %v1598_v31  ;;  %1922 = vmatpush.bf16.msrb.mxu2 %v7403_v16  ;;  %v8402_v16 = vld [vmem:[%s14764_s2 + $0x184] sm:$0xf] }
 0x129   : > { %v10266_v10 = vadd.f32 %v1695_v50, %v1647_v5  ;;  %v1550_v34 = vpop.f32.mrf.mxu2  ;;  %v8454_v50 = vld [vmem:[%s14764_s2 + $0x324] sm:$0xf] }
 0x12a   : > { %v1551_v53 = vadd.f32 %v1550_v34, %v10106_v36  ;;  %v7603_v36 = vor.u32 %v8454_v50, %v7600_v21  ;;  %v656_v34 = vld [vmem:[%s9384_s20 + $0x260] sm:$0xff] }
 0x12c   : > { %v1599_v40 = vpop.f32.mrf.mxu3  ;;  %v1651_v61 = vpop.f32.mrf.mxu0  ;;  %2068 = vmatpush.bf16.msrb.mxu1 %v7603_v36 }
 0x12d   : > { %v1600_v44 = vadd.f32 %v1599_v40, %v1551_v53  ;;  %v663_v53 = vld [vmem:[%s9384_s20 + $0x298] sm:$0xff] }
 0x12e   : > { %v1700_v23 = vpop.f32.mrf.mxu1  ;;  %1748 = vmatmul.bf16.gmra.mxu2 %v10269_v56  ;;  %v10307_v21 = vpack.c.bf16 %v663_v53, %v656_v34  ;;  %v8434_v34 = vld [vmem:[%s14764_s2 + $0x284] sm:$0xf]  ;;  %v670_v53 = vld [vmem:[%s9384_s20 + $0x2d0] sm:$0xff] }
 0x12f   : > { %v1649_v59 = vadd.f32 %v1648_v57, %v1600_v44  ;;  %1846 = vmatmul.bf16.gmra.mxu0 %v9443_v8  ;;  %v8420_v8 = vld [vmem:[%s14764_s2 + $0x214] sm:$0xf] }
 0x131   : > { %1797 = vmatmul.bf16.gmra.mxu3 %v9430_v3  ;;  %1895 = vmatmul.bf16.gmra.mxu1 %v9901_v1  ;;  %v7464_v3 = vld [vmem:[%s14764_s2 + $0x218] sm:$0xf0]  ;;  %v10293_v29 = vadd.f32 %v1697_v25, %v1649_v59  ;;  %v1553_v57 = vpop.f32.mrf.mxu2 }
 0x132   : > { %v7467_v31 = vor.u32 %v8420_v8, %v7464_v3  ;;  %v1554_v5 = vadd.f32 %v1553_v57, %v9935_v41  ;;  %v7528_v25 = vld [vmem:[%s14764_s2 + $0x298] sm:$0xf0]  ;;  %v7392_v3 = vld [vmem:[%s14764_s2 + $0x188] sm:$0xf0] }
 0x133   : > { %v7531_v40 = vor.u32 %v8436_v15, %v7528_v25  ;;  %v7592_v8 = vld [vmem:[%s14764_s2 + $0x318] sm:$0xf0]  ;;  %v7395_v57 = vor.u32 %v8402_v16, %v7392_v3  ;;  %v7584_v16 = vld [vmem:[%s14764_s2 + $0x308] sm:$0xf0] }
 0x134   : > { %v1602_v35 = vpop.f32.mrf.mxu3  ;;  %v1653_v48 = vpop.f32.mrf.mxu0  ;;  %1971 = vmatpush.bf16.msrb.mxu3 %v7467_v31 }
 0x135   : > { %v1603_v7 = vadd.f32 %v1602_v35, %v1554_v5  ;;  %2020 = vmatpush.bf16.msrb.mxu0 %v7531_v40  ;;  %1923 = vmatpush.bf16.msrb.mxu2 %v7395_v57  ;;  %v677_v40 = vld [vmem:[%s9384_s20 + $0x308] sm:$0xff] }
 0x136   : > { %v1702_v1 = vpop.f32.mrf.mxu1 }
 0x137   : > { %v1652_v28 = vadd.f32 %v1651_v61, %v1603_v7 }
 0x139   : > { %v10304_v44 = vadd.f32 %v1700_v23, %v1652_v28  ;;  %v1555_v41 = vpop.f32.mrf.mxu2  ;;  %v8452_v23 = vld [vmem:[%s14764_s2 + $0x314] sm:$0xf] }
 0x13a   : > { %v1556_v59 = vadd.f32 %v1555_v41, %v9961_v37  ;;  %v7595_v37 = vor.u32 %v8452_v23, %v7592_v8 }
 0x13c   : > { %v1604_v50 = vpop.f32.mrf.mxu3  ;;  %v1656_v61 = vpop.f32.mrf.mxu0  ;;  %2069 = vmatpush.bf16.msrb.mxu1 %v7595_v37  ;;  %v8450_v37 = vld [vmem:[%s14764_s2 + $0x304] sm:$0xf] }
 0x13d   : > { %v1605_v36 = vadd.f32 %v1604_v50, %v1556_v59 }
 0x13e   : > { %v1705_v26 = vpop.f32.mrf.mxu1  ;;  %1753 = vmatmul.bf16.gmra.mxu2 %v10307_v21 }
 0x13f   : > { %v1654_v62 = vadd.f32 %v1653_v48, %v1605_v36  ;;  %1851 = vmatmul.bf16.gmra.mxu0 %v9559_v6  ;;  %v8418_v6 = vld [vmem:[%s14764_s2 + $0x204] sm:$0xf] }
 0x141   : > { %1802 = vmatmul.bf16.gmra.mxu3 %v9546_v63  ;;  %1900 = vmatmul.bf16.gmra.mxu1 %v9955_v33  ;;  %v7456_v63 = vld [vmem:[%s14764_s2 + $0x208] sm:$0xf0]  ;;  %v10331_v31 = vadd.f32 %v1702_v1, %v1654_v62  ;;  %v1558_v5 = vpop.f32.mrf.mxu2  ;;  %v10345_v62 = vpack.c.bf16 %v677_v40, %v670_v53 }
 0x142   : > { %v7459_v35 = vor.u32 %v8418_v6, %v7456_v63  ;;  %v1559_v48 = vadd.f32 %v1558_v5, %v9991_v32  ;;  %v7520_v1 = vld [vmem:[%s14764_s2 + $0x288] sm:$0xf0] }
 0x143   : > { %v7523_v41 = vor.u32 %v8434_v34, %v7520_v1 }
 0x144   : > { %v1607_v7 = vpop.f32.mrf.mxu3  ;;  %v1658_v28 = vpop.f32.mrf.mxu0  ;;  %1972 = vmatpush.bf16.msrb.mxu3 %v7459_v35 }
 0x145   : > { %v1608_v15 = vadd.f32 %v1607_v7, %v1559_v48  ;;  %2021 = vmatpush.bf16.msrb.mxu0 %v7523_v41 }
 0x146   : > { %v1707_v33 = vpop.f32.mrf.mxu1 }
 0x147   : > { %v1657_v25 = vadd.f32 %v1656_v61, %v1608_v15  ;;  %v691_v15 = vld [vmem:[%s9384_s20 + $0x378] sm:$0xff] }
 0x149   : > { %v10342_v59 = vadd.f32 %v1705_v26, %v1657_v25  ;;  %v1560_v32 = vpop.f32.mrf.mxu2 }
 0x14a   : > { %v1561_v50 = vadd.f32 %v1560_v32, %v10017_v2  ;;  %v7587_v2 = vor.u32 %v8450_v37, %v7584_v16 }
 0x14c   : > { %v1609_v36 = vpop.f32.mrf.mxu3  ;;  %v1661_v61 = vpop.f32.mrf.mxu0  ;;  %2070 = vmatpush.bf16.msrb.mxu1 %v7587_v2 }
 0x14d   : > { %v1610_v23 = vadd.f32 %v1609_v36, %v1561_v50 }
 0x14e   : > { %v1710_v8 = vpop.f32.mrf.mxu1  ;;  %1758 = vmatmul.bf16.gmra.mxu2 %v10345_v62 }
 0x14f   : > { %v1659_v26 = vadd.f32 %v1658_v28, %v1610_v23  ;;  %1856 = vmatmul.bf16.gmra.mxu0 %v9633_v51  ;;  %v684_v28 = vld [vmem:[%s9384_s20 + $0x340] sm:$0xff]  ;;  %v8473_v23 = vld [vmem:[%s14766_s4 + $0x38] sm:$0xff] }
 0x150   : > { %2292 = vmatpush.bf16.msra.mxu2 %v8473_v23 }
 0x151   : > { %1807 = vmatmul.bf16.gmra.mxu3 %v9629_v49  ;;  %1905 = vmatmul.bf16.gmra.mxu1 %v10011_v39  ;;  %v10357_v3 = vadd.f32 %v1707_v33, %v1659_v26  ;;  %v1563_v6 = vpop.f32.mrf.mxu2  ;;  %v10365_v39 = vpack.c.bf16 %v691_v15, %v684_v28 }
 0x152   : > { %v1564_v57 = vadd.f32 %v1563_v6, %v10047_v43 }
 0x154   : > { %v1612_v63 = vpop.f32.mrf.mxu3  ;;  %v1663_v5 = vpop.f32.mrf.mxu0 }
 0x155   : > { %v1613_v35 = vadd.f32 %v1612_v63, %v1564_v57  ;;  %v10387_v57 = vperm.slane %v9882_v38, 1 }
 0x156   : > { %v1712_v48 = vpop.f32.mrf.mxu1 }
 0x157   : > { %v1662_v7 = vadd.f32 %v1661_v61, %v1613_v35 }
 0x159   : > { %v10362_v25 = vadd.f32 %v1710_v8, %v1662_v7  ;;  %v1565_v51 = vpop.f32.mrf.mxu2 }
 0x15a   : > { %v1566_v49 = vadd.f32 %v1565_v51, %v10073_v27 }
 0x15c   : > { %v1614_v34 = vpop.f32.mrf.mxu3  ;;  %v1666_v33 = vpop.f32.mrf.mxu0 }
 0x15d   : > { %v1615_v1 = vadd.f32 %v1614_v34, %v1566_v49 }
 0x15e   : > { %v1715_v53 = vpop.f32.mrf.mxu1  ;;  %1763 = vmatmul.bf16.gmra.mxu2 %v10365_v39 }
 0x15f   : > { %v1664_v40 = vadd.f32 %v1663_v5, %v1615_v1  ;;  %1861 = vmatmul.bf16.gmra.mxu0 %v9683_v22  ;;  %v8481_v22 = vld [vmem:[%s14766_s4 + $0x78] sm:$0xff] }
 0x160   : > { %2341 = vmatpush.bf16.msra.mxu3 %v8481_v22 }
 0x161   : > { %1812 = vmatmul.bf16.gmra.mxu3 %v9679_v20  ;;  %1910 = vmatmul.bf16.gmra.mxu1 %v10067_v12  ;;  %v10371_v43 = vadd.f32 %v1712_v48, %v1664_v40  ;;  %v1568_v41 = vpop.f32.mrf.mxu2 }
 0x162   : > { %v1569_v27 = vadd.f32 %v1568_v41, %v10103_v14 }
 0x164   : > { %v1617_v32 = vpop.f32.mrf.mxu3  ;;  %v1668_v50 = vpop.f32.mrf.mxu0 }
 0x165   : > { %v1618_v36 = vadd.f32 %v1617_v32, %v1569_v27 }
 0x166   : > { %v1717_v61 = vpop.f32.mrf.mxu1 }
 0x167   : > { %v1667_v20 = vadd.f32 %v1666_v33, %v1618_v36 }
 0x169   : > { %v10380_v12 = vadd.f32 %v1715_v53, %v1667_v20  ;;  %v1570_v8 = vpop.f32.mrf.mxu2 }
 0x16a   : > { %v1571_v14 = vadd.f32 %v1570_v8, %v10119_v58 }
 0x16c   : > { %v1619_v37 = vpop.f32.mrf.mxu3  ;;  %v1827_v16 = vpop.f32.mrf.mxu0 }
 0x16d   : > { %v1620_v26 = vadd.f32 %v1619_v37, %v1571_v14 }
 0x16e   : > { %v1876_v2 = vpop.f32.mrf.mxu1  ;;  %1924 = vmatmul.bf16.vlgmr.msrb.gmra.mxu2 %v9727_v46 }
 0x16f   : > { %v1669_v6 = vadd.f32 %v1668_v50, %v1620_v26  ;;  %2022 = vmatmul.bf16.vlgmr.msrb.gmra.mxu0 %v9729_v47  ;;  %v8480_v47 = vld [vmem:[%s14766_s4 + $0x70] sm:$0xff] }
 0x170   : > { %2342 = vmatpush.bf16.msra.mxu3 %v8480_v47 }
 0x171   : > { %1973 = vmatmul.bf16.vlgmr.msrb.gmra.mxu3 %v9725_v45  ;;  %2071 = vmatmul.bf16.vlgmr.msrb.gmra.mxu1 %v10117_v60  ;;  %v10390_v63 = vadd.f32 %v1717_v61, %v1669_v6  ;;  %v1729_v5 = vpop.f32.mrf.mxu2  ;;  %v8472_v45 = vld [vmem:[%s14766_s4 + $0x30] sm:$0xff]  ;;  %v14855_v6 = vld [vmem:[#allocation2_spill] sm:$0xff] }
 0x172   : > { %v1730_v58 = vadd.f32 %v1729_v5, %v10152_v4  ;;  %2293 = vmatpush.bf16.msra.mxu2 %v8472_v45 }
 0x174   : > { %v1778_v35 = vpop.f32.mrf.mxu3  ;;  %v1829_v7 = vpop.f32.mrf.mxu0  ;;  %v2112_v34 = vmax.f32 %v1730_v58, 0.0 }
 0x175   : > { %v1779_v48 = vadd.f32 %v1778_v35, %v10387_v57 }
 0x176   : > { %v1878_v46 = vpop.f32.mrf.mxu1 }
 0x177   : > { %v1828_v28 = vadd.f32 %v1827_v16, %v1779_v48 }
 0x179   : > { %v10400_v38 = vadd.f32 %v1876_v2, %v1828_v28  ;;  %v1731_v60 = vpop.f32.mrf.mxu2 }
 0x17a   : > { %v1732_v4 = vadd.f32 %v1731_v60, %v10179_v24 }
 0x17c   : > { %v1780_v15 = vpop.f32.mrf.mxu3  ;;  %v1832_v49 = vpop.f32.mrf.mxu0  ;;  %v2114_v33 = vmax.f32 %v1732_v4, 0.0 }
 0x17d   : > { %v1781_v51 = vadd.f32 %v1780_v15, %v10387_v57 }
 0x17e   : > { %v1881_v53 = vpop.f32.mrf.mxu1  ;;  %v10404_v40 = vpack.c.bf16 %v2114_v33, %v2112_v34  ;;  %1929 = vmatmul.bf16.gmra.mxu2 %v9771_v18  ;;  %v8471_v18 = vld [vmem:[%s14766_s4 + $0x28] sm:$0xff]  ;;  %v14856_v33 = vld [vmem:[#allocation4_spill] sm:$0xff] }
 0x17f   : > { %v1830_v1 = vadd.f32 %v1829_v7, %v1781_v51  ;;  %2027 = vmatmul.bf16.gmra.mxu0 %v9773_v19  ;;  %2294 = vmatpush.bf16.msra.mxu2 %v8471_v18 }
 0x181   : > { %1978 = vmatmul.bf16.gmra.mxu3 %v9769_v17  ;;  %v10409_v41 = vadd.f32 %v1878_v46, %v1830_v1  ;;  %2076 = vmatmul.bf16.gmra.mxu1 %v10155_v30  ;;  %v1734_v24 = vpop.f32.mrf.mxu2  ;;  %v8479_v17 = vld [vmem:[%s14766_s4 + $0x68] sm:$0xff]  ;;  %v14857_v1 = vld [vmem:[#allocation5_spill] sm:$0xff] }
 0x182   : > { %v1735_v27 = vadd.f32 %v1734_v24, %v10190_v11  ;;  %2343 = vmatpush.bf16.msra.mxu3 %v8479_v17  ;;  %v14858_v24 = vld [vmem:[#allocation3_spill] sm:$0xff]  ;;  %v8469_v17 = vld [vmem:[%s14766_s4 + $0x18] sm:$0xff] }
 0x184   : > { %v1783_v32 = vpop.f32.mrf.mxu3  ;;  %v1834_v36 = vpop.f32.mrf.mxu0  ;;  %v2116_v14 = vmax.f32 %v1735_v27, 0.0 }
 0x185   : > { %v1784_v50 = vadd.f32 %v1783_v32, %v10387_v57 }
 0x186   : > { %v1883_v23 = vpop.f32.mrf.mxu1 }
 0x187   : > { %v1833_v61 = vadd.f32 %v1832_v49, %v1784_v50 }
 0x189   : > { %v10420_v19 = vadd.f32 %v1881_v53, %v1833_v61  ;;  %v1736_v30 = vpop.f32.mrf.mxu2 }
 0x18a   : > { %v1737_v11 = vadd.f32 %v1736_v30, %v10217_v13  ;;  %v8477_v30 = vld [vmem:[%s14766_s4 + $0x58] sm:$0xff] }
 0x18c   : > { %v1785_v22 = vpop.f32.mrf.mxu3  ;;  %v1837_v8 = vpop.f32.mrf.mxu0  ;;  %v2118_v37 = vmax.f32 %v1737_v11, 0.0 }
 0x18d   : > { %v1786_v20 = vadd.f32 %v1785_v22, %v10387_v57 }
 0x18e   : > { %v1886_v26 = vpop.f32.mrf.mxu1  ;;  %1934 = vmatmul.bf16.gmra.mxu2 %v9815_v54  ;;  %v10426_v2 = vpack.c.bf16 %v2118_v37, %v2116_v14  ;;  %v8470_v54 = vld [vmem:[%s14766_s4 + $0x20] sm:$0xff] }
 0x18f   : > { %v1835_v16 = vadd.f32 %v1834_v36, %v1786_v20  ;;  %2032 = vmatmul.bf16.gmra.mxu0 %v9817_v55  ;;  %v8478_v55 = vld [vmem:[%s14766_s4 + $0x60] sm:$0xff]  ;;  %2295 = vmatpush.bf16.msra.mxu2 %v8470_v54 }
 0x190   : > { %2344 = vmatpush.bf16.msra.mxu3 %v8478_v55 }
 0x191   : > { %1983 = vmatmul.bf16.gmra.mxu3 %v14855_v6  ;;  %v10429_v5 = vadd.f32 %v1883_v23, %v1835_v16  ;;  %2081 = vmatmul.bf16.gmra.mxu1 %v10193_v0  ;;  %v1739_v13 = vpop.f32.mrf.mxu2  ;;  %v14859_v6 = vld [vmem:[#allocation7_spill] sm:$0xff] }
 0x192   : > { %v1740_v58 = vadd.f32 %v1739_v13, %v10228_v42  ;;  %v14860_v13 = vld [vmem:[#allocation8_spill] sm:$0xff] }
 0x193   : > { %2296 = vmatpush.bf16.msra.mxu2 %v8469_v17  ;;  %v8467_v17 = vld [vmem:[%s14766_s4 + $0x8] sm:$0xff] }
 0x194   : > { %v1788_v35 = vpop.f32.mrf.mxu3  ;;  %v1839_v7 = vpop.f32.mrf.mxu0  ;;  %v2120_v15 = vmax.f32 %v1740_v58, 0.0  ;;  %2345 = vmatpush.bf16.msra.mxu3 %v8477_v30  ;;  %v8475_v30 = vld [vmem:[%s14766_s4 + $0x48] sm:$0xff] }
 0x195   : > { %v1789_v48 = vadd.f32 %v1788_v35, %v10387_v57  ;;  %v14861_v35 = vld [vmem:[#allocation6_spill] sm:$0xff] }
 0x196   : > { %v1888_v46 = vpop.f32.mrf.mxu1 }
 0x197   : > { %v1838_v28 = vadd.f32 %v1837_v8, %v1789_v48 }
 0x199   : > { %v10440_v0 = vadd.f32 %v1886_v26, %v1838_v28  ;;  %v1741_v45 = vpop.f32.mrf.mxu2 }
 0x19a   : > { %v1742_v42 = vadd.f32 %v1741_v45, %v10255_v9 }
 0x19c   : > { %v1790_v47 = vpop.f32.mrf.mxu3  ;;  %v1842_v4 = vpop.f32.mrf.mxu0  ;;  %v2122_v51 = vmax.f32 %v1742_v42, 0.0  ;;  %v8468_v42 = vld [vmem:[%s14766_s4 + $0x10] sm:$0xff] }
 0x19d   : > { %v1791_v60 = vadd.f32 %v1790_v47, %v10387_v57  ;;  %v8476_v47 = vld [vmem:[%s14766_s4 + $0x50] sm:$0xff]  ;;  %2297 = vmatpush.bf16.msra.mxu2 %v8468_v42 }
 0x19e   : > { %v1891_v34 = vpop.f32.mrf.mxu1  ;;  %1939 = vmatmul.bf16.gmra.mxu2 %v14856_v33  ;;  %v10446_v53 = vpack.c.bf16 %v2122_v51, %v2120_v15  ;;  %2346 = vmatpush.bf16.msra.mxu3 %v8476_v47  ;;  %v14862_v33 = vld [vmem:[#allocation10_spill] sm:$0xff] }
 0x19f   : > { %v1840_v49 = vadd.f32 %v1839_v7, %v1791_v60  ;;  %2037 = vmatmul.bf16.gmra.mxu0 %v14857_v1  ;;  %v14863_v1 = vld [vmem:[#allocation11_spill] sm:$0xff] }
 0x1a1   : > { %1988 = vmatmul.bf16.gmra.mxu3 %v14858_v24  ;;  %v10449_v27 = vadd.f32 %v1888_v46, %v1840_v49  ;;  %2086 = vmatmul.bf16.gmra.mxu1 %v10231_v52  ;;  %v1744_v9 = vpop.f32.mrf.mxu2 }
 0x1a2   : > { %v1745_v32 = vadd.f32 %v1744_v9, %v10266_v10  ;;  %v14864_v9 = vld [vmem:[#allocation9_spill] sm:$0xff]  ;;  %2298 = vmatpush.bf16.msra.mxu2 %v8467_v17  ;;  %2347 = vmatpush.bf16.msra.mxu3 %v8475_v30 }
 0x1a4   : > { %v1793_v50 = vpop.f32.mrf.mxu3  ;;  %v1844_v61 = vpop.f32.mrf.mxu0  ;;  %v2124_v14 = vmax.f32 %v1745_v32, 0.0 }
 0x1a5   : > { %v1794_v36 = vadd.f32 %v1793_v50, %v10387_v57 }
 0x1a6   : > { %v1893_v18 = vpop.f32.mrf.mxu1 }
 0x1a7   : > { %v1843_v23 = vadd.f32 %v1842_v4, %v1794_v36 }
 0x1a9   : > { %v10460_v52 = vadd.f32 %v1891_v34, %v1843_v23  ;;  %v1746_v11 = vpop.f32.mrf.mxu2 }
 0x1aa   : > { %v1747_v10 = vadd.f32 %v1746_v11, %v10293_v29 }
 0x1ac   : > { %v1795_v22 = vpop.f32.mrf.mxu3  ;;  %v1847_v8 = vpop.f32.mrf.mxu0  ;;  %v2126_v37 = vmax.f32 %v1747_v10, 0.0 }
 0x1ad   : > { %v1796_v20 = vadd.f32 %v1795_v22, %v10387_v57  ;;  %v8466_v22 = vld [vmem:[%s14766_s4] sm:$0xff] }
 0x1ae   : > { %v1896_v26 = vpop.f32.mrf.mxu1  ;;  %1944 = vmatmul.bf16.gmra.mxu2 %v14859_v6  ;;  %v10466_v58 = vpack.c.bf16 %v2126_v37, %v2124_v14 }
 0x1af   : > { %v1845_v16 = vadd.f32 %v1844_v61, %v1796_v20  ;;  %2042 = vmatmul.bf16.gmra.mxu0 %v14860_v13  ;;  %2299 = vmatpush.bf16.msra.mxu2 %v8466_v22  ;;  %v14867_v13 = vld [vmem:[#allocation12_spill] sm:$0xff] }
 0x1b1   : > { %1993 = vmatmul.bf16.gmra.mxu3 %v14861_v35  ;;  %v10469_v48 = vadd.f32 %v1893_v18, %v1845_v16  ;;  %2091 = vmatmul.bf16.gmra.mxu1 %v10269_v56  ;;  %v1749_v29 = vpop.f32.mrf.mxu2  ;;  %v14865_v16 = vld [vmem:[#allocation13_spill] sm:$0xff] }
 0x1b2   : > { %v1750_v7 = vadd.f32 %v1749_v29, %v10304_v44 }
 0x1b4   : > { %v1798_v28 = vpop.f32.mrf.mxu3  ;;  %v10474_v54 = vpop.f32.mrf.mxu0  ;;  %v2128_v51 = vmax.f32 %v1750_v7, 0.0 }
 0x1b5   : > { %v1799_v46 = vadd.f32 %v1798_v28, %v10387_v57 }
 0x1b6   : > { %v10476_v45 = vpop.f32.mrf.mxu1 }
 0x1b7   : > { %v1848_v55 = vadd.f32 %v1847_v8, %v1799_v46 }
 0x1b9   : > { %v10484_v56 = vadd.f32 %v1896_v26, %v1848_v55  ;;  %v1751_v44 = vpop.f32.mrf.mxu2  ;;  %v14866_v26 = vld [vmem:[#allocation14_spill] sm:$0xff] }
 0x1ba   : > { %v1752_v60 = vadd.f32 %v1751_v44, %v10331_v31 }
 0x1bc   : > { %v10487_v4 = vpop.f32.mrf.mxu3  ;;  %v1852_v15 = vpop.f32.mrf.mxu0  ;;  %v2130_v49 = vmax.f32 %v1752_v60, 0.0 }
 0x1be   : > { %v1901_v34 = vpop.f32.mrf.mxu1  ;;  %1949 = vmatmul.bf16.gmra.mxu2 %v14862_v33  ;;  %v10491_v24 = vpack.c.bf16 %v2130_v49, %v2128_v51  ;;  %v14869_v33 = vld [vmem:[#allocation17_spill] sm:$0xff] }
 0x1bf   : > { %2047 = vmatmul.bf16.gmra.mxu0 %v14863_v1 }
 0x1c1   : > { %1998 = vmatmul.bf16.gmra.mxu3 %v14864_v9  ;;  %2096 = vmatmul.bf16.gmra.mxu1 %v10307_v21  ;;  %v1754_v32 = vpop.f32.mrf.mxu2  ;;  %v14870_v9 = vld [vmem:[#allocation15_spill] sm:$0xff] }
 0x1c2   : > { %v1755_v50 = vadd.f32 %v1754_v32, %v10342_v59 }
 0x1c4   : > { %v1803_v31 = vpop.f32.mrf.mxu3  ;;  %v10497_v61 = vpop.f32.mrf.mxu0  ;;  %v2132_v8 = vmax.f32 %v1755_v50, 0.0 }
 0x1c5   : > { %v1804_v36 = vadd.f32 %v1803_v31, %v10387_v57 }
 0x1c6   : > { %v10499_v18 = vpop.f32.mrf.mxu1 }
 0x1c7   : > { %v1853_v23 = vadd.f32 %v1852_v15, %v1804_v36 }
 0x1c9   : > { %v10507_v21 = vadd.f32 %v1901_v34, %v1853_v23  ;;  %v1756_v59 = vpop.f32.mrf.mxu2  ;;  %v14868_v34 = vld [vmem:[#allocation16_spill] sm:$0xff] }
 0x1ca   : > { %v1757_v11 = vadd.f32 %v1756_v59, %v10357_v3 }
 0x1cc   : > { %v10510_v10 = vpop.f32.mrf.mxu3  ;;  %v1857_v20 = vpop.f32.mrf.mxu0  ;;  %v2134_v14 = vmax.f32 %v1757_v11, 0.0 }
 0x1ce   : > { %v1906_v37 = vpop.f32.mrf.mxu1  ;;  %1954 = vmatmul.bf16.gmra.mxu2 %v14865_v16  ;;  %v10517_v6 = vpack.c.bf16 %v2134_v14, %v2132_v8 }
 0x1cf   : > { %2052 = vmatmul.bf16.gmra.mxu0 %v14866_v26 }
 0x1d1   : > { %2003 = vmatmul.bf16.gmra.mxu3 %v14867_v13  ;;  %2101 = vmatmul.bf16.gmra.mxu1 %v10345_v62  ;;  %v1759_v3 = vpop.f32.mrf.mxu2  ;;  %v8474_v62 = vld [vmem:[%s14766_s4 + $0x40] sm:$0xff] }
 0x1d2   : > { %v1760_v35 = vadd.f32 %v1759_v3, %v10362_v25  ;;  %2348 = vmatpush.bf16.msra.mxu3 %v8474_v62 }
 0x1d4   : > { %v1808_v29 = vpop.f32.mrf.mxu3  ;;  %v10523_v28 = vpop.f32.mrf.mxu0  ;;  %v2136_v15 = vmax.f32 %v1760_v35, 0.0 }
 0x1d5   : > { %v1809_v7 = vadd.f32 %v1808_v29, %v10387_v57 }
 0x1d6   : > { %v10525_v55 = vpop.f32.mrf.mxu1 }
 0x1d7   : > { %v1858_v46 = vadd.f32 %v1857_v20, %v1809_v7 }
 0x1d9   : > { %v10527_v42 = vadd.f32 %v1906_v37, %v1858_v46  ;;  %v1761_v47 = vpop.f32.mrf.mxu2 }
 0x1da   : > { %v1762_v44 = vadd.f32 %v1761_v47, %v10371_v43  ;;  %v8485_v47 = vld [vmem:[%s14768_s6 + $0x18] sm:$0xff] }
 0x1db   : > { %2479 = vmatpush.bf16.msra.mxu0 %v8485_v47 }
 0x1dc   : > { %v10530_v60 = vpop.f32.mrf.mxu3  ;;  %v1862_v25 = vpop.f32.mrf.mxu0  ;;  %v2138_v51 = vmax.f32 %v1762_v44, 0.0 }
 0x1de   : > { %v1911_v49 = vpop.f32.mrf.mxu1  ;;  %1959 = vmatmul.bf16.gmra.mxu2 %v14868_v34  ;;  %v10537_v1 = vpack.c.bf16 %v2138_v51, %v2136_v15 }
 0x1df   : > { %2057 = vmatmul.bf16.gmra.mxu0 %v14869_v33 }
 0x1e1   : > { %2008 = vmatmul.bf16.gmra.mxu3 %v14870_v9  ;;  %2106 = vmatmul.bf16.gmra.mxu1 %v10365_v39  ;;  %v1764_v43 = vpop.f32.mrf.mxu2 }
 0x1e2   : > { %v1765_v32 = vadd.f32 %v1764_v43, %v10380_v12 }
 0x1e4   : > { %v1813_v50 = vpop.f32.mrf.mxu3  ;;  %v10543_v36 = vpop.f32.mrf.mxu0  ;;  %v2140_v39 = vmax.f32 %v1765_v32, 0.0 }
 0x1e5   : > { %v1814_v31 = vadd.f32 %v1813_v50, %v10387_v57 }
 0x1e6   : > { %v10545_v17 = vpop.f32.mrf.mxu1 }
 0x1e7   : > { %v1863_v23 = vadd.f32 %v1862_v25, %v1814_v31 }
 0x1e9   : > { %v10547_v30 = vadd.f32 %v1911_v49, %v1863_v23  ;;  %v1766_v59 = vpop.f32.mrf.mxu2 }
 0x1ea   : > { %v1767_v11 = vadd.f32 %v1766_v59, %v10390_v63 }
 0x1ec   : > { %v10550_v22 = vpop.f32.mrf.mxu3  ;;  %v2023_v20 = vpop.f32.mrf.mxu0  ;;  %v2142_v8 = vmax.f32 %v1767_v11, 0.0 }
 0x1ee   : > { %v2072_v14 = vpop.f32.mrf.mxu1  ;;  %2300 = vmatmul.bf16.vlgmr.msra.gmra.mxu2 %v10404_v40  ;;  %v10553_v12 = vpack.c.bf16 %v2142_v8, %v2140_v39 }
 0x1f1   : > { %v1925_v37 = vpop.f32.mrf.mxu2 }
 0x1f2   : > { %v1926_v16 = vadd.f32 %v1925_v37, %v10400_v38 }
 0x1f4   : > { %v1974_v26 = vpop.f32.mrf.mxu3  ;;  %v2025_v13 = vpop.f32.mrf.mxu0 }
 0x1f5   : > { %v1975_v35 = vadd.f32 %v1974_v26, %v1926_v16 }
 0x1f6   : > { %v2074_v3 = vpop.f32.mrf.mxu1 }
 0x1f7   : > { %v2024_v7 = vadd.f32 %v2023_v20, %v1975_v35 }
 0x1f9   : > { %v1927_v29 = vpop.f32.mrf.mxu2  ;;  %v2073_v25 = vadd.f32 %v2072_v14, %v2024_v7 }
 0x1fa   : > { %v1928_v63 = vadd.f32 %v1927_v29, %v10409_v41 }
 0x1fb   : > { %v2113_v49 = vmax.f32 %v2073_v25, 0.0 }
 0x1fc   : > { %v1976_v46 = vpop.f32.mrf.mxu3  ;;  %v2028_v44 = vpop.f32.mrf.mxu0 }
 0x1fd   : > { %v1977_v40 = vadd.f32 %v1976_v46, %v1928_v63 }
 0x1fe   : > { %v2077_v62 = vpop.f32.mrf.mxu1  ;;  %2305 = vmatmul.bf16.gmra.mxu2 %v10426_v2 }
 0x1ff   : > { %v2026_v15 = vadd.f32 %v2025_v13, %v1977_v40 }
 0x201   : > { %v2075_v38 = vadd.f32 %v2074_v3, %v2026_v15  ;;  %v1930_v51 = vpop.f32.mrf.mxu2 }
 0x202   : > { %v1931_v33 = vadd.f32 %v1930_v51, %v10420_v19 }
 0x203   : > { %v2115_v34 = vmax.f32 %v2075_v38, 0.0 }
 0x204   : > { %v1979_v41 = vpop.f32.mrf.mxu3  ;;  %v2030_v9 = vpop.f32.mrf.mxu0 }
 0x205   : > { %v2145_v43 = vpack.c.bf16 %v2115_v34, %v2113_v49  ;;  %v1980_v50 = vadd.f32 %v1979_v41, %v1931_v33 }
 0x206   : > { %v2079_v32 = vpop.f32.mrf.mxu1 }
 0x207   : > { %2349 = vmatmul.bf16.vlgmr.msra.gmra.mxu3 %v2145_v43  ;;  %v2029_v23 = vadd.f32 %v2028_v44, %v1980_v50 }
 0x209   : > { %v1932_v31 = vpop.f32.mrf.mxu2  ;;  %v2078_v8 = vadd.f32 %v2077_v62, %v2029_v23 }
 0x20a   : > { %v1933_v59 = vadd.f32 %v1932_v31, %v10429_v5 }
 0x20b   : > { %v2117_v16 = vmax.f32 %v2078_v8, 0.0 }
 0x20c   : > { %v1981_v11 = vpop.f32.mrf.mxu3  ;;  %v2033_v20 = vpop.f32.mrf.mxu0 }
 0x20d   : > { %v1982_v39 = vadd.f32 %v1981_v11, %v1933_v59 }
 0x20e   : > { %v2082_v2 = vpop.f32.mrf.mxu1  ;;  %2310 = vmatmul.bf16.gmra.mxu2 %v10446_v53  ;;  %v8484_v53 = vld [vmem:[%s14768_s6 + $0x10] sm:$0xff] }
 0x20f   : > { %v2031_v14 = vadd.f32 %v2030_v9, %v1982_v39  ;;  %2480 = vmatpush.bf16.msra.mxu0 %v8484_v53 }
 0x211   : > { %v2080_v37 = vadd.f32 %v2079_v32, %v2031_v14  ;;  %v1935_v19 = vpop.f32.mrf.mxu2 }
 0x212   : > { %v1936_v26 = vadd.f32 %v1935_v19, %v10440_v0 }
 0x213   : > { %v2119_v3 = vmax.f32 %v2080_v37, 0.0 }
 0x214   : > { %v1984_v13 = vpop.f32.mrf.mxu3  ;;  %v2035_v35 = vpop.f32.mrf.mxu0 }
 0x215   : > { %v2147_v29 = vpack.c.bf16 %v2119_v3, %v2117_v16  ;;  %v1985_v63 = vadd.f32 %v1984_v13, %v1936_v26 }
 0x216   : > { %v2084_v7 = vpop.f32.mrf.mxu1 }
 0x217   : > { %2354 = vmatmul.bf16.gmra.mxu3 %v2147_v29  ;;  %v2034_v46 = vadd.f32 %v2033_v20, %v1985_v63 }
 0x219   : > { %v1937_v5 = vpop.f32.mrf.mxu2  ;;  %v2083_v25 = vadd.f32 %v2082_v2, %v2034_v46  ;;  %v8483_v46 = vld [vmem:[%s14768_s6 + $0x8] sm:$0xff] }
 0x21a   : > { %v1938_v47 = vadd.f32 %v1937_v5, %v10449_v27  ;;  %2481 = vmatpush.bf16.msra.mxu0 %v8483_v46 }
 0x21b   : > { %v2121_v49 = vmax.f32 %v2083_v25, 0.0 }
 0x21c   : > { %v1986_v44 = vpop.f32.mrf.mxu3  ;;  %v2038_v40 = vpop.f32.mrf.mxu0 }
 0x21d   : > { %v1987_v62 = vadd.f32 %v1986_v44, %v1938_v47 }
 0x21e   : > { %v2087_v0 = vpop.f32.mrf.mxu1  ;;  %2315 = vmatmul.bf16.gmra.mxu2 %v10466_v58 }
 0x21f   : > { %v2036_v15 = vadd.f32 %v2035_v35, %v1987_v62 }
 0x221   : > { %v2085_v38 = vadd.f32 %v2084_v7, %v2036_v15  ;;  %v1940_v51 = vpop.f32.mrf.mxu2 }
 0x222   : > { %v1941_v34 = vadd.f32 %v1940_v51, %v10460_v52  ;;  %v1801_v52 = vadd.f32 %v10487_v4, %v10387_v57 }
 0x223   : > { %v2123_v27 = vmax.f32 %v2085_v38, 0.0 }
 0x224   : > { %v1989_v33 = vpop.f32.mrf.mxu3  ;;  %v2040_v41 = vpop.f32.mrf.mxu0 }
 0x225   : > { %v2149_v9 = vpack.c.bf16 %v2123_v27, %v2121_v49  ;;  %v1990_v32 = vadd.f32 %v1989_v33, %v1941_v34 }
 0x226   : > { %v2089_v43 = vpop.f32.mrf.mxu1 }
 0x227   : > { %2359 = vmatmul.bf16.gmra.mxu3 %v2149_v9  ;;  %v2039_v31 = vadd.f32 %v2038_v40, %v1990_v32  ;;  %v1806_v40 = vadd.f32 %v10510_v10, %v10387_v57 }
 0x229   : > { %v1942_v50 = vpop.f32.mrf.mxu2  ;;  %v2088_v39 = vadd.f32 %v2087_v0, %v2039_v31  ;;  %v1855_v51 = vadd.f32 %v10497_v61, %v1806_v40  ;;  %v1811_v61 = vadd.f32 %v10530_v60, %v10387_v57 }
 0x22a   : > { %v1943_v23 = vadd.f32 %v1942_v50, %v10469_v48  ;;  %v1850_v48 = vadd.f32 %v10474_v54, %v1801_v52 }
 0x22b   : > { %v2125_v37 = vmax.f32 %v2088_v39, 0.0 }
 0x22c   : > { %v1991_v59 = vpop.f32.mrf.mxu3  ;;  %v2043_v11 = vpop.f32.mrf.mxu0  ;;  %v1899_v7 = vadd.f32 %v10476_v45, %v1850_v48 }
 0x22d   : > { %v1992_v20 = vadd.f32 %v1991_v59, %v1943_v23 }
 0x22e   : > { %v2092_v58 = vpop.f32.mrf.mxu1  ;;  %2320 = vmatmul.bf16.gmra.mxu2 %v10491_v24 }
 0x22f   : > { %v2041_v2 = vadd.f32 %v2040_v41, %v1992_v20  ;;  %v1904_v41 = vadd.f32 %v10499_v18, %v1855_v51 }
 0x231   : > { %v2090_v8 = vadd.f32 %v2089_v43, %v2041_v2  ;;  %v1945_v14 = vpop.f32.mrf.mxu2  ;;  %v1860_v2 = vadd.f32 %v10523_v28, %v1811_v61  ;;  %v1816_v28 = vadd.f32 %v10550_v22, %v10387_v57 }
 0x232   : > { %v1946_v19 = vadd.f32 %v1945_v14, %v10484_v56 }
 0x233   : > { %v2127_v26 = vmax.f32 %v2090_v8, 0.0  ;;  %v1909_v14 = vadd.f32 %v10525_v55, %v1860_v2 }
 0x234   : > { %v1994_v16 = vpop.f32.mrf.mxu3  ;;  %v2045_v13 = vpop.f32.mrf.mxu0 }
 0x235   : > { %v2151_v3 = vpack.c.bf16 %v2127_v26, %v2125_v37  ;;  %v1995_v29 = vadd.f32 %v1994_v16, %v1946_v19 }
 0x236   : > { %v2094_v35 = vpop.f32.mrf.mxu1 }
 0x237   : > { %2364 = vmatmul.bf16.gmra.mxu3 %v2151_v3  ;;  %v2044_v63 = vadd.f32 %v2043_v11, %v1995_v29 }
 0x239   : > { %v1947_v24 = vpop.f32.mrf.mxu2  ;;  %v2093_v53 = vadd.f32 %v2092_v58, %v2044_v63 }
 0x23a   : > { %v1948_v5 = vadd.f32 %v1947_v24, %v1899_v7 }
 0x23b   : > { %v2129_v0 = vmax.f32 %v2093_v53, 0.0 }
 0x23c   : > { %v1996_v4 = vpop.f32.mrf.mxu3  ;;  %v2048_v56 = vpop.f32.mrf.mxu0 }
 0x23d   : > { %v1997_v47 = vadd.f32 %v1996_v4, %v1948_v5  ;;  %v1865_v4 = vadd.f32 %v10543_v36, %v1816_v28 }
 0x23e   : > { %v2097_v44 = vpop.f32.mrf.mxu1  ;;  %2325 = vmatmul.bf16.gmra.mxu2 %v10517_v6 }
 0x23f   : > { %v2046_v54 = vadd.f32 %v2045_v13, %v1997_v47 }
 0x241   : > { %v2095_v45 = vadd.f32 %v2094_v35, %v2046_v54  ;;  %v1950_v62 = vpop.f32.mrf.mxu2 }
 0x242   : > { %v1951_v25 = vadd.f32 %v1950_v62, %v10507_v21 }
 0x243   : > { %v2131_v38 = vmax.f32 %v2095_v45, 0.0 }
 0x244   : > { %v1999_v15 = vpop.f32.mrf.mxu3  ;;  %v2050_v34 = vpop.f32.mrf.mxu0 }
 0x245   : > { %v2153_v49 = vpack.c.bf16 %v2131_v38, %v2129_v0  ;;  %v2000_v33 = vadd.f32 %v1999_v15, %v1951_v25 }
 0x246   : > { %v2099_v27 = vpop.f32.mrf.mxu1 }
 0x247   : > { %2369 = vmatmul.bf16.gmra.mxu3 %v2153_v49  ;;  %v2049_v9 = vadd.f32 %v2048_v56, %v2000_v33 }
 0x249   : > { %v1952_v6 = vpop.f32.mrf.mxu2  ;;  %v2098_v50 = vadd.f32 %v2097_v44, %v2049_v9  ;;  %v1914_v44 = vadd.f32 %v10545_v17, %v1865_v4  ;;  %v10605_v17 = vld [vmem:[%s14767_s5] ss:$0 sm:$0xff] }
 0x24a   : > { %v1953_v43 = vadd.f32 %v1952_v6, %v1904_v41 }
 0x24b   : > { %v2133_v20 = vmax.f32 %v2098_v50, 0.0 }
 0x24c   : > { %v2001_v10 = vpop.f32.mrf.mxu3  ;;  %v2053_v21 = vpop.f32.mrf.mxu0 }
 0x24d   : > { %v2002_v32 = vadd.f32 %v2001_v10, %v1953_v43 }
 0x24e   : > { %2330 = vmatmul.bf16.gmra.mxu2 %v10537_v1  ;;  %v2102_v59 = vpop.f32.mrf.mxu1  ;;  %v8482_v1 = vld [vmem:[%s14768_s6] sm:$0xff] }
 0x24f   : > { %v2051_v31 = vadd.f32 %v2050_v34, %v2002_v32  ;;  %2482 = vmatpush.bf16.msra.mxu0 %v8482_v1 }
 0x251   : > { %v2100_v23 = vadd.f32 %v2099_v27, %v2051_v31  ;;  %v1955_v11 = vpop.f32.mrf.mxu2 }
 0x252   : > { %v1956_v58 = vadd.f32 %v1955_v11, %v10527_v42 }
 0x253   : > { %v2135_v39 = vmax.f32 %v2100_v23, 0.0 }
 0x254   : > { %v2004_v18 = vpop.f32.mrf.mxu3  ;;  %v2055_v60 = vpop.f32.mrf.mxu0 }
 0x255   : > { %v2155_v52 = vpack.c.bf16 %v2135_v39, %v2133_v20  ;;  %v2005_v8 = vadd.f32 %v2004_v18, %v1956_v58 }
 0x256   : > { %v2104_v42 = vpop.f32.mrf.mxu1 }
 0x257   : > { %2374 = vmatmul.bf16.gmra.mxu3 %v2155_v52  ;;  %v2054_v19 = vadd.f32 %v2053_v21, %v2005_v8 }
 0x259   : > { %v1957_v37 = vpop.f32.mrf.mxu2  ;;  %v2103_v48 = vadd.f32 %v2102_v59, %v2054_v19 }
 0x25a   : > { %v1958_v16 = vadd.f32 %v1957_v37, %v1909_v14 }
 0x25b   : > { %v2137_v7 = vmax.f32 %v2103_v48, 0.0 }
 0x25c   : > { %v2006_v26 = vpop.f32.mrf.mxu3  ;;  %v2058_v5 = vpop.f32.mrf.mxu0 }
 0x25d   : > { %v2007_v13 = vadd.f32 %v2006_v26, %v1958_v16 }
 0x25e   : > { %2335 = vmatmul.bf16.gmra.mxu2 %v10553_v12  ;;  %v2107_v56 = vpop.f32.mrf.mxu1 }
 0x25f   : > { %v2056_v3 = vadd.f32 %v2055_v60, %v2007_v13 }
 0x261   : > { %v2105_v35 = vadd.f32 %v2104_v42, %v2056_v3  ;;  %v1960_v29 = vpop.f32.mrf.mxu2 }
 0x262   : > { %v1961_v55 = vadd.f32 %v1960_v29, %v10547_v30 }
 0x263   : > { %v2139_v63 = vmax.f32 %v2105_v35, 0.0 }
 0x264   : > { %v2009_v24 = vpop.f32.mrf.mxu3  ;;  %v2060_v40 = vpop.f32.mrf.mxu0 }
 0x265   : > { %v2157_v46 = vpack.c.bf16 %v2139_v63, %v2137_v7  ;;  %v2010_v47 = vadd.f32 %v2009_v24, %v1961_v55 }
 0x266   : > { %v2109_v30 = vpop.f32.mrf.mxu1 }
 0x267   : > { %2379 = vmatmul.bf16.gmra.mxu3 %v2157_v46  ;;  %v2059_v53 = vadd.f32 %v2058_v5, %v2010_v47 }
 0x269   : > { %v1962_v12 = vpop.f32.mrf.mxu2  ;;  %v2108_v45 = vadd.f32 %v2107_v56, %v2059_v53 }
 0x26a   : > { %v1963_v54 = vadd.f32 %v1962_v12, %v1914_v44 }
 0x26b   : > { %v2141_v15 = vmax.f32 %v2108_v45, 0.0 }
 0x26c   : > { %v2011_v57 = vpop.f32.mrf.mxu3 }
 0x26d   : > { %v2012_v22 = vadd.f32 %v2011_v57, %v1963_v54 }
 0x26f   : > { %v2061_v62 = vadd.f32 %v2060_v40, %v2012_v22 }
 0x271   : > { %v2110_v0 = vadd.f32 %v2109_v30, %v2061_v62  ;;  %v2301_v25 = vpop.f32.mrf.mxu2 }
 0x272   : > { %v2302_v27 = vadd.f32 %v10605_v17, %v2301_v25 }
 0x273   : > { %v2143_v38 = vmax.f32 %v2110_v0, 0.0 }
 0x275   : > { %v2159_v36 = vpack.c.bf16 %v2143_v38, %v2141_v15 }
 0x277   : > { %2384 = vmatmul.bf16.gmra.mxu3 %v2159_v36 }
 0x279   : > { %v2303_v51 = vpop.f32.mrf.mxu2 }
 0x27a   : > { %v2304_v41 = vadd.f32 %v10605_v17, %v2303_v51 }
 0x281   : > { %v2306_v49 = vpop.f32.mrf.mxu2 }
 0x282   : > { %v2307_v23 = vadd.f32 %v10605_v17, %v2306_v49 }
 0x289   : > { %v2308_v34 = vpop.f32.mrf.mxu2 }
 0x28a   : > { %v2350_v33 = vpop.f32.mrf.mxu3  ;;  %v2309_v59 = vadd.f32 %v10605_v17, %v2308_v34 }
 0x28b   : > { %v2351_v6 = vadd.f32 %v2350_v33, %v2302_v27 }
 0x28d   : > { %v2390_v32 = vmax.f32 %v2351_v6, 0.0 }
 0x291   : > { %v2311_v9 = vpop.f32.mrf.mxu2 }
 0x292   : > { %v2352_v43 = vpop.f32.mrf.mxu3  ;;  %v2312_v14 = vadd.f32 %v10605_v17, %v2311_v9 }
 0x293   : > { %v2353_v10 = vadd.f32 %v2352_v43, %v2304_v41 }
 0x295   : > { %v2391_v50 = vmax.f32 %v2353_v10, 0.0 }
 0x297   : > { %v2406_v31 = vpack.c.bf16 %v2391_v50, %v2390_v32 }
 0x299   : > { %7724 = vmatmul.msk.bf16.vlgmr.msra.gmra.mxu0 %vm2450_vm0, %v2406_v31  ;;  %v2313_v21 = vpop.f32.mrf.mxu2 }
 0x29a   : > { %v2355_v61 = vpop.f32.mrf.mxu3  ;;  %v2314_v60 = vadd.f32 %v10605_v17, %v2313_v21 }
 0x29b   : > { %v2356_v11 = vadd.f32 %v2355_v61, %v2307_v23 }
 0x29d   : > { %v2392_v39 = vmax.f32 %v2356_v11, 0.0 }
 0x2a1   : > { %v2316_v18 = vpop.f32.mrf.mxu2 }
 0x2a2   : > { %v2357_v20 = vpop.f32.mrf.mxu3  ;;  %v2317_v28 = vadd.f32 %v10605_v17, %v2316_v18 }
 0x2a3   : > { %v2358_v58 = vadd.f32 %v2357_v20, %v2309_v59 }
 0x2a5   : > { %v2393_v2 = vmax.f32 %v2358_v58, 0.0 }
 0x2a7   : > { %v2407_v52 = vpack.c.bf16 %v2393_v2, %v2392_v39 }
 0x2a9   : > { %7725 = vmatmul.msk.bf16.gmra.mxu0 %vm2450_vm0, %v2407_v52  ;;  %v2318_v1 = vpop.f32.mrf.mxu2  ;;  %v8486_v52 = vld [vmem:[%s14770_s8] sm:$0xff] }
 0x2aa   : > { %v2360_v8 = vpop.f32.mrf.mxu3  ;;  %v2319_v35 = vadd.f32 %v10605_v17, %v2318_v1  ;;  %2736 = vmatpush.bf16.msra.mxu1 %v8486_v52 }
 0x2ab   : > { %v2361_v37 = vadd.f32 %v2360_v8, %v2312_v14 }
 0x2ad   : > { %v2394_v26 = vmax.f32 %v2361_v37, 0.0 }
 0x2b1   : > { %v2321_v48 = vpop.f32.mrf.mxu2 }
 0x2b2   : > { %v2362_v19 = vpop.f32.mrf.mxu3  ;;  %v2322_v47 = vadd.f32 %v10605_v17, %v2321_v48 }
 0x2b3   : > { %v2363_v16 = vadd.f32 %v2362_v19, %v2314_v60 }
 0x2b5   : > { %v2395_v42 = vmax.f32 %v2363_v16, 0.0 }
 0x2b7   : > { %v2408_v13 = vpack.c.bf16 %v2395_v42, %v2394_v26 }
 0x2b9   : > { %7726 = vmatmul.msk.bf16.gmra.mxu0 %vm2450_vm0, %v2408_v13  ;;  %v2323_v7 = vpop.f32.mrf.mxu2 }
 0x2ba   : > { %v2365_v3 = vpop.f32.mrf.mxu3  ;;  %v2324_v44 = vadd.f32 %v10605_v17, %v2323_v7 }
 0x2bb   : > { %v2366_v29 = vadd.f32 %v2365_v3, %v2317_v28 }
 0x2bd   : > { %v2396_v63 = vmax.f32 %v2366_v29, 0.0 }
 0x2c1   : > { %v2326_v56 = vpop.f32.mrf.mxu2 }
 0x2c2   : > { %v2367_v55 = vpop.f32.mrf.mxu3  ;;  %v2327_v30 = vadd.f32 %v10605_v17, %v2326_v56 }
 0x2c3   : > { %v2368_v24 = vadd.f32 %v2367_v55, %v2319_v35 }
 0x2c5   : > { %v2397_v5 = vmax.f32 %v2368_v24, 0.0 }
 0x2c7   : > { %v2409_v4 = vpack.c.bf16 %v2397_v5, %v2396_v63 }
 0x2c9   : > { %7727 = vmatmul.msk.bf16.gmra.mxu0 %vm2450_vm0, %v2409_v4  ;;  %v2328_v40 = vpop.f32.mrf.mxu2 }
 0x2ca   : > { %v2370_v46 = vpop.f32.mrf.mxu3  ;;  %v2329_v25 = vadd.f32 %v10605_v17, %v2328_v40 }
 0x2cb   : > { %v2371_v12 = vadd.f32 %v2370_v46, %v2322_v47 }
 0x2cd   : > { %v2398_v57 = vmax.f32 %v2371_v12, 0.0 }
 0x2d1   : > { %v2331_v0 = vpop.f32.mrf.mxu2 }
 0x2d2   : > { %v2372_v53 = vpop.f32.mrf.mxu3  ;;  %v2332_v41 = vadd.f32 %v10605_v17, %v2331_v0 }
 0x2d3   : > { %v2373_v54 = vadd.f32 %v2372_v53, %v2324_v44 }
 0x2d5   : > { %v2399_v22 = vmax.f32 %v2373_v54, 0.0 }
 0x2d7   : > { %v2410_v45 = vpack.c.bf16 %v2399_v22, %v2398_v57 }
 0x2d9   : > { %7728 = vmatmul.msk.bf16.gmra.mxu0 %vm2450_vm0, %v2410_v45  ;;  %v2333_v33 = vpop.f32.mrf.mxu2 }
 0x2da   : > { %v2375_v62 = vpop.f32.mrf.mxu3  ;;  %v2334_v6 = vadd.f32 %v10605_v17, %v2333_v33 }
 0x2db   : > { %v2376_v15 = vadd.f32 %v2375_v62, %v2327_v30 }
 0x2dd   : > { %v2400_v51 = vmax.f32 %v2376_v15, 0.0 }
 0x2e1   : > { %v2336_v32 = vpop.f32.mrf.mxu2 }
 0x2e2   : > { %v2377_v38 = vpop.f32.mrf.mxu3  ;;  %v2337_v59 = vadd.f32 %v10605_v17, %v2336_v32 }
 0x2e3   : > { %v2378_v36 = vadd.f32 %v2377_v38, %v2329_v25 }
 0x2e5   : > { %v2401_v49 = vmax.f32 %v2378_v36, 0.0 }
 0x2e7   : > { %v2411_v34 = vpack.c.bf16 %v2401_v49, %v2400_v51 }
 0x2e9   : > { %7729 = vmatmul.msk.bf16.gmra.mxu0 %vm2450_vm0, %v2411_v34  ;;  %v2338_v23 = vpop.f32.mrf.mxu2 }
 0x2ea   : > { %v2380_v27 = vpop.f32.mrf.mxu3  ;;  %v2339_v11 = vadd.f32 %v10605_v17, %v2338_v23  ;;  %v10640_v17 = vld [vmem:[%s14769_s7] ss:$0 sm:$0xff] }
 0x2eb   : > { %v2381_v9 = vadd.f32 %v2380_v27, %v2332_v41 }
 0x2ed   : > { %v2402_v50 = vmax.f32 %v2381_v9, 0.0 }
 0x2f2   : > { %v2382_v43 = vpop.f32.mrf.mxu3 }
 0x2f3   : > { %v2383_v10 = vadd.f32 %v2382_v43, %v2334_v6 }
 0x2f5   : > { %v2403_v31 = vmax.f32 %v2383_v10, 0.0 }
 0x2f7   : > { %v2412_v21 = vpack.c.bf16 %v2403_v31, %v2402_v50 }
 0x2f9   : > { %7730 = vmatmul.msk.bf16.gmra.mxu0 %vm2450_vm0, %v2412_v21 }
 0x2fa   : > { %v2385_v61 = vpop.f32.mrf.mxu3 }
 0x2fb   : > { %v2386_v20 = vadd.f32 %v2385_v61, %v2337_v59 }
 0x2fd   : > { %v2404_v39 = vmax.f32 %v2386_v20, 0.0 }
 0x302   : > { %v2387_v58 = vpop.f32.mrf.mxu3 }
 0x303   : > { %v2388_v18 = vadd.f32 %v2387_v58, %v2339_v11 }
 0x305   : > { %v2405_v2 = vmax.f32 %v2388_v18, 0.0 }
 0x307   : > { %v2413_v8 = vpack.c.bf16 %v2405_v2, %v2404_v39 }
 0x309   : > { %7731 = vmatmul.msk.bf16.gmra.mxu0 %vm2450_vm0, %v2413_v8 }
 0x316   : > { %v2484_v1 = vpop.f32.mrf.mxu0 }
 0x317   : > { %v10649_v14 = vadd.f32 %v10640_v17, %v2484_v1 }
 0x319   : > { %v2524_v60 = vmul.f32 0.5, %v10649_v14  ;;  %7027 = vst.msk [vmem:[%s10646_s26] sm:$0xff] %vm7026_vm1, %v10649_v14 }
 0x31b   : > { %v2540_v37 = vmul.f32 1.442695, %v2524_v60 }
 0x31d   : > { %8637 = vpow2.f32 %v2540_v37 }
 0x31e   : > { %v2486_v19 = vpop.f32.mrf.mxu0 }
 0x31f   : > { %v10656_v16 = vadd.f32 %v10640_v17, %v2486_v19 }
 0x321   : > { %v2525_v26 = vmul.f32 0.5, %v10656_v16  ;;  %7028 = vst.msk [vmem:[%s10646_s26 + $0x8] sm:$0xff] %vm7026_vm1, %v10656_v16 }
 0x323   : > { %v8638_v42 = vpop.eup %8637  ;;  %v2542_v13 = vmul.f32 1.442695, %v2525_v26 }
 0x324   : > { %2604 = vrot.lane.b32.xlu0 %v8638_v42, %s9192_s27 }
 0x325   : > { %8639 = vpow2.f32 %v2542_v13 }
 0x326   : > { %v2489_v48 = vpop.f32.mrf.mxu0 }
 0x327   : > { %v10664_v3 = vadd.f32 %v10640_v17, %v2489_v48 }
 0x329   : > { %v2526_v28 = vmul.f32 0.5, %v10664_v3  ;;  %7029 = vst.msk [vmem:[%s10646_s26 + $0x10] sm:$0xff] %vm7026_vm1, %v10664_v3 }
 0x32b   : > { %v8640_v35 = vpop.eup %8639  ;;  %v2544_v29 = vmul.f32 1.442695, %v2526_v28 }
 0x32c   : > { %2606 = vrot.lane.b32.xlu0 %v8640_v35, %s9192_s27 }
 0x32d   : > { %8641 = vpow2.f32 %v2544_v29 }
 0x32e   : > { %v2491_v7 = vpop.f32.mrf.mxu0 }
 0x32f   : > { %v10672_v55 = vadd.f32 %v10640_v17, %v2491_v7 }
 0x331   : > { %v2527_v24 = vmul.f32 0.5, %v10672_v55  ;;  %7030 = vst.msk [vmem:[%s10646_s26 + $0x18] sm:$0xff] %vm7026_vm1, %v10672_v55 }
 0x333   : > { %v8642_v63 = vpop.eup %8641  ;;  %v2546_v5 = vmul.f32 1.442695, %v2527_v24 }
 0x334   : > { %2608 = vrot.lane.b32.xlu1 %v8642_v63, %s9192_s27 }
 0x335   : > { %8643 = vpow2.f32 %v2546_v5 }
 0x336   : > { %v2494_v4 = vpop.f32.mrf.mxu0 }
 0x337   : > { %v10680_v46 = vadd.f32 %v10640_v17, %v2494_v4 }
 0x339   : > { %v2528_v56 = vmul.f32 0.5, %v10680_v46  ;;  %7031 = vst.msk [vmem:[%s10646_s26 + $0x20] sm:$0xff] %vm7026_vm1, %v10680_v46 }
 0x33b   : > { %v8644_v47 = vpop.eup %8643  ;;  %v2548_v44 = vmul.f32 1.442695, %v2528_v56  ;;  %v7770_v56 = vld [vmem:[%s14772_s10 + $0x30] sm:$0xf] }
 0x33c   : > { %2610 = vrot.lane.b32.xlu1 %v8644_v47, %s9192_s27  ;;  %v8494_v47 = vld [vmem:[%s14772_s10 + $0x34] sm:$0xf0] }
 0x33d   : > { %8645 = vpow2.f32 %v2548_v44  ;;  %v7771_v44 = vor.u32 %v8494_v47, %v7770_v56 }
 0x33e   : > { %v2496_v12 = vpop.f32.mrf.mxu0 }
 0x33f   : > { %v10688_v53 = vadd.f32 %v10640_v17, %v2496_v12  ;;  %v7772_v12 = vld [vmem:[%s14772_s10 + $0x38] sm:$0xf0]  ;;  %2884 = vmatpush.bf16.msrb.mxu2 %v7771_v44 }
 0x341   : > { %v2529_v54 = vmul.f32 0.5, %v10688_v53  ;;  %7032 = vst.msk [vmem:[%s10646_s26 + $0x28] sm:$0xff] %vm7026_vm1, %v10688_v53 }
 0x343   : > { %v8646_v57 = vpop.eup %8645  ;;  %v2550_v22 = vmul.f32 1.442695, %v2529_v54 }
 0x344   : > { %2612 = vrot.lane.b32.xlu2 %v8646_v57, %s9192_s27 }
 0x345   : > { %8647 = vpow2.f32 %v2550_v22 }
 0x346   : > { %v2499_v40 = vpop.f32.mrf.mxu0 }
 0x347   : > { %v10696_v45 = vadd.f32 %v10640_v17, %v2499_v40 }
 0x349   : > { %v2530_v62 = vmul.f32 0.5, %v10696_v45  ;;  %7033 = vst.msk [vmem:[%s10646_s26 + $0x30] sm:$0xff] %vm7026_vm1, %v10696_v45 }
 0x34b   : > { %v8648_v30 = vpop.eup %8647  ;;  %v2552_v0 = vmul.f32 1.442695, %v2530_v62 }
 0x34c   : > { %2614 = vrot.lane.b32.xlu2 %v8648_v30, %s9192_s27 }
 0x34d   : > { %8649 = vpow2.f32 %v2552_v0 }
 0x34e   : > { %v2501_v25 = vpop.f32.mrf.mxu0 }
 0x34f   : > { %v10704_v15 = vadd.f32 %v10640_v17, %v2501_v25 }
 0x351   : > { %v2531_v38 = vmul.f32 0.5, %v10704_v15  ;;  %7034 = vst.msk [vmem:[%s10646_s26 + $0x38] sm:$0xff] %vm7026_vm1, %v10704_v15 }
 0x353   : > { %v8650_v36 = vpop.eup %8649  ;;  %v2554_v51 = vmul.f32 1.442695, %v2531_v38 }
 0x354   : > { %2616 = vrot.lane.b32.xlu0 %v8650_v36, %s9192_s27 }
 0x355   : > { %8651 = vpow2.f32 %v2554_v51 }
 0x356   : > { %v2504_v49 = vpop.f32.mrf.mxu0 }
 0x357   : > { %v10712_v34 = vadd.f32 %v10640_v17, %v2504_v49 }
 0x359   : > { %v2532_v33 = vmul.f32 0.5, %v10712_v34  ;;  %7035 = vst.msk [vmem:[%s10646_s26 + $0x40] sm:$0xff] %vm7026_vm1, %v10712_v34 }
 0x35b   : > { %v8652_v27 = vpop.eup %8651  ;;  %v2556_v41 = vmul.f32 1.442695, %v2532_v33 }
 0x35c   : > { %2618 = vrot.lane.b32.xlu1 %v8652_v27, %s9192_s27 }
 0x35d   : > { %8653 = vpow2.f32 %v2556_v41 }
 0x35e   : > { %v2506_v6 = vpop.f32.mrf.mxu0 }
 0x35f   : > { %v10720_v9 = vadd.f32 %v10640_v17, %v2506_v6 }
 0x361   : > { %v2533_v43 = vmul.f32 0.5, %v10720_v9  ;;  %7036 = vst.msk [vmem:[%s10646_s26 + $0x48] sm:$0xff] %vm7026_vm1, %v10720_v9 }
 0x363   : > { %v8654_v10 = vpop.eup %8653  ;;  %v2558_v32 = vmul.f32 1.442695, %v2533_v43 }
 0x364   : > { %2620 = vrot.lane.b32.xlu2 %v8654_v10, %s9192_s27 }
 0x365   : > { %8655 = vpow2.f32 %v2558_v32 }
 0x366   : > { %v2509_v50 = vpop.f32.mrf.mxu0 }
 0x367   : > { %v10728_v31 = vadd.f32 %v10640_v17, %v2509_v50 }
 0x369   : > { %v2534_v21 = vmul.f32 0.5, %v10728_v31  ;;  %7037 = vst.msk [vmem:[%s10646_s26 + $0x50] sm:$0xff] %vm7026_vm1, %v10728_v31 }
 0x36b   : > { %v8656_v61 = vpop.eup %8655  ;;  %v2560_v23 = vmul.f32 1.442695, %v2534_v21  ;;  %v8492_v21 = vld [vmem:[%s14772_s10 + $0x24] sm:$0xf0] }
 0x36c   : > { %2622 = vrot.lane.b32.xlu0 %v8656_v61, %s9192_s27  ;;  %v8491_v61 = vld [vmem:[%s14772_s10 + $0x24] sm:$0xf] }
 0x36d   : > { %8657 = vpow2.f32 %v2560_v23 }
 0x36e   : > { %v2511_v59 = vpop.f32.mrf.mxu0 }
 0x36f   : > { %v10736_v11 = vadd.f32 %v10640_v17, %v2511_v59 }
 0x371   : > { %v2535_v20 = vmul.f32 0.5, %v10736_v11  ;;  %7038 = vst.msk [vmem:[%s10646_s26 + $0x58] sm:$0xff] %vm7026_vm1, %v10736_v11 }
 0x373   : > { %v8658_v58 = vpop.eup %8657  ;;  %v2562_v18 = vmul.f32 1.442695, %v2535_v20 }
 0x374   : > { %2624 = vrot.lane.b32.xlu1 %v8658_v58, %s9192_s27 }
 0x375   : > { %8659 = vpow2.f32 %v2562_v18 }
 0x376   : > { %v2514_v39 = vpop.f32.mrf.mxu0 }
 0x377   : > { %v10744_v2 = vadd.f32 %v10640_v17, %v2514_v39 }
 0x379   : > { %v2536_v52 = vmul.f32 0.5, %v10744_v2  ;;  %7039 = vst.msk [vmem:[%s10646_s26 + $0x60] sm:$0xff] %vm7026_vm1, %v10744_v2 }
 0x37b   : > { %v8660_v8 = vpop.eup %8659  ;;  %v2564_v1 = vmul.f32 1.442695, %v2536_v52 }
 0x37c   : > { %2626 = vrot.lane.b32.xlu2 %v8660_v8, %s9192_s27 }
 0x37d   : > { %8661 = vpow2.f32 %v2564_v1 }
 0x37e   : > { %v2516_v60 = vpop.f32.mrf.mxu0 }
 0x37f   : > { %v10752_v37 = vadd.f32 %v10640_v17, %v2516_v60 }
 0x381   : > { %v2537_v19 = vmul.f32 0.5, %v10752_v37  ;;  %7040 = vst.msk [vmem:[%s10646_s26 + $0x68] sm:$0xff] %vm7026_vm1, %v10752_v37 }
 0x383   : > { %v8662_v26 = vpop.eup %8661  ;;  %v2566_v42 = vmul.f32 1.442695, %v2537_v19 }
 0x384   : > { %2628 = vrot.lane.b32.xlu0 %v8662_v26, %s9192_s27 }
 0x385   : > { %8663 = vpow2.f32 %v2566_v42 }
 0x386   : > { %v2519_v13 = vpop.f32.mrf.mxu0 }
 0x387   : > { %v10760_v48 = vadd.f32 %v10640_v17, %v2519_v13 }
 0x389   : > { %v2538_v28 = vmul.f32 0.5, %v10760_v48  ;;  %7041 = vst.msk [vmem:[%s10646_s26 + $0x70] sm:$0xff] %vm7026_vm1, %v10760_v48 }
 0x38b   : > { %v8664_v35 = vpop.eup %8663  ;;  %v2568_v29 = vmul.f32 1.442695, %v2538_v28 }
 0x38c   : > { %2630 = vrot.lane.b32.xlu1 %v8664_v35, %s9192_s27 }
 0x38d   : > { %8665 = vpow2.f32 %v2568_v29 }
 0x38e   : > { %v2521_v7 = vpop.f32.mrf.mxu0 }
 0x38f   : > { %v10768_v24 = vadd.f32 %v10640_v17, %v2521_v7  ;;  %v8493_v17 = vld [vmem:[%s14772_s10 + $0x34] sm:$0xf] }
 0x390   : > { %v7775_v54 = vor.u32 %v8493_v17, %v7772_v12  ;;  %v8489_v7 = vld [vmem:[%s14772_s10 + $0x14] sm:$0xf] }
 0x391   : > { %v2539_v63 = vmul.f32 0.5, %v10768_v24  ;;  %7042 = vst.msk [vmem:[%s10646_s26 + $0x78] sm:$0xff] %vm7026_vm1, %v10768_v24  ;;  %s10791_s26 = scalar_lea.vmem %s14763_s1, %s10635_s22 }
 0x392   : > { %2933 = vmatpush.bf16.msrb.mxu3 %v7775_v54  ;;  %v2572_v22 = vld [vmem:[%s10791_s26] sm:$0xff]  ;;  %v2573_v62 = vld [vmem:[%s10791_s26 + $0x8] sm:$0xff]  ;;  %v2574_v33 = vld [vmem:[%s10791_s26 + $0x10] sm:$0xff] }
 0x393   : > { %v8666_v5 = vpop.eup %8665  ;;  %v2570_v4 = vmul.f32 1.442695, %v2539_v63  ;;  %v2575_v27 = vld [vmem:[%s10791_s26 + $0x18] sm:$0xff]  ;;  %v2577_v59 = vld [vmem:[%s10791_s26 + $0x28] sm:$0xff]  ;;  %v2576_v58 = vld [vmem:[%s10791_s26 + $0x20] sm:$0xff] }
 0x394   : > { %2632 = vrot.lane.b32.xlu2 %v8666_v5, %s9192_s27  ;;  %v2578_v60 = vld [vmem:[%s10791_s26 + $0x30] sm:$0xff]  ;;  %v2579_v26 = vld [vmem:[%s10791_s26 + $0x38] sm:$0xff]  ;;  %v2581_v47 = vld [vmem:[%s10791_s26 + $0x48] sm:$0xff] }
 0x395   : > { %8667 = vpow2.f32 %v2570_v4  ;;  %v7756_v5 = vld [vmem:[%s14772_s10 + $0x18] sm:$0xf0]  ;;  %v2580_v4 = vld [vmem:[%s10791_s26 + $0x40] sm:$0xff] }
 0x396   : > { %v2605_v57 = vpop.permute.xlu0 %2604 }
 0x397   : > { %v2652_v30 = vmul.f32 %v2605_v57, %v2572_v22 }
 0x399   : > { %v2668_v38 = vadd.f32 %v2652_v30, %v10649_v14  ;;  %v2583_v30 = vld [vmem:[%s10791_s26 + $0x58] sm:$0xff] }
 0x39b   : > { %v8668_v40 = vpop.eup %8667 }
 0x39c   : > { %2634 = vrot.lane.b32.xlu0 %v8668_v40, %s9192_s27  ;;  %v2582_v40 = vld [vmem:[%s10791_s26 + $0x50] sm:$0xff] }
 0x39e   : > { %v2607_v0 = vpop.permute.xlu0 %2606  ;;  %v2613_v6 = vpop.permute.xlu2 %2612 }
 0x39f   : > { %v2653_v25 = vmul.f32 %v2607_v0, %v2573_v62  ;;  %v2656_v39 = vmul.f32 %v2613_v6, %v2576_v58 }
 0x3a1   : > { %v2669_v36 = vadd.f32 %v2653_v25, %v10656_v16  ;;  %v7762_v16 = vld [vmem:[%s14772_s10 + $0x20] sm:$0xf]  ;;  %v2672_v8 = vadd.f32 %v2656_v39, %v10680_v46  ;;  %v8490_v46 = vld [vmem:[%s14772_s10 + $0x14] sm:$0xf0] }
 0x3a2   : > { %v7763_v23 = vor.u32 %v8492_v21, %v7762_v16 }
 0x3a3   : > { %v2684_v51 = vpack.c.bf16 %v2669_v36, %v2668_v38 }
 0x3a4   : > { %2885 = vmatpush.bf16.msrb.mxu2 %v7763_v23 }
 0x3a5   : > { %7736 = vmatmul.msk.bf16.vlgmr.msra.gmra.mxu1 %vm2704_vm2, %v2684_v51 }
 0x3a6   : > { %v2609_v49 = vpop.permute.xlu1 %2608  ;;  %v2615_v20 = vpop.permute.xlu2 %2614 }
 0x3a7   : > { %v2654_v41 = vmul.f32 %v2609_v49, %v2574_v33  ;;  %v2657_v18 = vmul.f32 %v2615_v20, %v2577_v59  ;;  %v8487_v33 = vld [vmem:[%s14772_s10 + $0x4] sm:$0xf] }
 0x3a9   : > { %v2670_v32 = vadd.f32 %v2654_v41, %v10664_v3  ;;  %v7764_v3 = vld [vmem:[%s14772_s10 + $0x28] sm:$0xf0]  ;;  %v2673_v52 = vadd.f32 %v2657_v18, %v10688_v53  ;;  %v7754_v53 = vld [vmem:[%s14772_s10 + $0x10] sm:$0xf]  ;;  %v2584_v41 = vld [vmem:[%s10791_s26 + $0x60] sm:$0xff] }
 0x3aa   : > { %v7755_v63 = vor.u32 %v8490_v46, %v7754_v53 }
 0x3ab   : > { %v2686_v1 = vpack.c.bf16 %v2673_v52, %v2672_v8 }
 0x3ac   : > { %2886 = vmatpush.bf16.msrb.mxu2 %v7755_v63 }
 0x3ae   : > { %v2611_v43 = vpop.permute.xlu1 %2610 }
 0x3af   : > { %v2655_v10 = vmul.f32 %v2611_v43, %v2575_v27  ;;  %v2585_v43 = vld [vmem:[%s10791_s26 + $0x68] sm:$0xff] }
 0x3b1   : > { %v2671_v50 = vadd.f32 %v2655_v10, %v10672_v55  ;;  %v7767_v55 = vor.u32 %v8491_v61, %v7764_v3  ;;  %v2586_v61 = vld [vmem:[%s10791_s26 + $0x70] sm:$0xff]  ;;  %v2587_v3 = vld [vmem:[%s10791_s26 + $0x78] sm:$0xff]  ;;  %s9193_s26 = smov 64  }
 0x3b3   : > { %v2685_v14 = vpack.c.bf16 %v2671_v50, %v2670_v32  ;;  %2934 = vmatpush.bf16.msrb.mxu3 %v7767_v55 }
 0x3b5   : > { %7737 = vmatmul.msk.bf16.gmra.mxu1 %vm2704_vm2, %v2685_v14 }
 0x3be   : > { %v2621_v56 = vpop.permute.xlu2 %2620 }
 0x3bf   : > { %v2660_v44 = vmul.f32 %v2621_v56, %v2580_v4  ;;  %v8186_v4 = vld [vmem:[%s14774_s12 + $0x310] sm:$0xf]  ;;  %v8596_v56 = vld [vmem:[%s14774_s12 + $0x328] sm:$0xf0] }
 0x3c1   : > { %v2676_v54 = vadd.f32 %v2660_v44, %v10712_v34  ;;  %v7746_v34 = vld [vmem:[%s14772_s10] sm:$0xf] }
 0x3c5   : > { %7738 = vmatmul.msk.bf16.gmra.mxu1 %vm2704_vm2, %v2686_v1 }
 0x3c6   : > { %v2617_v19 = vpop.permute.xlu0 %2616 }
 0x3c7   : > { %v2658_v42 = vmul.f32 %v2617_v19, %v2578_v60  ;;  %v8214_v60 = vld [vmem:[%s14774_s12 + $0x348] sm:$0xf]  ;;  %v8603_v19 = vld [vmem:[%s14774_s12 + $0x360] sm:$0xf0] }
 0x3c9   : > { %v2674_v35 = vadd.f32 %v2658_v42, %v10696_v45 }
 0x3ce   : > { %v2619_v13 = vpop.permute.xlu1 %2618 }
 0x3cf   : > { %v2659_v28 = vmul.f32 %v2619_v13, %v2579_v26  ;;  %v8215_v26 = vor.u32 %v8603_v19, %v8214_v60 }
 0x3d1   : > { %v2675_v29 = vadd.f32 %v2659_v28, %v10704_v15  ;;  %v7759_v15 = vor.u32 %v8489_v7, %v7756_v5  ;;  %3795 = vmatpush.bf16.msrb.mxu1 %v8215_v26  ;;  %v7962_v5 = vld [vmem:[%s14774_s12 + $0x150] sm:$0xf] }
 0x3d3   : > { %v2687_v45 = vpack.c.bf16 %v2675_v29, %v2674_v35  ;;  %2935 = vmatpush.bf16.msrb.mxu3 %v7759_v15 }
 0x3d5   : > { %7739 = vmatmul.msk.bf16.gmra.mxu1 %vm2704_vm2, %v2687_v45  ;;  %v8540_v45 = vld [vmem:[%s14774_s12 + $0x168] sm:$0xf0] }
 0x3d6   : > { %v2627_v0 = vpop.permute.xlu2 %2626  ;;  %v7963_v15 = vor.u32 %v8540_v45, %v7962_v5  ;;  %v7850_v5 = vld [vmem:[%s14774_s12 + $0x70] sm:$0xf]  ;;  %v8512_v45 = vld [vmem:[%s14774_s12 + $0x88] sm:$0xf0] }
 0x3d7   : > { %v2663_v38 = vmul.f32 %v2627_v0, %v2583_v30  ;;  %v7934_v0 = vld [vmem:[%s14774_s12 + $0x118] sm:$0xf] }
 0x3d9   : > { %v2679_v51 = vadd.f32 %v2663_v38, %v10736_v11 }
 0x3de   : > { %v2623_v17 = vpop.permute.xlu0 %2622 }
 0x3df   : > { %v2661_v12 = vmul.f32 %v2623_v17, %v2581_v47  ;;  %v8187_v47 = vor.u32 %v8596_v56, %v8186_v4  ;;  %v8074_v4 = vld [vmem:[%s14774_s12 + $0x230] sm:$0xf]  ;;  %v8568_v56 = vld [vmem:[%s14774_s12 + $0x248] sm:$0xf0] }
 0x3e1   : > { %v2677_v57 = vadd.f32 %v2661_v12, %v10720_v9  ;;  %v8488_v9 = vld [vmem:[%s14772_s10 + $0x4] sm:$0xf0]  ;;  %3796 = vmatpush.bf16.msrb.mxu1 %v8187_v47  ;;  %v8075_v47 = vor.u32 %v8568_v56, %v8074_v4 }
 0x3e2   : > { %v7747_v27 = vor.u32 %v8488_v9, %v7746_v34 }
 0x3e3   : > { %v2688_v22 = vpack.c.bf16 %v2677_v57, %v2676_v54 }
 0x3e4   : > { %2887 = vmatpush.bf16.msrb.mxu2 %v7747_v27 }
 0x3e5   : > { %7740 = vmatmul.msk.bf16.gmra.mxu1 %vm2704_vm2, %v2688_v22 }
 0x3e6   : > { %v2625_v62 = vpop.permute.xlu1 %2624 }
 0x3e7   : > { %v2662_v25 = vmul.f32 %v2625_v62, %v2582_v40 }
 0x3e9   : > { %v2678_v36 = vadd.f32 %v2662_v25, %v10728_v31  ;;  %v7748_v31 = vld [vmem:[%s14772_s10 + $0x8] sm:$0xf0]  ;;  %v8533_v25 = vld [vmem:[%s14774_s12 + $0x130] sm:$0xf0] }
 0x3ea   : > { %v7751_v11 = vor.u32 %v8487_v33, %v7748_v31  ;;  %v7935_v38 = vor.u32 %v8533_v25, %v7934_v0  ;;  %v8544_v0 = vld [vmem:[%s14774_s12 + $0x18c] sm:$0xf]  ;;  %v7992_v25 = vld [vmem:[%s14774_s12 + $0x1a4] sm:$0xf0] }
 0x3eb   : > { %v2689_v49 = vpack.c.bf16 %v2679_v51, %v2678_v36  ;;  %v8158_v36 = vld [vmem:[%s14774_s12 + $0x2d8] sm:$0xf]  ;;  %v8589_v51 = vld [vmem:[%s14774_s12 + $0x2f0] sm:$0xf0] }
 0x3ec   : > { %2936 = vmatpush.bf16.msrb.mxu3 %v7751_v11 }
 0x3ee   : > { %v2633_v23 = vpop.permute.xlu2 %2632 }
 0x3ef   : > { %v2666_v55 = vmul.f32 %v2633_v23, %v2586_v61 }
 0x3f1   : > { %v2682_v58 = vadd.f32 %v2666_v55, %v10760_v48  ;;  %v7990_v48 = vld [vmem:[%s14774_s12 + $0x188] sm:$0xf] }
 0x3f5   : > { %7741 = vmatmul.msk.bf16.gmra.mxu1 %vm2704_vm2, %v2689_v49  ;;  %v8159_v49 = vor.u32 %v8589_v51, %v8158_v36  ;;  %v7995_v51 = vor.u32 %v8544_v0, %v7992_v25  ;;  %v8018_v0 = vld [vmem:[%s14774_s12 + $0x1c0] sm:$0xf]  ;;  %v8554_v25 = vld [vmem:[%s14774_s12 + $0x1d8] sm:$0xf0] }
 0x3f6   : > { %v2629_v6 = vpop.permute.xlu0 %2628 }
 0x3f7   : > { %v2664_v10 = vmul.f32 %v2629_v6, %v2584_v41  ;;  %3797 = vmatpush.bf16.msrb.mxu1 %v8159_v49  ;;  %v8216_v49 = vld [vmem:[%s14774_s12 + $0x364] sm:$0xf0]  ;;  %3844 = vmatpush.bf16.msra.mxu2 %v7995_v51  ;;  %v8019_v51 = vor.u32 %v8554_v25, %v8018_v0  ;;  %v7970_v25 = vld [vmem:[%s14774_s12 + $0x158] sm:$0xf] }
 0x3f9   : > { %v2680_v14 = vadd.f32 %v2664_v10, %v10744_v2  ;;  %v10873_v2 = vld [vmem:[%s14771_s9] ss:$0 sm:$0xff] }
 0x3fa   : > { %v7906_v10 = vld [vmem:[%s14774_s12 + $0xe0] sm:$0xf] }
 0x3fe   : > { %v2631_v32 = vpop.permute.xlu1 %2630 }
 0x3ff   : > { %v2665_v50 = vmul.f32 %v2631_v32, %v2585_v43  ;;  %v8526_v32 = vld [vmem:[%s14774_s12 + $0xf8] sm:$0xf0] }
 0x401   : > { %v2681_v16 = vadd.f32 %v2665_v50, %v10752_v37  ;;  %v7907_v50 = vor.u32 %v8526_v32, %v7906_v10  ;;  %v8537_v10 = vld [vmem:[%s14774_s12 + $0x154] sm:$0xf]  ;;  %v7964_v32 = vld [vmem:[%s14774_s12 + $0x16c] sm:$0xf0] }
 0x403   : > { %v2690_v21 = vpack.c.bf16 %v2681_v16, %v2680_v14  ;;  %v8130_v14 = vld [vmem:[%s14774_s12 + $0x2a0] sm:$0xf]  ;;  %v8582_v16 = vld [vmem:[%s14774_s12 + $0x2b8] sm:$0xf0] }
 0x405   : > { %7742 = vmatmul.msk.bf16.gmra.mxu1 %vm2704_vm2, %v2690_v21  ;;  %v8131_v21 = vor.u32 %v8582_v16, %v8130_v14  ;;  %v7967_v14 = vor.u32 %v8537_v10, %v7964_v32  ;;  %v8593_v16 = vld [vmem:[%s14774_s12 + $0x314] sm:$0xf]  ;;  %v7824_v10 = vld [vmem:[%s14774_s12 + $0x54] sm:$0xf0]  ;;  %v8558_v32 = vld [vmem:[%s14774_s12 + $0x1fc] sm:$0xf] }
 0x407   : > { %3798 = vmatpush.bf16.msrb.mxu1 %v8131_v21  ;;  %v8188_v21 = vld [vmem:[%s14774_s12 + $0x32c] sm:$0xf0]  ;;  %3845 = vmatpush.bf16.msra.mxu2 %v7967_v14 }
 0x40e   : > { %v2635_v59 = vpop.permute.xlu0 %2634 }
 0x40f   : > { %v2667_v20 = vmul.f32 %v2635_v59, %v2587_v3 }
 0x411   : > { %v2683_v18 = vadd.f32 %v2667_v20, %v10768_v24  ;;  %v8547_v24 = vld [vmem:[%s14774_s12 + $0x1a0] sm:$0xf0] }
 0x412   : > { %v7991_v1 = vor.u32 %v8547_v24, %v7990_v48  ;;  %v8102_v24 = vld [vmem:[%s14774_s12 + $0x268] sm:$0xf] }
 0x413   : > { %v2691_v39 = vpack.c.bf16 %v2683_v18, %v2682_v58 }
 0x414   : > { %3746 = vmatpush.bf16.msrb.mxu0 %v7991_v1  ;;  %v8575_v1 = vld [vmem:[%s14774_s12 + $0x280] sm:$0xf0] }
 0x415   : > { %7743 = vmatmul.msk.bf16.gmra.mxu1 %vm2704_vm2, %v2691_v39  ;;  %v8103_v60 = vor.u32 %v8575_v1, %v8102_v24 }
 0x417   : > { %3799 = vmatpush.bf16.msrb.mxu1 %v8103_v60  ;;  %v8523_v60 = vld [vmem:[%s14774_s12 + $0xe4] sm:$0xf] }
 0x418   : > { %3747 = vmatpush.bf16.msrb.mxu0 %v7963_v15  ;;  %v7851_v15 = vor.u32 %v8512_v45, %v7850_v5  ;;  %v8516_v5 = vld [vmem:[%s14774_s12 + $0xac] sm:$0xf]  ;;  %v7880_v45 = vld [vmem:[%s14774_s12 + $0xc4] sm:$0xf0] }
 0x419   : > { %v7883_v56 = vor.u32 %v8516_v5, %v7880_v45 }
 0x41b   : > { %3800 = vmatpush.bf16.msrb.mxu1 %v8075_v47  ;;  %v8104_v47 = vld [vmem:[%s14774_s12 + $0x284] sm:$0xf0] }
 0x41c   : > { %3748 = vmatpush.bf16.msrb.mxu0 %v7935_v38  ;;  %v8600_v38 = vld [vmem:[%s14774_s12 + $0x34c] sm:$0xf] }
 0x420   : > { %3749 = vmatpush.bf16.msrb.mxu0 %v7907_v50 }
 0x422   : > { %v2738_v37 = vpop.f32.mrf.mxu1 }
 0x423   : > { %v10876_v52 = vadd.f32 %v10873_v2, %v2738_v37  ;;  %v7878_v37 = vld [vmem:[%s14774_s12 + $0xa8] sm:$0xf] }
 0x425   : > { %v6673_v8 = vsel %vm6672_vm3, %v10876_v52, -inf  ;;  %v2778_v28 = vmax.f32 %v10876_v52, 0.0 }
 0x426   : > { %6674 = vmax.xlane.f32.xlu1 %v6673_v8  ;;  %v8519_v8 = vld [vmem:[%s14774_s12 + $0xc0] sm:$0xf0] }
 0x427   : > { %v7879_v48 = vor.u32 %v8519_v8, %v7878_v37  ;;  %v8160_v37 = vld [vmem:[%s14774_s12 + $0x2f4] sm:$0xf0] }
 0x429   : > { %3750 = vmatpush.bf16.msrb.mxu0 %v7879_v48 }
 0x42a   : > { %v2740_v42 = vpop.f32.mrf.mxu1 }
 0x42b   : > { %v10893_v13 = vadd.f32 %v10873_v2, %v2740_v42 }
 0x42d   : > { %v2779_v35 = vmax.f32 %v10893_v13, 0.0  ;;  %v6676_v29 = vsel %vm6672_vm3, %v10893_v13, -inf  ;;  %3751 = vmatpush.bf16.msrb.mxu0 %v7851_v15  ;;  %v8572_v15 = vld [vmem:[%s14774_s12 + $0x26c] sm:$0xf] }
 0x42e   : > { %6677 = vmax.xlane.f32.xlu2 %v6676_v29 }
 0x42f   : > { %v2794_v53 = vpack.c.bf16 %v2779_v35, %v2778_v28 }
 0x431   : > { %7776 = vmatmul.msk.bf16.vlgmr.msrb.gmra.mxu2 %vm2450_vm0, %v2794_v53  ;;  %7784 = vmatmul.msk.bf16.vlgmr.msrb.gmra.mxu3 %vm2450_vm0, %v2794_v53 }
 0x432   : > { %v2743_v46 = vpop.f32.mrf.mxu1 }
 0x433   : > { %v10902_v7 = vadd.f32 %v10873_v2, %v2743_v46 }
 0x435   : > { %v6679_v63 = vsel %vm6672_vm3, %v10902_v7, -inf  ;;  %v2780_v12 = vmax.f32 %v10902_v7, 0.0 }
 0x436   : > { %6680 = vmax.xlane.f32.xlu0 %v6679_v63 }
 0x43a   : > { %v2745_v44 = vpop.f32.mrf.mxu1 }
 0x43b   : > { %v10919_v17 = vadd.f32 %v10873_v2, %v2745_v44 }
 0x43d   : > { %v6682_v54 = vsel %vm6672_vm3, %v10919_v17, -inf  ;;  %v2781_v57 = vmax.f32 %v10919_v17, 0.0 }
 0x43e   : > { %6683 = vmax.xlane.f32.xlu2 %v6682_v54 }
 0x43f   : > { %v2795_v22 = vpack.c.bf16 %v2781_v57, %v2780_v12 }
 0x441   : > { %7777 = vmatmul.msk.bf16.gmra.mxu2 %vm2450_vm0, %v2795_v22  ;;  %7785 = vmatmul.msk.bf16.gmra.mxu3 %vm2450_vm0, %v2795_v22 }
 0x442   : > { %v2748_v40 = vpop.f32.mrf.mxu1 }
 0x443   : > { %v10928_v62 = vadd.f32 %v10873_v2, %v2748_v40 }
 0x445   : > { %14871 = vst [vmem:[#allocation2_spill] sm:$0xff] %v10928_v62  ;;  %v6685_v30 = vsel %vm6672_vm3, %v10928_v62, -inf  ;;  %v2782_v33 = vmax.f32 %v10928_v62, 0.0 }
 0x446   : > { %6686 = vmax.xlane.f32.xlu1 %v6685_v30 }
 0x44a   : > { %v2750_v34 = vpop.f32.mrf.mxu1 }
 0x44b   : > { %v10945_v9 = vadd.f32 %v10873_v2, %v2750_v34  ;;  %v8219_v34 = vor.u32 %v8600_v38, %v8216_v49  ;;  %v7852_v38 = vld [vmem:[%s14774_s12 + $0x8c] sm:$0xf0] }
 0x44d   : > { %14872 = vst [vmem:[#allocation4_spill] sm:$0xff] %v10945_v9  ;;  %v6688_v27 = vsel %vm6672_vm3, %v10945_v9, -inf  ;;  %v2783_v31 = vmax.f32 %v10945_v9, 0.0  ;;  %3893 = vmatpush.bf16.msra.mxu3 %v8219_v34  ;;  %v8565_v34 = vld [vmem:[%s14774_s12 + $0x234] sm:$0xf] }
 0x44e   : > { %6689 = vmax.xlane.f32.xlu2 %v6688_v27  ;;  %v7822_v27 = vld [vmem:[%s14774_s12 + $0x38] sm:$0xf] }
 0x44f   : > { %v2796_v11 = vpack.c.bf16 %v2783_v31, %v2782_v33  ;;  %v8505_v31 = vld [vmem:[%s14774_s12 + $0x50] sm:$0xf0] }
 0x451   : > { %7778 = vmatmul.msk.bf16.gmra.mxu2 %vm2450_vm0, %v2796_v11  ;;  %7786 = vmatmul.msk.bf16.gmra.mxu3 %vm2450_vm0, %v2796_v11  ;;  %v8046_v11 = vld [vmem:[%s14774_s12 + $0x1f8] sm:$0xf] }
 0x452   : > { %v2753_v41 = vpop.f32.mrf.mxu1 }
 0x453   : > { %v10954_v6 = vadd.f32 %v10873_v2, %v2753_v41  ;;  %v7823_v41 = vor.u32 %v8505_v31, %v7822_v27 }
 0x455   : > { %v6691_v43 = vsel %vm6672_vm3, %v10954_v6, -inf  ;;  %v2784_v3 = vmax.f32 %v10954_v6, 0.0  ;;  %3752 = vmatpush.bf16.msrb.mxu0 %v7823_v41 }
 0x456   : > { %6692 = vmax.xlane.f32.xlu0 %v6691_v43  ;;  %v8561_v43 = vld [vmem:[%s14774_s12 + $0x210] sm:$0xf0] }
 0x457   : > { %v8047_v50 = vor.u32 %v8561_v43, %v8046_v11  ;;  %v8502_v43 = vld [vmem:[%s14774_s12 + $0x3c] sm:$0xf] }
 0x458   : > { %v7827_v14 = vor.u32 %v8502_v43, %v7824_v10 }
 0x459   : > { %3801 = vmatpush.bf16.msrb.mxu1 %v8047_v50 }
 0x45a   : > { %v2755_v61 = vpop.f32.mrf.mxu1 }
 0x45b   : > { %v10971_v23 = vadd.f32 %v10873_v2, %v2755_v61  ;;  %v8191_v61 = vor.u32 %v8593_v16, %v8188_v21  ;;  %v8048_v16 = vld [vmem:[%s14774_s12 + $0x214] sm:$0xf0] }
 0x45d   : > { %14873 = vst [vmem:[#allocation5_spill] sm:$0xff] %v10971_v23  ;;  %v6694_v55 = vsel %vm6672_vm3, %v10971_v23, -inf  ;;  %v2785_v59 = vmax.f32 %v10971_v23, 0.0  ;;  %3894 = vmatpush.bf16.msra.mxu3 %v8191_v61  ;;  %3802 = vmatpush.bf16.msrb.mxu1 %v8019_v51  ;;  %v8051_v61 = vor.u32 %v8558_v32, %v8048_v16 }
 0x45e   : > { %6695 = vmax.xlane.f32.xlu1 %v6694_v55  ;;  %v8530_v55 = vld [vmem:[%s14774_s12 + $0x11c] sm:$0xf] }
 0x45f   : > { %v2797_v20 = vpack.c.bf16 %v2785_v59, %v2784_v3  ;;  %v7936_v59 = vld [vmem:[%s14774_s12 + $0x134] sm:$0xf0] }
 0x461   : > { %7779 = vmatmul.msk.bf16.gmra.mxu2 %vm2450_vm0, %v2797_v20  ;;  %7787 = vmatmul.msk.bf16.gmra.mxu3 %vm2450_vm0, %v2797_v20  ;;  %v8586_v20 = vld [vmem:[%s14774_s12 + $0x2dc] sm:$0xf] }
 0x462   : > { %v2758_v58 = vpop.f32.mrf.mxu1  ;;  %v8163_v8 = vor.u32 %v8586_v20, %v8160_v37  ;;  %v7796_v20 = vld [vmem:[%s14774_s12 + $0x1c] sm:$0xf0] }
 0x463   : > { %v10980_v18 = vadd.f32 %v10873_v2, %v2758_v58 }
 0x464   : > { %3895 = vmatpush.bf16.msra.mxu3 %v8163_v8 }
 0x465   : > { %14874 = vst [vmem:[#allocation3_spill] sm:$0xff] %v10980_v18  ;;  %v6697_v39 = vsel %vm6672_vm3, %v10980_v18, -inf  ;;  %v2786_v42 = vmax.f32 %v10980_v18, 0.0 }
 0x466   : > { %6698 = vmax.xlane.f32.xlu2 %v6697_v39  ;;  %v7939_v39 = vor.u32 %v8530_v55, %v7936_v59 }
 0x468   : > { %3846 = vmatpush.bf16.msra.mxu2 %v7939_v39  ;;  %v8551_v39 = vld [vmem:[%s14774_s12 + $0x1c4] sm:$0xf] }
 0x46a   : > { %v2760_v19 = vpop.f32.mrf.mxu1 }
 0x46b   : > { %v10997_v26 = vadd.f32 %v10873_v2, %v2760_v19  ;;  %v7908_v19 = vld [vmem:[%s14774_s12 + $0xfc] sm:$0xf0] }
 0x46d   : > { %14875 = vst [vmem:[#allocation7_spill] sm:$0xff] %v10997_v26  ;;  %v6700_v28 = vsel %vm6672_vm3, %v10997_v26, -inf  ;;  %v2787_v35 = vmax.f32 %v10997_v26, 0.0 }
 0x46e   : > { %6701 = vmax.xlane.f32.xlu0 %v6700_v28 }
 0x46f   : > { %v2798_v29 = vpack.c.bf16 %v2787_v35, %v2786_v42  ;;  %v8579_v42 = vld [vmem:[%s14774_s12 + $0x2a4] sm:$0xf]  ;;  %v7911_v35 = vor.u32 %v8523_v60, %v7908_v19 }
 0x471   : > { %7780 = vmatmul.msk.bf16.gmra.mxu2 %vm2450_vm0, %v2798_v29  ;;  %7788 = vmatmul.msk.bf16.gmra.mxu3 %vm2450_vm0, %v2798_v29  ;;  %v8132_v29 = vld [vmem:[%s14774_s12 + $0x2bc] sm:$0xf0] }
 0x472   : > { %v2763_v53 = vpop.f32.mrf.mxu1  ;;  %3847 = vmatpush.bf16.msra.mxu2 %v7911_v35  ;;  %v8548_v35 = vld [vmem:[%s14774_s12 + $0x1a8] sm:$0xf0] }
 0x473   : > { %v11006_v46 = vadd.f32 %v10873_v2, %v2763_v53  ;;  %v8135_v53 = vor.u32 %v8579_v42, %v8132_v29 }
 0x475   : > { %14876 = vst [vmem:[#allocation8_spill] sm:$0xff] %v11006_v46  ;;  %v6703_v63 = vsel %vm6672_vm3, %v11006_v46, -inf  ;;  %v2788_v54 = vmax.f32 %v11006_v46, 0.0  ;;  %3896 = vmatpush.bf16.msra.mxu3 %v8135_v53  ;;  %v8222_v53 = vld [vmem:[%s14774_s12 + $0x350] sm:$0xf] }
 0x476   : > { %6704 = vmax.xlane.f32.xlu1 %v6703_v63  ;;  %3848 = vmatpush.bf16.msra.mxu2 %v7883_v56 }
 0x47a   : > { %v2765_v44 = vpop.f32.mrf.mxu1 }
 0x47b   : > { %v11023_v12 = vadd.f32 %v10873_v2, %v2765_v44  ;;  %v8107_v44 = vor.u32 %v8572_v15, %v8104_v47 }
 0x47d   : > { %14877 = vst [vmem:[#allocation6_spill] sm:$0xff] %v11023_v12  ;;  %v6706_v57 = vsel %vm6672_vm3, %v11023_v12, -inf  ;;  %v2789_v22 = vmax.f32 %v11023_v12, 0.0  ;;  %3897 = vmatpush.bf16.msra.mxu3 %v8107_v44 }
 0x47e   : > { %6707 = vmax.xlane.f32.xlu2 %v6706_v57  ;;  %v7794_v57 = vld [vmem:[%s14774_s12] sm:$0xf] }
 0x47f   : > { %v2799_v40 = vpack.c.bf16 %v2789_v22, %v2788_v54  ;;  %v8498_v22 = vld [vmem:[%s14774_s12 + $0x18] sm:$0xf0] }
 0x481   : > { %7781 = vmatmul.msk.bf16.gmra.mxu2 %vm2450_vm0, %v2799_v40  ;;  %7789 = vmatmul.msk.bf16.gmra.mxu3 %vm2450_vm0, %v2799_v40  ;;  %v8509_v40 = vld [vmem:[%s14774_s12 + $0x74] sm:$0xf] }
 0x482   : > { %v2768_v30 = vpop.f32.mrf.mxu1  ;;  %v7855_v49 = vor.u32 %v8509_v40, %v7852_v38  ;;  %v2810_v40 = vld [vmem:[%s14773_s11] sm:$0x3]  ;;  %v8541_v38 = vld [vmem:[%s14774_s12 + $0x170] sm:$0xf0] }
 0x483   : > { %v11041_v36 = vadd.f32 %v10873_v2, %v2768_v30  ;;  %v7795_v30 = vor.u32 %v8498_v22, %v7794_v57  ;;  %v11219_v51 = vperm.slane %v2810_v40, 0 }
 0x484   : > { %3849 = vmatpush.bf16.msra.mxu2 %v7855_v49  ;;  %v11221_v49 = vperm.slane %v2810_v40, 1 }
 0x485   : > { %14878 = vst [vmem:[#allocation10_spill] sm:$0xff] %v11041_v36  ;;  %v6709_v33 = vsel %vm6672_vm3, %v11041_v36, -inf  ;;  %v2790_v48 = vmax.f32 %v11041_v36, 0.0  ;;  %3753 = vmatpush.bf16.msrb.mxu0 %v7795_v30 }
 0x486   : > { %6710 = vmax.xlane.f32.xlu0 %v6709_v33  ;;  %v8076_v33 = vld [vmem:[%s14774_s12 + $0x24c] sm:$0xf0] }
 0x487   : > { %v8079_v31 = vor.u32 %v8565_v34, %v8076_v33  ;;  %v7971_v34 = vor.u32 %v8541_v38, %v7970_v25  ;;  %v8194_v33 = vld [vmem:[%s14774_s12 + $0x318] sm:$0xf] }
 0x488   : > { %3850 = vmatpush.bf16.msra.mxu2 %v7827_v14 }
 0x489   : > { %3898 = vmatpush.bf16.msra.mxu3 %v8079_v31  ;;  %v8597_v31 = vld [vmem:[%s14774_s12 + $0x330] sm:$0xf0] }
 0x48a   : > { %v2770_v3 = vpop.f32.mrf.mxu1 }
 0x48b   : > { %v11082_v58 = vadd.f32 %v10873_v2, %v2770_v3 }
 0x48d   : > { %14879 = vst [vmem:[#allocation11_spill] sm:$0xff] %v11082_v58  ;;  %v6712_v24 = vsel %vm6672_vm3, %v11082_v58, -inf  ;;  %v2791_v1 = vmax.f32 %v11082_v58, 0.0  ;;  %3899 = vmatpush.bf16.msra.mxu3 %v8051_v61 }
 0x48e   : > { %6713 = vmax.xlane.f32.xlu1 %v6712_v24 }
 0x48f   : > { %v2800_v28 = vpack.c.bf16 %v2791_v1, %v2790_v48  ;;  %v8020_v48 = vld [vmem:[%s14774_s12 + $0x1dc] sm:$0xf0] }
 0x490   : > { %v8023_v24 = vor.u32 %v8551_v39, %v8020_v48 }
 0x491   : > { %7782 = vmatmul.msk.bf16.gmra.mxu2 %vm2450_vm0, %v2800_v28  ;;  %7790 = vmatmul.msk.bf16.gmra.mxu3 %vm2450_vm0, %v2800_v28  ;;  %v7998_v28 = vld [vmem:[%s14774_s12 + $0x190] sm:$0xf] }
 0x492   : > { %v2773_v63 = vpop.f32.mrf.mxu1  ;;  %3900 = vmatpush.bf16.msra.mxu3 %v8023_v24  ;;  %v7999_v29 = vor.u32 %v8548_v35, %v7998_v28  ;;  %v7942_v35 = vld [vmem:[%s14774_s12 + $0x120] sm:$0xf] }
 0x493   : > { %v11115_v4 = vadd.f32 %v10873_v2, %v2773_v63  ;;  %v8604_v63 = vld [vmem:[%s14774_s12 + $0x368] sm:$0xf0] }
 0x494   : > { %v8223_v5 = vor.u32 %v8604_v63, %v8222_v53  ;;  %3942 = vmatpush.bf16.msra.mxu0 %v7999_v29  ;;  %v8534_v29 = vld [vmem:[%s14774_s12 + $0x138] sm:$0xf0]  ;;  %v8166_v63 = vld [vmem:[%s14774_s12 + $0x2e0] sm:$0xf] }
 0x495   : > { %14880 = vst [vmem:[#allocation9_spill] sm:$0xff] %v11115_v4  ;;  %v6715_v54 = vsel %vm6672_vm3, %v11115_v4, -inf  ;;  %v2792_v3 = vmax.f32 %v11115_v4, 0.0  ;;  %v7943_v53 = vor.u32 %v8534_v29, %v7942_v35 }
 0x496   : > { %6716 = vmax.xlane.f32.xlu2 %v6715_v54  ;;  %3991 = vmatpush.bf16.msra.mxu1 %v8223_v5  ;;  %v8590_v5 = vld [vmem:[%s14774_s12 + $0x2f8] sm:$0xf0] }
 0x498   : > { %3943 = vmatpush.bf16.msra.mxu0 %v7971_v34 }
 0x499   : > { %v11146_v27 = vpop.xlane.xlu1 %6674 }
 0x49a   : > { %v6721_v11 = vsub.f32 %v10876_v52, %v11146_v27  ;;  %v2775_v41 = vpop.f32.mrf.mxu1 }
 0x49b   : > { %v11160_v50 = vadd.f32 %v10873_v2, %v2775_v41  ;;  %v8495_v2 = vld [vmem:[%s14774_s12 + $0x4] sm:$0xf] }
 0x49c   : > { %v6737_v21 = vmul.f32 1.442695, %v6721_v11  ;;  %v7799_v8 = vor.u32 %v8495_v2, %v7796_v20  ;;  %v8195_v11 = vor.u32 %v8597_v31, %v8194_v33  ;;  %3944 = vmatpush.bf16.msra.mxu0 %v7943_v53 }
 0x49d   : > { %14881 = vst [vmem:[#allocation13_spill] sm:$0xff] %v11160_v50  ;;  %v6718_v55 = vsel %vm6672_vm3, %v11160_v50, -inf  ;;  %v2793_v59 = vmax.f32 %v11160_v50, 0.0 }
 0x49e   : > { %6719 = vmax.xlane.f32.xlu0 %v6718_v55  ;;  %8669 = vpow2.f32 %v6737_v21  ;;  %3851 = vmatpush.bf16.msra.mxu2 %v7799_v8 }
 0x49f   : > { %v2801_v37 = vpack.c.bf16 %v2793_v59, %v2792_v3  ;;  %3992 = vmatpush.bf16.msra.mxu1 %v8195_v11 }
 0x4a1   : > { %v11181_v1 = vpop.xlane.xlu2 %6677  ;;  %7783 = vmatmul.msk.bf16.gmra.mxu2 %vm2450_vm0, %v2801_v37  ;;  %7791 = vmatmul.msk.bf16.gmra.mxu3 %vm2450_vm0, %v2801_v37 }
 0x4a2   : > { %v6722_v60 = vsub.f32 %v10893_v13, %v11181_v1 }
 0x4a4   : > { %v6739_v19 = vmul.f32 1.442695, %v6722_v60  ;;  %v8670_v42 = vpop.eup %8669 }
 0x4a6   : > { %8671 = vpow2.f32 %v6739_v19 }
 0x4a7   : > { %6785 = vrot.lane.b32.xlu1 %v8670_v42, %s9193_s26 }
 0x4a9   : > { %v11200_v45 = vpop.xlane.xlu0 %6680 }
 0x4aa   : > { %v6723_v15 = vsub.f32 %v10902_v7, %v11200_v45 }
 0x4ac   : > { %v8672_v56 = vpop.eup %8671  ;;  %v6741_v47 = vmul.f32 1.442695, %v6723_v15  ;;  %v8167_v15 = vor.u32 %v8590_v5, %v8166_v63 }
 0x4ae   : > { %8673 = vpow2.f32 %v6741_v47  ;;  %6787 = vrot.lane.b32.xlu2 %v8672_v56, %s9193_s26  ;;  %3993 = vmatpush.bf16.msra.mxu1 %v8167_v15 }
 0x4b1   : > { %v11205_v44 = vpop.xlane.xlu2 %6683 }
 0x4b2   : > { %v6724_v54 = vsub.f32 %v10919_v17, %v11205_v44 }
 0x4b4   : > { %v8674_v57 = vpop.eup %8673  ;;  %v6743_v22 = vmul.f32 1.442695, %v6724_v54  ;;  %v2889_v30 = vpop.f32.mrf.mxu2 }
 0x4b5   : > { %v2938_v0 = vpop.f32.mrf.mxu3  ;;  %6789 = vrot.lane.b32.xlu0 %v8674_v57, %s9193_s26  ;;  %v2890_v10 = vadd.f32 %v2889_v30, %v11219_v51 }
 0x4b6   : > { %8675 = vpow2.f32 %v6743_v22  ;;  %v2939_v32 = vadd.f32 %v2938_v0, %v11221_v49 }
 0x4b7   : > { %v2978_v59 = vmax.f32 %v2890_v10, 0.0 }
 0x4b8   : > { %v2979_v2 = vmax.f32 %v2939_v32, 0.0 }
 0x4b9   : > { %v11229_v41 = vpop.xlane.xlu1 %6686 }
 0x4ba   : > { %v6725_v43 = vsub.f32 %v10928_v62, %v11229_v41 }
 0x4bc   : > { %v8676_v14 = vpop.eup %8675  ;;  %v6745_v16 = vmul.f32 1.442695, %v6725_v43  ;;  %v2891_v21 = vpop.f32.mrf.mxu2 }
 0x4bd   : > { %v2940_v61 = vpop.f32.mrf.mxu3  ;;  %v2892_v3 = vadd.f32 %v2891_v21, %v11219_v51  ;;  %6791 = vrot.lane.b32.xlu1 %v8676_v14, %s9193_s26 }
 0x4be   : > { %v2941_v55 = vadd.f32 %v2940_v61, %v11221_v49  ;;  %8677 = vpow2.f32 %v6745_v16 }
 0x4bf   : > { %v2980_v20 = vmax.f32 %v2892_v3, 0.0 }
 0x4c0   : > { %v2981_v39 = vmax.f32 %v2941_v55, 0.0  ;;  %v7914_v55 = vld [vmem:[%s14774_s12 + $0xe8] sm:$0xf] }
 0x4c1   : > { %v11238_v37 = vpack.c.bf16 %v2980_v20, %v2978_v59  ;;  %v11242_v48 = vpop.xlane.xlu2 %6689  ;;  %v8527_v59 = vld [vmem:[%s14774_s12 + $0x100] sm:$0xf0]  ;;  %v8138_v20 = vld [vmem:[%s14774_s12 + $0x2a8] sm:$0xf] }
 0x4c2   : > { %v11240_v8 = vpack.c.bf16 %v2981_v39, %v2979_v2  ;;  %v6726_v24 = vsub.f32 %v10945_v9, %v11242_v48  ;;  %v7915_v2 = vor.u32 %v8527_v59, %v7914_v55  ;;  %v8583_v39 = vld [vmem:[%s14774_s12 + $0x2c0] sm:$0xf0] }
 0x4c3   : > { %3754 = vmatmul.bf16.vlgmr.msrb.gmra.mxu0 %v11238_v37  ;;  %3852 = vmatmul.bf16.vlgmr.msra.gmra.mxu2 %v11238_v37 }
 0x4c4   : > { %3803 = vmatmul.bf16.vlgmr.msrb.gmra.mxu1 %v11240_v8  ;;  %v8678_v60 = vpop.eup %8677  ;;  %v6747_v19 = vmul.f32 1.442695, %v6726_v24  ;;  %3901 = vmatmul.bf16.vlgmr.msra.gmra.mxu3 %v11240_v8  ;;  %v2894_v42 = vpop.f32.mrf.mxu2  ;;  %v8139_v24 = vor.u32 %v8583_v39, %v8138_v20 }
 0x4c5   : > { %v2943_v28 = vpop.f32.mrf.mxu3  ;;  %6793 = vrot.lane.b32.xlu0 %v8678_v60, %s9193_s26  ;;  %v2895_v54 = vadd.f32 %v2894_v42, %v11219_v51  ;;  %3945 = vmatpush.bf16.msra.mxu0 %v7915_v2 }
 0x4c6   : > { %8679 = vpow2.f32 %v6747_v19  ;;  %v2944_v57 = vadd.f32 %v2943_v28, %v11221_v49  ;;  %3994 = vmatpush.bf16.msra.mxu1 %v8139_v24 }
 0x4c7   : > { %v2982_v34 = vmax.f32 %v2895_v54, 0.0 }
 0x4c8   : > { %v2983_v33 = vmax.f32 %v2944_v57, 0.0 }
 0x4c9   : > { %v11263_v56 = vpop.xlane.xlu0 %6692 }
 0x4ca   : > { %v6727_v47 = vsub.f32 %v10954_v6, %v11263_v56 }
 0x4cc   : > { %v8680_v22 = vpop.eup %8679  ;;  %v6749_v40 = vmul.f32 1.442695, %v6727_v47  ;;  %v2896_v30 = vpop.f32.mrf.mxu2 }
 0x4cd   : > { %v2945_v0 = vpop.f32.mrf.mxu3  ;;  %v2897_v25 = vadd.f32 %v2896_v30, %v11219_v51  ;;  %6795 = vrot.lane.b32.xlu2 %v8680_v22, %s9193_s26 }
 0x4ce   : > { %v2946_v38 = vadd.f32 %v2945_v0, %v11221_v49  ;;  %8681 = vpow2.f32 %v6749_v40 }
 0x4cf   : > { %v2984_v31 = vmax.f32 %v2897_v25, 0.0 }
 0x4d0   : > { %v2985_v11 = vmax.f32 %v2946_v38, 0.0 }
 0x4d1   : > { %v11272_v43 = vpack.c.bf16 %v2984_v31, %v2982_v34  ;;  %v11276_v32 = vpop.xlane.xlu1 %6695 }
 0x4d2   : > { %v11274_v10 = vpack.c.bf16 %v2985_v11, %v2983_v33  ;;  %14882 = vst [vmem:[#allocation14_spill] sm:$0xff] %v11276_v32  ;;  %v6728_v14 = vsub.f32 %v10971_v23, %v11276_v32  ;;  %v7886_v11 = vld [vmem:[%s14774_s12 + $0xb0] sm:$0xf] }
 0x4d3   : > { %3759 = vmatmul.bf16.gmra.mxu0 %v11272_v43  ;;  %3857 = vmatmul.bf16.gmra.mxu2 %v11272_v43 }
 0x4d4   : > { %3808 = vmatmul.bf16.gmra.mxu1 %v11274_v10  ;;  %v8682_v16 = vpop.eup %8681  ;;  %v6751_v21 = vmul.f32 1.442695, %v6728_v14  ;;  %3906 = vmatmul.bf16.gmra.mxu3 %v11274_v10  ;;  %v2899_v61 = vpop.f32.mrf.mxu2  ;;  %v8520_v14 = vld [vmem:[%s14774_s12 + $0xc8] sm:$0xf0] }
 0x4d5   : > { %v2948_v3 = vpop.f32.mrf.mxu3  ;;  %6797 = vrot.lane.b32.xlu1 %v8682_v16, %s9193_s26  ;;  %v2900_v42 = vadd.f32 %v2899_v61, %v11219_v51  ;;  %v7887_v16 = vor.u32 %v8520_v14, %v7886_v11  ;;  %v8576_v61 = vld [vmem:[%s14774_s12 + $0x288] sm:$0xf0]  ;;  %v8082_v14 = vld [vmem:[%s14774_s12 + $0x238] sm:$0xf] }
 0x4d6   : > { %8683 = vpow2.f32 %v6751_v21  ;;  %v2949_v28 = vadd.f32 %v2948_v3, %v11221_v49  ;;  %v8110_v21 = vld [vmem:[%s14774_s12 + $0x270] sm:$0xf] }
 0x4d7   : > { %v2986_v47 = vmax.f32 %v2900_v42, 0.0  ;;  %v8111_v3 = vor.u32 %v8576_v61, %v8110_v21  ;;  %3946 = vmatpush.bf16.msra.mxu0 %v7887_v16  ;;  %v8569_v16 = vld [vmem:[%s14774_s12 + $0x250] sm:$0xf0] }
 0x4d8   : > { %v2987_v54 = vmax.f32 %v2949_v28, 0.0  ;;  %v8083_v21 = vor.u32 %v8569_v16, %v8082_v14 }
 0x4d9   : > { %v11297_v60 = vpop.xlane.xlu2 %6698  ;;  %3995 = vmatpush.bf16.msra.mxu1 %v8111_v3 }
 0x4da   : > { %14883 = vst [vmem:[#allocation12_spill] sm:$0xff] %v11297_v60  ;;  %v6729_v19 = vsub.f32 %v10980_v18, %v11297_v60 }
 0x4dc   : > { %v8684_v35 = vpop.eup %8683  ;;  %v6753_v29 = vmul.f32 1.442695, %v6729_v19  ;;  %v2901_v53 = vpop.f32.mrf.mxu2 }
 0x4dd   : > { %v2950_v63 = vpop.f32.mrf.mxu3  ;;  %v2902_v5 = vadd.f32 %v2901_v53, %v11219_v51  ;;  %6799 = vrot.lane.b32.xlu0 %v8684_v35, %s9193_s26  ;;  %3996 = vmatpush.bf16.msra.mxu1 %v8083_v21 }
 0x4de   : > { %v2951_v15 = vadd.f32 %v2950_v63, %v11221_v49  ;;  %8685 = vpow2.f32 %v6753_v29 }
 0x4df   : > { %v2988_v57 = vmax.f32 %v2902_v5, 0.0 }
 0x4e0   : > { %v2989_v22 = vmax.f32 %v2951_v15, 0.0 }
 0x4e1   : > { %v11306_v40 = vpack.c.bf16 %v2988_v57, %v2986_v47  ;;  %v11310_v0 = vpop.xlane.xlu0 %6701 }
 0x4e2   : > { %v11308_v30 = vpack.c.bf16 %v2989_v22, %v2987_v54  ;;  %14884 = vst [vmem:[#allocation16_spill] sm:$0xff] %v11310_v0  ;;  %v6730_v25 = vsub.f32 %v10997_v26, %v11310_v0 }
 0x4e3   : > { %3764 = vmatmul.bf16.gmra.mxu0 %v11306_v40  ;;  %3862 = vmatmul.bf16.gmra.mxu2 %v11306_v40 }
 0x4e4   : > { %3813 = vmatmul.bf16.gmra.mxu1 %v11308_v30  ;;  %v8686_v38 = vpop.eup %8685  ;;  %v6755_v34 = vmul.f32 1.442695, %v6730_v25  ;;  %3911 = vmatmul.bf16.gmra.mxu3 %v11308_v30  ;;  %v2904_v33 = vpop.f32.mrf.mxu2 }
 0x4e5   : > { %v2953_v31 = vpop.f32.mrf.mxu3  ;;  %6801 = vrot.lane.b32.xlu2 %v8686_v38, %s9193_s26  ;;  %v2905_v2 = vadd.f32 %v2904_v33, %v11219_v51  ;;  %v7858_v33 = vld [vmem:[%s14774_s12 + $0x78] sm:$0xf] }
 0x4e6   : > { %8687 = vpow2.f32 %v6755_v34  ;;  %v2954_v20 = vadd.f32 %v2953_v31, %v11221_v49  ;;  %v8513_v31 = vld [vmem:[%s14774_s12 + $0x90] sm:$0xf0] }
 0x4e7   : > { %v2990_v29 = vmax.f32 %v2905_v2, 0.0  ;;  %v7859_v11 = vor.u32 %v8513_v31, %v7858_v33  ;;  %v8601_v33 = vld [vmem:[%s14774_s12 + $0x354] sm:$0xf] }
 0x4e8   : > { %v2991_v53 = vmax.f32 %v2954_v20, 0.0 }
 0x4e9   : > { %v11331_v55 = vpop.xlane.xlu1 %6704  ;;  %3947 = vmatpush.bf16.msra.mxu0 %v7859_v11  ;;  %v8224_v11 = vld [vmem:[%s14774_s12 + $0x36c] sm:$0xf0] }
 0x4ea   : > { %14885 = vst [vmem:[#allocation17_spill] sm:$0xff] %v11331_v55  ;;  %v6731_v59 = vsub.f32 %v11006_v46, %v11331_v55 }
 0x4ec   : > { %v8688_v39 = vpop.eup %8687  ;;  %v6757_v24 = vmul.f32 1.442695, %v6731_v59  ;;  %v2906_v19 = vpop.f32.mrf.mxu2 }
 0x4ed   : > { %v2955_v42 = vpop.f32.mrf.mxu3  ;;  %v2907_v28 = vadd.f32 %v2906_v19, %v11219_v51  ;;  %6803 = vrot.lane.b32.xlu1 %v8688_v39, %s9193_s26 }
 0x4ee   : > { %v2956_v35 = vadd.f32 %v2955_v42, %v11221_v49  ;;  %8689 = vpow2.f32 %v6757_v24 }
 0x4ef   : > { %v2992_v63 = vmax.f32 %v2907_v28, 0.0 }
 0x4f0   : > { %v2993_v5 = vmax.f32 %v2956_v35, 0.0 }
 0x4f1   : > { %v11340_v15 = vpack.c.bf16 %v2992_v63, %v2990_v29  ;;  %v11344_v54 = vpop.xlane.xlu2 %6707 }
 0x4f2   : > { %v11342_v47 = vpack.c.bf16 %v2993_v5, %v2991_v53  ;;  %14888 = vst [vmem:[#allocation19_spill] sm:$0xff] %v11344_v54  ;;  %v6732_v57 = vsub.f32 %v11023_v12, %v11344_v54 }
 0x4f3   : > { %14886 = vst [vmem:[#allocation15_spill] sm:$0xff] %v11340_v15  ;;  %3769 = vmatmul.bf16.gmra.mxu0 %v11340_v15  ;;  %3867 = vmatmul.bf16.gmra.mxu2 %v11340_v15 }
 0x4f4   : > { %14887 = vst [vmem:[#allocation18_spill] sm:$0xff] %v11342_v47  ;;  %3818 = vmatmul.bf16.gmra.mxu1 %v11342_v47  ;;  %v8690_v22 = vpop.eup %8689  ;;  %v6759_v25 = vmul.f32 1.442695, %v6732_v57  ;;  %3916 = vmatmul.bf16.gmra.mxu3 %v11342_v47  ;;  %v2909_v38 = vpop.f32.mrf.mxu2 }
 0x4f5   : > { %v2958_v34 = vpop.f32.mrf.mxu3  ;;  %6805 = vrot.lane.b32.xlu0 %v8690_v22, %s9193_s26  ;;  %v2910_v59 = vadd.f32 %v2909_v38, %v11219_v51  ;;  %v8545_v38 = vld [vmem:[%s14774_s12 + $0x194] sm:$0xf] }
 0x4f6   : > { %8691 = vpow2.f32 %v6759_v25  ;;  %v2959_v2 = vadd.f32 %v2958_v34, %v11221_v49  ;;  %v8000_v34 = vld [vmem:[%s14774_s12 + $0x1ac] sm:$0xf0] }
 0x4f7   : > { %v2994_v35 = vmax.f32 %v2910_v59, 0.0  ;;  %v8003_v31 = vor.u32 %v8545_v38, %v8000_v34  ;;  %v7830_v59 = vld [vmem:[%s14774_s12 + $0x40] sm:$0xf] }
 0x4f8   : > { %v2995_v29 = vmax.f32 %v2959_v2, 0.0  ;;  %v8506_v2 = vld [vmem:[%s14774_s12 + $0x58] sm:$0xf0] }
 0x4f9   : > { %v11365_v61 = vpop.xlane.xlu0 %6710  ;;  %4040 = vmatpush.bf16.msrb.mxu2 %v8003_v31  ;;  %v8531_v31 = vld [vmem:[%s14774_s12 + $0x124] sm:$0xf] }
 0x4fa   : > { %14889 = vst [vmem:[#allocation20_spill] sm:$0xff] %v11365_v61  ;;  %v6733_v3 = vsub.f32 %v11041_v36, %v11365_v61 }
 0x4fc   : > { %v8692_v20 = vpop.eup %8691  ;;  %v6761_v39 = vmul.f32 1.442695, %v6733_v3  ;;  %v2911_v24 = vpop.f32.mrf.mxu2 }
 0x4fd   : > { %v2960_v19 = vpop.f32.mrf.mxu3  ;;  %v2912_v42 = vadd.f32 %v2911_v24, %v11219_v51  ;;  %6807 = vrot.lane.b32.xlu2 %v8692_v20, %s9193_s26  ;;  %v8227_v20 = vor.u32 %v8601_v33, %v8224_v11  ;;  %v8538_v24 = vld [vmem:[%s14774_s12 + $0x15c] sm:$0xf]  ;;  %v7944_v11 = vld [vmem:[%s14774_s12 + $0x13c] sm:$0xf0] }
 0x4fe   : > { %v2961_v28 = vadd.f32 %v2960_v19, %v11221_v49  ;;  %8693 = vpow2.f32 %v6761_v39  ;;  %v7831_v39 = vor.u32 %v8506_v2, %v7830_v59  ;;  %v7972_v19 = vld [vmem:[%s14774_s12 + $0x174] sm:$0xf0]  ;;  %v8168_v59 = vld [vmem:[%s14774_s12 + $0x2fc] sm:$0xf0] }
 0x4ff   : > { %v2996_v53 = vmax.f32 %v2912_v42, 0.0  ;;  %4089 = vmatpush.bf16.msrb.mxu3 %v8227_v20  ;;  %v8594_v42 = vld [vmem:[%s14774_s12 + $0x31c] sm:$0xf] }
 0x500   : > { %v2997_v63 = vmax.f32 %v2961_v28, 0.0  ;;  %3948 = vmatpush.bf16.msra.mxu0 %v7831_v39  ;;  %v8054_v28 = vld [vmem:[%s14774_s12 + $0x200] sm:$0xf] }
 0x501   : > { %v11374_v5 = vpack.c.bf16 %v2996_v53, %v2994_v35  ;;  %v11378_v22 = vpop.xlane.xlu1 %6713  ;;  %v8562_v35 = vld [vmem:[%s14774_s12 + $0x218] sm:$0xf0] }
 0x502   : > { %v11376_v57 = vpack.c.bf16 %v2997_v63, %v2995_v29  ;;  %14892 = vst [vmem:[#allocation23_spill] sm:$0xff] %v11378_v22  ;;  %v6734_v25 = vsub.f32 %v11082_v58, %v11378_v22  ;;  %v7975_v29 = vor.u32 %v8538_v24, %v7972_v19  ;;  %v8055_v53 = vor.u32 %v8562_v35, %v8054_v28  ;;  %v8196_v63 = vld [vmem:[%s14774_s12 + $0x334] sm:$0xf0] }
 0x503   : > { %14890 = vst [vmem:[#allocation21_spill] sm:$0xff] %v11374_v5  ;;  %3774 = vmatmul.bf16.gmra.mxu0 %v11374_v5  ;;  %3872 = vmatmul.bf16.gmra.mxu2 %v11374_v5  ;;  %v8199_v34 = vor.u32 %v8594_v42, %v8196_v63 }
 0x504   : > { %14891 = vst [vmem:[#allocation22_spill] sm:$0xff] %v11376_v57  ;;  %3823 = vmatmul.bf16.gmra.mxu1 %v11376_v57  ;;  %v8694_v14 = vpop.eup %8693  ;;  %v6763_v16 = vmul.f32 1.442695, %v6734_v25  ;;  %3921 = vmatmul.bf16.gmra.mxu3 %v11376_v57  ;;  %v2914_v21 = vpop.f32.mrf.mxu2 }
 0x505   : > { %v2963_v3 = vpop.f32.mrf.mxu3  ;;  %6809 = vrot.lane.b32.xlu1 %v8694_v14, %s9193_s26  ;;  %v2915_v25 = vadd.f32 %v2914_v21, %v11219_v51  ;;  %4041 = vmatpush.bf16.msrb.mxu2 %v7975_v29  ;;  %v8587_v14 = vld [vmem:[%s14774_s12 + $0x2e4] sm:$0xf]  ;;  %v7947_v21 = vor.u32 %v8531_v31, %v7944_v11  ;;  %v7916_v29 = vld [vmem:[%s14774_s12 + $0x104] sm:$0xf0] }
 0x506   : > { %8695 = vpow2.f32 %v6763_v16  ;;  %3997 = vmatpush.bf16.msra.mxu1 %v8055_v53  ;;  %v2964_v16 = vadd.f32 %v2963_v3, %v11221_v49  ;;  %4090 = vmatpush.bf16.msrb.mxu3 %v8199_v34  ;;  %v8171_v19 = vor.u32 %v8587_v14, %v8168_v59  ;;  %v8524_v3 = vld [vmem:[%s14774_s12 + $0xec] sm:$0xf]  ;;  %v8140_v31 = vld [vmem:[%s14774_s12 + $0x2c4] sm:$0xf0] }
 0x507   : > { %v2998_v42 = vmax.f32 %v2915_v25, 0.0  ;;  %v8580_v53 = vld [vmem:[%s14774_s12 + $0x2ac] sm:$0xf] }
 0x508   : > { %v2999_v63 = vmax.f32 %v2964_v16, 0.0  ;;  %v8143_v59 = vor.u32 %v8580_v53, %v8140_v31  ;;  %v8517_v16 = vld [vmem:[%s14774_s12 + $0xb4] sm:$0xf]  ;;  %v8499_v53 = vld [vmem:[%s14774_s12 + $0x20] sm:$0xf0] }
 0x509   : > { %v11424_v38 = vpop.xlane.xlu2 %6716  ;;  %4042 = vmatpush.bf16.msrb.mxu2 %v7947_v21 }
 0x50a   : > { %14893 = vst [vmem:[#allocation24_spill] sm:$0xff] %v11424_v38  ;;  %v6735_v33 = vsub.f32 %v11115_v4, %v11424_v38  ;;  %4091 = vmatpush.bf16.msrb.mxu3 %v8171_v19  ;;  %v8112_v19 = vld [vmem:[%s14774_s12 + $0x28c] sm:$0xf0] }
 0x50c   : > { %v8696_v2 = vpop.eup %8695  ;;  %v6765_v20 = vmul.f32 1.442695, %v6735_v33  ;;  %v2916_v39 = vpop.f32.mrf.mxu2  ;;  %v7919_v33 = vor.u32 %v8524_v3, %v7916_v29  ;;  %v7802_v29 = vld [vmem:[%s14774_s12 + $0x8] sm:$0xf] }
 0x50d   : > { %v2965_v24 = vpop.f32.mrf.mxu3  ;;  %v2917_v28 = vadd.f32 %v2916_v39, %v11219_v51  ;;  %6811 = vrot.lane.b32.xlu0 %v8696_v2, %s9193_s26  ;;  %v8573_v39 = vld [vmem:[%s14774_s12 + $0x274] sm:$0xf] }
 0x50e   : > { %v2966_v35 = vadd.f32 %v2965_v24, %v11221_v49  ;;  %8697 = vpow2.f32 %v6765_v20  ;;  %4043 = vmatpush.bf16.msrb.mxu2 %v7919_v33  ;;  %v7888_v20 = vld [vmem:[%s14774_s12 + $0xcc] sm:$0xf0]  ;;  %4092 = vmatpush.bf16.msrb.mxu3 %v8143_v59  ;;  %v8555_v33 = vld [vmem:[%s14774_s12 + $0x1e0] sm:$0xf0]  ;;  %v7860_v59 = vld [vmem:[%s14774_s12 + $0x94] sm:$0xf0] }
 0x50f   : > { %v3000_v25 = vmax.f32 %v2917_v28, 0.0  ;;  %v7891_v24 = vor.u32 %v8517_v16, %v7888_v20  ;;  %v8566_v16 = vld [vmem:[%s14774_s12 + $0x23c] sm:$0xf] }
 0x510   : > { %v3001_v34 = vmax.f32 %v2966_v35, 0.0 }
 0x511   : > { %v11456_v11 = vpack.c.bf16 %v3000_v25, %v2998_v42  ;;  %v11460_v21 = vpop.xlane.xlu0 %6719  ;;  %v8115_v25 = vor.u32 %v8573_v39, %v8112_v19  ;;  %v8084_v39 = vld [vmem:[%s14774_s12 + $0x254] sm:$0xf0]  ;;  %v7832_v19 = vld [vmem:[%s14774_s12 + $0x5c] sm:$0xf0] }
 0x512   : > { %v11458_v14 = vpack.c.bf16 %v3001_v34, %v2999_v63  ;;  %14896 = vst [vmem:[#allocation27_spill] sm:$0xff] %v11460_v21  ;;  %v6736_v2 = vsub.f32 %v11160_v50, %v11460_v21  ;;  %v7803_v63 = vor.u32 %v8499_v53, %v7802_v29  ;;  %v8026_v34 = vld [vmem:[%s14774_s12 + $0x1c8] sm:$0xf]  ;;  %4044 = vmatpush.bf16.msrb.mxu2 %v7891_v24  ;;  %v8503_v24 = vld [vmem:[%s14774_s12 + $0x44] sm:$0xf] }
 0x513   : > { %14894 = vst [vmem:[#allocation25_spill] sm:$0xff] %v11456_v11  ;;  %3779 = vmatmul.bf16.gmra.mxu0 %v11456_v11  ;;  %3877 = vmatmul.bf16.gmra.mxu2 %v11456_v11  ;;  %v8027_v31 = vor.u32 %v8555_v33, %v8026_v34  ;;  %v7835_v29 = vor.u32 %v8503_v24, %v7832_v19  ;;  %v8559_v53 = vld [vmem:[%s14774_s12 + $0x204] sm:$0xf] }
 0x514   : > { %14895 = vst [vmem:[#allocation26_spill] sm:$0xff] %v11458_v14  ;;  %3828 = vmatmul.bf16.gmra.mxu1 %v11458_v14  ;;  %v8698_v42 = vpop.eup %8697  ;;  %v6767_v28 = vmul.f32 1.442695, %v6736_v2  ;;  %3926 = vmatmul.bf16.gmra.mxu3 %v11458_v14  ;;  %v2919_v35 = vpop.f32.mrf.mxu2  ;;  %v8510_v2 = vld [vmem:[%s14774_s12 + $0x7c] sm:$0xf] }
 0x515   : > { %v2968_v3 = vpop.f32.mrf.mxu3  ;;  %6813 = vrot.lane.b32.xlu2 %v8698_v42, %s9193_s26  ;;  %3949 = vmatpush.bf16.msra.mxu0 %v7803_v63  ;;  %v7863_v20 = vor.u32 %v8510_v2, %v7860_v59  ;;  %v2920_v42 = vadd.f32 %v2919_v35, %v11219_v51  ;;  %v8056_v63 = vld [vmem:[%s14774_s12 + $0x21c] sm:$0xf0] }
 0x516   : > { %8699 = vpow2.f32 %v6767_v28  ;;  %3998 = vmatpush.bf16.msra.mxu1 %v8027_v31  ;;  %4093 = vmatpush.bf16.msrb.mxu3 %v8115_v25  ;;  %v8087_v28 = vor.u32 %v8566_v16, %v8084_v39  ;;  %v2969_v34 = vadd.f32 %v2968_v3, %v11221_v49  ;;  %v8059_v16 = vor.u32 %v8559_v53, %v8056_v63  ;;  %v7804_v3 = vld [vmem:[%s14774_s12 + $0x24] sm:$0xf0]  ;;  %v8552_v39 = vld [vmem:[%s14774_s12 + $0x1cc] sm:$0xf] }
 0x517   : > { %4045 = vmatpush.bf16.msrb.mxu2 %v7863_v20  ;;  %v3002_v59 = vmax.f32 %v2920_v42, 0.0  ;;  %v8496_v20 = vld [vmem:[%s14774_s12 + $0xc] sm:$0xf] }
 0x518   : > { %v3003_v24 = vmax.f32 %v2969_v34, 0.0 }
 0x51a   : > { %4094 = vmatpush.bf16.msrb.mxu3 %v8087_v28  ;;  %v8028_v28 = vld [vmem:[%s14774_s12 + $0x1e4] sm:$0xf0] }
 0x51b   : > { %4046 = vmatpush.bf16.msrb.mxu2 %v7835_v29  ;;  %v8031_v63 = vor.u32 %v8552_v39, %v8028_v28  ;;  %v6786_v28 = vpop.permute.xlu1 %6785 }
 0x51c   : > { %v8700_v33 = vpop.eup %8699  ;;  %v2921_v31 = vpop.f32.mrf.mxu2 }
 0x51d   : > { %v2970_v2 = vpop.f32.mrf.mxu3  ;;  %v2922_v35 = vadd.f32 %v2921_v31, %v11219_v51  ;;  %6815 = vrot.lane.b32.xlu1 %v8700_v33, %s9193_s26  ;;  %v7807_v31 = vor.u32 %v8496_v20, %v7804_v3 }
 0x51e   : > { %v2971_v25 = vadd.f32 %v2970_v2, %v11221_v49  ;;  %4095 = vmatpush.bf16.msrb.mxu3 %v8059_v16 }
 0x51f   : > { %v3004_v19 = vmax.f32 %v2922_v35, 0.0  ;;  %4047 = vmatpush.bf16.msrb.mxu2 %v7807_v31 }
 0x520   : > { %v3005_v42 = vmax.f32 %v2971_v25, 0.0 }
 0x521   : > { %v11534_v29 = vpack.c.bf16 %v3004_v19, %v3002_v59 }
 0x522   : > { %v11536_v53 = vpack.c.bf16 %v3005_v42, %v3003_v24  ;;  %4096 = vmatpush.bf16.msrb.mxu3 %v8031_v63 }
 0x523   : > { %14897 = vst [vmem:[#allocation28_spill] sm:$0xff] %v11534_v29  ;;  %3784 = vmatmul.bf16.gmra.mxu0 %v11534_v29  ;;  %3882 = vmatmul.bf16.gmra.mxu2 %v11534_v29 }
 0x524   : > { %14898 = vst [vmem:[#allocation29_spill] sm:$0xff] %v11536_v53  ;;  %3833 = vmatmul.bf16.gmra.mxu1 %v11536_v53  ;;  %3931 = vmatmul.bf16.gmra.mxu3 %v11536_v53  ;;  %v2924_v34 = vpop.f32.mrf.mxu2 }
 0x525   : > { %v2973_v33 = vpop.f32.mrf.mxu3  ;;  %v2925_v2 = vadd.f32 %v2924_v34, %v11219_v51  ;;  %v3154_v34 = vld [vmem:[%s14775_s13] sm:$0xff] }
 0x526   : > { %v2974_v59 = vadd.f32 %v2973_v33, %v11221_v49 }
 0x527   : > { %v3006_v3 = vmax.f32 %v2925_v2, 0.0  ;;  %v6790_v63 = vpop.permute.xlu0 %6789 }
 0x528   : > { %v3007_v39 = vmax.f32 %v2974_v59, 0.0  ;;  %v11559_v59 = vperm.slane %v3154_v34, 0 }
 0x52c   : > { %v2926_v35 = vpop.f32.mrf.mxu2 }
 0x52d   : > { %v2975_v25 = vpop.f32.mrf.mxu3  ;;  %v2927_v16 = vadd.f32 %v2926_v35, %v11219_v51  ;;  %v6834_v51 = vsel %vm6833_vm4, %v6786_v28, 0.0 }
 0x52e   : > { %v2976_v20 = vadd.f32 %v2975_v25, %v11221_v49  ;;  %v6788_v49 = vpop.permute.xlu2 %6787 }
 0x52f   : > { %v3008_v24 = vmax.f32 %v2927_v16, 0.0  ;;  %v6792_v33 = vpop.permute.xlu1 %6791  ;;  %v6837_v2 = vsel %vm6833_vm4, %v6788_v49, 0.0 }
 0x530   : > { %v3009_v19 = vmax.f32 %v2976_v20, 0.0  ;;  %v6843_v35 = vsel %vm6833_vm4, %v6792_v33, 0.0 }
 0x531   : > { %v11546_v42 = vpack.c.bf16 %v3008_v24, %v3006_v3  ;;  %v8006_v3 = vld [vmem:[%s14774_s12 + $0x198] sm:$0xf] }
 0x532   : > { %v11548_v31 = vpack.c.bf16 %v3009_v19, %v3007_v39  ;;  %v8549_v39 = vld [vmem:[%s14774_s12 + $0x1b0] sm:$0xf0]  ;;  %v8230_v24 = vld [vmem:[%s14774_s12 + $0x358] sm:$0xf] }
 0x533   : > { %14899 = vst [vmem:[#allocation30_spill] sm:$0xff] %v11546_v42  ;;  %3789 = vmatmul.bf16.gmra.mxu0 %v11546_v42  ;;  %3887 = vmatmul.bf16.gmra.mxu2 %v11546_v42  ;;  %v8007_v28 = vor.u32 %v8549_v39, %v8006_v3  ;;  %v6840_v3 = vsel %vm6833_vm4, %v6790_v63, 0.0 }
 0x534   : > { %14900 = vst [vmem:[#allocation31_spill] sm:$0xff] %v11548_v31  ;;  %3838 = vmatmul.bf16.gmra.mxu1 %v11548_v31  ;;  %3936 = vmatmul.bf16.gmra.mxu3 %v11548_v31 }
 0x535   : > { %4138 = vmatpush.bf16.msrb.mxu0 %v8007_v28 }
 0x537   : > { %6835 = vadd.xlane.f32.xlu0 %v6834_v51  ;;  %v6794_v19 = vpop.permute.xlu0 %6793  ;;  %v8605_v51 = vld [vmem:[%s14774_s12 + $0x370] sm:$0xf0] }
 0x538   : > { %v8231_v33 = vor.u32 %v8605_v51, %v8230_v24 }
 0x53a   : > { %4187 = vmatpush.bf16.msrb.mxu1 %v8231_v33  ;;  %v6796_v33 = vpop.permute.xlu2 %6795 }
 0x53e   : > { %6838 = vadd.xlane.f32.xlu2 %v6837_v2  ;;  %v11579_v2 = vperm.slane %v3154_v34, 1 }
 0x53f   : > { %6844 = vadd.xlane.f32.xlu0 %v6843_v35 }
 0x540   : > { %v3755_v25 = vpop.f32.mrf.mxu0 }
 0x541   : > { %v3804_v16 = vpop.f32.mrf.mxu1  ;;  %v3756_v20 = vadd.f32 %v3755_v25, %v11559_v59  ;;  %v6846_v25 = vsel %vm6833_vm4, %v6794_v19, 0.0 }
 0x543   : > { %v3805_v49 = vadd.f32 %v3804_v16, %v3756_v20  ;;  %3950 = vmatmul.bf16.vlgmr.msra.gmra.mxu0 %v11238_v37  ;;  %4048 = vmatmul.bf16.vlgmr.msrb.gmra.mxu2 %v11238_v37 }
 0x544   : > { %3999 = vmatmul.bf16.vlgmr.msra.gmra.mxu1 %v11240_v8  ;;  %4097 = vmatmul.bf16.vlgmr.msrb.gmra.mxu3 %v11240_v8 }
 0x545   : > { %v8240_v35 = vmul.f32 -1.442695, %v3805_v49 }
 0x546   : > { %6847 = vadd.xlane.f32.xlu2 %v6846_v25  ;;  %v3853_v16 = vpop.f32.mrf.mxu2 }
 0x547   : > { %8701 = vpow2.f32 %v8240_v35  ;;  %v3902_v20 = vpop.f32.mrf.mxu3  ;;  %6841 = vadd.xlane.f32.xlu1 %v6840_v3  ;;  %v3854_v39 = vadd.f32 %v3853_v16, %v11579_v2  ;;  %v6798_v24 = vpop.permute.xlu1 %6797  ;;  %v6849_v3 = vsel %vm6833_vm4, %v6796_v33, 0.0 }
 0x548   : > { %v3757_v51 = vpop.f32.mrf.mxu0  ;;  %v6852_v49 = vsel %vm6833_vm4, %v6798_v24, 0.0 }
 0x549   : > { %v3758_v50 = vadd.f32 %v3757_v51, %v11559_v59  ;;  %v3806_v34 = vpop.f32.mrf.mxu1  ;;  %v3903_v28 = vadd.f32 %v3902_v20, %v3854_v39  ;;  %6853 = vadd.xlane.f32.xlu0 %v6852_v49 }
 0x54b   : > { %v3807_v19 = vadd.f32 %v3806_v34, %v3758_v50  ;;  %v8241_v25 = vmul.f32 -1.442695, %v3903_v28 }
 0x54d   : > { %v8702_v21 = vpop.eup %8701  ;;  %v8247_v63 = vmul.f32 -1.442695, %v3807_v19  ;;  %8703 = vpow2.f32 %v8241_v25  ;;  %v7978_v19 = vld [vmem:[%s14774_s12 + $0x160] sm:$0xf]  ;;  %v8542_v25 = vld [vmem:[%s14774_s12 + $0x178] sm:$0xf0] }
 0x54e   : > { %v11586_v35 = vadd.f32 1.0, %v8702_v21  ;;  %v3855_v16 = vpop.f32.mrf.mxu2  ;;  %v6802_v21 = vpop.permute.xlu2 %6801 }
 0x54f   : > { %8705 = vpow2.f32 %v8247_v63  ;;  %v3904_v58 = vpop.f32.mrf.mxu3  ;;  %6850 = vadd.xlane.f32.xlu1 %v6849_v3  ;;  %v6800_v51 = vpop.permute.xlu0 %6799  ;;  %v3856_v20 = vadd.f32 %v3855_v16, %v11579_v2  ;;  %v7979_v16 = vor.u32 %v8542_v25, %v7978_v19 }
 0x550   : > { %8707 = vrcp.f32 %v11586_v35  ;;  %v3760_v24 = vpop.f32.mrf.mxu0  ;;  %v6855_v34 = vsel %vm6833_vm4, %v6800_v51, 0.0  ;;  %vm4885_vm6 = vweird.f32 %v11586_v35 }
 0x551   : > { %v3761_v50 = vadd.f32 %v3760_v24, %v11559_v59  ;;  %v3809_v39 = vpop.f32.mrf.mxu1  ;;  %6856 = vadd.xlane.f32.xlu2 %v6855_v34  ;;  %v3905_v49 = vadd.f32 %v3904_v58, %v3856_v20  ;;  %4139 = vmatpush.bf16.msrb.mxu0 %v7979_v16  ;;  %v8202_v34 = vld [vmem:[%s14774_s12 + $0x320] sm:$0xf] }
 0x553   : > { %v3810_v28 = vadd.f32 %v3809_v39, %v3761_v50  ;;  %3955 = vmatmul.bf16.gmra.mxu0 %v11272_v43  ;;  %v8704_v33 = vpop.eup %8703  ;;  %4053 = vmatmul.bf16.gmra.mxu2 %v11272_v43  ;;  %v8248_v3 = vmul.f32 -1.442695, %v3905_v49  ;;  %v6858_v50 = vsel %vm6833_vm4, %v6802_v21, 0.0  ;;  %v8598_v49 = vld [vmem:[%s14774_s12 + $0x338] sm:$0xf0] }
 0x554   : > { %4004 = vmatmul.bf16.gmra.mxu1 %v11274_v10  ;;  %4102 = vmatmul.bf16.gmra.mxu3 %v11274_v10  ;;  %v11603_v58 = vadd.f32 1.0, %v8704_v33  ;;  %v8203_v36 = vor.u32 %v8598_v49, %v8202_v34 }
 0x555   : > { %v8706_v63 = vpop.eup %8705  ;;  %v8254_v20 = vmul.f32 -1.442695, %v3810_v28  ;;  %v4889_v28 = vand.u32 2147483647, %v11586_v35 }
 0x556   : > { %v8708_v51 = vpop.eup %8707  ;;  %v11605_v24 = vadd.f32 1.0, %v8706_v63  ;;  %8709 = vrcp.f32 %v11603_v58  ;;  %v3858_v33 = vpop.f32.mrf.mxu2  ;;  %v4891_v63 = vand.u32 2147483648, %v11586_v35  ;;  %4188 = vmatpush.bf16.msrb.mxu1 %v8203_v36  ;;  %v4906_v36 = vand.u32 2147483648, %v11603_v58 }
 0x557   : > { %v4881_v39 = vmul.f32 %v8708_v51, %v11586_v35  ;;  %v3907_v19 = vpop.f32.mrf.mxu3  ;;  %6859 = vadd.xlane.f32.xlu1 %v6858_v50  ;;  %vm4886_vm5 = vweird.f32 %v8708_v51  ;;  %v3859_v61 = vadd.f32 %v3858_v33, %v11579_v2  ;;  %v6808_v4 = vpop.permute.xlu2 %6807  ;;  %vm11621_vm7 = vcmp.eq.f32.partialorder %v4889_v28, 8.507059e+37 }
 0x558   : > { %8711 = vrcp.f32 %v11605_v24  ;;  %v3762_v21 = vpop.f32.mrf.mxu0  ;;  %v4892_v46 = vor.u32 1.1754944e-38, %v4891_v63  ;;  %vm4887_vm8 = vmor %vm4885_vm6, %vm4886_vm5  ;;  %vm4900_vm10 = vweird.f32 %v11603_v58  ;;  %vm4990_vm13 = vweird.f32 %v11605_v24 }
 0x559   : > { %v4882_v25 = vsub.f32 1.0, %v4881_v39  ;;  %8713 = vpow2.f32 %v8248_v3  ;;  %v3811_v16 = vpop.f32.mrf.mxu1  ;;  %v3763_v39 = vadd.f32 %v3762_v21, %v11559_v59  ;;  %v3908_v34 = vadd.f32 %v3907_v19, %v3859_v61 }
 0x55a   : > { %8715 = vpow2.f32 %v8254_v20  ;;  %v4904_v20 = vand.u32 2147483647, %v11603_v58  ;;  %v4994_v19 = vand.u32 2147483647, %v11605_v24 }
 0x55b   : > { %v4883_v22 = vmul.f32 %v8708_v51, %v4882_v25  ;;  %v3812_v33 = vadd.f32 %v3811_v16, %v3763_v39  ;;  %v8255_v25 = vmul.f32 -1.442695, %v3908_v34 }
 0x55c   : > { %v8710_v38 = vpop.eup %8709  ;;  %vm11658_vm12 = vcmp.eq.f32.partialorder %v4904_v20, 8.507059e+37  ;;  %vm11667_vm15 = vcmp.eq.f32.partialorder %v4994_v19, 8.507059e+37  ;;  %v7950_v19 = vld [vmem:[%s14774_s12 + $0x128] sm:$0xf] }
 0x55d   : > { %v4884_v3 = vadd.f32 %v8708_v51, %v4883_v22  ;;  %v4896_v35 = vmul.f32 %v8710_v38, %v11603_v58  ;;  %v6867_v22 = vsel %vm6833_vm4, %v6808_v4, 0.0  ;;  %v8261_v39 = vmul.f32 -1.442695, %v3812_v33 }
 0x55e   : > { %v11627_v49 = vpop.eup %8711  ;;  %v3860_v63 = vpop.f32.mrf.mxu2  ;;  %8717 = vpow2.f32 %v8255_v25  ;;  %vm4901_vm9 = vweird.f32 %v8710_v38 }
 0x55f   : > { %v8714_v28 = vpop.eup %8713  ;;  %v4888_v21 = vsel %vm4887_vm8, %v8708_v51, %v4884_v3  ;;  %v4986_v61 = vmul.f32 %v11627_v49, %v11605_v24  ;;  %v3909_v55 = vpop.f32.mrf.mxu3  ;;  %6868 = vadd.xlane.f32.xlu1 %v6867_v22  ;;  %v4897_v0 = vsub.f32 1.0, %v4896_v35  ;;  %v3861_v54 = vadd.f32 %v3860_v63, %v11579_v2  ;;  %vm4902_vm14 = vmor %vm4900_vm10, %vm4901_vm9  ;;  %v8591_v35 = vld [vmem:[%s14774_s12 + $0x300] sm:$0xf0] }
 0x560   : > { %v8716_v26 = vpop.eup %8715  ;;  %v4893_v12 = vsel %vm11621_vm7, %v4892_v46, %v4888_v21  ;;  %v11644_v16 = vadd.f32 1.0, %v8714_v28  ;;  %v3765_v4 = vpop.f32.mrf.mxu0  ;;  %v4996_v22 = vand.u32 2147483648, %v11605_v24  ;;  %vm4991_vm11 = vweird.f32 %v11627_v49 }
 0x561   : > { %6560 = vst [vmem:[%s11634_s24] sm:$0xff] %v4893_v12  ;;  %v4987_v51 = vsub.f32 1.0, %v4986_v61  ;;  %v11647_v3 = vadd.f32 1.0, %v8716_v26  ;;  %v3814_v34 = vpop.f32.mrf.mxu1  ;;  %v4898_v23 = vmul.f32 %v8710_v38, %v4897_v0  ;;  %v4907_v0 = vor.u32 1.1754944e-38, %v4906_v36  ;;  %v6804_v50 = vpop.permute.xlu1 %6803  ;;  %vm11673_vm0 = vmor %vm4990_vm13, %vm4991_vm11 }
 0x562   : > { %8719 = vrcp.f32 %v11644_v16  ;;  %v4997_v36 = vor.u32 1.1754944e-38, %v4996_v22  ;;  %v5009_v33 = vand.u32 2147483647, %v11644_v16  ;;  %v3766_v28 = vadd.f32 %v3765_v4, %v11559_v59  ;;  %v8535_v22 = vld [vmem:[%s14774_s12 + $0x140] sm:$0xf0] }
 0x563   : > { %v4988_v46 = vmul.f32 %v11627_v49, %v4987_v51  ;;  %8721 = vrcp.f32 %v11647_v3  ;;  %3960 = vmatmul.bf16.gmra.mxu0 %v11306_v40  ;;  %v4899_v26 = vadd.f32 %v8710_v38, %v4898_v23  ;;  %4058 = vmatmul.bf16.gmra.mxu2 %v11306_v40  ;;  %v3910_v23 = vadd.f32 %v3909_v55, %v3861_v54 }
 0x564   : > { %4009 = vmatmul.bf16.gmra.mxu1 %v11308_v30  ;;  %4107 = vmatmul.bf16.gmra.mxu3 %v11308_v30  ;;  %8723 = vpow2.f32 %v8261_v39  ;;  %v8718_v21 = vpop.eup %8717  ;;  %vm5005_vm1 = vweird.f32 %v11644_v16  ;;  %vm5095_vm2 = vweird.f32 %v11647_v3  ;;  %v5099_v24 = vand.u32 2147483647, %v11647_v3 }
 0x565   : > { %v4989_v58 = vadd.f32 %v11627_v49, %v4988_v46  ;;  %v4903_v20 = vsel %vm4902_vm14, %v8710_v38, %v4899_v26  ;;  %v8262_v54 = vmul.f32 -1.442695, %v3910_v23  ;;  %v6861_v38 = vsel %vm6833_vm4, %v6804_v50, 0.0 }
 0x566   : > { %v4908_v61 = vsel %vm11658_vm12, %v4907_v0, %v4903_v20  ;;  %v3863_v25 = vpop.f32.mrf.mxu2  ;;  %v11694_v51 = vadd.f32 1.0, %v8718_v21  ;;  %6862 = vadd.xlane.f32.xlu0 %v6861_v38  ;;  %v5011_v50 = vand.u32 2147483648, %v11644_v16  ;;  %vm11714_vm3 = vcmp.eq.f32.partialorder %v5009_v33, 8.507059e+37 }
 0x567   : > { %v4993_v55 = vsel %vm11673_vm0, %v11627_v49, %v4989_v58  ;;  %v3912_v63 = vpop.f32.mrf.mxu3  ;;  %6561 = vst [vmem:[%s11634_s24 + $0x8] sm:$0xff] %v4908_v61  ;;  %v3815_v49 = vadd.f32 %v3814_v34, %v3766_v28  ;;  %v3864_v46 = vadd.f32 %v3863_v25, %v11579_v2  ;;  %8725 = vpow2.f32 %v8262_v54  ;;  %v8174_v34 = vld [vmem:[%s14774_s12 + $0x2e8] sm:$0xf] }
 0x568   : > { %v11689_v39 = vpop.eup %8719  ;;  %v4998_v4 = vsel %vm11667_vm15, %v4997_v36, %v4993_v55  ;;  %v3767_v26 = vpop.f32.mrf.mxu0  ;;  %v7951_v58 = vor.u32 %v8535_v22, %v7950_v19  ;;  %8727 = vrcp.f32 %v11694_v51  ;;  %v5101_v61 = vand.u32 2147483648, %v11647_v3 }
 0x569   : > { %v8722_v12 = vpop.eup %8721  ;;  %6567 = vst [vmem:[%s11634_s24 + $0x38] sm:$0xff] %v4998_v4  ;;  %v5001_v0 = vmul.f32 %v11689_v39, %v11644_v16  ;;  %v3816_v23 = vpop.f32.mrf.mxu1  ;;  %v8268_v55 = vmul.f32 -1.442695, %v3815_v49  ;;  %v8175_v19 = vor.u32 %v8591_v35, %v8174_v34  ;;  %v3913_v25 = vadd.f32 %v3912_v63, %v3864_v46 }
 0x56a   : > { %v5091_v20 = vmul.f32 %v8722_v12, %v11647_v3  ;;  %v8724_v36 = vpop.eup %8723  ;;  %4140 = vmatpush.bf16.msrb.mxu0 %v7951_v58  ;;  %vm5006_vm5 = vweird.f32 %v11689_v39  ;;  %v5012_v22 = vor.u32 1.1754944e-38, %v5011_v50  ;;  %vm5096_vm6 = vweird.f32 %v8722_v12 }
 0x56b   : > { %v5002_v28 = vsub.f32 1.0, %v5001_v0  ;;  %v11719_v38 = vadd.f32 1.0, %v8724_v36  ;;  %8729 = vpow2.f32 %v8268_v55  ;;  %v6806_v0 = vpop.permute.xlu0 %6805  ;;  %vm11723_vm7 = vcmp.eq.f32.partialorder %v5099_v24, 8.507059e+37  ;;  %4189 = vmatpush.bf16.msrb.mxu1 %v8175_v19  ;;  %vm5007_vm8 = vmor %vm5005_vm1, %vm5006_vm5 }
 0x56c   : > { %v5092_v54 = vsub.f32 1.0, %v5091_v20  ;;  %v5102_v63 = vor.u32 1.1754944e-38, %v5101_v61  ;;  %v5114_v46 = vand.u32 2147483647, %v11694_v51  ;;  %v8269_v34 = vmul.f32 -1.442695, %v3913_v25  ;;  %vm5097_vm9 = vmor %vm5095_vm2, %vm5096_vm6 }
 0x56d   : > { %v5003_v4 = vmul.f32 %v11689_v39, %v5002_v28  ;;  %8731 = vrcp.f32 %v11719_v38  ;;  %v8726_v49 = vpop.eup %8725  ;;  %v3768_v28 = vadd.f32 %v3767_v26, %v11559_v59  ;;  %v6864_v61 = vsel %vm6833_vm4, %v6806_v0, 0.0 }
 0x56e   : > { %v5093_v33 = vmul.f32 %v8722_v12, %v5092_v54  ;;  %v3865_v35 = vpop.f32.mrf.mxu2  ;;  %v11730_v20 = vpop.eup %8727  ;;  %v11736_v36 = vadd.f32 1.0, %v8726_v49  ;;  %v5116_v16 = vand.u32 2147483648, %v11694_v51  ;;  %v5204_v25 = vand.u32 2147483647, %v11719_v38  ;;  %6865 = vadd.xlane.f32.xlu2 %v6864_v61 }
 0x56f   : > { %v5004_v58 = vadd.f32 %v11689_v39, %v5003_v4  ;;  %v3914_v50 = vpop.f32.mrf.mxu3  ;;  %v5106_v19 = vmul.f32 %v11730_v20, %v11694_v51  ;;  %vm5110_vm10 = vweird.f32 %v11694_v51  ;;  %vm11756_vm11 = vcmp.eq.f32.partialorder %v5114_v46, 8.507059e+37  ;;  %v6814_v61 = vpop.permute.xlu2 %6813 }
 0x570   : > { %v5094_v24 = vadd.f32 %v8722_v12, %v5093_v33  ;;  %v3770_v55 = vpop.f32.mrf.mxu0  ;;  %8733 = vrcp.f32 %v11736_v36  ;;  %v3866_v32 = vadd.f32 %v3865_v35, %v11579_v2  ;;  %vm5111_vm12 = vweird.f32 %v11730_v20 }
 0x571   : > { %v5008_v54 = vsel %vm5007_vm8, %v11689_v39, %v5004_v58  ;;  %v3819_v4 = vpop.f32.mrf.mxu1  ;;  %v5206_v39 = vand.u32 2147483648, %v11719_v38  ;;  %v8730_v3 = vpop.eup %8729  ;;  %v5107_v49 = vsub.f32 1.0, %v5106_v19  ;;  %8735 = vpow2.f32 %v8269_v34  ;;  %vm5112_vm15 = vmor %vm5110_vm10, %vm5111_vm12 }
 0x572   : > { %v5013_v26 = vsel %vm11714_vm3, %v5012_v22, %v5008_v54  ;;  %v5098_v0 = vsel %vm5097_vm9, %v8722_v12, %v5094_v24  ;;  %v11763_v21 = vadd.f32 1.0, %v8730_v3  ;;  %v3817_v22 = vadd.f32 %v3816_v23, %v3768_v28 }
 0x573   : > { %6568 = vst [vmem:[%s11634_s24 + $0x40] sm:$0xff] %v5013_v26  ;;  %v5103_v33 = vsel %vm11723_vm7, %v5102_v63, %v5098_v0  ;;  %3965 = vmatmul.bf16.gmra.mxu0 %v11340_v15  ;;  %v8732_v12 = vpop.eup %8731  ;;  %4063 = vmatmul.bf16.gmra.mxu2 %v11340_v15  ;;  %v5108_v63 = vmul.f32 %v11730_v20, %v5107_v49  ;;  %v5117_v46 = vor.u32 1.1754944e-38, %v5116_v16  ;;  %vm5200_vm13 = vweird.f32 %v11719_v38 }
 0x574   : > { %4014 = vmatmul.bf16.gmra.mxu1 %v11342_v47  ;;  %6574 = vst [vmem:[%s11634_s24 + $0x70] sm:$0xff] %v5103_v33  ;;  %4112 = vmatmul.bf16.gmra.mxu3 %v11342_v47  ;;  %v5196_v24 = vmul.f32 %v8732_v12, %v11719_v38  ;;  %vm11772_vm14 = vcmp.eq.f32.partialorder %v5204_v25, 8.507059e+37  ;;  %v5207_v23 = vor.u32 1.1754944e-38, %v5206_v39  ;;  %8737 = vrcp.f32 %v11763_v21 }
 0x575   : > { %v5109_v34 = vadd.f32 %v11730_v20, %v5108_v63  ;;  %v5219_v28 = vand.u32 2147483647, %v11736_v36  ;;  %v8275_v19 = vmul.f32 -1.442695, %v3817_v22  ;;  %v5221_v25 = vand.u32 2147483648, %v11736_v36 }
 0x576   : > { %v5197_v35 = vsub.f32 1.0, %v5196_v24  ;;  %v3868_v26 = vpop.f32.mrf.mxu2  ;;  %v11779_v0 = vpop.eup %8733  ;;  %v3915_v39 = vadd.f32 %v3914_v50, %v3866_v32  ;;  %v3771_v3 = vadd.f32 %v3770_v55, %v11559_v59  ;;  %v6876_v33 = vsel %vm6833_vm4, %v6814_v61, 0.0 }
 0x577   : > { %v3917_v16 = vpop.f32.mrf.mxu3  ;;  %v5113_v22 = vsel %vm5112_vm15, %v11730_v20, %v5109_v34  ;;  %vm5201_vm0 = vweird.f32 %v8732_v12  ;;  %v5211_v24 = vmul.f32 %v11779_v0, %v11736_v36  ;;  %6877 = vadd.xlane.f32.xlu1 %v6876_v33  ;;  %v8736_v51 = vpop.eup %8735  ;;  %vm5215_vm1 = vweird.f32 %v11736_v36 }
 0x578   : > { %v3772_v49 = vpop.f32.mrf.mxu0  ;;  %v5198_v63 = vmul.f32 %v8732_v12, %v5197_v35  ;;  %v5118_v15 = vsel %vm11756_vm11, %v5117_v46, %v5113_v22  ;;  %8739 = vpow2.f32 %v8275_v19  ;;  %v8276_v50 = vmul.f32 -1.442695, %v3915_v39  ;;  %vm5202_vm2 = vmor %vm5200_vm13, %vm5201_vm0 }
 0x579   : > { %v3821_v47 = vpop.f32.mrf.mxu1  ;;  %6575 = vst [vmem:[%s11634_s24 + $0x78] sm:$0xff] %v5118_v15  ;;  %v5212_v32 = vsub.f32 1.0, %v5211_v24  ;;  %v11795_v61 = vadd.f32 1.0, %v8736_v51  ;;  %v3820_v20 = vadd.f32 %v3819_v4, %v3771_v3  ;;  %vm11802_vm3 = vcmp.eq.f32.partialorder %v5219_v28, 8.507059e+37  ;;  %v7922_v15 = vld [vmem:[%s14774_s12 + $0xf0] sm:$0xf] }
 0x57a   : > { %v5199_v55 = vadd.f32 %v8732_v12, %v5198_v63  ;;  %v11797_v34 = vpop.eup %8737  ;;  %v5222_v58 = vor.u32 1.1754944e-38, %v5221_v25  ;;  %8741 = vpow2.f32 %v8276_v50  ;;  %v3869_v46 = vadd.f32 %v3868_v26, %v11579_v2  ;;  %v8528_v28 = vld [vmem:[%s14774_s12 + $0x108] sm:$0xf0]  ;;  %v8146_v25 = vld [vmem:[%s14774_s12 + $0x2b0] sm:$0xf] }
 0x57b   : > { %v5213_v19 = vmul.f32 %v11779_v0, %v5212_v32  ;;  %vm5216_vm5 = vweird.f32 %v11779_v0  ;;  %v5301_v38 = vmul.f32 %v11797_v34, %v11763_v21  ;;  %v8584_v26 = vld [vmem:[%s14774_s12 + $0x2c8] sm:$0xf0]  ;;  %v5309_v39 = vand.u32 2147483647, %v11763_v21 }
 0x57c   : > { %v5203_v4 = vsel %vm5202_vm2, %v8732_v12, %v5199_v55  ;;  %8743 = vrcp.f32 %v11795_v61  ;;  %v3773_v3 = vadd.f32 %v3772_v49, %v11559_v59  ;;  %v5311_v63 = vand.u32 2147483648, %v11763_v21  ;;  %vm5217_vm6 = vmor %vm5215_vm1, %vm5216_vm5 }
 0x57d   : > { %v5208_v12 = vsel %vm11772_vm14, %v5207_v23, %v5203_v4  ;;  %v5214_v33 = vadd.f32 %v11779_v0, %v5213_v19  ;;  %v5302_v22 = vsub.f32 1.0, %v5301_v38  ;;  %v8282_v24 = vmul.f32 -1.442695, %v3820_v20 }
 0x57e   : > { %6581 = vst [vmem:[%s11634_s24 + $0xa8] sm:$0xff] %v5208_v12  ;;  %v3870_v51 = vpop.f32.mrf.mxu2  ;;  %v8740_v55 = vpop.eup %8739  ;;  %vm5306_vm7 = vweird.f32 %v11797_v34  ;;  %v7923_v54 = vor.u32 %v8528_v28, %v7922_v15  ;;  %v8147_v23 = vor.u32 %v8584_v26, %v8146_v25  ;;  %v3918_v49 = vadd.f32 %v3917_v16, %v3869_v46 }
 0x57f   : > { %v11831_v50 = vpop.f32.mrf.mxu3  ;;  %v5218_v4 = vsel %vm5217_vm6, %v11779_v0, %v5214_v33  ;;  %v5303_v20 = vmul.f32 %v11797_v34, %v5302_v22  ;;  %v5324_v19 = vand.u32 2147483647, %v11795_v61  ;;  %v11841_v38 = vadd.f32 1.0, %v8740_v55  ;;  %v6810_v26 = vpop.permute.xlu1 %6809 }
 0x580   : > { %v3775_v32 = vpop.f32.mrf.mxu0  ;;  %v8742_v18 = vpop.eup %8741  ;;  %v5223_v36 = vsel %vm11802_vm3, %v5222_v58, %v5218_v4  ;;  %8745 = vpow2.f32 %v8282_v24  ;;  %4141 = vmatpush.bf16.msrb.mxu0 %v7923_v54  ;;  %4190 = vmatpush.bf16.msrb.mxu1 %v8147_v23  ;;  %v8283_v15 = vmul.f32 -1.442695, %v3918_v49  ;;  %v3822_v16 = vadd.f32 %v3821_v47, %v3773_v3 }
 0x581   : > { %v11843_v12 = vpop.f32.mrf.mxu1  ;;  %6582 = vst [vmem:[%s11634_s24 + $0xb0] sm:$0xff] %v5223_v36  ;;  %v5304_v0 = vadd.f32 %v11797_v34, %v5303_v20  ;;  %vm5305_vm8 = vweird.f32 %v11763_v21  ;;  %v5326_v46 = vand.u32 2147483648, %v11795_v61  ;;  %8747 = vrcp.f32 %v11841_v38  ;;  %v6812_v3 = vpop.permute.xlu0 %6811 }
 0x582   : > { %v8744_v35 = vpop.eup %8743  ;;  %vm5307_vm9 = vmor %vm5305_vm8, %vm5306_vm7  ;;  %v5312_v58 = vor.u32 1.1754944e-38, %v5311_v63  ;;  %v11856_v47 = vadd.f32 1.0, %v8742_v18  ;;  %8749 = vpow2.f32 %v8283_v15  ;;  %v8289_v28 = vmul.f32 -1.442695, %v3822_v16 }
 0x583   : > { %3970 = vmatmul.bf16.gmra.mxu0 %v11374_v5  ;;  %4068 = vmatmul.bf16.gmra.mxu2 %v11374_v5  ;;  %v5308_v21 = vsel %vm5307_vm9, %v11797_v34, %v5304_v0  ;;  %vm5310_vm10 = vcmp.eq.f32.partialorder %v5309_v39, 8.507059e+37  ;;  %v5316_v25 = vmul.f32 %v8744_v35, %v11795_v61  ;;  %vm5320_vm11 = vweird.f32 %v11795_v61 }
 0x584   : > { %4019 = vmatmul.bf16.gmra.mxu1 %v11376_v57  ;;  %4117 = vmatmul.bf16.gmra.mxu3 %v11376_v57  ;;  %v5313_v33 = vsel %vm5310_vm10, %v5312_v58, %v5308_v21  ;;  %vm11863_vm12 = vcmp.eq.f32.partialorder %v5324_v19, 8.507059e+37  ;;  %v5414_v18 = vand.u32 2147483647, %v11841_v38  ;;  %8751 = vrcp.f32 %v11856_v47 }
 0x585   : > { %6588 = vst [vmem:[%s11634_s24 + $0xe0] sm:$0xff] %v5313_v33  ;;  %v5317_v63 = vsub.f32 1.0, %v5316_v25  ;;  %v5327_v24 = vor.u32 1.1754944e-38, %v5326_v46  ;;  %v5416_v34 = vand.u32 2147483648, %v11841_v38  ;;  %8753 = vpow2.f32 %v8289_v28 }
 0x586   : > { %v11871_v39 = vpop.f32.mrf.mxu2  ;;  %v8746_v54 = vpop.eup %8745  ;;  %v6870_v23 = vsel %vm6833_vm4, %v6810_v26, 0.0  ;;  %v3871_v49 = vadd.f32 %v3870_v51, %v11579_v2  ;;  %v3776_v4 = vadd.f32 %v3775_v32, %v11559_v59  ;;  %v6873_v20 = vsel %vm6833_vm4, %v6812_v3, 0.0 }
 0x587   : > { %v11873_v55 = vpop.f32.mrf.mxu3  ;;  %v8748_v36 = vpop.eup %8747  ;;  %v5318_v15 = vmul.f32 %v8744_v35, %v5317_v63  ;;  %vm5321_vm13 = vweird.f32 %v8744_v35  ;;  %v5429_v16 = vand.u32 2147483647, %v11856_v47  ;;  %v11882_v0 = vadd.f32 1.0, %v8746_v54  ;;  %6871 = vadd.xlane.f32.xlu0 %v6870_v23  ;;  %6874 = vadd.xlane.f32.xlu2 %v6873_v20 }
 0x588   : > { %v11879_v19 = vpop.f32.mrf.mxu0  ;;  %v8750_v58 = vpop.eup %8749  ;;  %v5406_v51 = vmul.f32 %v8748_v36, %v11841_v38  ;;  %vm5410_vm14 = vweird.f32 %v11841_v38  ;;  %vm11888_vm15 = vcmp.eq.f32.partialorder %v5414_v18, 8.507059e+37  ;;  %v3920_v28 = vadd.f32 %v11831_v50, %v3871_v49  ;;  %vm5322_vm0 = vmor %vm5320_vm11, %vm5321_vm13 }
 0x589   : > { %v11884_v46 = vpop.f32.mrf.mxu1  ;;  %v5319_v21 = vadd.f32 %v8744_v35, %v5318_v15  ;;  %v5417_v25 = vor.u32 1.1754944e-38, %v5416_v34  ;;  %v5431_v26 = vand.u32 2147483648, %v11856_v47  ;;  %8755 = vrcp.f32 %v11882_v0 }
 0x58a   : > { %v11895_v3 = vpop.eup %8751  ;;  %v5407_v33 = vsub.f32 1.0, %v5406_v51  ;;  %v11900_v18 = vadd.f32 1.0, %v8750_v58  ;;  %v8290_v63 = vmul.f32 -1.442695, %v3920_v28  ;;  %v3825_v54 = vadd.f32 %v11843_v12, %v3776_v4  ;;  %v7894_v12 = vld [vmem:[%s14774_s12 + $0xb8] sm:$0xf] }
 0x58b   : > { %v8754_v50 = vpop.eup %8753  ;;  %v5323_v23 = vsel %vm5322_vm0, %v8744_v35, %v5319_v21  ;;  %v5421_v34 = vmul.f32 %v11895_v3, %v11856_v47  ;;  %vm5425_vm1 = vweird.f32 %v11856_v47  ;;  %vm11906_vm2 = vcmp.eq.f32.partialorder %v5429_v16, 8.507059e+37  ;;  %v8521_v35 = vld [vmem:[%s14774_s12 + $0xd0] sm:$0xf0] }
 0x58c   : > { %v5328_v61 = vsel %vm11863_vm12, %v5327_v24, %v5323_v23  ;;  %v5408_v20 = vmul.f32 %v8748_v36, %v5407_v33  ;;  %vm5411_vm3 = vweird.f32 %v8748_v36  ;;  %8757 = vrcp.f32 %v11900_v18 }
 0x58d   : > { %6589 = vst [vmem:[%s11634_s24 + $0xe8] sm:$0xff] %v5328_v61  ;;  %v5422_v4 = vsub.f32 1.0, %v5421_v34  ;;  %v5432_v15 = vor.u32 1.1754944e-38, %v5431_v26  ;;  %v5519_v16 = vand.u32 2147483647, %v11882_v0  ;;  %v5521_v22 = vand.u32 2147483648, %v11882_v0  ;;  %vm5412_vm5 = vmor %vm5410_vm14, %vm5411_vm3 }
 0x58e   : > { %v11922_v24 = vpop.f32.mrf.mxu2  ;;  %v5409_v51 = vadd.f32 %v8748_v36, %v5408_v20  ;;  %v11926_v28 = vadd.f32 1.0, %v8754_v50  ;;  %8759 = vpow2.f32 %v8290_v63  ;;  %v8296_v21 = vmul.f32 -1.442695, %v3825_v54  ;;  %v8118_v50 = vld [vmem:[%s14774_s12 + $0x278] sm:$0xf] }
 0x58f   : > { %v11924_v58 = vpop.f32.mrf.mxu3  ;;  %v11928_v33 = vpop.eup %8755  ;;  %v5423_v26 = vmul.f32 %v11895_v3, %v5422_v4  ;;  %vm5426_vm6 = vweird.f32 %v11895_v3  ;;  %v5534_v23 = vand.u32 2147483647, %v11900_v18  ;;  %v7895_v34 = vor.u32 %v8521_v35, %v7894_v12  ;;  %v8577_v63 = vld [vmem:[%s14774_s12 + $0x290] sm:$0xf0] }
 0x590   : > { %v3780_v54 = vpop.f32.mrf.mxu0  ;;  %v5413_v38 = vsel %vm5412_vm5, %v8748_v36, %v5409_v51  ;;  %v5511_v20 = vmul.f32 %v11928_v33, %v11882_v0  ;;  %vm5515_vm7 = vweird.f32 %v11882_v0  ;;  %8761 = vrcp.f32 %v11926_v28  ;;  %vm5427_vm9 = vmor %vm5425_vm1, %vm5426_vm6  ;;  %v6816_v47 = vpop.permute.xlu1 %6815 }
 0x591   : > { %v11942_v61 = vpop.f32.mrf.mxu1  ;;  %v5418_v12 = vsel %vm11888_vm15, %v5417_v25, %v5413_v38  ;;  %v5424_v35 = vadd.f32 %v11895_v3, %v5423_v26  ;;  %vm11951_vm8 = vcmp.eq.f32.partialorder %v5519_v16, 8.507059e+37  ;;  %v5536_v57 = vand.u32 2147483648, %v11900_v18  ;;  %4142 = vmatpush.bf16.msrb.mxu0 %v7895_v34 }
 0x592   : > { %v8758_v36 = vpop.eup %8757  ;;  %6595 = vst [vmem:[%s11634_s24 + $0x118] sm:$0xff] %v5418_v12  ;;  %v5512_v32 = vsub.f32 1.0, %v5511_v20  ;;  %v5522_v25 = vor.u32 1.1754944e-38, %v5521_v22  ;;  %8763 = vpow2.f32 %v8296_v21  ;;  %v8119_v16 = vor.u32 %v8577_v63, %v8118_v50 }
 0x593   : > { %3975 = vmatmul.bf16.gmra.mxu0 %v11456_v11  ;;  %4073 = vmatmul.bf16.gmra.mxu2 %v11456_v11  ;;  %v5428_v51 = vsel %vm5427_vm9, %v11895_v3, %v5424_v35  ;;  %v5526_v26 = vmul.f32 %v8758_v36, %v11900_v18  ;;  %vm5530_vm10 = vweird.f32 %v11900_v18  ;;  %vm11967_vm11 = vcmp.eq.f32.partialorder %v5534_v23, 8.507059e+37 }
 0x594   : > { %4024 = vmatmul.bf16.gmra.mxu1 %v11458_v14  ;;  %4122 = vmatmul.bf16.gmra.mxu3 %v11458_v14  ;;  %v8760_v22 = vpop.eup %8759  ;;  %v5433_v21 = vsel %vm11906_vm2, %v5432_v15, %v5428_v51  ;;  %v5513_v50 = vmul.f32 %v11928_v33, %v5512_v32  ;;  %vm5516_vm12 = vweird.f32 %v11928_v33  ;;  %v3874_v3 = vadd.f32 %v11871_v39, %v11579_v2  ;;  %v7952_v14 = vld [vmem:[%s14774_s12 + $0x144] sm:$0xf0] }
 0x595   : > { %4191 = vmatpush.bf16.msrb.mxu1 %v8119_v16  ;;  %6596 = vst [vmem:[%s11634_s24 + $0x120] sm:$0xff] %v5433_v21  ;;  %v5527_v23 = vsub.f32 1.0, %v5526_v26  ;;  %v5537_v63 = vor.u32 1.1754944e-38, %v5536_v57  ;;  %v5624_v38 = vand.u32 2147483647, %v11926_v28  ;;  %v11980_v20 = vadd.f32 1.0, %v8760_v22  ;;  %vm5517_vm13 = vmor %vm5515_vm7, %vm5516_vm12 }
 0x596   : > { %v3878_v12 = vpop.f32.mrf.mxu2  ;;  %v8762_v35 = vpop.eup %8761  ;;  %v5514_v49 = vadd.f32 %v11928_v33, %v5513_v50  ;;  %v3923_v15 = vadd.f32 %v11873_v55, %v3874_v3  ;;  %v3778_v32 = vadd.f32 %v11879_v19, %v11559_v59  ;;  %v6879_v16 = vsel %vm6833_vm4, %v6816_v47, 0.0 }
 0x597   : > { %v5528_v39 = vmul.f32 %v8758_v36, %v5527_v23  ;;  %vm5531_vm14 = vweird.f32 %v8758_v36  ;;  %v5616_v57 = vmul.f32 %v8762_v35, %v11926_v28  ;;  %8765 = vrcp.f32 %v11980_v20  ;;  %6880 = vadd.xlane.f32.xlu0 %v6879_v16  ;;  %v11991_v51 = vpop.f32.mrf.mxu3 }
 0x598   : > { %v8764_v26 = vpop.eup %8763  ;;  %v5518_v55 = vsel %vm5517_vm13, %v11928_v33, %v5514_v49  ;;  %v5626_v19 = vand.u32 2147483648, %v11926_v28  ;;  %v3876_v47 = vadd.f32 %v11922_v24, %v11579_v2  ;;  %v3781_v0 = vadd.f32 %v3780_v54, %v11559_v59  ;;  %v3782_v23 = vpop.f32.mrf.mxu0  ;;  %vm5532_vm15 = vmor %vm5530_vm10, %vm5531_vm14 }
 0x599   : > { %v5523_v22 = vsel %vm11951_vm8, %v5522_v25, %v5518_v55  ;;  %v5529_v21 = vadd.f32 %v8758_v36, %v5528_v39  ;;  %v5617_v50 = vsub.f32 1.0, %v5616_v57  ;;  %v12000_v3 = vadd.f32 1.0, %v8764_v26  ;;  %v3831_v16 = vpop.f32.mrf.mxu1 }
 0x59a   : > { %6602 = vst [vmem:[%s11634_s24 + $0x150] sm:$0xff] %v5523_v22  ;;  %vm5620_vm0 = vweird.f32 %v11926_v28  ;;  %v5639_v24 = vand.u32 2147483647, %v11980_v20  ;;  %v8297_v33 = vmul.f32 -1.442695, %v3923_v15  ;;  %v3827_v54 = vadd.f32 %v11884_v46, %v3778_v32 }
 0x59b   : > { %v5533_v4 = vsel %vm5532_vm15, %v8758_v36, %v5529_v21  ;;  %v5618_v25 = vmul.f32 %v8762_v35, %v5617_v50  ;;  %vm5621_vm1 = vweird.f32 %v8762_v35  ;;  %8767 = vrcp.f32 %v12000_v3  ;;  %v8514_v28 = vld [vmem:[%s14774_s12 + $0x98] sm:$0xf0] }
 0x59c   : > { %v5538_v49 = vsel %vm11967_vm11, %v5537_v63, %v5533_v4  ;;  %vm12012_vm2 = vcmp.eq.f32.partialorder %v5624_v38, 8.507059e+37  ;;  %v5627_v18 = vor.u32 1.1754944e-38, %v5626_v19  ;;  %8769 = vpow2.f32 %v8297_v33  ;;  %vm5622_vm3 = vmor %vm5620_vm0, %vm5621_vm1  ;;  %v8570_v50 = vld [vmem:[%s14774_s12 + $0x258] sm:$0xf0] }
 0x59d   : > { %v12016_v57 = vpop.eup %8765  ;;  %6603 = vst [vmem:[%s11634_s24 + $0x158] sm:$0xff] %v5538_v49  ;;  %v5619_v15 = vadd.f32 %v8762_v35, %v5618_v25  ;;  %v8303_v26 = vmul.f32 -1.442695, %v3827_v54  ;;  %v3925_v46 = vadd.f32 %v11924_v58, %v3876_v47  ;;  %v3830_v36 = vadd.f32 %v11942_v61, %v3781_v0  ;;  %v7866_v58 = vld [vmem:[%s14774_s12 + $0x80] sm:$0xf] }
 0x59e   : > { %v5631_v34 = vmul.f32 %v12016_v57, %v11980_v20  ;;  %vm5635_vm5 = vweird.f32 %v11980_v20  ;;  %vm12026_vm6 = vcmp.eq.f32.partialorder %v5639_v24, 8.507059e+37  ;;  %v5641_v38 = vand.u32 2147483648, %v11980_v20  ;;  %v3880_v61 = vpop.f32.mrf.mxu2  ;;  %v8090_v47 = vld [vmem:[%s14774_s12 + $0x240] sm:$0xf]  ;;  %v8546_v49 = vld [vmem:[%s14774_s12 + $0x19c] sm:$0xf] }
 0x59f   : > { %v5623_v32 = vsel %vm5622_vm3, %v8762_v35, %v5619_v15  ;;  %8771 = vpow2.f32 %v8303_v26  ;;  %v8304_v55 = vmul.f32 -1.442695, %v3925_v46  ;;  %v8310_v19 = vmul.f32 -1.442695, %v3830_v36  ;;  %v3929_v25 = vpop.f32.mrf.mxu3 }
 0x5a0   : > { %v5628_v0 = vsel %vm12012_vm2, %v5627_v18, %v5623_v32  ;;  %v5632_v22 = vsub.f32 1.0, %v5631_v34  ;;  %v7867_v21 = vor.u32 %v8514_v28, %v7866_v58  ;;  %v3879_v24 = vadd.f32 %v3878_v12, %v11579_v2  ;;  %v8008_v12 = vld [vmem:[%s14774_s12 + $0x1b4] sm:$0xf0]  ;;  %v3785_v34 = vpop.f32.mrf.mxu0 }
 0x5a1   : > { %v12046_v33 = vpop.eup %8767  ;;  %6609 = vst [vmem:[%s11634_s24 + $0x188] sm:$0xff] %v5628_v0  ;;  %8773 = vpow2.f32 %v8304_v55  ;;  %v8091_v35 = vor.u32 %v8570_v50, %v8090_v47  ;;  %v3783_v54 = vadd.f32 %v3782_v23, %v11559_v59  ;;  %v3881_v4 = vadd.f32 %v3880_v61, %v11579_v2  ;;  %v12067_v58 = vpop.f32.mrf.mxu1 }
 0x5a2   : > { %v8770_v39 = vpop.eup %8769  ;;  %v5633_v18 = vmul.f32 %v12016_v57, %v5632_v22  ;;  %vm5636_vm7 = vweird.f32 %v12016_v57  ;;  %v5721_v23 = vmul.f32 %v12046_v33, %v12000_v3  ;;  %8775 = vpow2.f32 %v8310_v19  ;;  %4143 = vmatpush.bf16.msrb.mxu0 %v7867_v21 }
 0x5a3   : > { %4078 = vmatmul.bf16.gmra.mxu2 %v11534_v29  ;;  %v5731_v15 = vand.u32 2147483648, %v12000_v3  ;;  %v12064_v26 = vadd.f32 1.0, %v8770_v39  ;;  %4192 = vmatpush.bf16.msrb.mxu1 %v8091_v35  ;;  %v3928_v46 = vadd.f32 %v11991_v51, %v3879_v24  ;;  %v3832_v36 = vadd.f32 %v3831_v16, %v3783_v54  ;;  %vm5637_vm8 = vmor %vm5635_vm5, %vm5636_vm7 }
 0x5a4   : > { %4029 = vmatmul.bf16.gmra.mxu1 %v11536_v53  ;;  %3980 = vmatmul.bf16.gmra.mxu0 %v11534_v29  ;;  %v5634_v28 = vadd.f32 %v12016_v57, %v5633_v18  ;;  %v5642_v61 = vor.u32 1.1754944e-38, %v5641_v38  ;;  %v5722_v32 = vsub.f32 1.0, %v5721_v23  ;;  %v8011_v55 = vor.u32 %v8546_v49, %v8008_v12 }
 0x5a5   : > { %4127 = vmatmul.bf16.gmra.mxu3 %v11536_v53  ;;  %v8772_v19 = vpop.eup %8771  ;;  %vm5726_vm9 = vweird.f32 %v12046_v33  ;;  %v5729_v51 = vand.u32 2147483647, %v12000_v3  ;;  %8777 = vrcp.f32 %v12064_v26  ;;  %v3930_v16 = vadd.f32 %v3929_v25, %v3881_v4 }
 0x5a6   : > { %v5638_v38 = vsel %vm5637_vm8, %v12016_v57, %v5634_v28  ;;  %v5723_v47 = vmul.f32 %v12046_v33, %v5722_v32  ;;  %v12081_v0 = vadd.f32 1.0, %v8772_v19  ;;  %v8311_v22 = vmul.f32 -1.442695, %v3928_v46  ;;  %4236 = vmatpush.bf16.msra.mxu2 %v8011_v55  ;;  %v8602_v28 = vld [vmem:[%s14774_s12 + $0x35c] sm:$0xf] }
 0x5a7   : > { %v8774_v21 = vpop.eup %8773  ;;  %v5643_v20 = vsel %vm12026_vm6, %v5642_v61, %v5638_v38  ;;  %vm5725_vm10 = vweird.f32 %v12000_v3  ;;  %v5732_v50 = vor.u32 1.1754944e-38, %v5731_v15  ;;  %v8317_v24 = vmul.f32 -1.442695, %v3832_v36  ;;  %v12103_v15 = vpop.f32.mrf.mxu2  ;;  %v8232_v19 = vld [vmem:[%s14774_s12 + $0x374] sm:$0xf0] }
 0x5a8   : > { %v8776_v35 = vpop.eup %8775  ;;  %6610 = vst [vmem:[%s11634_s24 + $0x190] sm:$0xff] %v5643_v20  ;;  %v5724_v54 = vadd.f32 %v12046_v33, %v5723_v47  ;;  %v5744_v57 = vand.u32 2147483647, %v12064_v26  ;;  %v5746_v4 = vand.u32 2147483648, %v12064_v26  ;;  %8779 = vrcp.f32 %v12081_v0  ;;  %vm5727_vm11 = vmor %vm5725_vm10, %vm5726_vm9  ;;  %v12105_v46 = vpop.f32.mrf.mxu3 }
 0x5a9   : > { %v5836_v63 = vand.u32 2147483648, %v12081_v0  ;;  %v12094_v25 = vadd.f32 1.0, %v8774_v21  ;;  %v12096_v3 = vadd.f32 1.0, %v8776_v35  ;;  %8781 = vpow2.f32 %v8311_v22 }
 0x5aa   : > { %v5728_v49 = vsel %vm5727_vm11, %v12046_v33, %v5724_v54  ;;  %vm5730_vm12 = vcmp.eq.f32.partialorder %v5729_v51, 8.507059e+37  ;;  %8783 = vpow2.f32 %v8317_v24  ;;  %v8318_v12 = vmul.f32 -1.442695, %v3930_v16  ;;  %v12125_v51 = vpop.f32.mrf.mxu0  ;;  %v7838_v54 = vld [vmem:[%s14774_s12 + $0x48] sm:$0xf] }
 0x5ab   : > { %v12099_v39 = vpop.eup %8777  ;;  %v5733_v18 = vsel %vm5730_vm12, %v5732_v50, %v5728_v49  ;;  %v5834_v23 = vand.u32 2147483647, %v12081_v0  ;;  %8785 = vrcp.f32 %v12094_v25  ;;  %vm5740_vm13 = vweird.f32 %v12064_v26 }
 0x5ac   : > { %6616 = vst [vmem:[%s11634_s24 + $0x1c0] sm:$0xff] %v5733_v18  ;;  %v5736_v36 = vmul.f32 %v12099_v39, %v12064_v26  ;;  %v3786_v33 = vadd.f32 %v3785_v34, %v11559_v59  ;;  %vm12115_vm14 = vcmp.eq.f32.partialorder %v5744_v57, 8.507059e+37  ;;  %v5747_v32 = vor.u32 1.1754944e-38, %v5746_v4  ;;  %v12127_v34 = vpop.f32.mrf.mxu1  ;;  %v8507_v57 = vld [vmem:[%s14774_s12 + $0x60] sm:$0xf0] }
 0x5ad   : > { %v12119_v55 = vor.u32 1.1754944e-38, %v5836_v63  ;;  %8787 = vrcp.f32 %v12096_v3  ;;  %v5849_v47 = vand.u32 2147483647, %v12094_v25  ;;  %v5939_v22 = vand.u32 2147483647, %v12096_v3 }
 0x5ae   : > { %v12129_v16 = vpop.eup %8779  ;;  %v5737_v38 = vsub.f32 1.0, %v5736_v36  ;;  %8789 = vpow2.f32 %v8318_v12  ;;  %vm5830_vm15 = vweird.f32 %v12081_v0  ;;  %vm12136_vm0 = vcmp.eq.f32.partialorder %v5834_v23, 8.507059e+37  ;;  %v8062_v18 = vld [vmem:[%s14774_s12 + $0x208] sm:$0xf]  ;;  %v8563_v23 = vld [vmem:[%s14774_s12 + $0x220] sm:$0xf0] }
 0x5af   : > { %v8782_v21 = vpop.eup %8781  ;;  %v5826_v20 = vmul.f32 %v12129_v16, %v12081_v0  ;;  %v5851_v24 = vand.u32 2147483648, %v12094_v25  ;;  %v5941_v35 = vand.u32 2147483648, %v12096_v3  ;;  %vm5741_vm1 = vweird.f32 %v12099_v39 }
 0x5b0   : > { %v8784_v4 = vpop.eup %8783  ;;  %v5738_v63 = vmul.f32 %v12099_v39, %v5737_v38  ;;  %v12150_v49 = vadd.f32 1.0, %v8782_v21  ;;  %v7839_v12 = vor.u32 %v8507_v57, %v7838_v54  ;;  %vm5845_vm2 = vweird.f32 %v12094_v25  ;;  %vm12180_vm6 = vmor %vm5740_vm13, %vm5741_vm1 }
 0x5b1   : > { %v12158_v36 = vpop.eup %8785  ;;  %v5827_v53 = vsub.f32 1.0, %v5826_v20  ;;  %v8235_v29 = vor.u32 %v8602_v28, %v8232_v19  ;;  %v8063_v38 = vor.u32 %v8563_v23, %v8062_v18  ;;  %vm12165_vm3 = vcmp.eq.f32.partialorder %v5849_v47, 8.507059e+37 }
 0x5b2   : > { %v5739_v21 = vadd.f32 %v12099_v39, %v5738_v63  ;;  %v5841_v54 = vmul.f32 %v12158_v36, %v12094_v25  ;;  %vm5935_vm5 = vweird.f32 %v12096_v3  ;;  %8791 = vrcp.f32 %v12150_v49  ;;  %4144 = vmatpush.bf16.msrb.mxu0 %v7839_v12 }
 0x5b3   : > { %v12171_v20 = vadd.f32 1.0, %v8784_v4  ;;  %4083 = vmatmul.bf16.gmra.mxu2 %v11546_v42  ;;  %v12174_v28 = vpop.eup %8787  ;;  %v5828_v47 = vmul.f32 %v12129_v16, %v5827_v53  ;;  %vm5831_vm7 = vweird.f32 %v12129_v16  ;;  %v5852_v63 = vor.u32 1.1754944e-38, %v5851_v24  ;;  %4285 = vmatpush.bf16.msra.mxu3 %v8235_v29 }
 0x5b4   : > { %4034 = vmatmul.bf16.gmra.mxu1 %v11548_v31  ;;  %v5942_v4 = vor.u32 1.1754944e-38, %v5941_v35  ;;  %v8790_v12 = vpop.eup %8789  ;;  %v5743_v18 = vsel %vm12180_vm6, %v12099_v39, %v5739_v21  ;;  %v5842_v23 = vsub.f32 1.0, %v5841_v54  ;;  %v5931_v26 = vmul.f32 %v12174_v28, %v12096_v3  ;;  %3985 = vmatmul.bf16.gmra.mxu0 %v11546_v42  ;;  %v12203_v35 = vpop.f32.mrf.mxu2  ;;  %vm5832_vm10 = vmor %vm5830_vm15, %vm5831_vm7 }
 0x5b5   : > { %4193 = vmatpush.bf16.msrb.mxu1 %v8063_v38  ;;  %vm12191_vm8 = vcmp.eq.f32.partialorder %v5939_v22, 8.507059e+37  ;;  %v3835_v53 = vadd.f32 %v12067_v58, %v3786_v33  ;;  %4132 = vmatmul.bf16.gmra.mxu3 %v11548_v31  ;;  %v5748_v29 = vsel %vm12115_vm14, %v5747_v32, %v5743_v18  ;;  %v5829_v24 = vadd.f32 %v12129_v16, %v5828_v47  ;;  %v12205_v22 = vpop.f32.mrf.mxu3  ;;  %v12220_v21 = vpop.f32.mrf.mxu0 }
 0x5b6   : > { %vm5846_vm9 = vweird.f32 %v12158_v36  ;;  %v5954_v39 = vand.u32 2147483647, %v12150_v49  ;;  %6617 = vst [vmem:[%s11634_s24 + $0x1c8] sm:$0xff] %v5748_v29  ;;  %v5843_v58 = vmul.f32 %v12158_v36, %v5842_v23  ;;  %v5932_v33 = vsub.f32 1.0, %v5931_v26  ;;  %v12222_v0 = vpop.f32.mrf.mxu1 }
 0x5b7   : > { %v5956_v61 = vand.u32 2147483648, %v12150_v49  ;;  %8793 = vrcp.f32 %v12171_v20  ;;  %v5833_v32 = vsel %vm5832_vm10, %v12129_v16, %v5829_v24  ;;  %vm5936_vm11 = vweird.f32 %v12174_v28  ;;  %vm5847_vm13 = vmor %vm5845_vm2, %vm5846_vm9 }
 0x5b8   : > { %vm5950_vm12 = vweird.f32 %v12150_v49  ;;  %v12218_v38 = vadd.f32 1.0, %v8790_v12  ;;  %v12224_v54 = vpop.eup %8791  ;;  %v5838_v19 = vsel %vm12136_vm0, %v12119_v55, %v5833_v32  ;;  %v5844_v47 = vadd.f32 %v12158_v36, %v5843_v58  ;;  %vm5937_vm15 = vmor %vm5935_vm5, %vm5936_vm11 }
 0x5b9   : > { %v5933_v16 = vmul.f32 %v12174_v28, %v5932_v33  ;;  %v8324_v18 = vmul.f32 -1.442695, %v3835_v53  ;;  %6623 = vst [vmem:[%s11634_s24 + $0x1f8] sm:$0xff] %v5838_v19  ;;  %v5946_v12 = vmul.f32 %v12224_v54, %v12150_v49  ;;  %vm12238_vm14 = vcmp.eq.f32.partialorder %v5954_v39, 8.507059e+37  ;;  %v7980_v39 = vld [vmem:[%s14774_s12 + $0x17c] sm:$0xf0] }
 0x5ba   : > { %v6044_v55 = vand.u32 2147483647, %v12171_v20  ;;  %v6046_v50 = vand.u32 2147483648, %v12171_v20  ;;  %v5848_v26 = vsel %vm5847_vm13, %v12158_v36, %v5844_v47  ;;  %v5957_v29 = vor.u32 1.1754944e-38, %v5956_v61  ;;  %v8539_v36 = vld [vmem:[%s14774_s12 + $0x164] sm:$0xf]  ;;  %v6836_v47 = vpop.xlane.xlu0 %6835  ;;  %v6842_v31 = vpop.xlane.xlu1 %6841 }
 0x5bb   : > { %v5934_v53 = vadd.f32 %v12174_v28, %v5933_v16  ;;  %8795 = vrcp.f32 %v12218_v38  ;;  %v5853_v25 = vsel %vm12165_vm3, %v5852_v63, %v5848_v26  ;;  %v5947_v24 = vsub.f32 1.0, %v5946_v12  ;;  %v8595_v33 = vld [vmem:[%s14774_s12 + $0x324] sm:$0xf]  ;;  %v8204_v61 = vld [vmem:[%s14774_s12 + $0x33c] sm:$0xf0] }
 0x5bc   : > { %vm5951_vm0 = vweird.f32 %v12224_v54  ;;  %vm6040_vm1 = vweird.f32 %v12171_v20  ;;  %6624 = vst [vmem:[%s11634_s24 + $0x200] sm:$0xff] %v5853_v25  ;;  %8797 = vpow2.f32 %v8324_v18  ;;  %v3884_v63 = vadd.f32 %v12103_v15, %v11579_v2  ;;  %v8532_v16 = vld [vmem:[%s14774_s12 + $0x12c] sm:$0xf]  ;;  %v8525_v49 = vld [vmem:[%s14774_s12 + $0xf4] sm:$0xf] }
 0x5bd   : > { %v12261_v57 = vpop.eup %8793  ;;  %v5938_v3 = vsel %vm5937_vm15, %v12174_v28, %v5934_v53  ;;  %v3788_v58 = vadd.f32 %v12125_v51, %v11559_v59  ;;  %v5948_v28 = vmul.f32 %v12224_v54, %v5947_v24  ;;  %vm12280_vm2 = vcmp.eq.f32.partialorder %v6044_v55, 8.507059e+37  ;;  %v8588_v24 = vld [vmem:[%s14774_s12 + $0x2ec] sm:$0xf]  ;;  %v12304_v18 = vpop.f32.mrf.mxu3  ;;  %vm12312_vm3 = vmor %vm5950_vm12, %vm5951_vm0  ;;  %v8518_v15 = vld [vmem:[%s14774_s12 + $0xbc] sm:$0xf] }
 0x5be   : > { %v5943_v32 = vsel %vm12191_vm8, %v5942_v4, %v5938_v3  ;;  %v6036_v19 = vmul.f32 %v12261_v57, %v12171_v20  ;;  %v6047_v51 = vor.u32 1.1754944e-38, %v6046_v50  ;;  %v6059_v4 = vand.u32 2147483647, %v12218_v38  ;;  %v8176_v3 = vld [vmem:[%s14774_s12 + $0x304] sm:$0xf0] }
 0x5bf   : > { %6630 = vst [vmem:[%s11634_s24 + $0x230] sm:$0xff] %v5943_v32  ;;  %v3933_v12 = vadd.f32 %v12105_v46, %v3884_v63  ;;  %v3837_v55 = vadd.f32 %v12127_v34, %v3788_v58  ;;  %v5949_v50 = vadd.f32 %v12224_v54, %v5948_v28  ;;  %v7983_v53 = vor.u32 %v8539_v36, %v7980_v39  ;;  %v12302_v32 = vpop.f32.mrf.mxu2  ;;  %v7924_v28 = vld [vmem:[%s14774_s12 + $0x10c] sm:$0xf0] }
 0x5c0   : > { %v6037_v26 = vsub.f32 1.0, %v6036_v19  ;;  %v8207_v25 = vor.u32 %v8595_v33, %v8204_v61  ;;  %vm6041_vm5 = vweird.f32 %v12261_v57  ;;  %v7955_v63 = vor.u32 %v8532_v16, %v7952_v14  ;;  %v12329_v19 = vpop.f32.mrf.mxu0 }
 0x5c1   : > { %v12306_v46 = vpop.eup %8795  ;;  %v8325_v36 = vmul.f32 -1.442695, %v3933_v12  ;;  %v8331_v39 = vmul.f32 -1.442695, %v3837_v55  ;;  %v5953_v58 = vsel %vm12312_vm3, %v12224_v54, %v5949_v50  ;;  %4237 = vmatpush.bf16.msra.mxu2 %v7983_v53  ;;  %8799 = vlog2.f32 %v6836_v47  ;;  %v12331_v54 = vpop.f32.mrf.mxu1  ;;  %v8581_v55 = vld [vmem:[%s14774_s12 + $0x2b4] sm:$0xf]  ;;  %vm6042_vm6 = vmor %vm6040_vm1, %vm6041_vm5 }
 0x5c2   : > { %v6038_v33 = vmul.f32 %v12261_v57, %v6037_v26  ;;  %v6051_v61 = vmul.f32 %v12306_v46, %v12218_v38  ;;  %4286 = vmatpush.bf16.msra.mxu3 %v8207_v25  ;;  %v8798_v16 = vpop.eup %8797  ;;  %v5958_v14 = vsel %vm12238_vm14, %v5957_v29, %v5953_v58  ;;  %v8179_v12 = vor.u32 %v8588_v24, %v8176_v3  ;;  %v8148_v50 = vld [vmem:[%s14774_s12 + $0x2cc] sm:$0xf0]  ;;  %v6839_v24 = vpop.xlane.xlu2 %6838 }
 0x5c3   : > { %8801 = vpow2.f32 %v8325_v36  ;;  %v3886_v47 = vadd.f32 %v12203_v35, %v11579_v2  ;;  %6631 = vst [vmem:[%s11634_s24 + $0x238] sm:$0xff] %v5958_v14  ;;  %v12345_v25 = vadd.f32 1.0, %v8798_v16  ;;  %vm6056_vm7 = vweird.f32 %v12306_v46  ;;  %v7810_v36 = vld [vmem:[%s14774_s12 + $0x10] sm:$0xf] }
 0x5c4   : > { %v6039_v26 = vadd.f32 %v12261_v57, %v6038_v33  ;;  %v6052_v53 = vsub.f32 1.0, %v6051_v61  ;;  %8803 = vpow2.f32 %v8331_v39  ;;  %v3791_v23 = vadd.f32 %v12220_v21, %v11559_v59  ;;  %v6845_v61 = vpop.xlane.xlu0 %6844 }
 0x5c5   : > { %v3935_v35 = vadd.f32 %v12205_v22, %v3886_v47  ;;  %v7927_v29 = vor.u32 %v8525_v49, %v7924_v28  ;;  %8805 = vrcp.f32 %v12345_v25  ;;  %4238 = vmatpush.bf16.msra.mxu2 %v7955_v63  ;;  %v8151_v20 = vor.u32 %v8581_v55, %v8148_v50  ;;  %v8500_v22 = vld [vmem:[%s14774_s12 + $0x28] sm:$0xf0] }
 0x5c6   : > { %v6043_v3 = vsel %vm6042_vm6, %v12261_v57, %v6039_v26  ;;  %v6053_v34 = vmul.f32 %v12306_v46, %v6052_v53  ;;  %4287 = vmatpush.bf16.msra.mxu3 %v8179_v12  ;;  %vm6055_vm8 = vweird.f32 %v12218_v38  ;;  %vm12369_vm9 = vcmp.eq.f32.partialorder %v6059_v4, 8.507059e+37  ;;  %v12391_v53 = vpop.f32.mrf.mxu3 }
 0x5c7   : > { %v6048_v21 = vsel %vm12280_vm2, %v6047_v51, %v6043_v3  ;;  %v8332_v57 = vmul.f32 -1.442695, %v3935_v35  ;;  %v8800_v39 = vpop.eup %8799  ;;  %v3840_v33 = vadd.f32 %v12222_v0, %v3791_v23  ;;  %8807 = vlog2.f32 %v6839_v24  ;;  %v7896_v51 = vld [vmem:[%s14774_s12 + $0xd4] sm:$0xf0]  ;;  %vm6057_vm10 = vmor %vm6055_vm8, %vm6056_vm7  ;;  %v12389_v26 = vpop.f32.mrf.mxu2 }
 0x5c8   : > { %6637 = vst [vmem:[%s11634_s24 + $0x268] sm:$0xff] %v6048_v21  ;;  %v6054_v63 = vadd.f32 %v12306_v46, %v6053_v34  ;;  %v14952_v4 = vand.u32 2147483648, %v12218_v38  ;;  %v6149_v16 = vand.u32 2147483647, %v12345_v25  ;;  %v7811_v0 = vor.u32 %v8500_v22, %v7810_v36  ;;  %v8120_v3 = vld [vmem:[%s14774_s12 + $0x294] sm:$0xf0]  ;;  %v12407_v34 = vpop.f32.mrf.mxu0 }
 0x5c9   : > { %v8802_v49 = vpop.eup %8801  ;;  %8809 = vpow2.f32 %v8332_v57  ;;  %v6151_v47 = vand.u32 2147483648, %v12345_v25  ;;  %v8338_v50 = vmul.f32 -1.442695, %v3840_v33  ;;  %4239 = vmatpush.bf16.msra.mxu2 %v7927_v29  ;;  %v7899_v23 = vor.u32 %v8518_v15, %v7896_v51  ;;  %v8034_v21 = vld [vmem:[%s14774_s12 + $0x1d0] sm:$0xf] }
 0x5ca   : > { %v6062_v28 = vor.u32 1.1754944e-38, %v14952_v4  ;;  %v8804_v14 = vpop.eup %8803  ;;  %v6058_v12 = vsel %vm6057_vm10, %v12306_v46, %v6054_v63  ;;  %v12387_v55 = vadd.f32 1.0, %v8802_v49  ;;  %4288 = vmatpush.bf16.msra.mxu3 %v8151_v20  ;;  %8811 = vlog2.f32 %v6845_v61  ;;  %4145 = vmatpush.bf16.msrb.mxu0 %v7811_v0  ;;  %v8574_v46 = vld [vmem:[%s14774_s12 + $0x27c] sm:$0xf]  ;;  %v12409_v20 = vpop.f32.mrf.mxu1  ;;  %v8556_v57 = vld [vmem:[%s14774_s12 + $0x1e8] sm:$0xf0] }
 0x5cb   : > { %v12395_v35 = vadd.f32 1.0, %v8804_v14  ;;  %v12400_v24 = vpop.eup %8805  ;;  %v6883_v29 = vmul.f32 0.6931472, %v8800_v39  ;;  %vm6145_vm11 = vweird.f32 %v12345_v25  ;;  %vm12414_vm12 = vcmp.eq.f32.partialorder %v6149_v16, 8.507059e+37 }
 0x5cc   : > { %v6063_v38 = vsel %vm12369_vm9, %v6062_v28, %v6058_v12  ;;  %8813 = vrcp.f32 %v12387_v55  ;;  %v6141_v36 = vmul.f32 %v12400_v24, %v12345_v25  ;;  %v6152_v63 = vor.u32 1.1754944e-38, %v6151_v47  ;;  %v8092_v25 = vld [vmem:[%s14774_s12 + $0x25c] sm:$0xf0] }
 0x5cd   : > { %6638 = vst [vmem:[%s11634_s24 + $0x270] sm:$0xff] %v6063_v38  ;;  %8815 = vrcp.f32 %v12395_v35  ;;  %v8808_v39 = vpop.eup %8807  ;;  %v6164_v58 = vand.u32 2147483647, %v12387_v55  ;;  %v6166_v33 = vand.u32 2147483648, %v12387_v55  ;;  %v6256_v61 = vand.u32 2147483648, %v12395_v35  ;;  %4240 = vmatpush.bf16.msra.mxu2 %v7899_v23  ;;  %4146 = vmatmul.bf16.vlgmr.msrb.gmra.mxu0 %v11238_v37 }
 0x5ce   : > { %v6142_v51 = vsub.f32 1.0, %v6141_v36  ;;  %8817 = vpow2.f32 %v8338_v50  ;;  %v6885_v49 = vmul.f32 0.6931472, %v8808_v39  ;;  %v8123_v4 = vor.u32 %v8574_v46, %v8120_v3  ;;  %v8511_v46 = vld [vmem:[%s14774_s12 + $0x84] sm:$0xf] }
 0x5cf   : > { %v8810_v15 = vpop.eup %8809  ;;  %v6254_v28 = vand.u32 2147483647, %v12395_v35  ;;  %v12431_v16 = vadd.f32 %v6883_v29, %v11146_v27  ;;  %v8035_v14 = vor.u32 %v8556_v57, %v8034_v21  ;;  %vm6146_vm13 = vweird.f32 %v12400_v24  ;;  %v8036_v36 = vld [vmem:[%s14774_s12 + $0x1ec] sm:$0xf0] }
 0x5d0   : > { %v12433_v0 = vadd.f32 1.0, %v8810_v15  ;;  %v8812_v12 = vpop.eup %8811  ;;  %v6143_v47 = vmul.f32 %v12400_v24, %v6142_v51  ;;  %vm6160_vm14 = vweird.f32 %v12387_v55  ;;  %4289 = vmatpush.bf16.msra.mxu3 %v8123_v4  ;;  %v3889_v50 = vadd.f32 %v12302_v32, %v11579_v2  ;;  %vm12475_vm1 = vmor %vm6145_vm11, %vm6146_vm13  ;;  %v12491_v15 = vpop.f32.mrf.mxu2 }
 0x5d1   : > { %v12442_v23 = vor.u32 1.1754944e-38, %v6166_v33  ;;  %vm6250_vm15 = vweird.f32 %v12395_v35  ;;  %4194 = vmatpush.bf16.msrb.mxu1 %v8035_v14  ;;  %v3793_v27 = vadd.f32 %v12329_v19, %v11559_v59  ;;  %vm12456_vm0 = vcmp.eq.f32.partialorder %v6164_v58, 8.507059e+37  ;;  %v7868_v59 = vld [vmem:[%s14774_s12 + $0x9c] sm:$0xf0]  ;;  %v8567_v19 = vld [vmem:[%s14774_s12 + $0x244] sm:$0xf]  ;;  %v12493_v51 = vpop.f32.mrf.mxu3  ;;  %v12505_v62 = vpop.f32.mrf.mxu0 }
 0x5d2   : > { %v12440_v38 = vpop.eup %8813  ;;  %8819 = vrcp.f32 %v12433_v0  ;;  %v6144_v32 = vadd.f32 %v12400_v24, %v6143_v47  ;;  %v12460_v21 = vor.u32 1.1754944e-38, %v6256_v61  ;;  %v12463_v57 = vadd.f32 %v6885_v49, %v11181_v1  ;;  %v12507_v9 = vpop.f32.mrf.mxu1 }
 0x5d3   : > { %v12451_v29 = vpop.eup %8815  ;;  %v6156_v3 = vmul.f32 %v12440_v38, %v12387_v55  ;;  %vm6161_vm2 = vweird.f32 %v12440_v38  ;;  %vm12482_vm3 = vcmp.eq.f32.partialorder %v6254_v28, 8.507059e+37  ;;  %v6269_v33 = vand.u32 2147483647, %v12433_v0 }
 0x5d4   : > { %v6246_v1 = vmul.f32 %v12451_v29, %v12395_v35  ;;  %v6271_v61 = vand.u32 2147483648, %v12433_v0  ;;  %v8818_v49 = vpop.eup %8817  ;;  %v6148_v4 = vsel %vm12475_vm1, %v12400_v24, %v6144_v32  ;;  %v6889_v14 = vmul.f32 0.6931472, %v8812_v12  ;;  %4195 = vmatmul.bf16.vlgmr.msrb.gmra.mxu1 %v11240_v8  ;;  %vm6162_vm8 = vmor %vm6160_vm14, %vm6161_vm2  ;;  %v8497_v35 = vld [vmem:[%s14774_s12 + $0x14] sm:$0xf] }
 0x5d5   : > { %v6157_v28 = vsub.f32 1.0, %v6156_v3  ;;  %v3938_v47 = vadd.f32 %v12304_v18, %v3889_v50  ;;  %v6153_v42 = vsel %vm12414_vm12, %v6152_v63, %v6148_v4  ;;  %v12502_v5 = vadd.f32 1.0, %v8818_v49  ;;  %v7840_v3 = vld [vmem:[%s14774_s12 + $0x64] sm:$0xf0]  ;;  %v6854_v4 = vpop.xlane.xlu0 %6853 }
 0x5d6   : > { %v6247_v11 = vsub.f32 1.0, %v6246_v1  ;;  %v3842_v60 = vadd.f32 %v12331_v54, %v3793_v27  ;;  %6644 = vst [vmem:[%s11634_s24 + $0x2a0] sm:$0xff] %v6153_v42  ;;  %v7871_v18 = vor.u32 %v8511_v46, %v7868_v59  ;;  %v8095_v50 = vor.u32 %v8567_v19, %v8092_v25  ;;  %v8504_v54 = vld [vmem:[%s14774_s12 + $0x4c] sm:$0xf]  ;;  %v6848_v1 = vpop.xlane.xlu2 %6847 }
 0x5d7   : > { %v6158_v24 = vmul.f32 %v12440_v38, %v6157_v28  ;;  %v8339_v12 = vmul.f32 -1.442695, %v3938_v47  ;;  %vm6251_vm5 = vweird.f32 %v12451_v29  ;;  %vm6265_vm6 = vweird.f32 %v12433_v0  ;;  %v8560_v59 = vld [vmem:[%s14774_s12 + $0x20c] sm:$0xf]  ;;  %v7812_v28 = vld [vmem:[%s14774_s12 + $0x2c] sm:$0xf0] }
 0x5d8   : > { %v12511_v32 = vpop.eup %8819  ;;  %v6248_v22 = vmul.f32 %v12451_v29, %v6247_v11  ;;  %8821 = vrcp.f32 %v12502_v5  ;;  %vm12523_vm7 = vcmp.eq.f32.partialorder %v6269_v33, 8.507059e+37  ;;  %v12527_v11 = vor.u32 1.1754944e-38, %v6271_v61  ;;  %4241 = vmatpush.bf16.msra.mxu2 %v7871_v18  ;;  %4290 = vmatpush.bf16.msra.mxu3 %v8095_v50  ;;  %v8064_v33 = vld [vmem:[%s14774_s12 + $0x224] sm:$0xf0]  ;;  %vm6252_vm9 = vmor %vm6250_vm15, %vm6251_vm5  ;;  %v12587_v47 = vld [vmem:[%s14775_s13] sm:$0xff] }
 0x5d9   : > { %v6159_v42 = vadd.f32 %v12440_v38, %v6158_v24  ;;  %v6261_v63 = vmul.f32 %v12511_v32, %v12433_v0  ;;  %v12530_v46 = vadd.f32 %v6889_v14, %v11205_v44  ;;  %v6359_v44 = vand.u32 2147483647, %v12502_v5  ;;  %v12594_v18 = vpop.f32.mrf.mxu3 }
 0x5da   : > { %v6249_v19 = vadd.f32 %v12451_v29, %v6248_v22  ;;  %8823 = vpow2.f32 %v8339_v12  ;;  %v8345_v39 = vmul.f32 -1.442695, %v3842_v60  ;;  %vm6266_vm10 = vweird.f32 %v12511_v32  ;;  %v12592_v12 = vpop.f32.mrf.mxu2 }
 0x5db   : > { %v6163_v61 = vsel %vm6162_vm8, %v12440_v38, %v6159_v42  ;;  %v6262_v55 = vsub.f32 1.0, %v6261_v63  ;;  %v6930_v25 = vsub.f32 %v10876_v52, %v12431_v16  ;;  %v7843_v38 = vor.u32 %v8504_v54, %v7840_v3  ;;  %vm6267_vm11 = vmor %vm6265_vm6, %vm6266_vm10  ;;  %v12609_v63 = vpop.f32.mrf.mxu0  ;;  %v12611_v3 = vpop.f32.mrf.mxu1 }
 0x5dc   : > { %v6168_v60 = vsel %vm12456_vm0, %v12442_v23, %v6163_v61  ;;  %v6253_v49 = vsel %vm6252_vm9, %v12451_v29, %v6249_v19  ;;  %8825 = vpow2.f32 %v8345_v39  ;;  %v8067_v23 = vor.u32 %v8560_v59, %v8064_v33  ;;  %v8553_v29 = vld [vmem:[%s14774_s12 + $0x1d4] sm:$0xf] }
 0x5dd   : > { %6645 = vst [vmem:[%s11634_s24 + $0x2a8] sm:$0xff] %v6168_v60  ;;  %v6258_v52 = vsel %vm12482_vm3, %v12460_v21, %v6253_v49  ;;  %v6263_v16 = vmul.f32 %v12511_v32, %v6262_v55  ;;  %6962 = vrot.lane.b32.xlu2 %v6930_v25, %s9193_s26  ;;  %8827 = vlog2.f32 %v6848_v1  ;;  %4242 = vmatpush.bf16.msra.mxu2 %v7843_v38  ;;  %v12590_v24 = vperm.slane %v12587_v47, 2  ;;  %v8014_v38 = vld [vmem:[%s14774_s12 + $0x1a0] sm:$0xf] }
 0x5de   : > { %v12577_v14 = vpop.eup %8821  ;;  %6651 = vst [vmem:[%s11634_s24 + $0x2d8] sm:$0xff] %v6258_v52  ;;  %8829 = vlog2.f32 %v6842_v31  ;;  %v3891_v21 = vadd.f32 %v12389_v26, %v11579_v2  ;;  %v6931_v58 = vsub.f32 %v10893_v13, %v12463_v57  ;;  %4151 = vmatmul.bf16.gmra.mxu0 %v11272_v43  ;;  %v6361_v13 = vand.u32 2147483648, %v12502_v5  ;;  %4291 = vmatpush.bf16.msra.mxu3 %v8067_v23  ;;  %v6851_v26 = vpop.xlane.xlu1 %6850  ;;  %v8238_v52 = vld [vmem:[%s14774_s12 + $0x360] sm:$0xf] }
 0x5df   : > { %v6264_v31 = vadd.f32 %v12511_v32, %v6263_v16  ;;  %v6351_v2 = vmul.f32 %v12577_v14, %v12502_v5  ;;  %8831 = vlog2.f32 %v6854_v4  ;;  %v3952_v22 = vadd.f32 %v12407_v34, %v12590_v24  ;;  %v8550_v4 = vld [vmem:[%s14774_s12 + $0x1b8] sm:$0xf0] }
 0x5e0   : > { %v8824_v57 = vpop.eup %8823  ;;  %v3940_v50 = vadd.f32 %v12391_v53, %v3891_v21  ;;  %6964 = vrot.lane.b32.xlu1 %v6931_v58, %s9193_s26  ;;  %v7815_v54 = vor.u32 %v8497_v35, %v7812_v28  ;;  %v8039_v42 = vor.u32 %v8553_v29, %v8036_v36  ;;  %v6933_v53 = vsub.f32 %v10919_v17, %v12530_v46  ;;  %v6857_v28 = vpop.xlane.xlu2 %6856  ;;  %v8606_v16 = vld [vmem:[%s14774_s12 + $0x378] sm:$0xf0] }
 0x5e1   : > { %v6268_v59 = vsel %vm6267_vm11, %v12511_v32, %v6264_v31  ;;  %v6352_v19 = vsub.f32 1.0, %v6351_v2  ;;  %v12614_v39 = vadd.f32 1.0, %v8824_v57  ;;  %v4001_v33 = vadd.f32 %v12409_v20, %v3952_v22  ;;  %v12666_v58 = vpop.f32.mrf.mxu3 }
 0x5e2   : > { %v8826_v0 = vpop.eup %8825  ;;  %v6273_v34 = vsel %vm12523_vm7, %v12527_v11, %v6268_v59  ;;  %v8346_v1 = vmul.f32 -1.442695, %v3940_v50  ;;  %4243 = vmatpush.bf16.msra.mxu2 %v7815_v54  ;;  %8833 = vlog2.f32 %v6851_v26  ;;  %vm6355_vm12 = vweird.f32 %v12502_v5  ;;  %4292 = vmatpush.bf16.msra.mxu3 %v8039_v42 }
 0x5e3   : > { %v8828_v61 = vpop.eup %8827  ;;  %6652 = vst [vmem:[%s11634_s24 + $0x2e0] sm:$0xff] %v6273_v34  ;;  %v6353_v32 = vmul.f32 %v12577_v14, %v6352_v19  ;;  %vm6356_vm13 = vweird.f32 %v12577_v14  ;;  %8835 = vrcp.f32 %v12614_v39  ;;  %vm12629_vm14 = vcmp.eq.f32.partialorder %v6359_v44, 8.507059e+37  ;;  %v12677_v19 = vpop.f32.mrf.mxu0 }
 0x5e4   : > { %v8830_v17 = vpop.eup %8829  ;;  %v6362_v20 = vor.u32 1.1754944e-38, %v6361_v13  ;;  %v12633_v11 = vadd.f32 1.0, %v8826_v0  ;;  %8837 = vpow2.f32 %v8346_v1  ;;  %v6376_v25 = vand.u32 2147483648, %v12614_v39  ;;  %vm6357_vm15 = vmor %vm6355_vm12, %vm6356_vm13  ;;  %4200 = vmatmul.bf16.gmra.mxu1 %v11274_v10 }
 0x5e5   : > { %v8832_v46 = vpop.eup %8831  ;;  %v6354_v55 = vadd.f32 %v12577_v14, %v6353_v32  ;;  %v6887_v60 = vmul.f32 0.6931472, %v8830_v17  ;;  %v8242_v49 = vmul.f32 -1.442695, %v4001_v33  ;;  %6968 = vrot.lane.b32.xlu2 %v6933_v53, %s9193_s26  ;;  %4244 = vmatmul.bf16.vlgmr.msra.gmra.mxu2 %v11238_v37  ;;  %v6374_v44 = vand.u32 2147483647, %v12614_v39  ;;  %v12679_v53 = vpop.f32.mrf.mxu1 }
 0x5e6   : > { %8839 = vrcp.f32 %v12633_v11  ;;  %4293 = vmatmul.bf16.vlgmr.msra.gmra.mxu3 %v11240_v8  ;;  %v6891_v35 = vmul.f32 0.6931472, %v8828_v61  ;;  %vm6370_vm0 = vweird.f32 %v12614_v39  ;;  %v6895_v21 = vmul.f32 0.6931472, %v8832_v46  ;;  %v6860_v50 = vpop.xlane.xlu1 %6859 }
 0x5e7   : > { %v6358_v5 = vsel %vm6357_vm15, %v12577_v14, %v6354_v55  ;;  %v6916_v36 = vadd.f32 %v6887_v60, %v11200_v45  ;;  %8841 = vpow2.f32 %v8242_v49  ;;  %v12664_v14 = vpop.f32.mrf.mxu2  ;;  %v6377_v2 = vor.u32 1.1754944e-38, %v6376_v25  ;;  %v6863_v55 = vpop.xlane.xlu0 %6862 }
 0x5e8   : > { %v8834_v23 = vpop.eup %8833  ;;  %v6363_v29 = vsel %vm12629_vm14, %v6362_v20, %v6358_v5  ;;  %v6464_v13 = vand.u32 2147483647, %v12633_v11  ;;  %v6466_v26 = vand.u32 2147483648, %v12633_v11  ;;  %v8015_v57 = vor.u32 %v8550_v4, %v8014_v38 }
 0x5e9   : > { %v8836_v31 = vpop.eup %8835  ;;  %6658 = vst [vmem:[%s11634_s24 + $0x310] sm:$0xff] %v6363_v29  ;;  %vm12672_vm1 = vcmp.eq.f32.partialorder %v6374_v44, 8.507059e+37  ;;  %v6920_v42 = vadd.f32 %v6895_v21, %v11263_v56  ;;  %8843 = vlog2.f32 %v6857_v28  ;;  %v8239_v59 = vor.u32 %v8606_v16, %v8238_v52  ;;  %v14975_v21 = vld [vmem:[#allocation14_spill] sm:$0xff] }
 0x5ea   : > { %v8838_v22 = vpop.eup %8837  ;;  %v6366_v54 = vmul.f32 %v8836_v31, %v12614_v39  ;;  %v6893_v34 = vmul.f32 0.6931472, %v8834_v23  ;;  %4334 = vmatpush.bf16.msra.mxu0 %v8015_v57  ;;  %v12684_v1 = vperm.slane %v12587_v47, 3  ;;  %v3954_v33 = vadd.f32 %v12505_v62, %v12590_v24  ;;  %v12723_v39 = vpop.f32.mrf.mxu3 }
 0x5eb   : > { %v12681_v0 = vadd.f32 1.0, %v8838_v22  ;;  %4383 = vmatpush.bf16.msra.mxu1 %v8239_v59  ;;  %v6932_v56 = vsub.f32 %v10902_v7, %v6916_v36  ;;  %8845 = vlog2.f32 %v6860_v50  ;;  %v6936_v17 = vsub.f32 %v10954_v6, %v6920_v42  ;;  %v7986_v59 = vld [vmem:[%s14774_s12 + $0x168] sm:$0xf] }
 0x5ec   : > { %v8840_v61 = vpop.eup %8839  ;;  %v6367_v32 = vsub.f32 1.0, %v6366_v54  ;;  %vm6460_vm2 = vweird.f32 %v12633_v11  ;;  %v12693_v20 = vadd.f32 %v6891_v35, %v11229_v41  ;;  %vm6371_vm3 = vweird.f32 %v8836_v31 }
 0x5ed   : > { %v6456_v27 = vmul.f32 %v8840_v61, %v12633_v11  ;;  %8847 = vrcp.f32 %v12681_v0  ;;  %v8842_v47 = vpop.eup %8841  ;;  %v6481_v62 = vand.u32 2147483648, %v12681_v0  ;;  %v4050_v7 = vadd.f32 %v12491_v15, %v12684_v1  ;;  %6966 = vrot.lane.b32.xlu0 %v6932_v56, %s9193_s26  ;;  %6974 = vrot.lane.b32.xlu2 %v6936_v17, %s9193_s26  ;;  %vm6372_vm6 = vmor %vm6370_vm0, %vm6371_vm3  ;;  %v12745_v57 = vpop.f32.mrf.mxu1 }
 0x5ee   : > { %v6368_v46 = vmul.f32 %v8836_v31, %v6367_v32  ;;  %vm12701_vm5 = vcmp.eq.f32.partialorder %v6464_v13, 8.507059e+37  ;;  %v12705_v41 = vadd.f32 1.0, %v8842_v47  ;;  %v4003_v25 = vadd.f32 %v12507_v9, %v3954_v33  ;;  %4156 = vmatmul.bf16.gmra.mxu0 %v11306_v40  ;;  %v14972_v32 = vld [vmem:[#allocation2_spill] sm:$0xff]  ;;  %v6869_v17 = vpop.xlane.xlu1 %6868 }
 0x5ef   : > { %v6457_v6 = vsub.f32 1.0, %v6456_v27  ;;  %v8844_v60 = vpop.eup %8843  ;;  %v6467_v44 = vor.u32 1.1754944e-38, %v6466_v26  ;;  %v6479_v15 = vand.u32 2147483647, %v12681_v0  ;;  %v6919_v38 = vadd.f32 %v6893_v34, %v11242_v48  ;;  %v12721_v52 = vpop.f32.mrf.mxu2  ;;  %v8210_v27 = vld [vmem:[%s14774_s12 + $0x328] sm:$0xf] }
 0x5f0   : > { %v6369_v49 = vadd.f32 %v8836_v31, %v6368_v46  ;;  %vm6461_vm7 = vweird.f32 %v8840_v61  ;;  %8849 = vrcp.f32 %v12705_v41  ;;  %v4052_v9 = vadd.f32 %v12592_v12, %v12684_v1  ;;  %v12743_v26 = vpop.f32.mrf.mxu0 }
 0x5f1   : > { %v6458_v4 = vmul.f32 %v8840_v61, %v6457_v6  ;;  %v8846_v5 = vpop.eup %8845  ;;  %vm6475_vm8 = vweird.f32 %v12681_v0  ;;  %v12718_v28 = vor.u32 1.1754944e-38, %v6481_v62  ;;  %v4099_v48 = vadd.f32 %v12493_v51, %v4050_v7  ;;  %vm6462_vm9 = vmor %vm6460_vm2, %vm6461_vm7  ;;  %v14973_v62 = vld [vmem:[#allocation12_spill] sm:$0xff] }
 0x5f2   : > { %v6373_v35 = vsel %vm6372_vm6, %v8836_v31, %v6369_v49  ;;  %v12729_v36 = vmul.f32 0.6931472, %v8844_v60  ;;  %v8249_v12 = vmul.f32 -1.442695, %v4003_v25  ;;  %vm12737_vm10 = vcmp.eq.f32.partialorder %v6479_v15, 8.507059e+37 }
 0x5f3   : > { %v12725_v16 = vpop.eup %8847  ;;  %v6378_v23 = vsel %vm12672_vm1, %v6377_v2, %v6373_v35  ;;  %v6459_v29 = vadd.f32 %v8840_v61, %v6458_v4  ;;  %v4919_v31 = vand.u32 2147483647, %v12705_v41  ;;  %v4921_v2 = vand.u32 2147483648, %v12705_v41  ;;  %v8599_v25 = vld [vmem:[%s14774_s12 + $0x340] sm:$0xf0]  ;;  %v12786_v4 = vpop.f32.mrf.mxu3 }
 0x5f4   : > { %6659 = vst [vmem:[%s11634_s24 + $0x318] sm:$0xff] %v6378_v23  ;;  %v6471_v51 = vmul.f32 %v12725_v16, %v12681_v0  ;;  %v8243_v13 = vmul.f32 -1.442695, %v4099_v48  ;;  %8851 = vpow2.f32 %v8249_v12  ;;  %v6899_v11 = vmul.f32 0.6931472, %v8846_v5  ;;  %4205 = vmatmul.bf16.gmra.mxu1 %v11308_v30 }
 0x5f5   : > { %v6463_v50 = vsel %vm6462_vm9, %v8840_v61, %v6459_v29  ;;  %v4101_v22 = vadd.f32 %v12594_v18, %v4052_v9  ;;  %4249 = vmatmul.bf16.gmra.mxu2 %v11272_v43  ;;  %v3957_v42 = vadd.f32 %v12609_v63, %v12590_v24  ;;  %v8543_v18 = vld [vmem:[%s14774_s12 + $0x180] sm:$0xf0]  ;;  %vm6476_vm11 = vweird.f32 %v12725_v16  ;;  %v14971_v61 = vld [vmem:[#allocation4_spill] sm:$0xff]  ;;  %v12802_v12 = vpop.f32.mrf.mxu1 }
 0x5f6   : > { %v6468_v54 = vsel %vm12701_vm5, %v6467_v44, %v6463_v50  ;;  %v6472_v45 = vsub.f32 1.0, %v6471_v51  ;;  %8853 = vpow2.f32 %v8243_v13  ;;  %4298 = vmatmul.bf16.gmra.mxu3 %v11274_v10  ;;  %v12761_v34 = vpop.eup %8849  ;;  %v6935_v63 = vsub.f32 %v14971_v61, %v6919_v38  ;;  %vm6477_vm12 = vmor %vm6475_vm8, %vm6476_vm11  ;;  %v14974_v13 = vld [vmem:[#allocation3_spill] sm:$0xff] }
 0x5f7   : > { %6665 = vst [vmem:[%s11634_s24 + $0x348] sm:$0xff] %v6468_v54  ;;  %v8250_v33 = vmul.f32 -1.442695, %v4101_v22  ;;  %v6934_v56 = vsub.f32 %v14972_v32, %v12693_v20  ;;  %v4911_v46 = vmul.f32 %v12761_v34, %v12705_v41  ;;  %v6922_v7 = vadd.f32 %v6899_v11, %v14973_v62  ;;  %v14976_v22 = vld [vmem:[#allocation15_spill] sm:$0xff] }
 0x5f8   : > { %v6473_v47 = vmul.f32 %v12725_v16, %v6472_v45  ;;  %v4006_v6 = vadd.f32 %v12611_v3, %v3957_v42  ;;  %6972 = vrot.lane.b32.xlu1 %v6935_v63, %s9193_s26  ;;  %v7987_v20 = vor.u32 %v8543_v18, %v7986_v59  ;;  %v8211_v60 = vor.u32 %v8599_v25, %v8210_v27  ;;  %v12784_v3 = vpop.f32.mrf.mxu2  ;;  %v12800_v0 = vpop.f32.mrf.mxu0  ;;  %v14991_v25 = vld [vmem:[#allocation21_spill] sm:$0xff] }
 0x5f9   : > { %8855 = vpow2.f32 %v8250_v33  ;;  %6970 = vrot.lane.b32.xlu0 %v6934_v56, %s9193_s26  ;;  %v4055_v49 = vadd.f32 %v12664_v14, %v12684_v1  ;;  %v4912_v15 = vsub.f32 1.0, %v4911_v46  ;;  %vm4916_vm13 = vweird.f32 %v12761_v34  ;;  %v14977_v46 = vld [vmem:[#allocation5_spill] sm:$0xff] }
 0x5fa   : > { %v6474_v44 = vadd.f32 %v12725_v16, %v6473_v47  ;;  %v8256_v38 = vmul.f32 -1.442695, %v4006_v6  ;;  %8857 = vlog2.f32 %v6869_v17  ;;  %v8852_v9 = vpop.eup %8851  ;;  %4335 = vmatpush.bf16.msra.mxu0 %v7987_v20  ;;  %4384 = vmatpush.bf16.msra.mxu1 %v8211_v60  ;;  %v3959_v5 = vadd.f32 %v12677_v19, %v12590_v24 }
 0x5fb   : > { %8859 = vlog2.f32 %v6863_v55  ;;  %v4104_v14 = vadd.f32 %v12666_v58, %v4055_v49  ;;  %v4913_v23 = vmul.f32 %v12761_v34, %v4912_v15  ;;  %v12798_v29 = vadd.f32 1.0, %v8852_v9  ;;  %v12840_v17 = vpop.f32.mrf.mxu3 }
 0x5fc   : > { %v8854_v35 = vpop.eup %8853  ;;  %v6478_v48 = vsel %vm6477_vm12, %v12725_v16, %v6474_v44  ;;  %8861 = vpow2.f32 %v8256_v38  ;;  %v6938_v19 = vsub.f32 %v14974_v13, %v6922_v7  ;;  %vm4915_vm14 = vweird.f32 %v12705_v41  ;;  %v6866_v7 = vpop.xlane.xlu2 %6865  ;;  %v14984_v13 = vld [vmem:[#allocation18_spill] sm:$0xff] }
 0x5fd   : > { %v6483_v51 = vsel %vm12737_vm10, %v12718_v28, %v6478_v48  ;;  %v12807_v58 = vadd.f32 1.0, %v8854_v35  ;;  %v4914_v16 = vadd.f32 %v12761_v34, %v4913_v23  ;;  %8863 = vrcp.f32 %v12798_v29  ;;  %vm4917_vm15 = vmor %vm4915_vm14, %vm4916_vm13  ;;  %v12860_v44 = vpop.f32.mrf.mxu1  ;;  %v14983_v23 = vld [vmem:[#allocation16_spill] sm:$0xff] }
 0x5fe   : > { %6666 = vst [vmem:[%s11634_s24 + $0x350] sm:$0xff] %v6483_v51  ;;  %vm4920_vm0 = vcmp.eq.f32.partialorder %v4919_v31, 8.507059e+37  ;;  %v4922_v28 = vor.u32 1.1754944e-38, %v4921_v2  ;;  %v6921_v11 = vadd.f32 %v12729_v36, %v14975_v21  ;;  %4161 = vmatmul.bf16.gmra.mxu0 %v14976_v22  ;;  %v8257_v59 = vmul.f32 -1.442695, %v4104_v14 }
 0x5ff   : > { %v8856_v50 = vpop.eup %8855  ;;  %8865 = vrcp.f32 %v12807_v58  ;;  %v4918_v45 = vsel %vm4917_vm15, %v12761_v34, %v4914_v16  ;;  %v4008_v18 = vadd.f32 %v12679_v53, %v3959_v5  ;;  %v4934_v41 = vand.u32 2147483647, %v12807_v58  ;;  %v14982_v5 = vld [vmem:[#allocation19_spill] sm:$0xff] }
 0x600   : > { %v8858_v54 = vpop.eup %8857  ;;  %v12825_v42 = vadd.f32 1.0, %v8856_v50  ;;  %v4923_v33 = vsel %vm4920_vm0, %v4922_v28, %v4918_v45  ;;  %v5024_v2 = vand.u32 2147483647, %v12798_v29  ;;  %6978 = vrot.lane.b32.xlu1 %v6938_v19, %s9193_s26  ;;  %v4936_v61 = vand.u32 2147483648, %v12807_v58  ;;  %v12838_v56 = vpop.f32.mrf.mxu2 }
 0x601   : > { %v8860_v31 = vpop.eup %8859  ;;  %6562 = vst [vmem:[%s11634_s24 + $0x10] sm:$0xff] %v4923_v33  ;;  %v5026_v63 = vand.u32 2147483648, %v12798_v29  ;;  %v6905_v34 = vmul.f32 0.6931472, %v8858_v54  ;;  %vm5020_vm1 = vweird.f32 %v12798_v29  ;;  %vm4930_vm2 = vweird.f32 %v12807_v58  ;;  %v12858_v49 = vpop.f32.mrf.mxu0 }
 0x602   : > { %v8862_v36 = vpop.eup %8861  ;;  %8867 = vrcp.f32 %v12825_v42  ;;  %v6901_v32 = vmul.f32 0.6931472, %v8860_v31  ;;  %v8263_v47 = vmul.f32 -1.442695, %v4008_v18  ;;  %v6937_v62 = vsub.f32 %v14977_v46, %v6921_v11 }
 0x603   : > { %v12836_v53 = vadd.f32 1.0, %v8862_v36  ;;  %v12842_v27 = vpop.eup %8863  ;;  %8869 = vpow2.f32 %v8257_v59  ;;  %vm12850_vm3 = vcmp.eq.f32.partialorder %v5024_v2, 8.507059e+37  ;;  %v5039_v20 = vand.u32 2147483647, %v12825_v42 }
 0x604   : > { %v5016_v55 = vmul.f32 %v12842_v27, %v12798_v29  ;;  %v5041_v60 = vand.u32 2147483648, %v12825_v42  ;;  %vm12864_vm5 = vcmp.eq.f32.partialorder %v4934_v41, 8.507059e+37  ;;  %v4937_v9 = vor.u32 1.1754944e-38, %v4936_v61  ;;  %6976 = vrot.lane.b32.xlu0 %v6937_v62, %s9193_s26  ;;  %4210 = vmatmul.bf16.gmra.mxu1 %v14984_v13 }
 0x605   : > { %v12846_v6 = vpop.eup %8865  ;;  %8871 = vrcp.f32 %v12836_v53  ;;  %4254 = vmatmul.bf16.gmra.mxu2 %v11306_v40  ;;  %v5027_v14 = vor.u32 1.1754944e-38, %v5026_v63  ;;  %v6925_v35 = vadd.f32 %v6905_v34, %v14982_v5  ;;  %vm5035_vm6 = vweird.f32 %v12825_v42  ;;  %v14988_v63 = vld [vmem:[#allocation7_spill] sm:$0xff] }
 0x606   : > { %v4926_v15 = vmul.f32 %v12846_v6, %v12807_v58  ;;  %4303 = vmatmul.bf16.gmra.mxu3 %v11308_v30  ;;  %v5017_v48 = vsub.f32 1.0, %v5016_v55  ;;  %v6923_v51 = vadd.f32 %v6901_v32, %v14983_v23  ;;  %8873 = vpow2.f32 %v8263_v47 }
 0x607   : > { %vm5021_vm7 = vweird.f32 %v12842_v27  ;;  %8875 = vlog2.f32 %v6866_v7  ;;  %v4057_v50 = vadd.f32 %v12721_v52, %v12684_v1  ;;  %vm4931_vm8 = vweird.f32 %v12846_v6  ;;  %v14987_v52 = vld [vmem:[#allocation6_spill] sm:$0xff] }
 0x608   : > { %v12874_v19 = vpop.eup %8867  ;;  %v4927_v16 = vsub.f32 1.0, %v4926_v15  ;;  %v5018_v28 = vmul.f32 %v12842_v27, %v5017_v48  ;;  %vm12883_vm9 = vcmp.eq.f32.partialorder %v5039_v20, 8.507059e+37  ;;  %v5042_v54 = vor.u32 1.1754944e-38, %v5041_v60  ;;  %vm12902_vm10 = vmor %vm5020_vm1, %vm5021_vm7  ;;  %v12921_v20 = vpop.f32.mrf.mxu2 }
 0x609   : > { %v5031_v21 = vmul.f32 %v12874_v19, %v12825_v42  ;;  %v8870_v45 = vpop.eup %8869  ;;  %v5129_v18 = vand.u32 2147483647, %v12836_v53  ;;  %v4106_v31 = vadd.f32 %v12723_v39, %v4057_v50  ;;  %v6941_v33 = vsub.f32 %v14987_v52, %v6925_v35  ;;  %vm4932_vm11 = vmor %vm4930_vm2, %vm4931_vm8  ;;  %v12923_v60 = vpop.f32.mrf.mxu3  ;;  %v7958_v42 = vld [vmem:[%s14774_s12 + $0x130] sm:$0xf]  ;;  %v14992_v52 = vld [vmem:[#allocation17_spill] sm:$0xff] }
 0x60a   : > { %v4928_v59 = vmul.f32 %v12846_v6, %v4927_v16  ;;  %v5019_v2 = vadd.f32 %v12842_v27, %v5018_v28  ;;  %v12894_v61 = vadd.f32 1.0, %v8870_v45  ;;  %v6939_v34 = vsub.f32 %v14988_v63, %v6923_v51  ;;  %v12937_v16 = vpop.f32.mrf.mxu0  ;;  %v8529_v63 = vld [vmem:[%s14774_s12 + $0x110] sm:$0xf0] }
 0x60b   : > { %v12891_v41 = vpop.eup %8871  ;;  %v5032_v36 = vsub.f32 1.0, %v5031_v21  ;;  %v5131_v46 = vand.u32 2147483648, %v12836_v53  ;;  %v8264_v62 = vmul.f32 -1.442695, %v4106_v31  ;;  %6984 = vrot.lane.b32.xlu1 %v6941_v33, %s9193_s26  ;;  %vm5036_vm12 = vweird.f32 %v12874_v19  ;;  %v8536_v21 = vld [vmem:[%s14774_s12 + $0x148] sm:$0xf0] }
 0x60c   : > { %v4929_v32 = vadd.f32 %v12846_v6, %v4928_v59  ;;  %v5121_v39 = vmul.f32 %v12891_v41, %v12836_v53  ;;  %v8874_v7 = vpop.eup %8873  ;;  %v5023_v29 = vsel %vm12902_vm10, %v12842_v27, %v5019_v2  ;;  %8877 = vrcp.f32 %v12894_v61  ;;  %6980 = vrot.lane.b32.xlu2 %v6939_v34, %s9193_s26  ;;  %vm5037_vm14 = vmor %vm5035_vm6, %vm5036_vm12 }
 0x60d   : > { %v5033_v55 = vmul.f32 %v12874_v19, %v5032_v36  ;;  %v8876_v15 = vpop.eup %8875  ;;  %v5028_v5 = vsel %vm12850_vm3, %v5027_v14, %v5023_v29  ;;  %v3962_v35 = vadd.f32 %v12743_v26, %v12590_v24  ;;  %vm5126_vm13 = vweird.f32 %v12891_v41  ;;  %v6878_v14 = vpop.xlane.xlu1 %6877 }
 0x60e   : > { %v4933_v58 = vsel %vm4932_vm11, %v12846_v6, %v4929_v32  ;;  %v5122_v27 = vsub.f32 1.0, %v5121_v39  ;;  %6569 = vst [vmem:[%s11634_s24 + $0x48] sm:$0xff] %v5028_v5  ;;  %v12935_v51 = vadd.f32 1.0, %v8874_v7  ;;  %v12939_v6 = vpop.f32.mrf.mxu1  ;;  %4166 = vmatmul.bf16.gmra.mxu0 %v14991_v25  ;;  %v5144_v38 = vand.u32 2147483647, %v12894_v61 }
 0x60f   : > { %v4938_v48 = vsel %vm12864_vm5, %v4937_v9, %v4933_v58  ;;  %v5034_v23 = vadd.f32 %v12874_v19, %v5033_v55  ;;  %v6903_v9 = vmul.f32 0.6931472, %v8876_v15  ;;  %8879 = vpow2.f32 %v8264_v62  ;;  %v14995_v62 = vld [vmem:[#allocation8_spill] sm:$0xff] }
 0x610   : > { %6563 = vst [vmem:[%s11634_s24 + $0x18] sm:$0xff] %v4938_v48  ;;  %v5123_v26 = vmul.f32 %v12891_v41, %v5122_v27  ;;  %vm5125_vm15 = vweird.f32 %v12836_v53  ;;  %v5146_v28 = vand.u32 2147483648, %v12894_v61  ;;  %8881 = vrcp.f32 %v12935_v51  ;;  %v8182_v53 = vld [vmem:[%s14774_s12 + $0x2f0] sm:$0xf]  ;;  %v12997_v5 = vpop.f32.mrf.mxu2 }
 0x611   : > { %v5038_v50 = vsel %vm5037_vm14, %v12874_v19, %v5034_v23  ;;  %vm5130_vm0 = vcmp.eq.f32.partialorder %v5129_v18, 8.507059e+37  ;;  %v5132_v19 = vor.u32 1.1754944e-38, %v5131_v46  ;;  %vm5127_vm1 = vmor %vm5125_vm15, %vm5126_vm13  ;;  %v6924_v33 = vadd.f32 %v6903_v9, %v14992_v52  ;;  %v8592_v18 = vld [vmem:[%s14774_s12 + $0x308] sm:$0xf0]  ;;  %v12999_v27 = vpop.f32.mrf.mxu3  ;;  %v6872_v23 = vpop.xlane.xlu0 %6871  ;;  %v14997_v52 = vld [vmem:[#allocation24_spill] sm:$0xff] }
 0x612   : > { %v5043_v45 = vsel %vm12883_vm9, %v5042_v54, %v5038_v50  ;;  %v5124_v59 = vadd.f32 %v12891_v41, %v5123_v26  ;;  %v12965_v31 = vpop.eup %8877  ;;  %v4011_v11 = vadd.f32 %v12745_v57, %v3962_v35  ;;  %v7959_v54 = vor.u32 %v8536_v21, %v7958_v42  ;;  %v14996_v26 = vld [vmem:[#allocation22_spill] sm:$0xff]  ;;  %v13014_v50 = vpop.f32.mrf.mxu0 }
 0x613   : > { %6570 = vst [vmem:[%s11634_s24 + $0x50] sm:$0xff] %v5043_v45  ;;  %8883 = vlog2.f32 %v6878_v14  ;;  %v5136_v36 = vmul.f32 %v12965_v31, %v12894_v61  ;;  %vm5140_vm2 = vweird.f32 %v12894_v61  ;;  %vm12979_vm3 = vcmp.eq.f32.partialorder %v5144_v38, 8.507059e+37 }
 0x614   : > { %v5128_v2 = vsel %vm5127_vm1, %v12891_v41, %v5124_v59  ;;  %v5147_v32 = vor.u32 1.1754944e-38, %v5146_v28  ;;  %v8270_v57 = vmul.f32 -1.442695, %v4011_v11  ;;  %4336 = vmatpush.bf16.msra.mxu0 %v7959_v54  ;;  %v8183_v47 = vor.u32 %v8592_v18, %v8182_v53  ;;  %4215 = vmatmul.bf16.gmra.mxu1 %v14996_v26  ;;  %v6875_v59 = vpop.xlane.xlu2 %6874 }
 0x615   : > { %v5133_v34 = vsel %vm5130_vm0, %v5132_v19, %v5128_v2  ;;  %4259 = vmatmul.bf16.gmra.mxu2 %v14976_v22  ;;  %v8880_v39 = vpop.eup %8879  ;;  %v5137_v46 = vsub.f32 1.0, %v5136_v36  ;;  %vm5230_vm5 = vweird.f32 %v12935_v51  ;;  %v4060_v41 = vadd.f32 %v12784_v3, %v12684_v1 }
 0x616   : > { %6576 = vst [vmem:[%s11634_s24 + $0x80] sm:$0xff] %v5133_v34  ;;  %v6940_v7 = vsub.f32 %v14995_v62, %v6924_v33  ;;  %4308 = vmatmul.bf16.gmra.mxu3 %v14984_v13  ;;  %v12990_v29 = vpop.eup %8881  ;;  %v5236_v55 = vand.u32 2147483648, %v12935_v51  ;;  %v12993_v15 = vadd.f32 1.0, %v8880_v39  ;;  %8885 = vpow2.f32 %v8270_v57  ;;  %4385 = vmatpush.bf16.msra.mxu1 %v8183_v47  ;;  %v13016_v28 = vpop.f32.mrf.mxu1  ;;  %v7930_v57 = vld [vmem:[%s14774_s12 + $0xf8] sm:$0xf] }
 0x617   : > { %v3964_v58 = vadd.f32 %v12800_v0, %v12590_v24  ;;  %v5138_v3 = vmul.f32 %v12965_v31, %v5137_v46  ;;  %vm5141_vm6 = vweird.f32 %v12965_v31  ;;  %v5226_v35 = vmul.f32 %v12990_v29, %v12935_v51  ;;  %v8154_v46 = vld [vmem:[%s14774_s12 + $0x2b8] sm:$0xf] }
 0x618   : > { %v4109_v48 = vadd.f32 %v12786_v4, %v4060_v41  ;;  %6982 = vrot.lane.b32.xlu0 %v6940_v7, %s9193_s26  ;;  %v5234_v0 = vand.u32 2147483647, %v12935_v51  ;;  %8887 = vrcp.f32 %v12993_v15  ;;  %v4062_v9 = vadd.f32 %v12838_v56, %v12684_v1  ;;  %vm5142_vm7 = vmor %vm5140_vm2, %vm5141_vm6  ;;  %v13056_v41 = vpop.f32.mrf.mxu2  ;;  %v15001_v7 = vld [vmem:[#allocation25_spill] sm:$0xff] }
 0x619   : > { %v8884_v38 = vpop.eup %8883  ;;  %v3967_v14 = vadd.f32 %v12858_v49, %v12590_v24  ;;  %v5139_v4 = vadd.f32 %v12965_v31, %v5138_v3  ;;  %v5227_v42 = vsub.f32 1.0, %v5226_v35  ;;  %vm5231_vm8 = vweird.f32 %v12990_v29  ;;  %v13058_v62 = vpop.f32.mrf.mxu3 }
 0x61a   : > { %v6911_v21 = vmul.f32 0.6931472, %v8884_v38  ;;  %v8271_v45 = vmul.f32 -1.442695, %v4109_v48  ;;  %v5237_v56 = vor.u32 1.1754944e-38, %v5236_v55  ;;  %v4013_v49 = vadd.f32 %v12802_v12, %v3964_v58  ;;  %vm13049_vm9 = vmor %vm5230_vm5, %vm5231_vm8 }
 0x61b   : > { %8889 = vlog2.f32 %v6872_v23  ;;  %v5143_v19 = vsel %vm5142_vm7, %v12965_v31, %v5139_v4  ;;  %v5228_v53 = vmul.f32 %v12990_v29, %v5227_v42  ;;  %v4111_v18 = vadd.f32 %v12840_v17, %v4062_v9  ;;  %v14998_v31 = vld [vmem:[#allocation9_spill] sm:$0xff]  ;;  %v8585_v58 = vld [vmem:[%s14774_s12 + $0x2d0] sm:$0xf0] }
 0x61c   : > { %v6928_v33 = vadd.f32 %v6911_v21, %v14997_v52  ;;  %8891 = vpow2.f32 %v8271_v45  ;;  %v8886_v11 = vpop.eup %8885  ;;  %v5148_v61 = vsel %vm12979_vm3, %v5147_v32, %v5143_v19  ;;  %v8277_v54 = vmul.f32 -1.442695, %v4013_v49 }
 0x61d   : > { %v4016_v2 = vadd.f32 %v12860_v44, %v3967_v14  ;;  %6577 = vst [vmem:[%s11634_s24 + $0x88] sm:$0xff] %v5148_v61  ;;  %v5229_v12 = vadd.f32 %v12990_v29, %v5228_v53  ;;  %v13034_v36 = vadd.f32 1.0, %v8886_v11  ;;  %8893 = vlog2.f32 %v6875_v59 }
 0x61e   : > { %v6944_v34 = vsub.f32 %v14998_v31, %v6928_v33  ;;  %v13043_v32 = vpop.eup %8887  ;;  %8895 = vpow2.f32 %v8277_v54  ;;  %v8278_v44 = vmul.f32 -1.442695, %v4111_v18  ;;  %v7931_v39 = vor.u32 %v8529_v63, %v7930_v57  ;;  %4171 = vmatmul.bf16.gmra.mxu0 %v15001_v7  ;;  %v13076_v14 = vpop.f32.mrf.mxu1  ;;  %v15006_v63 = vld [vmem:[#allocation26_spill] sm:$0xff] }
 0x61f   : > { %v8284_v47 = vmul.f32 -1.442695, %v4016_v2  ;;  %v5233_v51 = vsel %vm13049_vm9, %v12990_v29, %v5229_v12  ;;  %vm5235_vm10 = vcmp.eq.f32.partialorder %v5234_v0, 8.507059e+37  ;;  %v5241_v55 = vmul.f32 %v13043_v32, %v12993_v15  ;;  %v13073_v29 = vpop.f32.mrf.mxu0 }
 0x620   : > { %8897 = vrcp.f32 %v13034_v36  ;;  %6990 = vrot.lane.b32.xlu1 %v6944_v34, %s9193_s26  ;;  %v5238_v35 = vsel %vm5235_vm10, %v5237_v56, %v5233_v51  ;;  %v5249_v48 = vand.u32 2147483647, %v12993_v15  ;;  %v5251_v23 = vand.u32 2147483648, %v12993_v15  ;;  %4337 = vmatpush.bf16.msra.mxu0 %v7931_v39  ;;  %v13116_v51 = vpop.f32.mrf.mxu2 }
 0x621   : > { %v8890_v3 = vpop.eup %8889  ;;  %6583 = vst [vmem:[%s11634_s24 + $0xb8] sm:$0xff] %v5238_v35  ;;  %v5242_v0 = vsub.f32 1.0, %v5241_v55  ;;  %8899 = vpow2.f32 %v8278_v44  ;;  %v8155_v9 = vor.u32 %v8585_v58, %v8154_v46  ;;  %v5339_v4 = vand.u32 2147483647, %v13034_v36  ;;  %v13118_v55 = vpop.f32.mrf.mxu3 }
 0x622   : > { %v8892_v38 = vpop.eup %8891  ;;  %v5341_v42 = vand.u32 2147483648, %v13034_v36  ;;  %8901 = vpow2.f32 %v8284_v47  ;;  %vm5246_vm11 = vweird.f32 %v13043_v32  ;;  %v4065_v49 = vadd.f32 %v12921_v20, %v12684_v1 }
 0x623   : > { %v13080_v21 = vadd.f32 1.0, %v8892_v38  ;;  %v8894_v45 = vpop.eup %8893  ;;  %v5243_v56 = vmul.f32 %v13043_v32, %v5242_v0  ;;  %4386 = vmatpush.bf16.msra.mxu1 %v8155_v9  ;;  %vm5245_vm12 = vweird.f32 %v12993_v15  ;;  %vm13087_vm13 = vcmp.eq.f32.partialorder %v5249_v48, 8.507059e+37 }
 0x624   : > { %v8896_v59 = vpop.eup %8895  ;;  %v5252_v53 = vor.u32 1.1754944e-38, %v5251_v23  ;;  %vm5335_vm14 = vweird.f32 %v13034_v36  ;;  %v6907_v20 = vmul.f32 0.6931472, %v8890_v3  ;;  %vm5247_vm15 = vmor %vm5245_vm12, %vm5246_vm11  ;;  %vm13101_vm0 = vcmp.eq.f32.partialorder %v5339_v4, 8.507059e+37  ;;  %4220 = vmatmul.bf16.gmra.mxu1 %v15006_v63 }
 0x625   : > { %8903 = vrcp.f32 %v13080_v21  ;;  %4264 = vmatmul.bf16.gmra.mxu2 %v14991_v25  ;;  %v5244_v33 = vadd.f32 %v13043_v32, %v5243_v56  ;;  %v13095_v11 = vadd.f32 1.0, %v8896_v59  ;;  %v5342_v54 = vor.u32 1.1754944e-38, %v5341_v42 }
 0x626   : > { %v8898_v52 = vpop.eup %8897  ;;  %4313 = vmatmul.bf16.gmra.mxu3 %v14996_v26  ;;  %v5354_v18 = vand.u32 2147483647, %v13080_v21  ;;  %v5356_v2 = vand.u32 2147483648, %v13080_v21  ;;  %v6909_v34 = vmul.f32 0.6931472, %v8894_v45  ;;  %v4114_v57 = vadd.f32 %v12923_v60, %v4065_v49  ;;  %v13136_v45 = vpop.f32.mrf.mxu1  ;;  %v15010_v49 = vld [vmem:[#allocation23_spill] sm:$0xff] }
 0x627   : > { %v5331_v15 = vmul.f32 %v8898_v52, %v13034_v36  ;;  %v8900_v12 = vpop.eup %8899  ;;  %v5248_v31 = vsel %vm5247_vm15, %v13043_v32, %v5244_v33  ;;  %8905 = vrcp.f32 %v13095_v11  ;;  %v5446_v39 = vand.u32 2147483648, %v13095_v11  ;;  %v15007_v32 = vld [vmem:[#allocation20_spill] sm:$0xff]  ;;  %v13129_v38 = vpop.f32.mrf.mxu0 }
 0x628   : > { %v8902_v17 = vpop.eup %8901  ;;  %v5253_v44 = vsel %vm13087_vm13, %v5252_v53, %v5248_v31  ;;  %v13114_v46 = vadd.f32 1.0, %v8900_v12  ;;  %vm5350_vm1 = vweird.f32 %v13080_v21  ;;  %v6926_v60 = vadd.f32 %v6907_v20, %v15007_v32  ;;  %v15013_v31 = vld [vmem:[#allocation28_spill] sm:$0xff] }
 0x629   : > { %v5332_v47 = vsub.f32 1.0, %v5331_v15  ;;  %6584 = vst [vmem:[%s11634_s24 + $0xc0] sm:$0xff] %v5253_v44  ;;  %v13123_v58 = vadd.f32 1.0, %v8902_v17  ;;  %v3969_v3 = vadd.f32 %v12937_v16, %v12590_v24  ;;  %vm5336_vm2 = vweird.f32 %v8898_v52 }
 0x62a   : > { %v5444_v23 = vand.u32 2147483647, %v13095_v11  ;;  %8907 = vrcp.f32 %v13114_v46  ;;  %vm13132_vm3 = vcmp.eq.f32.partialorder %v5354_v18, 8.507059e+37  ;;  %v5357_v4 = vor.u32 1.1754944e-38, %v5356_v2  ;;  %vm5337_vm6 = vmor %vm5335_vm14, %vm5336_vm2 }
 0x62b   : > { %v8904_v35 = vpop.eup %8903  ;;  %v5333_v48 = vmul.f32 %v8898_v52, %v5332_v47  ;;  %v8285_v42 = vmul.f32 -1.442695, %v4114_v57  ;;  %vm5440_vm5 = vweird.f32 %v13095_v11  ;;  %v13139_v56 = vor.u32 1.1754944e-38, %v5446_v39  ;;  %v15014_v47 = vld [vmem:[#allocation10_spill] sm:$0xff] }
 0x62c   : > { %v5346_v0 = vmul.f32 %v8904_v35, %v13080_v21  ;;  %8909 = vrcp.f32 %v13123_v58  ;;  %v6927_v59 = vadd.f32 %v6909_v34, %v15010_v49  ;;  %vm5351_vm7 = vweird.f32 %v8904_v35 }
 0x62d   : > { %v5334_v16 = vadd.f32 %v8898_v52, %v5333_v48  ;;  %v13143_v19 = vpop.eup %8905  ;;  %v5459_v33 = vand.u32 2147483647, %v13114_v46  ;;  %v5461_v20 = vand.u32 2147483648, %v13114_v46  ;;  %vm13152_vm8 = vcmp.eq.f32.partialorder %v5444_v23, 8.507059e+37  ;;  %vm5352_vm13 = vmor %vm5350_vm1, %vm5351_vm7 }
 0x62e   : > { %v5347_v53 = vsub.f32 1.0, %v5346_v0  ;;  %v5436_v18 = vmul.f32 %v13143_v19, %v13095_v11  ;;  %v5549_v12 = vand.u32 2147483647, %v13123_v58  ;;  %v5551_v36 = vand.u32 2147483648, %v13123_v58  ;;  %4176 = vmatmul.bf16.gmra.mxu0 %v15013_v31  ;;  %v13225_v11 = vpop.f32.mrf.mxu1 }
 0x62f   : > { %v5338_v15 = vsel %vm5337_vm6, %v8898_v52, %v5334_v16  ;;  %vm5441_vm9 = vweird.f32 %v13143_v19  ;;  %vm5455_vm10 = vweird.f32 %v13114_v46  ;;  %8911 = vpow2.f32 %v8285_v42  ;;  %v13185_v42 = vpop.f32.mrf.mxu2  ;;  %v13187_v16 = vpop.f32.mrf.mxu3 }
 0x630   : > { %v5343_v34 = vsel %vm13101_vm0, %v5342_v54, %v5338_v15  ;;  %v5348_v57 = vmul.f32 %v8904_v35, %v5347_v53  ;;  %v13163_v52 = vpop.eup %8907  ;;  %v5437_v17 = vsub.f32 1.0, %v5436_v18  ;;  %v4018_v44 = vadd.f32 %v12939_v6, %v3969_v3  ;;  %v15015_v3 = vld [vmem:[#allocation11_spill] sm:$0xff]  ;;  %v13209_v9 = vpop.f32.mrf.mxu0  ;;  %vm5442_vm15 = vmor %vm5440_vm5, %vm5441_vm9 }
 0x631   : > { %6590 = vst [vmem:[%s11634_s24 + $0xf0] sm:$0xff] %v5343_v34  ;;  %v6942_v39 = vsub.f32 %v15014_v47, %v6926_v60  ;;  %v4067_v32 = vadd.f32 %v12997_v5, %v12684_v1  ;;  %v5451_v61 = vmul.f32 %v13163_v52, %v13114_v46  ;;  %vm5456_vm11 = vweird.f32 %v13163_v52  ;;  %v8578_v47 = vld [vmem:[%s14774_s12 + $0x298] sm:$0xf0] }
 0x632   : > { %v5349_v48 = vadd.f32 %v8904_v35, %v5348_v57  ;;  %vm5545_vm12 = vweird.f32 %v13123_v58  ;;  %v3972_v54 = vadd.f32 %v13014_v50, %v12590_v24  ;;  %v13176_v23 = vpop.eup %8909  ;;  %v5438_v6 = vmul.f32 %v13143_v19, %v5437_v17  ;;  %vm5457_vm0 = vmor %vm5455_vm10, %vm5456_vm11  ;;  %v15018_v46 = vld [vmem:[#allocation29_spill] sm:$0xff] }
 0x633   : > { %v8291_v5 = vmul.f32 -1.442695, %v4018_v44  ;;  %6986 = vrot.lane.b32.xlu2 %v6942_v39, %s9193_s26  ;;  %v4116_v60 = vadd.f32 %v12999_v27, %v4067_v32  ;;  %v6943_v0 = vsub.f32 %v15015_v3, %v6927_v59  ;;  %v5452_v49 = vsub.f32 1.0, %v5451_v61  ;;  %v7902_v59 = vld [vmem:[%s14774_s12 + $0xc0] sm:$0xf] }
 0x634   : > { %v5353_v50 = vsel %vm5352_vm13, %v8904_v35, %v5349_v48  ;;  %v5541_v21 = vmul.f32 %v13176_v23, %v13123_v58  ;;  %vm5546_vm14 = vweird.f32 %v13176_v23  ;;  %v5439_v15 = vadd.f32 %v13143_v19, %v5438_v6  ;;  %v8522_v35 = vld [vmem:[%s14774_s12 + $0xd8] sm:$0xf0]  ;;  %v8126_v44 = vld [vmem:[%s14774_s12 + $0x280] sm:$0xf]  ;;  %4225 = vmatmul.bf16.gmra.mxu1 %v15018_v46 }
 0x635   : > { %v5358_v53 = vsel %vm13132_vm3, %v5357_v4, %v5353_v50  ;;  %8913 = vpow2.f32 %v8291_v5  ;;  %v8292_v27 = vmul.f32 -1.442695, %v4116_v60  ;;  %6988 = vrot.lane.b32.xlu0 %v6943_v0, %s9193_s26  ;;  %4269 = vmatmul.bf16.gmra.mxu2 %v15001_v7  ;;  %v8912_v4 = vpop.eup %8911  ;;  %v5453_v18 = vmul.f32 %v13163_v52, %v5452_v49  ;;  %v6881_v60 = vpop.xlane.xlu0 %6880  ;;  %vm5547_vm3 = vmor %vm5545_vm12, %vm5546_vm14 }
 0x636   : > { %6591 = vst [vmem:[%s11634_s24 + $0xf8] sm:$0xff] %v5358_v53  ;;  %v5542_v34 = vsub.f32 1.0, %v5541_v21  ;;  %v4021_v57 = vadd.f32 %v13016_v28, %v3972_v54  ;;  %v7903_v17 = vor.u32 %v8522_v35, %v7902_v59  ;;  %4318 = vmatmul.bf16.gmra.mxu3 %v15006_v63  ;;  %v5443_v39 = vsel %vm5442_vm15, %v13143_v19, %v5439_v15 }
 0x637   : > { %v13228_v32 = vadd.f32 1.0, %v8912_v4  ;;  %8915 = vpow2.f32 %v8292_v27  ;;  %v8127_v28 = vor.u32 %v8578_v47, %v8126_v44  ;;  %v6963_v48 = vpop.permute.xlu2 %6962  ;;  %v5448_v61 = vsel %vm13152_vm8, %v13139_v56, %v5443_v39  ;;  %v13278_v27 = vpop.f32.mrf.mxu3 }
 0x638   : > { %v5454_v54 = vadd.f32 %v13163_v52, %v5453_v18  ;;  %v5543_v6 = vmul.f32 %v13176_v23, %v5542_v34  ;;  %v8298_v5 = vmul.f32 -1.442695, %v4021_v57  ;;  %4338 = vmatpush.bf16.msra.mxu0 %v7903_v17  ;;  %7010 = vst.msk [vmem:[%s13206_s19] sm:$0xff] %vm6833_vm4, %v6963_v48  ;;  %vm5460_vm1 = vcmp.eq.f32.partialorder %v5459_v33, 8.507059e+37  ;;  %v13289_v18 = vpop.f32.mrf.mxu0  ;;  %v15019_v34 = vld [vmem:[#allocation30_spill] sm:$0xff] }
 0x639   : > { %6597 = vst [vmem:[%s11634_s24 + $0x128] sm:$0xff] %v5448_v61  ;;  %v5462_v56 = vor.u32 1.1754944e-38, %v5461_v20  ;;  %vm13248_vm2 = vcmp.eq.f32.partialorder %v5549_v12, 8.507059e+37  ;;  %8917 = vrcp.f32 %v13228_v32  ;;  %4387 = vmatpush.bf16.msra.mxu1 %v8127_v28  ;;  %v4070_v33 = vadd.f32 %v13056_v41, %v12684_v1 }
 0x63a   : > { %v5458_v2 = vsel %vm5457_vm0, %v13163_v52, %v5454_v54  ;;  %v5544_v3 = vadd.f32 %v13176_v23, %v5543_v6  ;;  %8919 = vpow2.f32 %v8298_v5  ;;  %v5552_v12 = vor.u32 1.1754944e-38, %v5551_v36  ;;  %v13276_v36 = vpop.f32.mrf.mxu2 }
 0x63b   : > { %v8914_v20 = vpop.eup %8913  ;;  %v5463_v0 = vsel %vm5460_vm1, %v5462_v56, %v5458_v2  ;;  %v5564_v52 = vand.u32 2147483647, %v13228_v32  ;;  %8921 = vlog2.f32 %v6881_v60  ;;  %v4119_v49 = vadd.f32 %v13058_v62, %v4070_v33 }
 0x63c   : > { %6598 = vst [vmem:[%s11634_s24 + $0x130] sm:$0xff] %v5463_v0  ;;  %v5548_v50 = vsel %vm5547_vm3, %v13176_v23, %v5544_v3  ;;  %v13267_v41 = vadd.f32 1.0, %v8914_v20  ;;  %v3974_v21 = vadd.f32 %v13073_v29, %v12590_v24  ;;  %v4072_v58 = vadd.f32 %v13116_v51, %v12684_v1  ;;  %v15024_v20 = vld [vmem:[#allocation27_spill] sm:$0xff] }
 0x63d   : > { %v8916_v53 = vpop.eup %8915  ;;  %v5553_v15 = vsel %vm13248_vm2, %v5552_v12, %v5548_v50  ;;  %v5566_v23 = vand.u32 2147483648, %v13228_v32  ;;  %v8299_v59 = vmul.f32 -1.442695, %v4119_v49  ;;  %vm5560_vm5 = vweird.f32 %v13228_v32 }
 0x63e   : > { %6604 = vst [vmem:[%s11634_s24 + $0x160] sm:$0xff] %v5553_v15  ;;  %8923 = vrcp.f32 %v13267_v41  ;;  %v13285_v29 = vadd.f32 1.0, %v8916_v53  ;;  %v4023_v35 = vadd.f32 %v13076_v14, %v3974_v21  ;;  %v4121_v4 = vadd.f32 %v13118_v55, %v4072_v58  ;;  %4181 = vmatmul.bf16.gmra.mxu0 %v15019_v34  ;;  %v13301_v14 = vpop.f32.mrf.mxu1  ;;  %v7874_v53 = vld [vmem:[%s14774_s12 + $0x88] sm:$0xf]  ;;  %v8515_v15 = vld [vmem:[%s14774_s12 + $0xa0] sm:$0xf0] }
 0x63f   : > { %v13283_v62 = vpop.eup %8917  ;;  %v6969_v51 = vpop.permute.xlu2 %6968  ;;  %vm13295_vm6 = vcmp.eq.f32.partialorder %v5564_v52, 8.507059e+37  ;;  %v5654_v47 = vand.u32 2147483647, %v13267_v41  ;;  %v5656_v39 = vand.u32 2147483648, %v13267_v41  ;;  %v3977_v28 = vadd.f32 %v13129_v38, %v12590_v24 }
 0x640   : > { %v8920_v57 = vpop.eup %8919  ;;  %v5556_v17 = vmul.f32 %v13283_v62, %v13228_v32  ;;  %7013 = vst.msk [vmem:[%s13206_s19 + $0x18] sm:$0xff] %vm6833_vm4, %v6969_v51  ;;  %8925 = vrcp.f32 %v13285_v29  ;;  %v5567_v6 = vor.u32 1.1754944e-38, %v5566_v23  ;;  %v8305_v5 = vmul.f32 -1.442695, %v4023_v35  ;;  %v13331_v52 = vpop.f32.mrf.mxu3  ;;  %v15027_v35 = vld [vmem:[#allocation13_spill] sm:$0xff] }
 0x641   : > { %v8922_v55 = vpop.eup %8921  ;;  %v13308_v61 = vadd.f32 1.0, %v8920_v57  ;;  %8927 = vpow2.f32 %v8299_v59  ;;  %v8306_v60 = vmul.f32 -1.442695, %v4121_v4  ;;  %v4075_v56 = vadd.f32 %v13185_v42, %v12684_v1  ;;  %v8098_v51 = vld [vmem:[%s14774_s12 + $0x248] sm:$0xf]  ;;  %v13362_v32 = vpop.f32.mrf.mxu0 }
 0x642   : > { %v5557_v48 = vsub.f32 1.0, %v5556_v17  ;;  %v6913_v54 = vmul.f32 0.6931472, %v8922_v55  ;;  %vm5561_vm7 = vweird.f32 %v13283_v62  ;;  %vm5650_vm8 = vweird.f32 %v13267_v41  ;;  %v13329_v12 = vpop.f32.mrf.mxu2  ;;  %v8571_v57 = vld [vmem:[%s14774_s12 + $0x260] sm:$0xf0] }
 0x643   : > { %8929 = vrcp.f32 %v13308_v61  ;;  %vm13320_vm9 = vcmp.eq.f32.partialorder %v5654_v47, 8.507059e+37  ;;  %v13324_v33 = vor.u32 1.1754944e-38, %v5656_v39  ;;  %v5669_v42 = vand.u32 2147483647, %v13285_v29  ;;  %vm13350_vm11 = vmor %vm5560_vm5, %vm5561_vm7 }
 0x644   : > { %v13312_v19 = vpop.eup %8923  ;;  %v5558_v2 = vmul.f32 %v13283_v62, %v5557_v48  ;;  %v6929_v0 = vadd.f32 %v6913_v54, %v15024_v20  ;;  %vm5665_vm10 = vweird.f32 %v13285_v29  ;;  %v5759_v49 = vand.u32 2147483647, %v13308_v61 }
 0x645   : > { %v5646_v38 = vmul.f32 %v13312_v19, %v13267_v41  ;;  %4274 = vmatmul.bf16.gmra.mxu2 %v15013_v31  ;;  %8931 = vpow2.f32 %v8305_v5  ;;  %v4026_v21 = vadd.f32 %v13136_v45, %v3977_v28  ;;  %v5671_v59 = vand.u32 2147483648, %v13285_v29 }
 0x646   : > { %v5559_v50 = vadd.f32 %v13283_v62, %v5558_v2  ;;  %4323 = vmatmul.bf16.gmra.mxu3 %v15018_v46  ;;  %v13344_v58 = vpop.eup %8925  ;;  %8933 = vpow2.f32 %v8306_v60  ;;  %v6945_v4 = vsub.f32 %v15027_v35, %v6929_v0  ;;  %vm5651_vm12 = vweird.f32 %v13312_v19  ;;  %v13370_v48 = vpop.f32.mrf.mxu1 }
 0x647   : > { %v5647_v45 = vsub.f32 1.0, %v5646_v38  ;;  %v8928_v17 = vpop.eup %8927  ;;  %v5661_v47 = vmul.f32 %v13344_v58, %v13285_v29  ;;  %v8312_v39 = vmul.f32 -1.442695, %v4026_v21  ;;  %v6975_v28 = vpop.permute.xlu2 %6974  ;;  %v7875_v2 = vor.u32 %v8515_v15, %v7874_v53  ;;  %vm5652_vm14 = vmor %vm5650_vm8, %vm5651_vm12 }
 0x648   : > { %v5563_v55 = vsel %vm13350_vm11, %v13283_v62, %v5559_v50  ;;  %v13375_v60 = vadd.f32 1.0, %v8928_v17  ;;  %6992 = vrot.lane.b32.xlu2 %v6945_v4, %s9193_s26  ;;  %7016 = vst.msk [vmem:[%s13206_s19 + $0x30] sm:$0xff] %vm6833_vm4, %v6975_v28  ;;  %v8099_v20 = vor.u32 %v8571_v57, %v8098_v51  ;;  %v4124_v0 = vadd.f32 %v13187_v16, %v4075_v56  ;;  %v15028_v50 = vld [vmem:[#allocation31_spill] sm:$0xff]  ;;  %v13402_v41 = vpop.f32.mrf.mxu3 }
 0x649   : > { %v5568_v54 = vsel %vm13295_vm6, %v5567_v6, %v5563_v55  ;;  %v5648_v5 = vmul.f32 %v13312_v19, %v5647_v45  ;;  %v8930_v62 = vpop.eup %8929  ;;  %v5662_v38 = vsub.f32 1.0, %v5661_v47  ;;  %8935 = vpow2.f32 %v8312_v39  ;;  %4230 = vmatmul.bf16.gmra.mxu1 %v15028_v50  ;;  %4339 = vmatpush.bf16.msra.mxu0 %v7875_v2 }
 0x64a   : > { %6605 = vst [vmem:[%s11634_s24 + $0x168] sm:$0xff] %v5568_v54  ;;  %vm13384_vm13 = vcmp.eq.f32.partialorder %v5669_v42, 8.507059e+37  ;;  %v5751_v21 = vmul.f32 %v8930_v62, %v13308_v61  ;;  %8937 = vrcp.f32 %v13375_v60  ;;  %vm5666_vm15 = vweird.f32 %v13344_v58  ;;  %4388 = vmatpush.bf16.msra.mxu1 %v8099_v20  ;;  %v13400_v51 = vpop.f32.mrf.mxu2 }
 0x64b   : > { %v5649_v44 = vadd.f32 %v13312_v19, %v5648_v5  ;;  %v8932_v53 = vpop.eup %8931  ;;  %v5663_v16 = vmul.f32 %v13344_v58, %v5662_v38  ;;  %v5672_v56 = vor.u32 1.1754944e-38, %v5671_v59  ;;  %v5761_v42 = vand.u32 2147483648, %v13308_v61  ;;  %vm5667_vm2 = vmor %vm5665_vm10, %vm5666_vm15 }
 0x64c   : > { %v8934_v15 = vpop.eup %8933  ;;  %v5752_v45 = vsub.f32 1.0, %v5751_v21  ;;  %v13398_v35 = vadd.f32 1.0, %v8932_v53  ;;  %v8313_v4 = vmul.f32 -1.442695, %v4124_v0  ;;  %vm5755_vm0 = vweird.f32 %v13308_v61 }
 0x64d   : > { %v5653_v23 = vsel %vm5652_vm14, %v13312_v19, %v5649_v44  ;;  %v5664_v59 = vadd.f32 %v13344_v58, %v5663_v16  ;;  %vm13409_vm1 = vcmp.eq.f32.partialorder %v5759_v49, 8.507059e+37  ;;  %vm5756_vm3 = vweird.f32 %v8930_v62 }
 0x64e   : > { %v5658_v57 = vsel %vm13320_vm9, %v13324_v33, %v5653_v23  ;;  %v5753_v19 = vmul.f32 %v8930_v62, %v5752_v45  ;;  %v5774_v3 = vand.u32 2147483647, %v13375_v60  ;;  %8939 = vrcp.f32 %v13398_v35  ;;  %v13420_v33 = vpop.f32.mrf.mxu0  ;;  %v13426_v28 = vpop.f32.mrf.mxu1  ;;  %vm5757_vm5 = vmor %vm5755_vm0, %vm5756_vm3 }
 0x64f   : > { %6611 = vst [vmem:[%s11634_s24 + $0x198] sm:$0xff] %v5658_v57  ;;  %v8936_v55 = vpop.eup %8935  ;;  %v5668_v49 = vsel %vm5667_vm2, %v13344_v58, %v5664_v59  ;;  %v5776_v47 = vand.u32 2147483648, %v13375_v60  ;;  %v13424_v39 = vadd.f32 1.0, %v8934_v15  ;;  %8941 = vpow2.f32 %v8313_v4 }
 0x650   : > { %v13428_v29 = vpop.eup %8937  ;;  %v5673_v54 = vsel %vm13384_vm13, %v5672_v56, %v5668_v49  ;;  %v5754_v5 = vadd.f32 %v8930_v62, %v5753_v19  ;;  %v5762_v2 = vor.u32 1.1754944e-38, %v5761_v42  ;;  %v13432_v38 = vadd.f32 1.0, %v8936_v55 }
 0x651   : > { %6612 = vst [vmem:[%s11634_s24 + $0x1a0] sm:$0xff] %v5673_v54  ;;  %v5766_v58 = vmul.f32 %v13428_v29, %v13375_v60  ;;  %v5864_v20 = vand.u32 2147483647, %v13398_v35  ;;  %v5866_v0 = vand.u32 2147483648, %v13398_v35  ;;  %8943 = vrcp.f32 %v13424_v39 }
 0x652   : > { %v6965_v44 = vpop.permute.xlu1 %6964  ;;  %v5758_v6 = vsel %vm5757_vm5, %v8930_v62, %v5754_v5  ;;  %vm5770_vm6 = vweird.f32 %v13375_v60  ;;  %vm13444_vm7 = vcmp.eq.f32.partialorder %v5774_v3, 8.507059e+37  ;;  %v5881_v61 = vand.u32 2147483648, %v13424_v39  ;;  %v13478_v49 = vpop.f32.mrf.mxu2 }
 0x653   : > { %7011 = vst.msk [vmem:[%s13206_s19 + $0x8] sm:$0xff] %vm6833_vm4, %v6965_v44  ;;  %v5763_v53 = vsel %vm13409_vm1, %v5762_v2, %v5758_v6  ;;  %v5767_v16 = vsub.f32 1.0, %v5766_v58  ;;  %v5777_v56 = vor.u32 1.1754944e-38, %v5776_v47  ;;  %8945 = vrcp.f32 %v13432_v38  ;;  %v13480_v47 = vpop.f32.mrf.mxu3  ;;  %v8557_v44 = vld [vmem:[%s14774_s12 + $0x1f0] sm:$0xf0] }
 0x654   : > { %v13454_v42 = vpop.eup %8939  ;;  %6618 = vst [vmem:[%s11634_s24 + $0x1d0] sm:$0xff] %v5763_v53  ;;  %vm5771_vm8 = vweird.f32 %v13428_v29  ;;  %vm5860_vm9 = vweird.f32 %v13398_v35  ;;  %v5879_v62 = vand.u32 2147483647, %v13424_v39  ;;  %v5971_v15 = vand.u32 2147483648, %v13432_v38 }
 0x655   : > { %4279 = vmatmul.bf16.gmra.mxu2 %v15019_v34  ;;  %v8942_v23 = vpop.eup %8941  ;;  %v5768_v45 = vmul.f32 %v13428_v29, %v5767_v16  ;;  %v5856_v4 = vmul.f32 %v13454_v42, %v13398_v35  ;;  %vm13465_vm10 = vcmp.eq.f32.partialorder %v5864_v20, 8.507059e+37  ;;  %v5867_v59 = vor.u32 1.1754944e-38, %v5866_v0  ;;  %vm13492_vm12 = vmor %vm5770_vm6, %vm5771_vm8 }
 0x656   : > { %v3979_v17 = vadd.f32 %v13209_v9, %v12590_v24  ;;  %4328 = vmatmul.bf16.gmra.mxu3 %v15028_v50  ;;  %vm5875_vm11 = vweird.f32 %v13424_v39  ;;  %v13473_v19 = vor.u32 1.1754944e-38, %v5881_v61  ;;  %v5969_v3 = vand.u32 2147483647, %v13432_v38  ;;  %v13508_v6 = vpop.f32.mrf.mxu0  ;;  %v13510_v61 = vpop.f32.mrf.mxu1 }
 0x657   : > { %v13476_v55 = vadd.f32 1.0, %v8942_v23  ;;  %v13482_v54 = vpop.eup %8943  ;;  %v5769_v5 = vadd.f32 %v13428_v29, %v5768_v45  ;;  %v5857_v2 = vsub.f32 1.0, %v5856_v4  ;;  %v13485_v9 = vor.u32 1.1754944e-38, %v5971_v15  ;;  %v8070_v15 = vld [vmem:[%s14774_s12 + $0x210] sm:$0xf] }
 0x658   : > { %v4028_v58 = vadd.f32 %v13225_v11, %v3979_v17  ;;  %v5871_v0 = vmul.f32 %v13482_v54, %v13424_v39  ;;  %vm13498_vm13 = vcmp.eq.f32.partialorder %v5879_v62, 8.507059e+37  ;;  %vm5965_vm14 = vweird.f32 %v13432_v38 }
 0x659   : > { %8947 = vrcp.f32 %v13476_v55  ;;  %v4077_v11 = vadd.f32 %v13276_v36, %v12684_v1  ;;  %v3982_v60 = vadd.f32 %v13289_v18, %v12590_v24  ;;  %v13512_v53 = vpop.eup %8945  ;;  %v5773_v16 = vsel %vm13492_vm12, %v13428_v29, %v5769_v5  ;;  %v7846_v36 = vld [vmem:[%s14774_s12 + $0x50] sm:$0xf]  ;;  %v8508_v18 = vld [vmem:[%s14774_s12 + $0x68] sm:$0xf0] }
 0x65a   : > { %v5858_v62 = vmul.f32 %v13454_v42, %v5857_v2  ;;  %vm5861_vm15 = vweird.f32 %v13454_v42  ;;  %vm5876_vm0 = vweird.f32 %v13482_v54  ;;  %v5778_v29 = vsel %vm13444_vm7, %v5777_v56, %v5773_v16  ;;  %v8564_v5 = vld [vmem:[%s14774_s12 + $0x228] sm:$0xf0] }
 0x65b   : > { %v5872_v23 = vsub.f32 1.0, %v5871_v0  ;;  %v5961_v45 = vmul.f32 %v13512_v53, %v13432_v38  ;;  %vm13533_vm1 = vcmp.eq.f32.partialorder %v5969_v3, 8.507059e+37  ;;  %6619 = vst [vmem:[%s11634_s24 + $0x1d8] sm:$0xff] %v5778_v29  ;;  %vm5966_vm2 = vweird.f32 %v13512_v53  ;;  %vm5862_vm3 = vmor %vm5860_vm9, %vm5861_vm15  ;;  %v8042_v38 = vld [vmem:[%s14774_s12 + $0x1d8] sm:$0xf] }
 0x65c   : > { %v5859_v2 = vadd.f32 %v13454_v42, %v5858_v62  ;;  %v8319_v56 = vmul.f32 -1.442695, %v4028_v58  ;;  %v4126_v0 = vadd.f32 %v13278_v27, %v4077_v11  ;;  %v4031_v16 = vadd.f32 %v13301_v14, %v3982_v60  ;;  %vm13564_vm5 = vmor %vm5875_vm11, %vm5876_vm0 }
 0x65d   : > { %v5873_v3 = vmul.f32 %v13482_v54, %v5872_v23  ;;  %v5962_v20 = vsub.f32 1.0, %v5961_v45  ;;  %v7847_v29 = vor.u32 %v8508_v18, %v7846_v36  ;;  %v8071_v17 = vor.u32 %v8564_v5, %v8070_v15  ;;  %v7818_v36 = vld [vmem:[%s14774_s12 + $0x18] sm:$0xf]  ;;  %v13587_v18 = vpop.f32.mrf.mxu2  ;;  %v13589_v15 = vpop.f32.mrf.mxu3  ;;  %vm5967_vm7 = vmor %vm5965_vm14, %vm5966_vm2 }
 0x65e   : > { %v5863_v62 = vsel %vm5862_vm3, %v13454_v42, %v5859_v2  ;;  %8949 = vpow2.f32 %v8319_v56  ;;  %v8320_v23 = vmul.f32 -1.442695, %v4126_v0  ;;  %v8326_v42 = vmul.f32 -1.442695, %v4031_v16  ;;  %v13614_v2 = vpop.f32.mrf.mxu1 }
 0x65f   : > { %v13553_v21 = vpop.eup %8947  ;;  %v5868_v58 = vsel %vm13465_vm10, %v5867_v59, %v5863_v62  ;;  %v5874_v35 = vadd.f32 %v13482_v54, %v5873_v3  ;;  %v5963_v50 = vmul.f32 %v13512_v53, %v5962_v20  ;;  %4340 = vmatpush.bf16.msra.mxu0 %v7847_v29  ;;  %4389 = vmatpush.bf16.msra.mxu1 %v8071_v17  ;;  %v6967_v59 = vpop.permute.xlu0 %6966  ;;  %vm5980_vm8 = vweird.f32 %v13476_v55 }
 0x660   : > { %6625 = vst [vmem:[%s11634_s24 + $0x208] sm:$0xff] %v5868_v58  ;;  %v5976_v14 = vmul.f32 %v13553_v21, %v13476_v55  ;;  %vm5981_vm6 = vweird.f32 %v13553_v21  ;;  %v4080_v57 = vadd.f32 %v13329_v12, %v12684_v1  ;;  %8951 = vpow2.f32 %v8320_v23  ;;  %v8501_v12 = vld [vmem:[%s14774_s12 + $0x30] sm:$0xf0] }
 0x661   : > { %v5878_v39 = vsel %vm13564_vm5, %v13482_v54, %v5874_v35  ;;  %v5964_v11 = vadd.f32 %v13512_v53, %v5963_v50  ;;  %v3984_v60 = vadd.f32 %v13362_v32, %v12590_v24  ;;  %7012 = vst.msk [vmem:[%s13206_s19 + $0x10] sm:$0xff] %vm6833_vm4, %v6967_v59  ;;  %8953 = vpow2.f32 %v8326_v42  ;;  %vm5982_vm9 = vmor %vm5980_vm8, %vm5981_vm6 }
 0x662   : > { %v5883_v50 = vsel %vm13498_vm13, %v13473_v19, %v5878_v39  ;;  %v5977_v32 = vsub.f32 1.0, %v5976_v14  ;;  %v4129_v54 = vadd.f32 %v13331_v52, %v4080_v57  ;;  %v4082_v5 = vadd.f32 %v13400_v51, %v12684_v1  ;;  %v13612_v52 = vpop.f32.mrf.mxu0 }
 0x663   : > { %6626 = vst [vmem:[%s11634_s24 + $0x210] sm:$0xff] %v5883_v50  ;;  %v5968_v45 = vsel %vm5967_vm7, %v13512_v53, %v5964_v11  ;;  %v4033_v17 = vadd.f32 %v13370_v48, %v3984_v60  ;;  %v3987_v19 = vadd.f32 %v13420_v33, %v12590_v24  ;;  %v7819_v56 = vor.u32 %v8501_v12, %v7818_v36 }
 0x664   : > { %v8950_v53 = vpop.eup %8949  ;;  %v5973_v48 = vsel %vm13533_vm1, %v13485_v9, %v5968_v45  ;;  %v5978_v51 = vmul.f32 %v13553_v21, %v5977_v32  ;;  %v8327_v33 = vmul.f32 -1.442695, %v4129_v54  ;;  %v4131_v0 = vadd.f32 %v13402_v41, %v4082_v5 }
 0x665   : > { %6632 = vst [vmem:[%s11634_s24 + $0x240] sm:$0xff] %v5973_v48  ;;  %v13621_v3 = vadd.f32 1.0, %v8950_v53  ;;  %v8333_v20 = vmul.f32 -1.442695, %v4033_v17  ;;  %4341 = vmatpush.bf16.msra.mxu0 %v7819_v56  ;;  %v8043_v62 = vor.u32 %v8557_v44, %v8042_v38  ;;  %v15045_v9 = vand.u32 2147483647, %v13476_v55 }
 0x666   : > { %v5979_v16 = vadd.f32 %v13553_v21, %v5978_v51  ;;  %8955 = vpow2.f32 %v8327_v33  ;;  %v8952_v4 = vpop.eup %8951  ;;  %v15046_v29 = vand.u32 2147483648, %v13476_v55  ;;  %v4036_v41 = vadd.f32 %v13426_v28, %v3987_v19  ;;  %v6981_v35 = vpop.permute.xlu2 %6980 }
 0x667   : > { %vm5985_vm10 = vcmp.eq.f32.partialorder %v15045_v9, 8.507059e+37  ;;  %8957 = vrcp.f32 %v13621_v3  ;;  %v8954_v23 = vpop.eup %8953  ;;  %v13635_v14 = vadd.f32 1.0, %v8952_v4  ;;  %v8334_v42 = vmul.f32 -1.442695, %v4131_v0  ;;  %4390 = vmatpush.bf16.msra.mxu1 %v8043_v62  ;;  %7019 = vst.msk [vmem:[%s13206_s19 + $0x48] sm:$0xff] %vm6833_vm4, %v6981_v35  ;;  %v13659_v50 = vpop.f32.mrf.mxu1 }
 0x668   : > { %v5987_v58 = vor.u32 1.1754944e-38, %v15046_v29  ;;  %v5983_v27 = vsel %vm5982_vm9, %v13553_v21, %v5979_v16  ;;  %8959 = vpow2.f32 %v8333_v20  ;;  %v13639_v59 = vadd.f32 1.0, %v8954_v23  ;;  %4342 = vmatmul.bf16.vlgmr.msra.gmra.mxu0 %v11238_v37  ;;  %v13648_v39 = vpop.f32.mrf.mxu2 }
 0x669   : > { %v4085_v55 = vadd.f32 %v13478_v49, %v12684_v1  ;;  %v6074_v28 = vand.u32 2147483647, %v13621_v3  ;;  %v6076_v21 = vand.u32 2147483648, %v13621_v3  ;;  %8961 = vrcp.f32 %v13635_v14  ;;  %v13650_v11 = vpop.f32.mrf.mxu3 }
 0x66a   : > { %v5988_v57 = vsel %vm5985_vm10, %v5987_v58, %v5983_v27  ;;  %8963 = vrcp.f32 %v13639_v59  ;;  %v6973_v60 = vpop.permute.xlu1 %6972  ;;  %4391 = vmatmul.bf16.vlgmr.msra.gmra.mxu1 %v11240_v8  ;;  %vm6070_vm11 = vweird.f32 %v13621_v3  ;;  %v8340_v37 = vmul.f32 -1.442695, %v4036_v41  ;;  %v13657_v12 = vpop.f32.mrf.mxu0 }
 0x66b   : > { %6633 = vst [vmem:[%s11634_s24 + $0x248] sm:$0xff] %v5988_v57  ;;  %v6971_v36 = vpop.permute.xlu0 %6970  ;;  %8965 = vpow2.f32 %v8334_v42  ;;  %v6089_v54 = vand.u32 2147483647, %v13635_v14  ;;  %v6091_v45 = vand.u32 2147483648, %v13635_v14  ;;  %v4134_v8 = vadd.f32 %v13480_v47, %v4085_v55 }
 0x66c   : > { %v8956_v49 = vpop.eup %8955  ;;  %7015 = vst.msk [vmem:[%s13206_s19 + $0x28] sm:$0xff] %vm6833_vm4, %v6973_v60  ;;  %vm13669_vm12 = vcmp.eq.f32.partialorder %v6074_v28, 8.507059e+37  ;;  %v6077_v44 = vor.u32 1.1754944e-38, %v6076_v21  ;;  %v6179_v53 = vand.u32 2147483647, %v13639_v59  ;;  %8967 = vpow2.f32 %v8340_v37 }
 0x66d   : > { %v8958_v32 = vpop.eup %8957  ;;  %v13663_v17 = vadd.f32 1.0, %v8956_v49  ;;  %7014 = vst.msk [vmem:[%s13206_s19 + $0x20] sm:$0xff] %vm6833_vm4, %v6971_v36  ;;  %vm6085_vm13 = vweird.f32 %v13635_v14  ;;  %v6181_v48 = vand.u32 2147483648, %v13639_v59  ;;  %v3989_v47 = vadd.f32 %v13508_v6, %v12590_v24 }
 0x66e   : > { %v8960_v5 = vpop.eup %8959  ;;  %v6066_v19 = vmul.f32 %v8958_v32, %v13621_v3  ;;  %vm6175_vm14 = vweird.f32 %v13639_v59  ;;  %v8341_v20 = vmul.f32 -1.442695, %v4134_v8  ;;  %vm6071_vm15 = vweird.f32 %v8958_v32 }
 0x66f   : > { %8969 = vrcp.f32 %v13663_v17  ;;  %v13679_v51 = vpop.eup %8961  ;;  %v13682_v56 = vadd.f32 1.0, %v8960_v5  ;;  %vm13688_vm0 = vcmp.eq.f32.partialorder %v6089_v54, 8.507059e+37  ;;  %v6092_v4 = vor.u32 1.1754944e-38, %v6091_v45  ;;  %v13714_v49 = vpop.f32.mrf.mxu1  ;;  %vm6072_vm5 = vmor %vm6070_vm11, %vm6071_vm15 }
 0x670   : > { %v6067_v33 = vsub.f32 1.0, %v6066_v19  ;;  %v13684_v0 = vpop.eup %8963  ;;  %v6081_v16 = vmul.f32 %v13679_v51, %v13635_v14  ;;  %v6196_v24 = vand.u32 2147483648, %v13663_v17  ;;  %vm13695_vm1 = vcmp.eq.f32.partialorder %v6179_v53, 8.507059e+37  ;;  %v13701_v35 = vpop.f32.mrf.mxu2 }
 0x671   : > { %v8966_v6 = vpop.eup %8965  ;;  %v6171_v29 = vmul.f32 %v13684_v0, %v13639_v59  ;;  %v6194_v41 = vand.u32 2147483647, %v13663_v17  ;;  %8971 = vrcp.f32 %v13682_v56  ;;  %vm6086_vm2 = vweird.f32 %v13679_v51 }
 0x672   : > { %v6068_v9 = vmul.f32 %v8958_v32, %v6067_v33  ;;  %v6082_v23 = vsub.f32 1.0, %v6081_v16  ;;  %v6182_v27 = vor.u32 1.1754944e-38, %v6181_v48  ;;  %v13705_v42 = vadd.f32 %v13510_v61, %v3989_v47  ;;  %v6979_v57 = vpop.permute.xlu1 %6978  ;;  %v8968_v55 = vpop.eup %8967  ;;  %vm6087_vm8 = vmor %vm6085_vm13, %vm6086_vm2 }
 0x673   : > { %v6172_v21 = vsub.f32 1.0, %v6171_v29  ;;  %vm6190_vm3 = vweird.f32 %v13663_v17  ;;  %v13708_v60 = vadd.f32 1.0, %v8966_v6  ;;  %8973 = vpow2.f32 %v8341_v20  ;;  %7018 = vst.msk [vmem:[%s13206_s19 + $0x40] sm:$0xff] %vm6833_vm4, %v6979_v57  ;;  %v13712_v36 = vpop.f32.mrf.mxu0  ;;  %v13733_v48 = vpop.f32.mrf.mxu3 }
 0x674   : > { %v6069_v28 = vadd.f32 %v8958_v32, %v6068_v9  ;;  %v6083_v61 = vmul.f32 %v13679_v51, %v6082_v23  ;;  %vm6176_vm6 = vweird.f32 %v13684_v0  ;;  %v6197_v54 = vor.u32 1.1754944e-38, %v6196_v24 }
 0x675   : > { %v13716_v37 = vpop.eup %8969  ;;  %v13723_v45 = vadd.f32 1.0, %v8968_v55  ;;  %v6173_v5 = vmul.f32 %v13684_v0, %v6172_v21  ;;  %vm13728_vm7 = vcmp.eq.f32.partialorder %v6194_v41, 8.507059e+37  ;;  %v6284_v3 = vand.u32 2147483647, %v13682_v56  ;;  %vm6177_vm11 = vmor %vm6175_vm14, %vm6176_vm6 }
 0x676   : > { %v6073_v8 = vsel %vm6072_vm5, %v8958_v32, %v6069_v28  ;;  %v6186_v19 = vmul.f32 %v13716_v37, %v13663_v17  ;;  %v6084_v33 = vadd.f32 %v13679_v51, %v6083_v61  ;;  %v6286_v32 = vand.u32 2147483648, %v13682_v56  ;;  %v6977_v38 = vpop.permute.xlu0 %6976 }
 0x677   : > { %v6078_v47 = vsel %vm13669_vm12, %v6077_v44, %v6073_v8  ;;  %8975 = vrcp.f32 %v13708_v60  ;;  %v13740_v20 = vpop.eup %8971  ;;  %v6174_v16 = vadd.f32 %v13684_v0, %v6173_v5  ;;  %vm6191_vm9 = vweird.f32 %v13716_v37  ;;  %7017 = vst.msk [vmem:[%s13206_s19 + $0x38] sm:$0xff] %vm6833_vm4, %v6977_v38 }
 0x678   : > { %6639 = vst [vmem:[%s11634_s24 + $0x278] sm:$0xff] %v6078_v47  ;;  %v6187_v24 = vsub.f32 1.0, %v6186_v19  ;;  %vm6280_vm10 = vweird.f32 %v13682_v56  ;;  %v6088_v44 = vsel %vm6087_vm8, %v13679_v51, %v6084_v33  ;;  %v6276_v14 = vmul.f32 %v13740_v20, %v13682_v56  ;;  %4347 = vmatmul.bf16.gmra.mxu0 %v11272_v43  ;;  %vm6192_vm15 = vmor %vm6190_vm3, %vm6191_vm9  ;;  %v13801_v33 = vpop.f32.mrf.mxu1 }
 0x679   : > { %v6299_v6 = vand.u32 2147483647, %v13708_v60  ;;  %8977 = vrcp.f32 %v13723_v45  ;;  %v8974_v9 = vpop.eup %8973  ;;  %v6093_v51 = vsel %vm13688_vm0, %v6092_v4, %v6088_v44  ;;  %v6178_v29 = vsel %vm6177_vm11, %v13684_v0, %v6174_v16  ;;  %v13781_v4 = vpop.f32.mrf.mxu2 }
 0x67a   : > { %v6188_v59 = vmul.f32 %v13716_v37, %v6187_v24  ;;  %v6301_v41 = vand.u32 2147483648, %v13708_v60  ;;  %6640 = vst [vmem:[%s11634_s24 + $0x280] sm:$0xff] %v6093_v51  ;;  %v6183_v23 = vsel %vm13695_vm1, %v6182_v27, %v6178_v29  ;;  %v6277_v57 = vsub.f32 1.0, %v6276_v14  ;;  %4396 = vmatmul.bf16.gmra.mxu1 %v11274_v10 }
 0x67b   : > { %vm13770_vm12 = vcmp.eq.f32.partialorder %v6284_v3, 8.507059e+37  ;;  %v6287_v43 = vor.u32 1.1754944e-38, %v6286_v32  ;;  %6646 = vst [vmem:[%s11634_s24 + $0x2b0] sm:$0xff] %v6183_v23  ;;  %vm6281_vm13 = vweird.f32 %v13740_v20  ;;  %vm6295_vm14 = vweird.f32 %v13708_v60  ;;  %v13791_v61 = vpop.f32.mrf.mxu0 }
 0x67c   : > { %v6189_v62 = vadd.f32 %v13716_v37, %v6188_v59  ;;  %v13779_v0 = vadd.f32 1.0, %v8974_v9  ;;  %v6278_v27 = vmul.f32 %v13740_v20, %v6277_v57  ;;  %v6389_v10 = vand.u32 2147483647, %v13723_v45  ;;  %vm6282_vm1 = vmor %vm6280_vm10, %vm6281_vm13 }
 0x67d   : > { %v8976_v58 = vpop.eup %8975  ;;  %v6391_v28 = vand.u32 2147483648, %v13723_v45  ;;  %v8347_v21 = vmul.f32 -1.442695, %v13705_v42  ;;  %vm13795_vm0 = vcmp.eq.f32.partialorder %v6299_v6, 8.507059e+37  ;;  %v6302_v17 = vor.u32 1.1754944e-38, %v6301_v41  ;;  %v6985_v47 = vpop.permute.xlu1 %6984 }
 0x67e   : > { %v6193_v8 = vsel %vm6192_vm15, %v13716_v37, %v6189_v62  ;;  %v6291_v5 = vmul.f32 %v8976_v58, %v13708_v60  ;;  %v4087_v3 = vadd.f32 %v13587_v18, %v12684_v1  ;;  %v6279_v16 = vadd.f32 %v13740_v20, %v6278_v27  ;;  %v9182_v37 = vld [vmem:[%s14775_s13] sm:$0xff]  ;;  %7021 = vst.msk [vmem:[%s13206_s19 + $0x58] sm:$0xff] %vm6833_vm4, %v6985_v47 }
 0x67f   : > { %v8978_v32 = vpop.eup %8977  ;;  %v6198_v42 = vsel %vm13728_vm7, %v6197_v54, %v6193_v8  ;;  %8979 = vrcp.f32 %v13779_v0  ;;  %v13810_v24 = vperm.slane %v9182_v37, 4  ;;  %vm6296_vm2 = vweird.f32 %v8976_v58  ;;  %v13821_v54 = vpop.f32.mrf.mxu3 }
 0x680   : > { %6647 = vst [vmem:[%s11634_s24 + $0x2b8] sm:$0xff] %v6198_v42  ;;  %v6292_v1 = vsub.f32 1.0, %v6291_v5  ;;  %v6381_v18 = vmul.f32 %v8978_v32, %v13723_v45  ;;  %vm6385_vm3 = vweird.f32 %v13723_v45  ;;  %v6283_v53 = vsel %vm6282_vm1, %v13740_v20, %v6279_v16  ;;  %vm6297_vm7 = vmor %vm6295_vm14, %vm6296_vm2  ;;  %v13863_v19 = vpop.f32.mrf.mxu1 }
 0x681   : > { %vm13824_vm5 = vcmp.eq.f32.partialorder %v6389_v10, 8.507059e+37  ;;  %v6392_v44 = vor.u32 1.1754944e-38, %v6391_v28  ;;  %8981 = vpow2.f32 %v8347_v21  ;;  %v6288_v56 = vsel %vm13770_vm12, %v6287_v43, %v6283_v53  ;;  %v4252_v60 = vpop.f32.mrf.mxu2 }
 0x682   : > { %v6293_v14 = vmul.f32 %v8976_v58, %v6292_v1  ;;  %v6382_v6 = vsub.f32 1.0, %v6381_v18  ;;  %v4136_v9 = vadd.f32 %v13589_v15, %v4087_v3  ;;  %6653 = vst [vmem:[%s11634_s24 + $0x2e8] sm:$0xff] %v6288_v56  ;;  %vm6386_vm6 = vweird.f32 %v8978_v32 }
 0x683   : > { %v6404_v51 = vand.u32 2147483647, %v13779_v0  ;;  %v4148_v20 = vadd.f32 %v13612_v52, %v13810_v24  ;;  %v13835_v29 = vperm.slane %v9182_v37, 5  ;;  %v4150_v57 = vadd.f32 %v13657_v12, %v13810_v24  ;;  %vm6387_vm8 = vmor %vm6385_vm3, %vm6386_vm6  ;;  %v13861_v3 = vpop.f32.mrf.mxu0 }
 0x684   : > { %v6294_v59 = vadd.f32 %v8976_v58, %v6293_v14  ;;  %v6383_v41 = vmul.f32 %v8978_v32, %v6382_v6  ;;  %v8348_v23 = vmul.f32 -1.442695, %v4136_v9  ;;  %v6406_v15 = vand.u32 2147483648, %v13779_v0 }
 0x685   : > { %v8980_v55 = vpop.eup %8979  ;;  %v4197_v43 = vadd.f32 %v13614_v2, %v4148_v20  ;;  %v4246_v52 = vadd.f32 %v13648_v39, %v13835_v29  ;;  %v4248_v62 = vadd.f32 %v13701_v35, %v13835_v29  ;;  %v4153_v28 = vadd.f32 %v13712_v36, %v13810_v24 }
 0x686   : > { %v6298_v27 = vsel %vm6297_vm7, %v8976_v58, %v6294_v59  ;;  %v6384_v10 = vadd.f32 %v8978_v32, %v6383_v41  ;;  %v6396_v12 = vmul.f32 %v8980_v55, %v13779_v0  ;;  %8983 = vpow2.f32 %v8348_v23 }
 0x687   : > { %v8982_v21 = vpop.eup %8981  ;;  %v6303_v8 = vsel %vm13795_vm0, %v6302_v17, %v6298_v27  ;;  %v8244_v2 = vmul.f32 -1.442695, %v4197_v43  ;;  %v4295_v39 = vadd.f32 %v13650_v11, %v4246_v52  ;;  %v4199_v36 = vadd.f32 %v13659_v50, %v4150_v57 }
 0x688   : > { %6654 = vst [vmem:[%s11634_s24 + $0x2f0] sm:$0xff] %v6303_v8  ;;  %v6388_v35 = vsel %vm6387_vm8, %v8978_v32, %v6384_v10  ;;  %v6397_v58 = vsub.f32 1.0, %v6396_v12  ;;  %v13858_v5 = vadd.f32 1.0, %v8982_v21  ;;  %v4297_v47 = vadd.f32 %v13733_v48, %v4248_v62  ;;  %4352 = vmatmul.bf16.gmra.mxu0 %v11306_v40  ;;  %v4301_v32 = vpop.f32.mrf.mxu3  ;;  %v13894_v41 = vpop.f32.mrf.mxu1 }
 0x689   : > { %v6393_v45 = vsel %vm13824_vm5, %v6392_v44, %v6388_v35  ;;  %8985 = vpow2.f32 %v8244_v2  ;;  %v8245_v17 = vmul.f32 -1.442695, %v4295_v39  ;;  %vm6401_vm9 = vweird.f32 %v8980_v55 }
 0x68a   : > { %6660 = vst [vmem:[%s11634_s24 + $0x320] sm:$0xff] %v6393_v45  ;;  %v6398_v11 = vmul.f32 %v8980_v55, %v6397_v58  ;;  %8987 = vrcp.f32 %v13858_v5  ;;  %v6983_v50 = vpop.permute.xlu0 %6982  ;;  %v8251_v42 = vmul.f32 -1.442695, %v4199_v36  ;;  %v8252_v16 = vmul.f32 -1.442695, %v4297_v47  ;;  %4401 = vmatmul.bf16.gmra.mxu1 %v11308_v30 }
 0x68b   : > { %8989 = vpow2.f32 %v8245_v17  ;;  %7020 = vst.msk [vmem:[%s13206_s19 + $0x50] sm:$0xff] %vm6833_vm4, %v6983_v50  ;;  %vm6400_vm10 = vweird.f32 %v13779_v0  ;;  %v4202_v40 = vadd.f32 %v13714_v49, %v4153_v28  ;;  %v4251_v48 = vadd.f32 %v13781_v4, %v13835_v29  ;;  %v13883_v49 = vpop.f32.mrf.mxu2  ;;  %v13892_v59 = vpop.f32.mrf.mxu0 }
 0x68c   : > { %v6399_v37 = vadd.f32 %v8980_v55, %v6398_v11  ;;  %v8984_v1 = vpop.eup %8983  ;;  %vm6402_vm11 = vmor %vm6400_vm10, %vm6401_vm9  ;;  %vm6405_vm12 = vcmp.eq.f32.partialorder %v6404_v51, 8.507059e+37  ;;  %v6407_v18 = vor.u32 1.1754944e-38, %v6406_v15  ;;  %v6494_v53 = vand.u32 2147483647, %v13858_v5 }
 0x68d   : > { %8991 = vpow2.f32 %v8251_v42  ;;  %v6987_v38 = vpop.permute.xlu2 %6986  ;;  %v13879_v30 = vadd.f32 1.0, %v8984_v1  ;;  %v8258_v56 = vmul.f32 -1.442695, %v4202_v40  ;;  %v6496_v14 = vand.u32 2147483648, %v13858_v5 }
 0x68e   : > { %v6403_v44 = vsel %vm6402_vm11, %v8980_v55, %v6399_v37  ;;  %8993 = vpow2.f32 %v8252_v16  ;;  %7022 = vst.msk [vmem:[%s13206_s19 + $0x60] sm:$0xff] %vm6833_vm4, %v6987_v38  ;;  %v4300_v6 = vadd.f32 %v13821_v54, %v4251_v48  ;;  %v4155_v51 = vadd.f32 %v13791_v61, %v13810_v24 }
 0x68f   : > { %v8986_v0 = vpop.eup %8985  ;;  %v6408_v4 = vsel %vm6405_vm12, %v6407_v18, %v6403_v44  ;;  %8995 = vrcp.f32 %v13879_v30  ;;  %v4253_v20 = vadd.f32 %v4252_v60, %v13835_v29  ;;  %vm6490_vm13 = vweird.f32 %v13858_v5 }
 0x690   : > { %v8988_v9 = vpop.eup %8987  ;;  %6661 = vst [vmem:[%s11634_s24 + $0x328] sm:$0xff] %v6408_v4  ;;  %v13898_v54 = vadd.f32 1.0, %v8986_v0  ;;  %vm13900_vm14 = vcmp.eq.f32.partialorder %v6494_v53, 8.507059e+37  ;;  %8997 = vpow2.f32 %v8258_v56  ;;  %v8259_v61 = vmul.f32 -1.442695, %v4300_v6  ;;  %v13917_v8 = vpop.f32.mrf.mxu3 }
 0x691   : > { %v8990_v23 = vpop.eup %8989  ;;  %v6486_v57 = vmul.f32 %v8988_v9, %v13858_v5  ;;  %v6497_v27 = vor.u32 1.1754944e-38, %v6496_v14  ;;  %v6509_v10 = vand.u32 2147483647, %v13879_v30  ;;  %v6511_v28 = vand.u32 2147483648, %v13879_v30  ;;  %v13954_v18 = vpop.f32.mrf.mxu1 }
 0x692   : > { %v13904_v15 = vadd.f32 1.0, %v8990_v23  ;;  %v6991_v43 = vpop.permute.xlu1 %6990  ;;  %8999 = vrcp.f32 %v13898_v54  ;;  %v13913_v60 = vadd.f32 %v13801_v33, %v4155_v51  ;;  %v13915_v21 = vadd.f32 %v4301_v32, %v4253_v20 }
 0x693   : > { %v8992_v52 = vpop.eup %8991  ;;  %v6487_v62 = vsub.f32 1.0, %v6486_v57  ;;  %7024 = vst.msk [vmem:[%s13206_s19 + $0x70] sm:$0xff] %vm6833_vm4, %v6991_v43  ;;  %vm6491_vm15 = vweird.f32 %v8988_v9  ;;  %vm6505_vm0 = vweird.f32 %v13879_v30  ;;  %v4949_v58 = vand.u32 2147483647, %v13898_v54  ;;  %v13944_v37 = vpop.f32.mrf.mxu2 }
 0x694   : > { %v8994_v12 = vpop.eup %8993  ;;  %9001 = vrcp.f32 %v13904_v15  ;;  %v13920_v39 = vadd.f32 1.0, %v8992_v52  ;;  %v4951_v36 = vand.u32 2147483648, %v13898_v54  ;;  %vm13930_vm1 = vcmp.eq.f32.partialorder %v6509_v10, 8.507059e+37  ;;  %vm13937_vm2 = vmor %vm6490_vm13, %vm6491_vm15  ;;  %v13946_v40 = vpop.f32.mrf.mxu0 }
 0x695   : > { %v6488_v2 = vmul.f32 %v8988_v9, %v6487_v62  ;;  %v13922_v35 = vpop.eup %8995  ;;  %v13926_v45 = vadd.f32 1.0, %v8994_v12  ;;  %9003 = vpow2.f32 %v8259_v61  ;;  %v4964_v11 = vand.u32 2147483647, %v13904_v15 }
 0x696   : > { %v6501_v17 = vmul.f32 %v13922_v35, %v13879_v30  ;;  %v8998_v50 = vpop.eup %8997  ;;  %v6512_v42 = vor.u32 1.1754944e-38, %v6511_v28  ;;  %vm4945_vm3 = vweird.f32 %v13898_v54  ;;  %v4966_v16 = vand.u32 2147483648, %v13904_v15 }
 0x697   : > { %v6489_v33 = vadd.f32 %v8988_v9, %v6488_v2  ;;  %9005 = vrcp.f32 %v13920_v39  ;;  %vm4960_vm5 = vweird.f32 %v13904_v15  ;;  %vm13963_vm6 = vcmp.eq.f32.partialorder %v4949_v58, 8.507059e+37 }
 0x698   : > { %v13948_v48 = vpop.eup %8999  ;;  %v6502_v1 = vsub.f32 1.0, %v6501_v17  ;;  %9007 = vrcp.f32 %v13926_v45  ;;  %4357 = vmatmul.bf16.gmra.mxu0 %v14976_v22  ;;  %v4952_v0 = vor.u32 1.1754944e-38, %v4951_v36  ;;  %v5056_v4 = vand.u32 2147483648, %v13920_v39  ;;  %v13997_v10 = vpop.f32.mrf.mxu3 }
 0x699   : > { %v6493_v5 = vsel %vm13937_vm2, %v8988_v9, %v6489_v33  ;;  %v4941_v44 = vmul.f32 %v13948_v48, %v13898_v54  ;;  %vm6506_vm7 = vweird.f32 %v13922_v35  ;;  %vm13973_vm8 = vcmp.eq.f32.partialorder %v4964_v11, 8.507059e+37 }
 0x69a   : > { %v13957_v53 = vpop.eup %9001  ;;  %v6498_v38 = vsel %vm13900_vm14, %v6497_v27, %v6493_v5  ;;  %v6503_v14 = vmul.f32 %v13922_v35, %v6502_v1  ;;  %v5054_v9 = vand.u32 2147483647, %v13920_v39  ;;  %4406 = vmatmul.bf16.gmra.mxu1 %v14984_v13  ;;  %vm4946_vm9 = vweird.f32 %v13948_v48  ;;  %vm6507_vm12 = vmor %vm6505_vm0, %vm6506_vm7 }
 0x69b   : > { %6667 = vst [vmem:[%s11634_s24 + $0x358] sm:$0xff] %v6498_v38  ;;  %v4956_v22 = vmul.f32 %v13957_v53, %v13904_v15  ;;  %v9004_v51 = vpop.eup %9003  ;;  %v4942_v20 = vsub.f32 1.0, %v4941_v44  ;;  %v4967_v23 = vor.u32 1.1754944e-38, %v4966_v16  ;;  %v13980_v57 = vadd.f32 1.0, %v8998_v50  ;;  %vm4947_vm15 = vmor %vm4945_vm3, %vm4946_vm9  ;;  %v14031_v5 = vpop.f32.mrf.mxu2 }
 0x69c   : > { %v6504_v55 = vadd.f32 %v13922_v35, %v6503_v14  ;;  %vm4961_vm10 = vweird.f32 %v13957_v53  ;;  %vm5050_vm11 = vweird.f32 %v13920_v39  ;;  %v5069_v43 = vand.u32 2147483647, %v13926_v45  ;;  %v14033_v1 = vpop.f32.mrf.mxu0 }
 0x69d   : > { %v4957_v61 = vsub.f32 1.0, %v4956_v22  ;;  %v13986_v52 = vpop.eup %9005  ;;  %v4943_v13 = vmul.f32 %v13948_v48, %v4942_v20  ;;  %v5057_v62 = vor.u32 1.1754944e-38, %v5056_v4  ;;  %vm5065_vm13 = vweird.f32 %v13926_v45  ;;  %v14040_v4 = vpop.f32.mrf.mxu1 }
 0x69e   : > { %9009 = vrcp.f32 %v13980_v57  ;;  %v13995_v27 = vadd.f32 1.0, %v9004_v51  ;;  %v9008_v12 = vpop.eup %9007  ;;  %v6508_v28 = vsel %vm6507_vm12, %v13922_v35, %v6504_v55  ;;  %v5046_v30 = vmul.f32 %v13986_v52, %v13920_v39 }
 0x69f   : > { %v4958_v2 = vmul.f32 %v13957_v53, %v4957_v61  ;;  %vm14003_vm14 = vcmp.eq.f32.partialorder %v5054_v9, 8.507059e+37  ;;  %v5071_v36 = vand.u32 2147483648, %v13926_v45  ;;  %v6513_v33 = vsel %vm13930_vm1, %v6512_v42, %v6508_v28  ;;  %vm4962_vm1 = vmor %vm4960_vm5, %vm4961_vm10 }
 0x6a0   : > { %v4944_v17 = vadd.f32 %v13948_v48, %v4943_v13  ;;  %v5061_v11 = vmul.f32 %v9008_v12, %v13926_v45  ;;  %v8265_v35 = vmul.f32 -1.442695, %v13913_v60  ;;  %6668 = vst [vmem:[%s11634_s24 + $0x360] sm:$0xff] %v6513_v33  ;;  %v5047_v32 = vsub.f32 1.0, %v5046_v30 }
 0x6a1   : > { %v4959_v50 = vadd.f32 %v13957_v53, %v4958_v2  ;;  %vm14019_vm0 = vcmp.eq.f32.partialorder %v5069_v43, 8.507059e+37  ;;  %v5159_v47 = vand.u32 2147483647, %v13980_v57  ;;  %v5161_v54 = vand.u32 2147483648, %v13980_v57 }
 0x6a2   : > { %v4948_v42 = vsel %vm4947_vm15, %v13948_v48, %v4944_v17  ;;  %v5062_v60 = vsub.f32 1.0, %v5061_v11  ;;  %9011 = vrcp.f32 %v13995_v27  ;;  %v5048_v44 = vmul.f32 %v13986_v52, %v5047_v32  ;;  %v6993_v15 = vpop.permute.xlu2 %6992 }
 0x6a3   : > { %v4953_v38 = vsel %vm13963_vm6, %v4952_v0, %v4948_v42  ;;  %v4963_v48 = vsel %vm4962_vm1, %v13957_v53, %v4959_v50  ;;  %vm5051_vm2 = vweird.f32 %v13986_v52  ;;  %vm5066_vm3 = vweird.f32 %v9008_v12  ;;  %7025 = vst.msk [vmem:[%s13206_s19 + $0x78] sm:$0xff] %vm6833_vm4, %v6993_v15  ;;  %v4262_v50 = vpop.f32.mrf.mxu2 }
 0x6a4   : > { %v9010_v14 = vpop.eup %9009  ;;  %6564 = vst [vmem:[%s11634_s24 + $0x20] sm:$0xff] %v4953_v38  ;;  %v4968_v22 = vsel %vm13973_vm8, %v4967_v23, %v4963_v48  ;;  %v5063_v9 = vmul.f32 %v9008_v12, %v5062_v60  ;;  %v5072_v51 = vor.u32 1.1754944e-38, %v5071_v36  ;;  %v5049_v56 = vadd.f32 %v13986_v52, %v5048_v44  ;;  %vm5052_vm7 = vmor %vm5050_vm11, %vm5051_vm2 }
 0x6a5   : > { %6565 = vst [vmem:[%s11634_s24 + $0x28] sm:$0xff] %v4968_v22  ;;  %v5151_v53 = vmul.f32 %v9010_v14, %v13980_v57  ;;  %vm5155_vm5 = vweird.f32 %v13980_v57  ;;  %vm14049_vm6 = vcmp.eq.f32.partialorder %v5159_v47, 8.507059e+37  ;;  %v5162_v6 = vor.u32 1.1754944e-38, %v5161_v54  ;;  %vm5067_vm8 = vmor %vm5065_vm13, %vm5066_vm3  ;;  %v14094_v42 = vpop.f32.mrf.mxu1 }
 0x6a6   : > { %v5064_v20 = vadd.f32 %v9008_v12, %v5063_v9  ;;  %9013 = vpow2.f32 %v8265_v35  ;;  %v8266_v23 = vmul.f32 -1.442695, %v13915_v21  ;;  %v5053_v55 = vsel %vm5052_vm7, %v13986_v52, %v5049_v56  ;;  %v4309_v52 = vpop.f32.mrf.mxu3 }
 0x6a7   : > { %v5152_v61 = vsub.f32 1.0, %v5151_v53  ;;  %vm5156_vm9 = vweird.f32 %v9010_v14  ;;  %v4158_v39 = vadd.f32 %v13861_v3, %v13810_v24  ;;  %v6989_v43 = vpop.permute.xlu0 %6988  ;;  %v5058_v28 = vsel %vm14003_vm14, %v5057_v62, %v5053_v55 }
 0x6a8   : > { %v9012_v13 = vpop.eup %9011  ;;  %v5068_v2 = vsel %vm5067_vm8, %v9008_v12, %v5064_v20  ;;  %v5174_v21 = vand.u32 2147483647, %v13995_v27  ;;  %9015 = vpow2.f32 %v8266_v23  ;;  %7023 = vst.msk [vmem:[%s13206_s19 + $0x68] sm:$0xff] %vm6833_vm4, %v6989_v43  ;;  %v5176_v3 = vand.u32 2147483648, %v13995_v27  ;;  %4362 = vmatmul.bf16.gmra.mxu0 %v14991_v25  ;;  %vm5157_vm10 = vmor %vm5155_vm5, %vm5156_vm9 }
 0x6a9   : > { %6571 = vst [vmem:[%s11634_s24 + $0x58] sm:$0xff] %v5058_v28  ;;  %v5073_v45 = vsel %vm14019_vm0, %v5072_v51, %v5068_v2  ;;  %v5153_v30 = vmul.f32 %v9010_v14, %v5152_v61  ;;  %v5166_v36 = vmul.f32 %v9012_v13, %v13995_v27  ;;  %v4207_v62 = vadd.f32 %v13863_v19, %v4158_v39 }
 0x6aa   : > { %6572 = vst [vmem:[%s11634_s24 + $0x60] sm:$0xff] %v5073_v45  ;;  %v4256_v12 = vadd.f32 %v13883_v49, %v13835_v29  ;;  %v4160_v58 = vadd.f32 %v13892_v59, %v13810_v24  ;;  %v4258_v33 = vadd.f32 %v13944_v37, %v13835_v29  ;;  %vm5171_vm4 = vweird.f32 %v9012_v13  ;;  %4411 = vmatmul.bf16.gmra.mxu1 %v14996_v26 }
 0x6ab   : > { %v5154_v17 = vadd.f32 %v9010_v14, %v5153_v30  ;;  %v5167_v11 = vsub.f32 1.0, %v5166_v36  ;;  %v4163_v35 = vadd.f32 %v13946_v40, %v13810_v24  ;;  %v8272_v19 = vmul.f32 -1.442695, %v4207_v62  ;;  %v4167_v40 = vpop.f32.mrf.mxu0 }
 0x6ac   : > { %v9014_v25 = vpop.eup %9013  ;;  %v4305_v49 = vadd.f32 %v13917_v8, %v4256_v12  ;;  %v4209_v59 = vadd.f32 %v13894_v41, %v4160_v58  ;;  %v4307_v37 = vadd.f32 %v13997_v10, %v4258_v33  ;;  %vm5170_vm11 = vweird.f32 %v13995_v27 }
 0x6ad   : > { %v5158_v32 = vsel %vm5157_vm10, %v9010_v14, %v5154_v17  ;;  %v5168_v16 = vmul.f32 %v9012_v13, %v5167_v11  ;;  %v14091_v47 = vadd.f32 1.0, %v9014_v25  ;;  %v4212_v26 = vadd.f32 %v13954_v18, %v4163_v35  ;;  %vm5172_vm12 = vmor %vm5170_vm11, %vm5171_vm4  ;;  %v14116_v23 = vpop.f32.mrf.mxu1 }
 0x6ae   : > { %v9016_v57 = vpop.eup %9015  ;;  %v5163_v60 = vsel %vm14049_vm6, %v5162_v6, %v5158_v32  ;;  %9017 = vpow2.f32 %v8272_v19  ;;  %v8273_v8 = vmul.f32 -1.442695, %v4305_v49  ;;  %v8279_v54 = vmul.f32 -1.442695, %v4209_v59  ;;  %v4311_v9 = vpop.f32.mrf.mxu3 }
 0x6af   : > { %6578 = vst [vmem:[%s11634_s24 + $0x90] sm:$0xff] %v5163_v60  ;;  %v5169_v41 = vadd.f32 %v9012_v13, %v5168_v16  ;;  %v5177_v10 = vor.u32 1.1754944e-38, %v5176_v3  ;;  %9019 = vrcp.f32 %v14091_v47  ;;  %v14102_v18 = vadd.f32 1.0, %v9016_v57 }
 0x6b0   : > { %9021 = vpow2.f32 %v8273_v8  ;;  %v8280_v38 = vmul.f32 -1.442695, %v4307_v37  ;;  %v4261_v48 = vadd.f32 %v14031_v5, %v13835_v29  ;;  %vm5175_vm13 = vcmp.eq.f32.partialorder %v5174_v21, 8.507059e+37 }
 0x6b1   : > { %v5173_v44 = vsel %vm5172_vm12, %v9012_v13, %v5169_v41  ;;  %9023 = vpow2.f32 %v8279_v54  ;;  %v8286_v15 = vmul.f32 -1.442695, %v4212_v26  ;;  %v5264_v27 = vand.u32 2147483647, %v14091_v47  ;;  %v14124_v13 = vpop.f32.mrf.mxu2 }
 0x6b2   : > { %v5178_v14 = vsel %vm5175_vm13, %v5177_v10, %v5173_v44  ;;  %v5266_v22 = vand.u32 2147483648, %v14091_v47  ;;  %9025 = vrcp.f32 %v14102_v18  ;;  %v4310_v56 = vadd.f32 %v4309_v52, %v4261_v48 }
 0x6b3   : > { %6579 = vst [vmem:[%s11634_s24 + $0x98] sm:$0xff] %v5178_v14  ;;  %9027 = vpow2.f32 %v8280_v38  ;;  %v5279_v5 = vand.u32 2147483647, %v14102_v18  ;;  %v5281_v0 = vand.u32 2147483648, %v14102_v18  ;;  %v14114_v6 = vpop.f32.mrf.mxu0  ;;  %vm5260_vm14 = vweird.f32 %v14091_v47 }
 0x6b4   : > { %v9018_v51 = vpop.eup %9017  ;;  %9029 = vpow2.f32 %v8286_v15  ;;  %vm14120_vm15 = vcmp.eq.f32.partialorder %v5264_v27, 8.507059e+37  ;;  %v5267_v43 = vor.u32 1.1754944e-38, %v5266_v22  ;;  %vm5275_vm0 = vweird.f32 %v14102_v18 }
 0x6b5   : > { %v9020_v53 = vpop.eup %9019  ;;  %v14112_v20 = vadd.f32 1.0, %v9018_v51  ;;  %v4165_v2 = vadd.f32 %v14033_v1, %v13810_v24  ;;  %v4263_v21 = vadd.f32 %v4262_v50, %v13835_v29  ;;  %v14132_v52 = vadd.f32 %v4167_v40, %v13810_v24  ;;  %v14167_v40 = vpop.f32.mrf.mxu1 }
 0x6b6   : > { %v9022_v55 = vpop.eup %9021  ;;  %v5256_v61 = vmul.f32 %v9020_v53, %v14091_v47  ;;  %v8287_v62 = vmul.f32 -1.442695, %v4310_v56  ;;  %vm5261_vm1 = vweird.f32 %v9020_v53  ;;  %vm14139_vm2 = vcmp.eq.f32.partialorder %v5279_v5, 8.507059e+37 }
 0x6b7   : > { %v9024_v28 = vpop.eup %9023  ;;  %9031 = vrcp.f32 %v14112_v20  ;;  %v14134_v36 = vadd.f32 1.0, %v9022_v55  ;;  %v5282_v1 = vor.u32 1.1754944e-38, %v5281_v0  ;;  %v5369_v35 = vand.u32 2147483647, %v14112_v20  ;;  %vm5262_vm6 = vmor %vm5260_vm14, %vm5261_vm1 }
 0x6b8   : > { %v9026_v45 = vpop.eup %9025  ;;  %v5257_v30 = vsub.f32 1.0, %v5256_v61  ;;  %v14136_v3 = vadd.f32 1.0, %v9024_v28  ;;  %4367 = vmatmul.bf16.gmra.mxu0 %v15001_v7  ;;  %v5371_v25 = vand.u32 2147483648, %v14112_v20  ;;  %v14149_v49 = vadd.f32 %v14040_v4, %v4165_v2  ;;  %v14155_v7 = vpop.f32.mrf.mxu3 }
 0x6b9   : > { %v9028_v12 = vpop.eup %9027  ;;  %v5271_v58 = vmul.f32 %v9026_v45, %v14102_v18  ;;  %9033 = vrcp.f32 %v14134_v36  ;;  %v14151_v59 = vadd.f32 %v4311_v9, %v4263_v21  ;;  %vm5276_vm3 = vweird.f32 %v9026_v45  ;;  %v14186_v14 = vpop.f32.mrf.mxu2 }
 0x6ba   : > { %v9030_v17 = vpop.eup %9029  ;;  %v5258_v11 = vmul.f32 %v9020_v53, %v5257_v30  ;;  %9035 = vrcp.f32 %v14136_v3  ;;  %4416 = vmatmul.bf16.gmra.mxu1 %v15006_v63  ;;  %vm5365_vm5 = vweird.f32 %v14112_v20  ;;  %v5384_v4 = vand.u32 2147483647, %v14134_v36  ;;  %vm5277_vm8 = vmor %vm5275_vm0, %vm5276_vm3 }
 0x6bb   : > { %v5272_v19 = vsub.f32 1.0, %v5271_v58  ;;  %9037 = vpow2.f32 %v8287_v62  ;;  %v14161_v16 = vadd.f32 1.0, %v9028_v12  ;;  %v14163_v26 = vadd.f32 1.0, %v9030_v17  ;;  %v14165_v63 = vpop.f32.mrf.mxu0 }
 0x6bc   : > { %v5259_v37 = vadd.f32 %v9020_v53, %v5258_v11  ;;  %vm14170_vm7 = vcmp.eq.f32.partialorder %v5369_v35, 8.507059e+37  ;;  %v5372_v47 = vor.u32 1.1754944e-38, %v5371_v25  ;;  %v5386_v54 = vand.u32 2147483648, %v14134_v36 }
 0x6bd   : > { %v9032_v50 = vpop.eup %9031  ;;  %v5273_v32 = vmul.f32 %v9026_v45, %v5272_v19  ;;  %v5474_v38 = vand.u32 2147483647, %v14136_v3  ;;  %9039 = vrcp.f32 %v14161_v16  ;;  %vm5380_vm9 = vweird.f32 %v14134_v36  ;;  %v14217_v11 = vpop.f32.mrf.mxu1 }
 0x6be   : > { %v5263_v57 = vsel %vm5262_vm6, %v9020_v53, %v5259_v37  ;;  %v5361_v60 = vmul.f32 %v9032_v50, %v14112_v20  ;;  %vm5470_vm4 = vweird.f32 %v14136_v3  ;;  %v5476_v15 = vand.u32 2147483648, %v14136_v3 }
 0x6bf   : > { %v5268_v41 = vsel %vm14120_vm15, %v5267_v43, %v5263_v57  ;;  %v5274_v10 = vadd.f32 %v9026_v45, %v5273_v32  ;;  %v9034_v48 = vpop.eup %9033  ;;  %vm5366_vm10 = vweird.f32 %v9032_v50  ;;  %vm14189_vm11 = vcmp.eq.f32.partialorder %v5384_v4, 8.507059e+37 }
 0x6c0   : > { %6585 = vst [vmem:[%s11634_s24 + $0xc8] sm:$0xff] %v5268_v41  ;;  %v5362_v44 = vsub.f32 1.0, %v5361_v60  ;;  %v9036_v27 = vpop.eup %9035  ;;  %v5376_v9 = vmul.f32 %v9034_v48, %v14134_v36  ;;  %9041 = vrcp.f32 %v14163_v26  ;;  %v5489_v0 = vand.u32 2147483647, %v14161_v16  ;;  %vm5367_vm14 = vmor %vm5365_vm5, %vm5366_vm10 }
 0x6c1   : > { %v5278_v22 = vsel %vm5277_vm8, %v9026_v45, %v5274_v10  ;;  %v9038_v18 = vpop.eup %9037  ;;  %v5466_v5 = vmul.f32 %v9036_v27, %v14136_v3  ;;  %v5387_v61 = vor.u32 1.1754944e-38, %v5386_v54  ;;  %vm14199_vm12 = vcmp.eq.f32.partialorder %v5474_v38, 8.507059e+37 }
 0x6c2   : > { %v5283_v56 = vsel %vm14139_vm2, %v5282_v1, %v5278_v22  ;;  %v5363_v53 = vmul.f32 %v9032_v50, %v5362_v44  ;;  %v5377_v55 = vsub.f32 1.0, %v5376_v9  ;;  %v5491_v43 = vand.u32 2147483648, %v14161_v16 }
 0x6c3   : > { %6586 = vst [vmem:[%s11634_s24 + $0xd0] sm:$0xff] %v5283_v56  ;;  %v5467_v2 = vsub.f32 1.0, %v5466_v5  ;;  %v5477_v21 = vor.u32 1.1754944e-38, %v5476_v15  ;;  %vm5485_vm13 = vweird.f32 %v14161_v16  ;;  %v9040_v45 = vpop.eup %9039  ;;  %vm5381_vm15 = vweird.f32 %v9034_v48  ;;  %v14215_v17 = vpop.f32.mrf.mxu0 }
 0x6c4   : > { %v5364_v28 = vadd.f32 %v9032_v50, %v5363_v53  ;;  %v5378_v30 = vmul.f32 %v9034_v48, %v5377_v55  ;;  %vm5471_vm0 = vweird.f32 %v9036_v27  ;;  %v14208_v62 = vadd.f32 1.0, %v9038_v18  ;;  %vm5382_vm2 = vmor %vm5380_vm9, %vm5381_vm15 }
 0x6c5   : > { %v5468_v58 = vmul.f32 %v9036_v27, %v5467_v2  ;;  %v5481_v33 = vmul.f32 %v9040_v45, %v14161_v16  ;;  %vm14211_vm1 = vcmp.eq.f32.partialorder %v5489_v0, 8.507059e+37  ;;  %v5492_v19 = vor.u32 1.1754944e-38, %v5491_v43  ;;  %vm5472_vm3 = vmor %vm5470_vm4, %vm5471_vm0  ;;  %v14263_v56 = vpop.f32.mrf.mxu1 }
 0x6c6   : > { %v5368_v12 = vsel %vm5367_vm14, %v9032_v50, %v5364_v28  ;;  %v9042_v20 = vpop.eup %9041  ;;  %v5379_v25 = vadd.f32 %v9034_v48, %v5378_v30  ;;  %v8293_v37 = vmul.f32 -1.442695, %v14149_v49  ;;  %v4316_v50 = vpop.f32.mrf.mxu3  ;;  %v8294_v60 = vmul.f32 -1.442695, %v14151_v59 }
 0x6c7   : > { %v5373_v35 = vsel %vm14170_vm7, %v5372_v47, %v5368_v12  ;;  %v5469_v32 = vadd.f32 %v9036_v27, %v5468_v58  ;;  %v5482_v4 = vsub.f32 1.0, %v5481_v33  ;;  %v5571_v57 = vmul.f32 %v9042_v20, %v14163_v26  ;;  %v4270_v59 = vpop.f32.mrf.mxu2 }
 0x6c8   : > { %6592 = vst [vmem:[%s11634_s24 + $0x100] sm:$0xff] %v5373_v35  ;;  %v5383_v54 = vsel %vm5382_vm2, %v9034_v48, %v5379_v25  ;;  %vm5486_vm5 = vweird.f32 %v9040_v45  ;;  %v5581_v49 = vand.u32 2147483648, %v14163_v26  ;;  %9043 = vrcp.f32 %v14208_v62  ;;  %4372 = vmatmul.bf16.gmra.mxu0 %v15013_v31 }
 0x6c9   : > { %v5388_v36 = vsel %vm14189_vm11, %v5387_v61, %v5383_v54  ;;  %v5473_v8 = vsel %vm5472_vm3, %v9036_v27, %v5469_v32  ;;  %v5483_v47 = vmul.f32 %v9040_v45, %v5482_v4  ;;  %v5572_v41 = vsub.f32 1.0, %v5571_v57  ;;  %vm5487_vm7 = vmor %vm5485_vm13, %vm5486_vm5 }
 0x6ca   : > { %6593 = vst [vmem:[%s11634_s24 + $0x108] sm:$0xff] %v5388_v36  ;;  %v5478_v3 = vsel %vm14199_vm12, %v5477_v21, %v5473_v8  ;;  %vm5576_vm6 = vweird.f32 %v9042_v20  ;;  %v5579_v10 = vand.u32 2147483647, %v14163_v26  ;;  %9045 = vpow2.f32 %v8293_v37  ;;  %4421 = vmatmul.bf16.gmra.mxu1 %v15018_v46 }
 0x6cb   : > { %6599 = vst [vmem:[%s11634_s24 + $0x138] sm:$0xff] %v5478_v3  ;;  %v5484_v38 = vadd.f32 %v9040_v45, %v5483_v47  ;;  %v5573_v31 = vmul.f32 %v9042_v20, %v5572_v41  ;;  %9047 = vpow2.f32 %v8294_v60  ;;  %v4217_v48 = vadd.f32 %v14094_v42, %v14132_v52  ;;  %v14261_v18 = vpop.f32.mrf.mxu0 }
 0x6cc   : > { %vm5575_vm8 = vweird.f32 %v14163_v26  ;;  %v4266_v44 = vadd.f32 %v14124_v13, %v13835_v29  ;;  %v4170_v46 = vadd.f32 %v14114_v6, %v13810_v24  ;;  %v4268_v15 = vadd.f32 %v14186_v14, %v13835_v29 }
 0x6cd   : > { %v5488_v27 = vsel %vm5487_vm7, %v9040_v45, %v5484_v38  ;;  %v5574_v22 = vadd.f32 %v9042_v20, %v5573_v31  ;;  %v5582_v9 = vor.u32 1.1754944e-38, %v5581_v49  ;;  %v8300_v42 = vmul.f32 -1.442695, %v4217_v48  ;;  %vm5577_vm9 = vmor %vm5575_vm8, %vm5576_vm6  ;;  %v14290_v49 = vpop.f32.mrf.mxu1  ;;  %v15091_v38 = vld [vmem:[#allocation31_spill] sm:$0xff] }
 0x6ce   : > { %v9044_v52 = vpop.eup %9043  ;;  %v5493_v16 = vsel %vm14211_vm1, %v5492_v19, %v5488_v27  ;;  %v4315_v26 = vadd.f32 %v14155_v7, %v4266_v44  ;;  %v4219_v13 = vadd.f32 %v14116_v23, %v4170_v46  ;;  %v4317_v51 = vadd.f32 %v4316_v50, %v4268_v15  ;;  %v4319_v7 = vpop.f32.mrf.mxu3 }
 0x6cf   : > { %6600 = vst [vmem:[%s11634_s24 + $0x140] sm:$0xff] %v5493_v16  ;;  %v5578_v6 = vsel %vm5577_vm9, %v9042_v20, %v5574_v22  ;;  %vm5580_vm4 = vcmp.eq.f32.partialorder %v5579_v10, 8.507059e+37  ;;  %v5586_v14 = vmul.f32 %v9044_v52, %v14208_v62  ;;  %9049 = vpow2.f32 %v8300_v42 }
 0x6d0   : > { %v9046_v53 = vpop.eup %9045  ;;  %v5583_v5 = vsel %vm5580_vm4, %v5582_v9, %v5578_v6  ;;  %v5594_v0 = vand.u32 2147483647, %v14208_v62  ;;  %v8301_v55 = vmul.f32 -1.442695, %v4315_v26  ;;  %v4173_v23 = vadd.f32 %v14165_v63, %v13810_v24  ;;  %v4272_v63 = vpop.f32.mrf.mxu2 }
 0x6d1   : > { %v9048_v61 = vpop.eup %9047  ;;  %6606 = vst [vmem:[%s11634_s24 + $0x170] sm:$0xff] %v5583_v5  ;;  %v5587_v39 = vsub.f32 1.0, %v5586_v14  ;;  %v5596_v43 = vand.u32 2147483648, %v14208_v62  ;;  %v14270_v28 = vadd.f32 1.0, %v9046_v53  ;;  %v8307_v2 = vmul.f32 -1.442695, %v4219_v13 }
 0x6d2   : > { %v14272_v21 = vadd.f32 1.0, %v9048_v61  ;;  %9051 = vpow2.f32 %v8301_v55  ;;  %v8308_v45 = vmul.f32 -1.442695, %v4317_v51  ;;  %vm5591_vm10 = vweird.f32 %v9044_v52 }
 0x6d3   : > { %v5588_v30 = vmul.f32 %v9044_v52, %v5587_v39  ;;  %9053 = vrcp.f32 %v14270_v28  ;;  %v4271_v12 = vadd.f32 %v4270_v59, %v13835_v29  ;;  %vm5590_vm11 = vweird.f32 %v14208_v62  ;;  %v14288_v54 = vpop.f32.mrf.mxu0 }
 0x6d4   : > { %9055 = vrcp.f32 %v14272_v21  ;;  %v4222_v58 = vadd.f32 %v14167_v40, %v4173_v23  ;;  %vm5595_vm12 = vcmp.eq.f32.partialorder %v5594_v0, 8.507059e+37  ;;  %v5597_v20 = vor.u32 1.1754944e-38, %v5596_v43  ;;  %vm5592_vm13 = vmor %vm5590_vm11, %vm5591_vm10 }
 0x6d5   : > { %v9050_v33 = vpop.eup %9049  ;;  %v5589_v1 = vadd.f32 %v9044_v52, %v5588_v30  ;;  %9057 = vpow2.f32 %v8307_v2  ;;  %v5684_v35 = vand.u32 2147483647, %v14270_v28  ;;  %v5686_v25 = vand.u32 2147483648, %v14270_v28  ;;  %v14336_v61 = vpop.f32.mrf.mxu1 }
 0x6d6   : > { %v14281_v19 = vadd.f32 1.0, %v9050_v33  ;;  %9059 = vpow2.f32 %v8308_v45  ;;  %v5699_v62 = vand.u32 2147483647, %v14272_v21  ;;  %v5701_v50 = vand.u32 2147483648, %v14272_v21 }
 0x6d7   : > { %v5593_v37 = vsel %vm5592_vm13, %v9044_v52, %v5589_v1  ;;  %v4320_v40 = vadd.f32 %v4319_v7, %v4271_v12  ;;  %v8314_v57 = vmul.f32 -1.442695, %v4222_v58  ;;  %v4175_v60 = vadd.f32 %v14215_v17, %v13810_v24 }
 0x6d8   : > { %v9052_v32 = vpop.eup %9051  ;;  %v5598_v4 = vsel %vm5595_vm12, %v5597_v20, %v5593_v37  ;;  %9061 = vrcp.f32 %v14281_v19  ;;  %4377 = vmatmul.bf16.gmra.mxu0 %v15019_v34  ;;  %vm5680_vm14 = vweird.f32 %v14270_v28  ;;  %v14298_v41 = vadd.f32 %v4272_v63, %v13835_v29  ;;  %v14306_v34 = vpop.f32.mrf.mxu3 }
 0x6d9   : > { %v9054_v36 = vpop.eup %9053  ;;  %6607 = vst [vmem:[%s11634_s24 + $0x178] sm:$0xff] %v5598_v4  ;;  %v14295_v8 = vadd.f32 1.0, %v9052_v32  ;;  %v8315_v47 = vmul.f32 -1.442695, %v4320_v40  ;;  %vm14301_vm15 = vcmp.eq.f32.partialorder %v5684_v35, 8.507059e+37  ;;  %v5687_v10 = vor.u32 1.1754944e-38, %v5686_v25  ;;  %v14323_v13 = vpop.f32.mrf.mxu2 }
 0x6da   : > { %v9056_v59 = vpop.eup %9055  ;;  %v5676_v3 = vmul.f32 %v9054_v36, %v14270_v28  ;;  %vm5695_vm0 = vweird.f32 %v14272_v21  ;;  %4426 = vmatmul.bf16.gmra.mxu1 %v15091_v38  ;;  %vm14310_vm1 = vcmp.eq.f32.partialorder %v5699_v62, 8.507059e+37  ;;  %v5702_v46 = vor.u32 1.1754944e-38, %v5701_v50 }
 0x6db   : > { %v9058_v31 = vpop.eup %9057  ;;  %v5691_v48 = vmul.f32 %v9056_v59, %v14272_v21  ;;  %v5789_v15 = vand.u32 2147483647, %v14281_v19  ;;  %9063 = vrcp.f32 %v14295_v8  ;;  %v5791_v9 = vand.u32 2147483648, %v14281_v19  ;;  %v14334_v7 = vpop.f32.mrf.mxu0 }
 0x6dc   : > { %v9060_v27 = vpop.eup %9059  ;;  %v5677_v22 = vsub.f32 1.0, %v5676_v3  ;;  %9065 = vpow2.f32 %v8314_v57  ;;  %v4224_v42 = vadd.f32 %v14217_v11, %v4175_v60  ;;  %vm5785_vm2 = vweird.f32 %v14281_v19 }
 0x6dd   : > { %v5692_v52 = vsub.f32 1.0, %v5691_v48  ;;  %v14319_v16 = vadd.f32 1.0, %v9058_v31  ;;  %v14321_v26 = vadd.f32 1.0, %v9060_v27  ;;  %9067 = vpow2.f32 %v8315_v47 }
 0x6de   : > { %v9062_v51 = vpop.eup %9061  ;;  %v5678_v6 = vmul.f32 %v9054_v36, %v5677_v22  ;;  %vm5681_vm3 = vweird.f32 %v9054_v36  ;;  %v5804_v14 = vand.u32 2147483647, %v14295_v8  ;;  %v5806_v53 = vand.u32 2147483648, %v14295_v8 }
 0x6df   : > { %v5693_v5 = vmul.f32 %v9056_v59, %v5692_v52  ;;  %vm5696_vm5 = vweird.f32 %v9056_v59  ;;  %v5781_v11 = vmul.f32 %v9062_v51, %v14281_v19  ;;  %9069 = vrcp.f32 %v14319_v16  ;;  %vm5682_vm8 = vmor %vm5680_vm14, %vm5681_vm3 }
 0x6e0   : > { %v5679_v0 = vadd.f32 %v9054_v36, %v5678_v6  ;;  %vm14329_vm6 = vcmp.eq.f32.partialorder %v5789_v15, 8.507059e+37  ;;  %v5792_v23 = vor.u32 1.1754944e-38, %v5791_v9  ;;  %vm5800_vm7 = vweird.f32 %v14295_v8  ;;  %vm5697_vm9 = vmor %vm5695_vm0, %vm5696_vm5  ;;  %v14358_v40 = vpop.f32.mrf.mxu3  ;;  %v14383_v15 = vpop.f32.mrf.mxu1 }
 0x6e1   : > { %v9064_v39 = vpop.eup %9063  ;;  %v5694_v43 = vadd.f32 %v9056_v59, %v5693_v5  ;;  %v5782_v2 = vsub.f32 1.0, %v5781_v11  ;;  %9071 = vrcp.f32 %v14321_v26  ;;  %v8321_v45 = vmul.f32 -1.442695, %v4224_v42  ;;  %v14376_v38 = vpop.f32.mrf.mxu2 }
 0x6e2   : > { %v9066_v30 = vpop.eup %9065  ;;  %v5683_v12 = vsel %vm5682_vm8, %v9054_v36, %v5679_v0  ;;  %vm5786_vm4 = vweird.f32 %v9062_v51  ;;  %v5796_v63 = vmul.f32 %v9064_v39, %v14295_v8  ;;  %vm14345_vm10 = vcmp.eq.f32.partialorder %v5804_v14, 8.507059e+37 }
 0x6e3   : > { %v5807_v28 = vor.u32 1.1754944e-38, %v5806_v53  ;;  %v9068_v33 = vpop.eup %9067  ;;  %v5688_v1 = vsel %vm14301_vm15, %v5687_v10, %v5683_v12  ;;  %v5698_v20 = vsel %vm5697_vm9, %v9056_v59, %v5694_v43  ;;  %v5783_v35 = vmul.f32 %v9062_v51, %v5782_v2  ;;  %vm5787_vm12 = vmor %vm5785_vm2, %vm5786_vm4 }
 0x6e4   : > { %v5894_v25 = vand.u32 2147483647, %v14319_v16  ;;  %6613 = vst [vmem:[%s11634_s24 + $0x1a8] sm:$0xff] %v5688_v1  ;;  %v5703_v21 = vsel %vm14310_vm1, %v5702_v46, %v5698_v20  ;;  %v5797_v37 = vsub.f32 1.0, %v5796_v63  ;;  %vm5890_vm11 = vweird.f32 %v14319_v16  ;;  %v14381_v46 = vpop.f32.mrf.mxu0 }
 0x6e5   : > { %v5896_v62 = vand.u32 2147483648, %v14319_v16  ;;  %v5909_v50 = vand.u32 2147483647, %v14321_v26  ;;  %v9070_v32 = vpop.eup %9069  ;;  %6614 = vst [vmem:[%s11634_s24 + $0x1b0] sm:$0xff] %v5703_v21  ;;  %v5784_v4 = vadd.f32 %v9062_v51, %v5783_v35  ;;  %v14361_v57 = vadd.f32 1.0, %v9066_v30 }
 0x6e6   : > { %v14363_v60 = vadd.f32 1.0, %v9068_v33  ;;  %9073 = vpow2.f32 %v8321_v45  ;;  %v5798_v36 = vmul.f32 %v9064_v39, %v5797_v37  ;;  %vm5801_vm13 = vweird.f32 %v9064_v39 }
 0x6e7   : > { %v5886_v47 = vmul.f32 %v9070_v32, %v14319_v16  ;;  %v5911_v59 = vand.u32 2147483648, %v14321_v26  ;;  %v9072_v3 = vpop.eup %9071  ;;  %v5788_v17 = vsel %vm5787_vm12, %v9062_v51, %v5784_v4  ;;  %vm14370_vm14 = vcmp.eq.f32.partialorder %v5894_v25, 8.507059e+37  ;;  %vm5802_vm0 = vmor %vm5800_vm7, %vm5801_vm13 }
 0x6e8   : > { %vm5905_vm15 = vweird.f32 %v14321_v26  ;;  %9075 = vrcp.f32 %v14361_v57  ;;  %v5793_v19 = vsel %vm14329_vm6, %v5792_v23, %v5788_v17  ;;  %v5799_v31 = vadd.f32 %v9064_v39, %v5798_v36  ;;  %v4326_v63 = vpop.f32.mrf.mxu3  ;;  %v14438_v4 = vpop.f32.mrf.mxu1 }
 0x6e9   : > { %v5887_v48 = vsub.f32 1.0, %v5886_v47  ;;  %v5901_v44 = vmul.f32 %v9072_v3, %v14321_v26  ;;  %6620 = vst [vmem:[%s11634_s24 + $0x1e0] sm:$0xff] %v5793_v19  ;;  %vm5891_vm1 = vweird.f32 %v9070_v32  ;;  %v5897_v27 = vor.u32 1.1754944e-38, %v5896_v62  ;;  %v4280_v25 = vpop.f32.mrf.mxu2 }
 0x6ea   : > { %vm14389_vm2 = vcmp.eq.f32.partialorder %v5909_v50, 8.507059e+37  ;;  %9077 = vrcp.f32 %v14363_v60  ;;  %v5803_v9 = vsel %vm5802_vm0, %v9064_v39, %v5799_v31  ;;  %v5912_v51 = vor.u32 1.1754944e-38, %v5911_v59  ;;  %vm5892_vm5 = vmor %vm5890_vm11, %vm5891_vm1 }
 0x6eb   : > { %v5888_v42 = vmul.f32 %v9070_v32, %v5887_v48  ;;  %v5902_v52 = vsub.f32 1.0, %v5901_v44  ;;  %v5808_v14 = vsel %vm14345_vm10, %v5807_v28, %v5803_v9  ;;  %vm5906_vm3 = vweird.f32 %v9072_v3 }
 0x6ec   : > { %v9074_v6 = vpop.eup %9073  ;;  %v5999_v8 = vand.u32 2147483647, %v14361_v57  ;;  %v6001_v53 = vand.u32 2147483648, %v14361_v57  ;;  %6621 = vst [vmem:[%s11634_s24 + $0x1e8] sm:$0xff] %v5808_v14  ;;  %v6014_v0 = vand.u32 2147483647, %v14363_v60  ;;  %vm5995_vm6 = vweird.f32 %v14361_v57  ;;  %vm5907_vm8 = vmor %vm5905_vm15, %vm5906_vm3 }
 0x6ed   : > { %v5889_v5 = vadd.f32 %v9070_v32, %v5888_v42  ;;  %v5903_v11 = vmul.f32 %v9072_v3, %v5902_v52  ;;  %v14400_v55 = vadd.f32 1.0, %v9074_v6  ;;  %v6016_v39 = vand.u32 2147483648, %v14363_v60 }
 0x6ee   : > { %v9076_v23 = vpop.eup %9075  ;;  %v4322_v43 = vadd.f32 %v14306_v34, %v14298_v41  ;;  %v4178_v2 = vadd.f32 %v14261_v18, %v13810_v24  ;;  %vm6010_vm7 = vweird.f32 %v14363_v60  ;;  %v4276_v16 = vadd.f32 %v14323_v13, %v13835_v29 }
 0x6ef   : > { %v5893_v45 = vsel %vm5892_vm5, %v9070_v32, %v5889_v5  ;;  %v5904_v30 = vadd.f32 %v9072_v3, %v5903_v11  ;;  %v5991_v12 = vmul.f32 %v9076_v23, %v14361_v57  ;;  %vm14420_vm9 = vcmp.eq.f32.partialorder %v5999_v8, 8.507059e+37  ;;  %v14436_v32 = vpop.f32.mrf.mxu0 }
 0x6f0   : > { %v9078_v58 = vpop.eup %9077  ;;  %v5898_v28 = vsel %vm14370_vm14, %v5897_v27, %v5893_v45  ;;  %v6002_v41 = vor.u32 1.1754944e-38, %v6001_v53  ;;  %9079 = vrcp.f32 %v14400_v55  ;;  %vm14427_vm4 = vcmp.eq.f32.partialorder %v6014_v0, 8.507059e+37  ;;  %v4329_v52 = vpop.f32.mrf.mxu3 }
 0x6f1   : > { %6627 = vst [vmem:[%s11634_s24 + $0x218] sm:$0xff] %v5898_v28  ;;  %v5908_v34 = vsel %vm5907_vm8, %v9072_v3, %v5904_v30  ;;  %v5992_v13 = vsub.f32 1.0, %v5991_v12  ;;  %v6006_v33 = vmul.f32 %v9078_v58, %v14363_v60  ;;  %vm5996_vm10 = vweird.f32 %v9076_v23  ;;  %v4282_v0 = vpop.f32.mrf.mxu2 }
 0x6f2   : > { %v5913_v26 = vsel %vm14389_vm2, %v5912_v51, %v5908_v34  ;;  %v6017_v20 = vor.u32 1.1754944e-38, %v6016_v39  ;;  %v8322_v35 = vmul.f32 -1.442695, %v4322_v43  ;;  %v4227_v62 = vadd.f32 %v14263_v56, %v4178_v2  ;;  %vm5997_vm12 = vmor %vm5995_vm6, %vm5996_vm10  ;;  %v14470_v39 = vpop.f32.mrf.mxu1 }
 0x6f3   : > { %6628 = vst [vmem:[%s11634_s24 + $0x220] sm:$0xff] %v5913_v26  ;;  %v5993_v21 = vmul.f32 %v9076_v23, %v5992_v13  ;;  %v6007_v37 = vsub.f32 1.0, %v6006_v33  ;;  %v4325_v50 = vadd.f32 %v14358_v40, %v4276_v16  ;;  %vm6011_vm11 = vweird.f32 %v9078_v58 }
 0x6f4   : > { %v6104_v36 = vand.u32 2147483647, %v14400_v55  ;;  %9081 = vpow2.f32 %v8322_v35  ;;  %v4180_v47 = vadd.f32 %v14288_v54, %v13810_v24  ;;  %v8328_v17 = vmul.f32 -1.442695, %v4227_v62  ;;  %vm6012_vm13 = vmor %vm6010_vm7, %vm6011_vm11 }
 0x6f5   : > { %v5994_v59 = vadd.f32 %v9076_v23, %v5993_v21  ;;  %v6008_v3 = vmul.f32 %v9078_v58, %v6007_v37  ;;  %v8329_v10 = vmul.f32 -1.442695, %v4325_v50  ;;  %v4278_v40 = vadd.f32 %v14376_v38, %v13835_v29 }
 0x6f6   : > { %v9080_v19 = vpop.eup %9079  ;;  %v4229_v56 = vadd.f32 %v14290_v49, %v4180_v47  ;;  %v4183_v31 = vadd.f32 %v14334_v7, %v13810_v24  ;;  %v4281_v54 = vadd.f32 %v4280_v25, %v13835_v29  ;;  %v6106_v22 = vand.u32 2147483648, %v14400_v55 }
 0x6f7   : > { %v5998_v48 = vsel %vm5997_vm12, %v9076_v23, %v5994_v59  ;;  %v6009_v44 = vadd.f32 %v9078_v58, %v6008_v3  ;;  %v6096_v27 = vmul.f32 %v9080_v19, %v14400_v55  ;;  %9083 = vpow2.f32 %v8328_v17 }
 0x6f8   : > { %v6003_v57 = vsel %vm14420_vm9, %v6002_v41, %v5998_v48  ;;  %v8335_v49 = vmul.f32 -1.442695, %v4229_v56  ;;  %v4327_v38 = vadd.f32 %v4326_v63, %v4278_v40  ;;  %9085 = vpow2.f32 %v8329_v10 }
 0x6f9   : > { %6634 = vst [vmem:[%s11634_s24 + $0x250] sm:$0xff] %v6003_v57  ;;  %v6013_v7 = vsel %vm6012_vm13, %v9078_v58, %v6009_v44  ;;  %v6097_v9 = vsub.f32 1.0, %v6096_v27  ;;  %v4232_v42 = vadd.f32 %v14336_v61, %v4183_v31  ;;  %v4330_v8 = vadd.f32 %v4329_v52, %v4281_v54  ;;  %v14468_v61 = vpop.f32.mrf.mxu0 }
 0x6fa   : > { %v9082_v51 = vpop.eup %9081  ;;  %v6018_v6 = vsel %vm14427_vm4, %v6017_v20, %v6013_v7  ;;  %9087 = vpow2.f32 %v8335_v49  ;;  %v8336_v14 = vmul.f32 -1.442695, %v4327_v38  ;;  %vm6101_vm14 = vweird.f32 %v9080_v19  ;;  %v4331_v20 = vpop.f32.mrf.mxu3 }
 0x6fb   : > { %6635 = vst [vmem:[%s11634_s24 + $0x258] sm:$0xff] %v6018_v6  ;;  %v6098_v60 = vmul.f32 %v9080_v19, %v6097_v9  ;;  %v14464_v53 = vadd.f32 1.0, %v9082_v51  ;;  %v8342_v5 = vmul.f32 -1.442695, %v4232_v42  ;;  %v8343_v11 = vmul.f32 -1.442695, %v4330_v8  ;;  %v14509_v59 = vpop.f32.mrf.mxu1 }
 0x6fc   : > { %9089 = vpow2.f32 %v8336_v14  ;;  %vm6100_vm15 = vweird.f32 %v14400_v55  ;;  %v6107_v2 = vor.u32 1.1754944e-38, %v6106_v22  ;;  %v4185_v45 = vadd.f32 %v14381_v46, %v13810_v24 }
 0x6fd   : > { %v6099_v23 = vadd.f32 %v9080_v19, %v6098_v60  ;;  %9091 = vrcp.f32 %v14464_v53  ;;  %v9084_v43 = vpop.eup %9083  ;;  %vm6102_vm0 = vmor %vm6100_vm15, %vm6101_vm14  ;;  %vm6105_vm1 = vcmp.eq.f32.partialorder %v6104_v36, 8.507059e+37  ;;  %v4283_v55 = vadd.f32 %v4282_v0, %v13835_v29  ;;  %v9183_v29 = vld [vmem:[%s14775_s13] sm:$0xff] }
 0x6fe   : > { %9093 = vpow2.f32 %v8342_v5  ;;  %v9086_v30 = vpop.eup %9085  ;;  %v14474_v16 = vadd.f32 1.0, %v9084_v43  ;;  %v6119_v28 = vand.u32 2147483647, %v14464_v53  ;;  %v6121_v41 = vand.u32 2147483648, %v14464_v53 }
 0x6ff   : > { %v6103_v12 = vsel %vm6102_vm0, %v9080_v19, %v6099_v23  ;;  %v14478_v18 = vadd.f32 1.0, %v9086_v30  ;;  %9095 = vpow2.f32 %v8343_v11  ;;  %v4234_v46 = vadd.f32 %v14383_v15, %v4185_v45 }
 0x700   : > { %v9088_v63 = vpop.eup %9087  ;;  %v6108_v58 = vsel %vm6105_vm1, %v6107_v2, %v6103_v12  ;;  %9097 = vrcp.f32 %v14474_v16  ;;  %v14488_v34 = vperm.slane %v9183_v29, 6  ;;  %vm6115_vm2 = vweird.f32 %v14464_v53 }
 0x701   : > { %6641 = vst [vmem:[%s11634_s24 + $0x288] sm:$0xff] %v6108_v58  ;;  %9099 = vrcp.f32 %v14478_v18  ;;  %v6211_v33 = vand.u32 2147483648, %v14474_v16  ;;  %v14492_v1 = vadd.f32 1.0, %v9088_v63  ;;  %vm14497_vm3 = vcmp.eq.f32.partialorder %v6119_v28, 8.507059e+37  ;;  %v14507_v47 = vpop.f32.mrf.mxu0 }
 0x702   : > { %v9090_v24 = vpop.eup %9089  ;;  %v6209_v21 = vand.u32 2147483647, %v14474_v16  ;;  %v14502_v37 = vadd.f32 %v4331_v20, %v4283_v55  ;;  %v6122_v62 = vor.u32 1.1754944e-38, %v6121_v41  ;;  %v6224_v50 = vand.u32 2147483647, %v14478_v18 }
 0x703   : > { %v9092_v13 = vpop.eup %9091  ;;  %v14494_v26 = vadd.f32 1.0, %v9090_v24  ;;  %v6226_v36 = vand.u32 2147483648, %v14478_v18  ;;  %9101 = vrcp.f32 %v14492_v1  ;;  %vm6205_vm5 = vweird.f32 %v14474_v16  ;;  %v14547_v30 = vpop.f32.mrf.mxu1 }
 0x704   : > { %v9094_v35 = vpop.eup %9093  ;;  %v6111_v25 = vmul.f32 %v9092_v13, %v14464_v53  ;;  %v8349_v10 = vmul.f32 -1.442695, %v4234_v46  ;;  %v6212_v56 = vor.u32 1.1754944e-38, %v6211_v33  ;;  %vm6220_vm6 = vweird.f32 %v14478_v18 }
 0x705   : > { %v9096_v3 = vpop.eup %9095  ;;  %9103 = vrcp.f32 %v14494_v26  ;;  %v6316_v40 = vand.u32 2147483648, %v14492_v1  ;;  %v14515_v31 = vadd.f32 1.0, %v9094_v35  ;;  %vm6116_vm7 = vweird.f32 %v9092_v13 }
 0x706   : > { %v6112_v17 = vsub.f32 1.0, %v6111_v25  ;;  %v9098_v19 = vpop.eup %9097  ;;  %vm14518_vm8 = vcmp.eq.f32.partialorder %v6209_v21, 8.507059e+37  ;;  %v6314_v22 = vand.u32 2147483647, %v14492_v1  ;;  %vm14524_vm9 = vcmp.eq.f32.partialorder %v6224_v50, 8.507059e+37  ;;  %vm6117_vm10 = vmor %vm6115_vm2, %vm6116_vm7 }
 0x707   : > { %v9100_v54 = vpop.eup %9099  ;;  %v6201_v44 = vmul.f32 %v9098_v19, %v14474_v16  ;;  %v6227_v38 = vor.u32 1.1754944e-38, %v6226_v36  ;;  %9105 = vrcp.f32 %v14515_v31  ;;  %vm6310_vm4 = vweird.f32 %v14492_v1 }
 0x708   : > { %v6113_v48 = vmul.f32 %v9092_v13, %v6112_v17  ;;  %v6216_v57 = vmul.f32 %v9100_v54, %v14478_v18  ;;  %v6329_v42 = vand.u32 2147483647, %v14494_v26  ;;  %v6331_v52 = vand.u32 2147483648, %v14494_v26 }
 0x709   : > { %v6202_v9 = vsub.f32 1.0, %v6201_v44  ;;  %v9102_v51 = vpop.eup %9101  ;;  %v6317_v14 = vor.u32 1.1754944e-38, %v6316_v40  ;;  %vm6325_vm11 = vweird.f32 %v14494_v26  ;;  %v14535_v8 = vadd.f32 1.0, %v9096_v3  ;;  %v14545_v45 = vpop.f32.mrf.mxu0 }
 0x70a   : > { %v6114_v7 = vadd.f32 %v9092_v13, %v6113_v48  ;;  %v6217_v6 = vsub.f32 1.0, %v6216_v57  ;;  %9107 = vpow2.f32 %v8349_v10  ;;  %vm6206_vm12 = vweird.f32 %v9098_v19 }
 0x70b   : > { %v9104_v60 = vpop.eup %9103  ;;  %v6203_v11 = vmul.f32 %v9098_v19, %v6202_v9  ;;  %v6306_v0 = vmul.f32 %v9102_v51, %v14492_v1  ;;  %vm14538_vm13 = vcmp.eq.f32.partialorder %v6314_v22, 8.507059e+37  ;;  %vm6221_vm14 = vweird.f32 %v9100_v54  ;;  %vm6207_vm0 = vmor %vm6205_vm5, %vm6206_vm12 }
 0x70c   : > { %v6118_v5 = vsel %vm6117_vm10, %v9092_v13, %v6114_v7  ;;  %v6218_v43 = vmul.f32 %v9100_v54, %v6217_v6  ;;  %v6321_v2 = vmul.f32 %v9104_v60, %v14494_v26  ;;  %vm14550_vm15 = vcmp.eq.f32.partialorder %v6329_v42, 8.507059e+37  ;;  %vm6222_vm1 = vmor %vm6220_vm6, %vm6221_vm14  ;;  %v4402_v26 = vpop.f32.mrf.mxu1 }
 0x70d   : > { %v6123_v53 = vsel %vm14497_vm3, %v6122_v62, %v6118_v5  ;;  %v6204_v12 = vadd.f32 %v9098_v19, %v6203_v11  ;;  %v6307_v55 = vsub.f32 1.0, %v6306_v0  ;;  %v6332_v58 = vor.u32 1.1754944e-38, %v6331_v52  ;;  %v9106_v28 = vpop.eup %9105 }
 0x70e   : > { %6642 = vst [vmem:[%s11634_s24 + $0x290] sm:$0xff] %v6123_v53  ;;  %v6219_v41 = vadd.f32 %v9100_v54, %v6218_v43  ;;  %v6322_v24 = vsub.f32 1.0, %v6321_v2  ;;  %v6419_v46 = vand.u32 2147483647, %v14515_v31  ;;  %9109 = vrcp.f32 %v14535_v8 }
 0x70f   : > { %v6208_v29 = vsel %vm6207_vm0, %v9098_v19, %v6204_v12  ;;  %v6308_v13 = vmul.f32 %v9102_v51, %v6307_v55  ;;  %vm6311_vm2 = vweird.f32 %v9102_v51  ;;  %v6411_v33 = vmul.f32 %v9106_v28, %v14515_v31 }
 0x710   : > { %v9108_v20 = vpop.eup %9107  ;;  %v6213_v16 = vsel %vm14518_vm8, %v6212_v56, %v6208_v29  ;;  %v6223_v35 = vsel %vm6222_vm1, %v9100_v54, %v6219_v41  ;;  %v6323_v25 = vmul.f32 %v9104_v60, %v6322_v24  ;;  %vm6326_vm3 = vweird.f32 %v9104_v60  ;;  %vm6312_vm5 = vmor %vm6310_vm4, %vm6311_vm2 }
 0x711   : > { %6648 = vst [vmem:[%s11634_s24 + $0x2c0] sm:$0xff] %v6213_v16  ;;  %v6228_v15 = vsel %vm14524_vm9, %v6227_v38, %v6223_v35  ;;  %v6309_v21 = vadd.f32 %v9102_v51, %v6308_v13  ;;  %v6412_v62 = vsub.f32 1.0, %v6411_v33  ;;  %v6421_v18 = vand.u32 2147483648, %v14515_v31  ;;  %vm6327_vm7 = vmor %vm6325_vm11, %vm6326_vm3 }
 0x712   : > { %6649 = vst [vmem:[%s11634_s24 + $0x2c8] sm:$0xff] %v6228_v15  ;;  %v6324_v50 = vadd.f32 %v9104_v60, %v6323_v25  ;;  %vm6415_vm6 = vweird.f32 %v14515_v31  ;;  %v14573_v36 = vadd.f32 1.0, %v9108_v20  ;;  %v8350_v3 = vmul.f32 -1.442695, %v14502_v37  ;;  %v4353_v37 = vpop.f32.mrf.mxu0 }
 0x713   : > { %v6313_v17 = vsel %vm6312_vm5, %v9102_v51, %v6309_v21  ;;  %v6413_v10 = vmul.f32 %v9106_v28, %v6412_v62  ;;  %vm6416_vm8 = vweird.f32 %v9106_v28  ;;  %v4344_v19 = vadd.f32 %v14436_v32, %v14488_v34 }
 0x714   : > { %v9110_v1 = vpop.eup %9109  ;;  %v6318_v56 = vsel %vm14538_vm13, %v6317_v14, %v6313_v17  ;;  %v6328_v40 = vsel %vm6327_vm7, %v9104_v60, %v6324_v50  ;;  %vm14582_vm9 = vcmp.eq.f32.partialorder %v6419_v46, 8.507059e+37  ;;  %9111 = vrcp.f32 %v14573_v36  ;;  %vm6417_vm4 = vmor %vm6415_vm6, %vm6416_vm8  ;;  %v4404_v55 = vpop.f32.mrf.mxu1 }
 0x715   : > { %6655 = vst [vmem:[%s11634_s24 + $0x2f8] sm:$0xff] %v6318_v56  ;;  %v6333_v48 = vsel %vm14550_vm15, %v6332_v58, %v6328_v40  ;;  %v6414_v44 = vadd.f32 %v9106_v28, %v6413_v10  ;;  %v6422_v27 = vor.u32 1.1754944e-38, %v6421_v18  ;;  %v6426_v32 = vmul.f32 %v9110_v1, %v14535_v8 }
 0x716   : > { %6656 = vst [vmem:[%s11634_s24 + $0x300] sm:$0xff] %v6333_v48  ;;  %v6434_v22 = vand.u32 2147483647, %v14535_v8  ;;  %v6436_v57 = vand.u32 2147483648, %v14535_v8  ;;  %9113 = vpow2.f32 %v8350_v3  ;;  %v4393_v49 = vadd.f32 %v14438_v4, %v4344_v19 }
 0x717   : > { %v6418_v38 = vsel %vm6417_vm4, %v9106_v28, %v6414_v44  ;;  %v6427_v7 = vsub.f32 1.0, %v6426_v32  ;;  %v4346_v9 = vadd.f32 %v14468_v61, %v14488_v34  ;;  %v4349_v42 = vadd.f32 %v14507_v47, %v14488_v34 }
 0x718   : > { %v6423_v52 = vsel %vm14582_vm9, %v6422_v27, %v6418_v38  ;;  %vm6430_vm10 = vweird.f32 %v14535_v8  ;;  %vm6431_vm11 = vweird.f32 %v9110_v1  ;;  %v8246_v31 = vmul.f32 -1.442695, %v4393_v49 }
 0x719   : > { %6662 = vst [vmem:[%s11634_s24 + $0x330] sm:$0xff] %v6423_v52  ;;  %v6428_v51 = vmul.f32 %v9110_v1, %v6427_v7  ;;  %v4395_v6 = vadd.f32 %v14470_v39, %v4346_v9  ;;  %v4398_v4 = vadd.f32 %v14509_v59, %v4349_v42  ;;  %v4351_v14 = vadd.f32 %v14545_v45, %v14488_v34  ;;  %vm6432_vm13 = vmor %vm6430_vm10, %vm6431_vm11 }
 0x71a   : > { %v9112_v61 = vpop.eup %9111  ;;  %vm14610_vm12 = vcmp.eq.f32.partialorder %v6434_v22, 8.507059e+37  ;;  %v6437_v47 = vor.u32 1.1754944e-38, %v6436_v57  ;;  %9115 = vpow2.f32 %v8246_v31  ;;  %v4354_v5 = vadd.f32 %v4353_v37, %v14488_v34  ;;  %v4355_v12 = vpop.f32.mrf.mxu0 }
 0x71b   : > { %v6429_v11 = vadd.f32 %v9110_v1, %v6428_v51  ;;  %v6516_v0 = vmul.f32 %v9112_v61, %v14573_v36  ;;  %v6524_v23 = vand.u32 2147483647, %v14573_v36  ;;  %v8253_v39 = vmul.f32 -1.442695, %v4395_v6 }
 0x71c   : > { %v9114_v53 = vpop.eup %9113  ;;  %v6526_v59 = vand.u32 2147483648, %v14573_v36  ;;  %v8260_v43 = vmul.f32 -1.442695, %v4398_v4  ;;  %v4400_v2 = vadd.f32 %v14547_v30, %v4351_v14  ;;  %v4403_v45 = vadd.f32 %v4402_v26, %v4354_v5  ;;  %v14637_v3 = vpop.f32.mrf.mxu1 }
 0x71d   : > { %v6433_v63 = vsel %vm6432_vm13, %v9110_v1, %v6429_v11  ;;  %v6517_v58 = vsub.f32 1.0, %v6516_v0  ;;  %v14622_v28 = vadd.f32 1.0, %v9114_v53  ;;  %9117 = vpow2.f32 %v8253_v39 }
 0x71e   : > { %v6438_v41 = vsel %vm14610_vm12, %v6437_v47, %v6433_v63  ;;  %9119 = vpow2.f32 %v8260_v43  ;;  %v8267_v8 = vmul.f32 -1.442695, %v4400_v2  ;;  %v8274_v24 = vmul.f32 -1.442695, %v4403_v45 }
 0x71f   : > { %6663 = vst [vmem:[%s11634_s24 + $0x338] sm:$0xff] %v6438_v41  ;;  %v6518_v46 = vmul.f32 %v9112_v61, %v6517_v58  ;;  %vm6521_vm14 = vweird.f32 %v9112_v61  ;;  %9121 = vrcp.f32 %v14622_v28  ;;  %v4356_v29 = vadd.f32 %v4355_v12, %v14488_v34 }
 0x720   : > { %v9116_v30 = vpop.eup %9115  ;;  %9123 = vpow2.f32 %v8267_v8  ;;  %vm6520_vm15 = vweird.f32 %v14573_v36  ;;  %vm6525_vm1 = vcmp.eq.f32.partialorder %v6524_v23, 8.507059e+37  ;;  %v6527_v20 = vor.u32 1.1754944e-38, %v6526_v59 }
 0x721   : > { %v6519_v13 = vadd.f32 %v9112_v61, %v6518_v46  ;;  %v14630_v33 = vadd.f32 1.0, %v9116_v30  ;;  %9125 = vpow2.f32 %v8274_v24  ;;  %vm6522_vm0 = vmor %vm6520_vm15, %vm6521_vm14  ;;  %v6539_v25 = vand.u32 2147483647, %v14622_v28 }
 0x722   : > { %v6541_v15 = vand.u32 2147483648, %v14622_v28  ;;  %v4405_v50 = vadd.f32 %v4404_v55, %v4356_v29  ;;  %v4358_v36 = vpop.f32.mrf.mxu0  ;;  %vm6535_vm2 = vweird.f32 %v14622_v28 }
 0x723   : > { %v9118_v16 = vpop.eup %9117  ;;  %v6523_v35 = vsel %vm6522_vm0, %v9112_v61, %v6519_v13  ;;  %9127 = vrcp.f32 %v14630_v33  ;;  %v4979_v56 = vand.u32 2147483647, %v14630_v33  ;;  %vm14646_vm3 = vcmp.eq.f32.partialorder %v6539_v25, 8.507059e+37 }
 0x724   : > { %v9120_v21 = vpop.eup %9119  ;;  %v6528_v62 = vsel %vm6525_vm1, %v6527_v20, %v6523_v35  ;;  %v14635_v18 = vadd.f32 1.0, %v9118_v16  ;;  %v6542_v37 = vor.u32 1.1754944e-38, %v6541_v15  ;;  %v4981_v26 = vand.u32 2147483648, %v14630_v33  ;;  %v4409_v60 = vpop.f32.mrf.mxu1 }
 0x725   : > { %v9122_v17 = vpop.eup %9121  ;;  %6669 = vst [vmem:[%s11634_s24 + $0x368] sm:$0xff] %v6528_v62  ;;  %v14640_v10 = vadd.f32 1.0, %v9120_v21  ;;  %vm4975_vm5 = vweird.f32 %v14630_v33  ;;  %v8281_v27 = vmul.f32 -1.442695, %v4405_v50  ;;  %vm14661_vm7 = vcmp.eq.f32.partialorder %v4979_v56, 8.507059e+37 }
 0x726   : > { %v9124_v19 = vpop.eup %9123  ;;  %v6531_v1 = vmul.f32 %v9122_v17, %v14622_v28  ;;  %9129 = vrcp.f32 %v14635_v18  ;;  %v5084_v44 = vand.u32 2147483647, %v14635_v18  ;;  %v5086_v22 = vand.u32 2147483648, %v14635_v18 }
 0x727   : > { %v9126_v40 = vpop.eup %9125  ;;  %9131 = vrcp.f32 %v14640_v10  ;;  %v5191_v57 = vand.u32 2147483648, %v14640_v10  ;;  %v14656_v49 = vadd.f32 1.0, %v9124_v19  ;;  %vm6536_vm6 = vweird.f32 %v9122_v17 }
 0x728   : > { %v6532_v48 = vsub.f32 1.0, %v6531_v1  ;;  %v14658_v38 = vadd.f32 1.0, %v9126_v40  ;;  %v5189_v52 = vand.u32 2147483647, %v14640_v10  ;;  %v4982_v31 = vor.u32 1.1754944e-38, %v4981_v26  ;;  %vm6537_vm4 = vmor %vm6535_vm2, %vm6536_vm6 }
 0x729   : > { %v9128_v32 = vpop.eup %9127  ;;  %vm5080_vm8 = vweird.f32 %v14635_v18  ;;  %9133 = vrcp.f32 %v14656_v49  ;;  %v4359_v51 = vadd.f32 %v4358_v36, %v14488_v34  ;;  %vm5185_vm9 = vweird.f32 %v14640_v10 }
 0x72a   : > { %v6533_v7 = vmul.f32 %v9122_v17, %v6532_v48  ;;  %v4971_v9 = vmul.f32 %v9128_v32, %v14630_v33  ;;  %9135 = vrcp.f32 %v14658_v38  ;;  %v4360_v61 = vpop.f32.mrf.mxu0  ;;  %vm4976_vm10 = vweird.f32 %v9128_v32 }
 0x72b   : > { %vm14675_vm11 = vcmp.eq.f32.partialorder %v5084_v44, 8.507059e+37  ;;  %v5087_v0 = vor.u32 1.1754944e-38, %v5086_v22  ;;  %v5192_v23 = vor.u32 1.1754944e-38, %v5191_v57  ;;  %vm14680_vm12 = vcmp.eq.f32.partialorder %v5189_v52, 8.507059e+37  ;;  %vm4977_vm15 = vmor %vm4975_vm5, %vm4976_vm10 }
 0x72c   : > { %v9130_v6 = vpop.eup %9129  ;;  %v6534_v4 = vadd.f32 %v9122_v17, %v6533_v7  ;;  %v4972_v14 = vsub.f32 1.0, %v4971_v9  ;;  %v5294_v2 = vand.u32 2147483647, %v14656_v49  ;;  %v5296_v55 = vand.u32 2147483648, %v14656_v49  ;;  %v4412_v36 = vpop.f32.mrf.mxu1 }
 0x72d   : > { %v9132_v47 = vpop.eup %9131  ;;  %v5076_v5 = vmul.f32 %v9130_v6, %v14635_v18  ;;  %vm5081_vm13 = vweird.f32 %v9130_v6  ;;  %9137 = vpow2.f32 %v8281_v27  ;;  %v5399_v8 = vand.u32 2147483647, %v14658_v38 }
 0x72e   : > { %v6538_v39 = vsel %vm6537_vm4, %v9122_v17, %v6534_v4  ;;  %v4973_v53 = vmul.f32 %v9128_v32, %v4972_v14  ;;  %v5181_v59 = vmul.f32 %v9132_v47, %v14640_v10  ;;  %vm5186_vm14 = vweird.f32 %v9132_v47  ;;  %vm5082_vm1 = vmor %vm5080_vm8, %vm5081_vm13 }
 0x72f   : > { %v6543_v45 = vsel %vm14646_vm3, %v6542_v37, %v6538_v39  ;;  %v5077_v12 = vsub.f32 1.0, %v5076_v5  ;;  %v9134_v28 = vpop.eup %9133  ;;  %v4408_v24 = vadd.f32 %v14637_v3, %v4359_v51  ;;  %v4361_v46 = vadd.f32 %v4360_v61, %v14488_v34  ;;  %vm5187_vm3 = vmor %vm5185_vm9, %vm5186_vm14 }
 0x730   : > { %6670 = vst [vmem:[%s11634_s24 + $0x370] sm:$0xff] %v6543_v45  ;;  %v4974_v63 = vadd.f32 %v9128_v32, %v4973_v53  ;;  %v5182_v58 = vsub.f32 1.0, %v5181_v59  ;;  %v9136_v30 = vpop.eup %9135  ;;  %v5286_v20 = vmul.f32 %v9134_v28, %v14656_v49  ;;  %v5401_v16 = vand.u32 2147483648, %v14658_v38 }
 0x731   : > { %v5078_v41 = vmul.f32 %v9130_v6, %v5077_v12  ;;  %vm5291_vm0 = vweird.f32 %v9134_v28  ;;  %v5391_v33 = vmul.f32 %v9136_v30, %v14658_v38  ;;  %vm5396_vm2 = vweird.f32 %v9136_v30 }
 0x732   : > { %v4978_v29 = vsel %vm4977_vm15, %v9128_v32, %v4974_v63  ;;  %v5183_v13 = vmul.f32 %v9132_v47, %v5182_v58  ;;  %v5287_v21 = vsub.f32 1.0, %v5286_v20  ;;  %v8288_v62 = vmul.f32 -1.442695, %v4408_v24  ;;  %v4363_v50 = vpop.f32.mrf.mxu0 }
 0x733   : > { %v4983_v35 = vsel %vm14661_vm7, %v4982_v31, %v4978_v29  ;;  %v5079_v25 = vadd.f32 %v9130_v6, %v5078_v41  ;;  %v5392_v17 = vsub.f32 1.0, %v5391_v33  ;;  %v4410_v19 = vadd.f32 %v4409_v60, %v4361_v46  ;;  %v9138_v56 = vpop.eup %9137 }
 0x734   : > { %6566 = vst [vmem:[%s11634_s24 + $0x30] sm:$0xff] %v4983_v35  ;;  %v5184_v15 = vadd.f32 %v9132_v47, %v5183_v13  ;;  %v4364_v1 = vadd.f32 %v4363_v50, %v14488_v34  ;;  %v5288_v54 = vmul.f32 %v9134_v28, %v5287_v21  ;;  %9139 = vpow2.f32 %v8288_v62 }
 0x735   : > { %v5083_v3 = vsel %vm5082_vm1, %v9130_v6, %v5079_v25  ;;  %v5393_v26 = vmul.f32 %v9136_v30, %v5392_v17  ;;  %v4809_v48 = vadd.f32 1.0, %v9138_v56  ;;  %v8295_v44 = vmul.f32 -1.442695, %v4410_v19  ;;  %v4414_v6 = vpop.f32.mrf.mxu1 }
 0x736   : > { %v5088_v18 = vsel %vm14675_vm11, %v5087_v0, %v5083_v3  ;;  %v5188_v40 = vsel %vm5187_vm3, %v9132_v47, %v5184_v15  ;;  %v5289_v10 = vadd.f32 %v9134_v28, %v5288_v54  ;;  %vm5290_vm5 = vweird.f32 %v14656_v49 }
 0x737   : > { %6573 = vst [vmem:[%s11634_s24 + $0x68] sm:$0xff] %v5088_v18  ;;  %v5193_v37 = vsel %vm14680_vm12, %v5192_v23, %v5188_v40  ;;  %vm5295_vm6 = vcmp.eq.f32.partialorder %v5294_v2, 8.507059e+37  ;;  %v4413_v27 = vadd.f32 %v4412_v36, %v4364_v1  ;;  %vm5292_vm7 = vmor %vm5290_vm5, %vm5291_vm0  ;;  %v5297_v32 = vor.u32 1.1754944e-38, %v5296_v55 }
 0x738   : > { %6580 = vst [vmem:[%s11634_s24 + $0xa0] sm:$0xff] %v5193_v37  ;;  %v5394_v22 = vadd.f32 %v9136_v30, %v5393_v26  ;;  %vm5395_vm8 = vweird.f32 %v14658_v38  ;;  %9141 = vrcp.f32 %v4809_v48  ;;  %v5293_v57 = vsel %vm5292_vm7, %v9134_v28, %v5289_v10 }
 0x739   : > { %vm5397_vm9 = vmor %vm5395_vm8, %vm5396_vm2  ;;  %v5402_v7 = vor.u32 1.1754944e-38, %v5401_v16  ;;  %9143 = vpow2.f32 %v8295_v44  ;;  %v8302_v9 = vmul.f32 -1.442695, %v4413_v27  ;;  %v5298_v42 = vsel %vm5295_vm6, %v5297_v32, %v5293_v57 }
 0x73a   : > { %v5398_v52 = vsel %vm5397_vm9, %v9136_v30, %v5394_v22  ;;  %vm5400_vm4 = vcmp.eq.f32.partialorder %v5399_v8, 8.507059e+37  ;;  %v9140_v49 = vpop.eup %9139  ;;  %6587 = vst [vmem:[%s11634_s24 + $0xd8] sm:$0xff] %v5298_v42  ;;  %v4365_v51 = vpop.f32.mrf.mxu0  ;;  %v5504_v39 = vand.u32 2147483647, %v4809_v48  ;;  %v5506_v53 = vand.u32 2147483648, %v4809_v48 }
 0x73b   : > { %v5403_v31 = vsel %vm5400_vm4, %v5402_v7, %v5398_v52  ;;  %9145 = vpow2.f32 %v8302_v9  ;;  %v4816_v4 = vadd.f32 1.0, %v9140_v49  ;;  %v4366_v38 = vadd.f32 %v4365_v51, %v14488_v34 }
 0x73c   : > { %6594 = vst [vmem:[%s11634_s24 + $0x110] sm:$0xff] %v5403_v31  ;;  %vm5500_vm11 = vweird.f32 %v4809_v48  ;;  %v5507_v28 = vor.u32 1.1754944e-38, %v5506_v53  ;;  %vm5505_vm13 = vcmp.eq.f32.partialorder %v5504_v39, 8.507059e+37 }
 0x73d   : > { %9147 = vrcp.f32 %v4816_v4  ;;  %v4415_v47 = vadd.f32 %v4414_v6, %v4366_v38  ;;  %v4417_v45 = vpop.f32.mrf.mxu1  ;;  %v5609_v29 = vand.u32 2147483647, %v4816_v4  ;;  %v5611_v13 = vand.u32 2147483648, %v4816_v4 }
 0x73e   : > { %v9142_v14 = vpop.eup %9141  ;;  %vm5605_vm15 = vweird.f32 %v4816_v4 }
 0x73f   : > { %v9144_v61 = vpop.eup %9143  ;;  %v5496_v60 = vmul.f32 %v9142_v14, %v4809_v48  ;;  %v8309_v23 = vmul.f32 -1.442695, %v4415_v47  ;;  %vm5501_vm10 = vweird.f32 %v9142_v14  ;;  %vm5610_vm1 = vcmp.eq.f32.partialorder %v5609_v29, 8.507059e+37 }
 0x740   : > { %v14721_v5 = vadd.f32 1.0, %v9144_v61  ;;  %vm5502_vm12 = vmor %vm5500_vm11, %vm5501_vm10  ;;  %v5612_v17 = vor.u32 1.1754944e-38, %v5611_v13 }
 0x741   : > { %v9146_v11 = vpop.eup %9145  ;;  %v5497_v0 = vsub.f32 1.0, %v5496_v60 }
 0x742   : > { %9149 = vrcp.f32 %v14721_v5  ;;  %v14724_v43 = vadd.f32 1.0, %v9146_v11  ;;  %v4368_v2 = vpop.f32.mrf.mxu0  ;;  %v5716_v50 = vand.u32 2147483648, %v14721_v5  ;;  %v5714_v18 = vand.u32 2147483647, %v14721_v5 }
 0x743   : > { %v5498_v59 = vmul.f32 %v9142_v14, %v5497_v0  ;;  %9151 = vpow2.f32 %v8309_v23  ;;  %v9148_v12 = vpop.eup %9147  ;;  %v4369_v55 = vadd.f32 %v4368_v2, %v14488_v34  ;;  %vm5710_vm3 = vweird.f32 %v14721_v5 }
 0x744   : > { %v5601_v58 = vmul.f32 %v9148_v12, %v4816_v4  ;;  %9153 = vrcp.f32 %v14724_v43  ;;  %vm5606_vm14 = vweird.f32 %v9148_v12  ;;  %v5717_v48 = vor.u32 1.1754944e-38, %v5716_v50 }
 0x745   : > { %v5499_v63 = vadd.f32 %v9142_v14, %v5498_v59  ;;  %v4418_v41 = vadd.f32 %v4417_v45, %v4369_v55  ;;  %v4419_v3 = vpop.f32.mrf.mxu1  ;;  %vm5607_vm0 = vmor %vm5605_vm15, %vm5606_vm14  ;;  %v5821_v44 = vand.u32 2147483648, %v14724_v43  ;;  %v5819_v32 = vand.u32 2147483647, %v14724_v43 }
 0x746   : > { %v5602_v24 = vsub.f32 1.0, %v5601_v58  ;;  %vm5715_vm7 = vcmp.eq.f32.partialorder %v5714_v18, 8.507059e+37  ;;  %vm5815_vm8 = vweird.f32 %v14724_v43 }
 0x747   : > { %v5503_v8 = vsel %vm5502_vm12, %v9142_v14, %v5499_v63  ;;  %v8316_v20 = vmul.f32 -1.442695, %v4418_v41  ;;  %v5822_v31 = vor.u32 1.1754944e-38, %v5821_v44  ;;  %vm5820_vm4 = vcmp.eq.f32.partialorder %v5819_v32, 8.507059e+37 }
 0x748   : > { %v9150_v46 = vpop.eup %9149  ;;  %v5508_v30 = vsel %vm5505_vm13, %v5507_v28, %v5503_v8  ;;  %v5603_v35 = vmul.f32 %v9148_v12, %v5602_v24 }
 0x749   : > { %v9152_v16 = vpop.eup %9151  ;;  %6601 = vst [vmem:[%s11634_s24 + $0x148] sm:$0xff] %v5508_v30  ;;  %v5706_v25 = vmul.f32 %v9150_v46, %v14721_v5  ;;  %9155 = vpow2.f32 %v8316_v20  ;;  %vm5711_vm2 = vweird.f32 %v9150_v46 }
 0x74a   : > { %v14730_v33 = vadd.f32 1.0, %v9152_v16  ;;  %v9154_v15 = vpop.eup %9153  ;;  %v5604_v21 = vadd.f32 %v9148_v12, %v5603_v35  ;;  %v4370_v36 = vpop.f32.mrf.mxu0  ;;  %vm5712_vm5 = vmor %vm5710_vm3, %vm5711_vm2 }
 0x74b   : > { %v5707_v62 = vsub.f32 1.0, %v5706_v25  ;;  %v5811_v19 = vmul.f32 %v9154_v15, %v14724_v43  ;;  %v4371_v37 = vadd.f32 %v4370_v36, %v14488_v34  ;;  %vm5816_vm6 = vweird.f32 %v9154_v15 }
 0x74c   : > { %9157 = vrcp.f32 %v14730_v33  ;;  %v5608_v1 = vsel %vm5607_vm0, %v9148_v12, %v5604_v21  ;;  %vm5817_vm9 = vmor %vm5815_vm8, %vm5816_vm6  ;;  %v5926_v47 = vand.u32 2147483648, %v14730_v33  ;;  %v5924_v11 = vand.u32 2147483647, %v14730_v33 }
 0x74d   : > { %v5708_v56 = vmul.f32 %v9150_v46, %v5707_v62  ;;  %v5613_v40 = vsel %vm5610_vm1, %v5612_v17, %v5608_v1  ;;  %v5812_v54 = vsub.f32 1.0, %v5811_v19  ;;  %v4420_v22 = vadd.f32 %v4419_v3, %v4371_v37  ;;  %v4422_v4 = vpop.f32.mrf.mxu1 }
 0x74e   : > { %6608 = vst [vmem:[%s11634_s24 + $0x180] sm:$0xff] %v5613_v40  ;;  %vm5920_vm11 = vweird.f32 %v14730_v33  ;;  %v5927_v43 = vor.u32 1.1754944e-38, %v5926_v47  ;;  %vm5925_vm13 = vcmp.eq.f32.partialorder %v5924_v11, 8.507059e+37 }
 0x74f   : > { %v5709_v26 = vadd.f32 %v9150_v46, %v5708_v56  ;;  %v9156_v10 = vpop.eup %9155  ;;  %v5813_v27 = vmul.f32 %v9154_v15, %v5812_v54  ;;  %v8323_v49 = vmul.f32 -1.442695, %v4420_v22 }
 0x750   : > { %v4844_v7 = vadd.f32 1.0, %v9156_v10 }
 0x751   : > { %v5713_v57 = vsel %vm5712_vm5, %v9150_v46, %v5709_v26  ;;  %v5814_v52 = vadd.f32 %v9154_v15, %v5813_v27 }
 0x752   : > { %v9158_v9 = vpop.eup %9157  ;;  %v5718_v42 = vsel %vm5715_vm7, %v5717_v48, %v5713_v57  ;;  %9159 = vrcp.f32 %v4844_v7  ;;  %v4373_v6 = vpop.f32.mrf.mxu0  ;;  %v6031_v8 = vand.u32 2147483648, %v4844_v7  ;;  %v6029_v46 = vand.u32 2147483647, %v4844_v7 }
 0x753   : > { %6615 = vst [vmem:[%s11634_s24 + $0x1b8] sm:$0xff] %v5718_v42  ;;  %v5916_v51 = vmul.f32 %v9158_v9, %v14730_v33  ;;  %v5818_v38 = vsel %vm5817_vm9, %v9154_v15, %v5814_v52  ;;  %9161 = vpow2.f32 %v8323_v49  ;;  %v4374_v60 = vadd.f32 %v4373_v6, %v14488_v34 }
 0x754   : > { %v5823_v14 = vsel %vm5820_vm4, %v5822_v31, %v5818_v38  ;;  %vm5921_vm10 = vweird.f32 %v9158_v9  ;;  %vm6025_vm15 = vweird.f32 %v4844_v7  ;;  %v6032_v16 = vor.u32 1.1754944e-38, %v6031_v8 }
 0x755   : > { %v5917_v61 = vsub.f32 1.0, %v5916_v51  ;;  %6622 = vst [vmem:[%s11634_s24 + $0x1f0] sm:$0xff] %v5823_v14  ;;  %v4423_v0 = vadd.f32 %v4422_v4, %v4374_v60  ;;  %vm5922_vm12 = vmor %vm5920_vm11, %vm5921_vm10  ;;  %v4424_v63 = vpop.f32.mrf.mxu1  ;;  %vm6030_vm1 = vcmp.eq.f32.partialorder %v6029_v46, 8.507059e+37 }
 0x757   : > { %v5918_v5 = vmul.f32 %v9158_v9, %v5917_v61  ;;  %v8330_v53 = vmul.f32 -1.442695, %v4423_v0 }
 0x758   : > { %v9160_v23 = vpop.eup %9159 }
 0x759   : > { %v5919_v39 = vadd.f32 %v9158_v9, %v5918_v5  ;;  %v9162_v59 = vpop.eup %9161  ;;  %v6021_v2 = vmul.f32 %v9160_v23, %v4844_v7  ;;  %9163 = vpow2.f32 %v8330_v53  ;;  %vm6026_vm14 = vweird.f32 %v9160_v23 }
 0x75a   : > { %v4851_v12 = vadd.f32 1.0, %v9162_v59  ;;  %v4375_v55 = vpop.f32.mrf.mxu0  ;;  %vm6027_vm0 = vmor %vm6025_vm15, %vm6026_vm14 }
 0x75b   : > { %v5923_v45 = vsel %vm5922_vm12, %v9158_v9, %v5919_v39  ;;  %v6022_v28 = vsub.f32 1.0, %v6021_v2  ;;  %v4376_v41 = vadd.f32 %v4375_v55, %v14488_v34 }
 0x75c   : > { %v5928_v58 = vsel %vm5925_vm13, %v5927_v43, %v5923_v45  ;;  %9165 = vrcp.f32 %v4851_v12  ;;  %v6136_v17 = vand.u32 2147483648, %v4851_v12  ;;  %v6134_v18 = vand.u32 2147483647, %v4851_v12 }
 0x75d   : > { %6629 = vst [vmem:[%s11634_s24 + $0x228] sm:$0xff] %v5928_v58  ;;  %v6023_v24 = vmul.f32 %v9160_v23, %v6022_v28  ;;  %v4425_v30 = vadd.f32 %v4424_v63, %v4376_v41  ;;  %v4427_v50 = vpop.f32.mrf.mxu1  ;;  %vm6130_vm3 = vweird.f32 %v4851_v12 }
 0x75e   : > { %v6137_v48 = vor.u32 1.1754944e-38, %v6136_v17  ;;  %vm6135_vm6 = vcmp.eq.f32.partialorder %v6134_v18, 8.507059e+37 }
 0x75f   : > { %v6024_v29 = vadd.f32 %v9160_v23, %v6023_v24  ;;  %v8337_v13 = vmul.f32 -1.442695, %v4425_v30  ;;  %v9164_v20 = vpop.eup %9163 }
 0x760   : > { %v4858_v25 = vadd.f32 1.0, %v9164_v20 }
 0x761   : > { %v6028_v35 = vsel %vm6027_vm0, %v9160_v23, %v6024_v29  ;;  %9167 = vpow2.f32 %v8337_v13 }
 0x762   : > { %v9166_v33 = vpop.eup %9165  ;;  %v6033_v15 = vsel %vm6030_vm1, %v6032_v16, %v6028_v35  ;;  %v4378_v21 = vpop.f32.mrf.mxu0  ;;  %9169 = vrcp.f32 %v4858_v25  ;;  %v6241_v7 = vand.u32 2147483648, %v4858_v25  ;;  %v6239_v52 = vand.u32 2147483647, %v4858_v25 }
 0x763   : > { %6636 = vst [vmem:[%s11634_s24 + $0x260] sm:$0xff] %v6033_v15  ;;  %v6126_v62 = vmul.f32 %v9166_v33, %v4851_v12  ;;  %v4379_v36 = vadd.f32 %v4378_v21, %v14488_v34  ;;  %vm6131_vm2 = vweird.f32 %v9166_v33  ;;  %vm6235_vm8 = vweird.f32 %v4858_v25 }
 0x764   : > { %vm6132_vm5 = vmor %vm6130_vm3, %vm6131_vm2  ;;  %v6242_v38 = vor.u32 1.1754944e-38, %v6241_v7  ;;  %vm6240_vm4 = vcmp.eq.f32.partialorder %v6239_v52, 8.507059e+37 }
 0x765   : > { %v6127_v3 = vsub.f32 1.0, %v6126_v62  ;;  %v4428_v19 = vadd.f32 %v4427_v50, %v4379_v36  ;;  %v4429_v9 = vpop.f32.mrf.mxu1 }
 0x767   : > { %v9168_v1 = vpop.eup %9167  ;;  %v6128_v56 = vmul.f32 %v9166_v33, %v6127_v3  ;;  %v8344_v54 = vmul.f32 -1.442695, %v4428_v19 }
 0x768   : > { %v4865_v40 = vadd.f32 1.0, %v9168_v1  ;;  %v9170_v37 = vpop.eup %9169 }
 0x769   : > { %v6129_v26 = vadd.f32 %v9166_v33, %v6128_v56  ;;  %v6231_v44 = vmul.f32 %v9170_v37, %v4858_v25  ;;  %vm6236_vm7 = vweird.f32 %v9170_v37 }
 0x76a   : > { %9171 = vrcp.f32 %v4865_v40  ;;  %v4380_v10 = vpop.f32.mrf.mxu0  ;;  %vm6237_vm9 = vmor %vm6235_vm8, %vm6236_vm7  ;;  %v6346_v5 = vand.u32 2147483648, %v4865_v40  ;;  %v6344_v0 = vand.u32 2147483647, %v4865_v40  ;;  %vm6340_vm11 = vweird.f32 %v4865_v40 }
 0x76b   : > { %v6133_v27 = vsel %vm6132_vm5, %v9166_v33, %v6129_v26  ;;  %9173 = vpow2.f32 %v8344_v54  ;;  %v6232_v22 = vsub.f32 1.0, %v6231_v44  ;;  %v4381_v57 = vadd.f32 %v4380_v10, %v14488_v34 }
 0x76c   : > { %v6138_v32 = vsel %vm6135_vm6, %v6137_v48, %v6133_v27  ;;  %v6347_v53 = vor.u32 1.1754944e-38, %v6346_v5  ;;  %vm6345_vm13 = vcmp.eq.f32.partialorder %v6344_v0, 8.507059e+37 }
 0x76d   : > { %6643 = vst [vmem:[%s11634_s24 + $0x298] sm:$0xff] %v6138_v32  ;;  %v6233_v42 = vmul.f32 %v9170_v37, %v6232_v22  ;;  %v4430_v49 = vadd.f32 %v4429_v9, %v4381_v57 }
 0x76f   : > { %v6234_v51 = vadd.f32 %v9170_v37, %v6233_v42  ;;  %v8351_v6 = vmul.f32 -1.442695, %v4430_v49 }
 0x770   : > { %v9172_v31 = vpop.eup %9171 }
 0x771   : > { %v9174_v4 = vpop.eup %9173  ;;  %v6336_v14 = vmul.f32 %v9172_v31, %v4865_v40  ;;  %v6238_v61 = vsel %vm6237_vm9, %v9170_v37, %v6234_v51  ;;  %9175 = vpow2.f32 %v8351_v6  ;;  %vm6341_vm10 = vweird.f32 %v9172_v31 }
 0x772   : > { %v4872_v60 = vadd.f32 1.0, %v9174_v4  ;;  %v6243_v34 = vsel %vm6240_vm4, %v6242_v38, %v6238_v61  ;;  %vm6342_vm12 = vmor %vm6340_vm11, %vm6341_vm10 }
 0x773   : > { %v6337_v47 = vsub.f32 1.0, %v6336_v14  ;;  %6650 = vst [vmem:[%s11634_s24 + $0x2d0] sm:$0xff] %v6243_v34 }
 0x774   : > { %9177 = vrcp.f32 %v4872_v60  ;;  %v6451_v63 = vand.u32 2147483648, %v4872_v60  ;;  %v6449_v28 = vand.u32 2147483647, %v4872_v60  ;;  %vm6445_vm15 = vweird.f32 %v4872_v60 }
 0x775   : > { %v6338_v11 = vmul.f32 %v9172_v31, %v6337_v47 }
 0x776   : > { %v6452_v24 = vor.u32 1.1754944e-38, %v6451_v63  ;;  %vm6450_vm1 = vcmp.eq.f32.partialorder %v6449_v28, 8.507059e+37 }
 0x777   : > { %v6339_v23 = vadd.f32 %v9172_v31, %v6338_v11  ;;  %v9176_v39 = vpop.eup %9175 }
 0x778   : > { %v4879_v43 = vadd.f32 1.0, %v9176_v39 }
 0x779   : > { %v6343_v59 = vsel %vm6342_vm12, %v9172_v31, %v6339_v23 }
 0x77a   : > { %v9178_v2 = vpop.eup %9177  ;;  %v6348_v45 = vsel %vm6345_vm13, %v6347_v53, %v6343_v59  ;;  %9179 = vrcp.f32 %v4879_v43  ;;  %v6556_v20 = vand.u32 2147483648, %v4879_v43  ;;  %v6554_v35 = vand.u32 2147483647, %v4879_v43 }
 0x77b   : > { %6657 = vst [vmem:[%s11634_s24 + $0x308] sm:$0xff] %v6348_v45  ;;  %v6441_v12 = vmul.f32 %v9178_v2, %v4872_v60  ;;  %vm6446_vm14 = vweird.f32 %v9178_v2  ;;  %vm6550_vm3 = vweird.f32 %v4879_v43 }
 0x77c   : > { %vm6447_vm0 = vmor %vm6445_vm15, %vm6446_vm14  ;;  %v6557_v33 = vor.u32 1.1754944e-38, %v6556_v20  ;;  %vm6555_vm6 = vcmp.eq.f32.partialorder %v6554_v35, 8.507059e+37 }
 0x77d   : > { %v6442_v55 = vsub.f32 1.0, %v6441_v12 }
 0x77f   : > { %v6443_v58 = vmul.f32 %v9178_v2, %v6442_v55 }
 0x780   : > { %v9180_v41 = vpop.eup %9179 }
 0x781   : > { %v6444_v8 = vadd.f32 %v9178_v2, %v6443_v58  ;;  %v6546_v46 = vmul.f32 %v9180_v41, %v4879_v43  ;;  %vm6551_vm2 = vweird.f32 %v9180_v41 }
 0x782   : > { %vm6552_vm5 = vmor %vm6550_vm3, %vm6551_vm2 }
 0x783   : > { %v6448_v30 = vsel %vm6447_vm0, %v9178_v2, %v6444_v8  ;;  %v6547_v13 = vsub.f32 1.0, %v6546_v46 }
 0x784   : > { %v6453_v29 = vsel %vm6450_vm1, %v6452_v24, %v6448_v30 }
 0x785   : > { %6664 = vst [vmem:[%s11634_s24 + $0x340] sm:$0xff] %v6453_v29  ;;  %v6548_v16 = vmul.f32 %v9180_v41, %v6547_v13 }
 0x787   : > { %v6549_v25 = vadd.f32 %v9180_v41, %v6548_v16 }
 0x789   : > { %v6553_v15 = vsel %vm6552_vm5, %v9180_v41, %v6549_v25 }
 0x78a   : > { %v6558_v21 = vsel %vm6555_vm6, %v6557_v33, %v6553_v15 }
 0x78b   : > { %6671 = vst [vmem:[%s11634_s24 + $0x378] sm:$0xff] %v6558_v21 }
 0x78c PF: > { %s27_s21 = sadd.s32 1, %s9190_s21  }
 0x78d   : > { %p24_p4 = scmp.ge.s32.totalorder %s27_s21, 4  }
 0x78f   :  { %26 = sbr.rel (!%p24_p4) target bundleno = 2 (0x2), region = 133 }

</bundles_post_ra>
